<compile_context>
chip_gen: v7x
topology: tpu7x:2x2x1
jax: 0.10.0
libtpu: 0.0.40
codegen_flags: <defaults>
</compile_context>

<pallas_src>
import jax
import jax.numpy as jnp
from jax.experimental import pallas as pl
from jax.experimental.pallas import tpu as pltpu


# ---------------------------------------------------------------------------
# Fused kernel: conv1+pool -> conv2+pool -> linear, one image per grid step.
# ---------------------------------------------------------------------------
def cnn_kernel(p1_ref, w1_ref, b1_ref, w2_ref, b2_ref, wft_ref, gsel_ref,
               bf_ref, o_ref, xe_ref, xo_ref):
    # ---------------- conv1: one (896, 32) @ (32, 16) matmul ----------------
    # Patch rows were pre-grouped by the wrapper into 8 blocks of 112 rows:
    #   group (di, dj, s) = pool offset (di, dj) x output-column parity s,
    #   row-in-group = 8*i + jj   <->  conv1 output pixel (2i+di, 4jj+2s+dj).
    y1 = jnp.dot(p1_ref[0], w1_ref[...], preferred_element_type=jnp.float32)

    b1 = b1_ref[...]
    pooled1 = []                   # [s] -> (112, 16); rows = 8*i + jj (jj < 7 valid)
    for s in range(2):
        m = None
        for di in range(2):
            for dj in range(2):
                gi = di * 4 + dj * 2 + s
                blk = y1[gi * 112:(gi + 1) * 112, :]
                m = blk if m is None else jnp.maximum(m, blk)
        # bias + ReLU hoisted out of the pool reduction (bias is shared by the
        # 4 pool positions, so relu(max(y)+b) == max(relu(y+b))).
        pooled1.append(jnp.maximum(m + b1, 0.0))

    # -------- conv2 input: zero-padded 18x18x16 grid, resident in VMEM -------
    # Flat layout split by column parity: row m = h2*12 + (w2 // 2), parity = w2 % 2.
    xe_ref[...] = jnp.zeros_like(xe_ref)
    xo_ref[...] = jnp.zeros_like(xo_ref)
    for i in range(14):
        d0 = (2 + i) * 12 + 1
        xe_ref[d0:d0 + 7, :] = pooled1[0][8 * i:8 * i + 7, :]
        xo_ref[d0:d0 + 7, :] = pooled1[1][8 * i:8 * i + 7, :]

    # ------- conv2: in-VMEM im2col + one (672, 400) @ (400, 32) matmul -------
    xpar = (xe_ref, xo_ref)
    q = []                         # [dj] -> (228, 80); columns = kw*16 + cin
    for dj in range(2):
        pieces = []
        for kw in range(5):
            s0 = (dj + kw) // 2
            pieces.append(xpar[(dj + kw) % 2][s0:s0 + 228, :])
        q.append(jnp.concatenate(pieces, axis=1))

    groups = []                    # 4 pool-offset groups, each (168, 400)
    for di in range(2):
        for dj in range(2):
            pieces = [q[dj][12 * (di + kh):12 * (di + kh) + 168, :]
                      for kh in range(5)]
            groups.append(jnp.concatenate(pieces, axis=1))
    p2 = jnp.concatenate(groups, axis=0)                          # (672, 400)

    y2 = jnp.dot(p2, w2_ref[...], preferred_element_type=jnp.float32)  # (672, 32)
    m2 = jnp.maximum(jnp.maximum(y2[0:168, :], y2[168:336, :]),
                     jnp.maximum(y2[336:504, :], y2[504:672, :]))
    pooled2 = jnp.maximum(m2 + b2_ref[...], 0.0)   # (168, 32); rows = 24*i' + jj'

    # -------- linear: NCHW flatten folded into the pre-permuted weight -------
    # out[n] = sum_{r,c} pooled2[r,c] * Wftile[r, n*32+c]; gsel sums each 32-lane
    # block back to one logit.
    a_rep = jnp.tile(pooled2, (1, 10))                            # (168, 320)
    colsum = jnp.sum(a_rep * wft_ref[...], axis=0, keepdims=True)  # (1, 320)
    out = jnp.dot(colsum, gsel_ref[...],
                  preferred_element_type=jnp.float32) + bf_ref[...]   # (1, 10)
    o_ref[0] = out


# ---------------------------------------------------------------------------
# One-time weight preparation (layout permutations done once, not per call).
# ---------------------------------------------------------------------------
def prepare_params(params):
    w1, b1 = params["w1"], params["b1"]
    w2, b2 = params["w2"], params["b2"]
    wf, bf = params["wf"], params["bf"]

    # conv weights OIHW -> (kh*5+kw, cin) x cout, conv1 K padded 25 -> 32.
    w1m = jnp.transpose(w1, (2, 3, 1, 0)).reshape(25, 16)
    w1m = jnp.pad(w1m, ((0, 7), (0, 0)))                       # (32, 16)
    w2m = jnp.transpose(w2, (2, 3, 1, 0)).reshape(400, 32)     # (400, 32)

    # Linear weight: PyTorch flatten index f = c*49 + i'*7 + jj'.  Re-arrange to
    # match the kernel's pooled2 layout (row = 24*i' + jj', lanes = n*32 + c),
    # zero rows for the unused jj' >= 7 slots.
    wf4 = wf.reshape(10, 32, 7, 7)                             # (n, c, i', jj')
    wft = jnp.transpose(wf4, (2, 3, 0, 1)).reshape(7, 7, 320)  # (i', jj', n*32+c)
    wft = jnp.pad(wft, ((0, 0), (0, 17), (0, 0))).reshape(168, 320)

    # Block-sum selector: (320, 10), G[k, n] = 1 iff k // 32 == n.
    gsel = jnp.repeat(jnp.eye(10, dtype=jnp.float32), 32, axis=0)

    return {"w1m": w1m, "b1": b1.reshape(1, 16),
            "w2m": w2m, "b2": b2.reshape(1, 32),
            "wft": wft, "gsel": gsel, "bf": bf.reshape(1, 10)}


# ---------------------------------------------------------------------------
# Wrapper: conv1 patch matrix (tiny network input) + single pallas_call.
# ---------------------------------------------------------------------------
def conv1_patches(x):
    """x: (B, 1, 28, 28) -> (B, 896, 32) patch matrix, rows grouped for pooling."""
    B = x.shape[0]
    img = x[:, 0]                                            # (B, 28, 28)
    xp = jnp.pad(img, ((0, 0), (2, 2), (2, 2)))              # (B, 32, 32)
    cols = [xp[:, kh:kh + 28, kw:kw + 28]
            for kh in range(5) for kw in range(5)]
    pat = jnp.stack(cols, axis=-1)                           # (B, 28, 28, 25)
    # h = 2i + di ; w = 4jj + 2s + dj
    pat = pat.reshape(B, 14, 2, 7, 2, 2, 25)                 # (B, i, di, jj, s, dj, K)
    pat = pat.transpose(0, 2, 5, 4, 1, 3, 6)                 # (B, di, dj, s, i, jj, K)
    pat = jnp.pad(pat, ((0, 0),) * 5 + ((0, 1), (0, 0)))     # jj: 7 -> 8
    pat = pat.reshape(B, 896, 25)
    pat = jnp.pad(pat, ((0, 0), (0, 0), (0, 7)))             # K: 25 -> 32
    return pat


def cnn_forward(x, prep):
    B = x.shape[0]
    p1 = conv1_patches(x)

    out3 = pl.pallas_call(
        cnn_kernel,
        out_shape=jax.ShapeDtypeStruct((B, 1, 10), jnp.float32),
        grid=(B,),
        in_specs=[
            pl.BlockSpec((1, 896, 32), lambda b: (b, 0, 0)),   # conv1 patches
            pl.BlockSpec((32, 16), lambda b: (0, 0)),          # w1
            pl.BlockSpec((1, 16), lambda b: (0, 0)),           # b1
            pl.BlockSpec((400, 32), lambda b: (0, 0)),         # w2
            pl.BlockSpec((1, 32), lambda b: (0, 0)),           # b2
            pl.BlockSpec((168, 320), lambda b: (0, 0)),        # linear weight (tiled)
            pl.BlockSpec((320, 10), lambda b: (0, 0)),         # block-sum selector
            pl.BlockSpec((1, 10), lambda b: (0, 0)),           # linear bias
        ],
        out_specs=pl.BlockSpec((1, 1, 10), lambda b: (b, 0, 0)),
        scratch_shapes=[pltpu.VMEM((232, 16), jnp.float32),    # conv2 input, even cols
                        pltpu.VMEM((232, 16), jnp.float32)],   # conv2 input, odd cols
        compiler_params=pltpu.CompilerParams(
            dimension_semantics=("parallel",)),
    )(p1, prep["w1m"], prep["b1"], prep["w2m"], prep["b2"],
      prep["wft"], prep["gsel"], prep["bf"])
    return out3[:, 0, :]


# ---------------------------------------------------------------------------
# Pure-JAX reference (for correctness check only).
# ---------------------------------------------------------------------------
def reference_forward(x_nchw, params):
    def block(x, w, b):
        y = jax.lax.conv_general_dilated(
            x, w, window_strides=(1, 1), padding=((2, 2), (2, 2)),
            dimension_numbers=("NCHW", "OIHW", "NCHW"),
            precision=jax.lax.Precision.HIGHEST)
        y = jnp.maximum(y + b[None, :, None, None], 0.0)
        return jax.lax.reduce_window(y, -jnp.inf, jax.lax.max,
                                     (1, 1, 2, 2), (1, 1, 2, 2), "VALID")

    y = block(x_nchw, params["w1"], params["b1"])
    y = block(y, params["w2"], params["b2"])
    y = y.reshape(y.shape[0], -1)
    return y @ params["wf"].T + params["bf"]


# ---------------------------------------------------------------------------
if __name__ == "__main__":
    key = jax.random.PRNGKey(0)
    ks = jax.random.split(key, 7)

    params = {
        "w1": jax.random.normal(ks[0], (16, 1, 5, 5), jnp.float32) * 0.1,
        "b1": jax.random.normal(ks[1], (16,), jnp.float32) * 0.1,
        "w2": jax.random.normal(ks[2], (32, 16, 5, 5), jnp.float32) * 0.05,
        "b2": jax.random.normal(ks[3], (32,), jnp.float32) * 0.1,
        "wf": jax.random.normal(ks[4], (10, 32 * 7 * 7), jnp.float32) * 0.02,
        "bf": jax.random.normal(ks[5], (10,), jnp.float32) * 0.1,
    }

    # Module geometry (MNIST-style): Linear(32*7*7, 10) forces 28x28 input.
    x = jax.random.normal(ks[6], (2, 1, 28, 28), jnp.float32)

    prep = prepare_params(params)                 # one-time weight layout prep
    fwd = jax.jit(cnn_forward)
    out = jax.block_until_ready(fwd(x, prep))

    ref = jax.block_until_ready(reference_forward(x, params))
    assert out.shape == (2, 10), out.shape
    # Tolerance relaxed vs. the f32-HIGHEST reference: the kernel uses default
    # (bf16-class) MXU precision per the performance review.
    assert jnp.allclose(out, ref, rtol=2e-2, atol=2e-2), (
        f"max abs err = {jnp.max(jnp.abs(out - ref))}")

    print("KERNEL_OK")
</pallas_src>

<mosaic_0001>
module attributes {stable_mosaic.version = 11 : i64} {
  func.func @cnn_kernel(%arg0: i32, %arg1: memref<1x896x32xf32, #tpu.memory_space<vmem>>, %arg2: memref<32x16xf32, #tpu.memory_space<vmem>>, %arg3: memref<1x16xf32, #tpu.memory_space<vmem>>, %arg4: memref<400x32xf32, #tpu.memory_space<vmem>>, %arg5: memref<1x32xf32, #tpu.memory_space<vmem>>, %arg6: memref<168x320xf32, #tpu.memory_space<vmem>>, %arg7: memref<320x10xf32, #tpu.memory_space<vmem>>, %arg8: memref<1x10xf32, #tpu.memory_space<vmem>>, %arg9: memref<1x1x10xf32, #tpu.memory_space<vmem>>, %arg10: memref<232x16xf32, #tpu.memory_space<vmem>>, %arg11: memref<232x16xf32, #tpu.memory_space<vmem>>) attributes {dimension_semantics = [#tpu.dimension_semantics<parallel>], iteration_bounds = array<i64: 2>, scalar_prefetch = 0 : i64, scratch_operands = 2 : i64, tpu.core_type = #tpu.core_type<tc>, window_params = [{transform_indices = @transform_0, window_bounds = array<i64: 1, 896, 32>}, {pipeline_mode = #tpu.pipeline_mode<synchronous>, transform_indices = @transform_1, window_bounds = array<i64: 32, 16>}, {pipeline_mode = #tpu.pipeline_mode<synchronous>, transform_indices = @transform_2, window_bounds = array<i64: 1, 16>}, {pipeline_mode = #tpu.pipeline_mode<synchronous>, transform_indices = @transform_3, window_bounds = array<i64: 400, 32>}, {pipeline_mode = #tpu.pipeline_mode<synchronous>, transform_indices = @transform_4, window_bounds = array<i64: 1, 32>}, {pipeline_mode = #tpu.pipeline_mode<synchronous>, transform_indices = @transform_5, window_bounds = array<i64: 168, 320>}, {pipeline_mode = #tpu.pipeline_mode<synchronous>, transform_indices = @transform_6, window_bounds = array<i64: 320, 10>}, {pipeline_mode = #tpu.pipeline_mode<synchronous>, transform_indices = @transform_7, window_bounds = array<i64: 1, 10>}, {transform_indices = @transform_8, window_bounds = array<i64: 1, 1, 10>}]} {
    %c0 = arith.constant 0 : index
    %c0_0 = arith.constant 0 : index
    %c0_1 = arith.constant 0 : index
    %0 = vector.load %arg1[%c0, %c0_0, %c0_1] : memref<1x896x32xf32, #tpu.memory_space<vmem>>, vector<1x896x32xf32>
    %1 = vector.shape_cast %0 : vector<1x896x32xf32> to vector<896x32xf32>
    %c0_2 = arith.constant 0 : index
    %c0_3 = arith.constant 0 : index
    %2 = vector.load %arg2[%c0_2, %c0_3] : memref<32x16xf32, #tpu.memory_space<vmem>>, vector<32x16xf32>
    %cst = arith.constant dense<0.000000e+00> : vector<896x16xf32>
    %3 = tpu.matmul %1, %2, %cst {dimension_numbers = #tpu.dot_dimension_numbers<[1], [0], [0], [1], [0, 0, 1, 1], [], []>} : vector<896x32xf32>, vector<32x16xf32>, vector<896x16xf32> -> vector<896x16xf32>
    %c0_4 = arith.constant 0 : index
    %c0_5 = arith.constant 0 : index
    %4 = vector.load %arg3[%c0_4, %c0_5] : memref<1x16xf32, #tpu.memory_space<vmem>>, vector<1x16xf32>
    %5 = vector.extract_strided_slice %3 {offsets = [0, 0], sizes = [112, 16], strides = [1, 1]} : vector<896x16xf32> to vector<112x16xf32>
    %6 = vector.extract_strided_slice %3 {offsets = [224, 0], sizes = [112, 16], strides = [1, 1]} : vector<896x16xf32> to vector<112x16xf32>
    %7 = arith.maximumf %5, %6 : vector<112x16xf32>
    %8 = vector.extract_strided_slice %3 {offsets = [448, 0], sizes = [112, 16], strides = [1, 1]} : vector<896x16xf32> to vector<112x16xf32>
    %9 = arith.maximumf %7, %8 : vector<112x16xf32>
    %10 = vector.extract_strided_slice %3 {offsets = [672, 0], sizes = [112, 16], strides = [1, 1]} : vector<896x16xf32> to vector<112x16xf32>
    %11 = arith.maximumf %9, %10 : vector<112x16xf32>
    %12 = vector.broadcast %4 : vector<1x16xf32> to vector<112x16xf32>
    %13 = arith.addf %11, %12 : vector<112x16xf32>
    %cst_6 = arith.constant 0.000000e+00 : f32
    %14 = vector.broadcast %cst_6 : f32 to vector<112x16xf32>
    %15 = arith.maximumf %13, %14 : vector<112x16xf32>
    %16 = vector.extract_strided_slice %3 {offsets = [112, 0], sizes = [112, 16], strides = [1, 1]} : vector<896x16xf32> to vector<112x16xf32>
    %17 = vector.extract_strided_slice %3 {offsets = [336, 0], sizes = [112, 16], strides = [1, 1]} : vector<896x16xf32> to vector<112x16xf32>
    %18 = arith.maximumf %16, %17 : vector<112x16xf32>
    %19 = vector.extract_strided_slice %3 {offsets = [560, 0], sizes = [112, 16], strides = [1, 1]} : vector<896x16xf32> to vector<112x16xf32>
    %20 = arith.maximumf %18, %19 : vector<112x16xf32>
    %21 = vector.extract_strided_slice %3 {offsets = [784, 0], sizes = [112, 16], strides = [1, 1]} : vector<896x16xf32> to vector<112x16xf32>
    %22 = arith.maximumf %20, %21 : vector<112x16xf32>
    %23 = vector.broadcast %4 : vector<1x16xf32> to vector<112x16xf32>
    %24 = arith.addf %22, %23 : vector<112x16xf32>
    %cst_7 = arith.constant 0.000000e+00 : f32
    %25 = vector.broadcast %cst_7 : f32 to vector<112x16xf32>
    %26 = arith.maximumf %24, %25 : vector<112x16xf32>
    %cst_8 = arith.constant 0.000000e+00 : f32
    %27 = vector.broadcast %cst_8 : f32 to vector<232x16xf32>
    %c0_9 = arith.constant 0 : index
    %c0_10 = arith.constant 0 : index
    %28 = vector.load %arg10[%c0_9, %c0_10] : memref<232x16xf32, #tpu.memory_space<vmem>>, vector<232x16xf32>
    tpu.vector_store %arg10[%c0_9, %c0_10], %27 {strides = array<i32>} : memref<232x16xf32, #tpu.memory_space<vmem>>, vector<232x16xf32>,
    %cst_11 = arith.constant 0.000000e+00 : f32
    %29 = vector.broadcast %cst_11 : f32 to vector<232x16xf32>
    %c0_12 = arith.constant 0 : index
    %c0_13 = arith.constant 0 : index
    %30 = vector.load %arg11[%c0_12, %c0_13] : memref<232x16xf32, #tpu.memory_space<vmem>>, vector<232x16xf32>
    tpu.vector_store %arg11[%c0_12, %c0_13], %29 {strides = array<i32>} : memref<232x16xf32, #tpu.memory_space<vmem>>, vector<232x16xf32>,
    %31 = vector.extract_strided_slice %15 {offsets = [0, 0], sizes = [7, 16], strides = [1, 1]} : vector<112x16xf32> to vector<7x16xf32>
    %c25 = arith.constant 25 : index
    %c0_14 = arith.constant 0 : index
    %32 = vector.load %arg10[%c25, %c0_14] : memref<232x16xf32, #tpu.memory_space<vmem>>, vector<7x16xf32>
    tpu.vector_store %arg10[%c25, %c0_14], %31 {strides = array<i32>} : memref<232x16xf32, #tpu.memory_space<vmem>>, vector<7x16xf32>,
    %33 = vector.extract_strided_slice %26 {offsets = [0, 0], sizes = [7, 16], strides = [1, 1]} : vector<112x16xf32> to vector<7x16xf32>
    %c25_15 = arith.constant 25 : index
    %c0_16 = arith.constant 0 : index
    %34 = vector.load %arg11[%c25_15, %c0_16] : memref<232x16xf32, #tpu.memory_space<vmem>>, vector<7x16xf32>
    tpu.vector_store %arg11[%c25_15, %c0_16], %33 {strides = array<i32>} : memref<232x16xf32, #tpu.memory_space<vmem>>, vector<7x16xf32>,
    %35 = vector.extract_strided_slice %15 {offsets = [8, 0], sizes = [7, 16], strides = [1, 1]} : vector<112x16xf32> to vector<7x16xf32>
    %c37 = arith.constant 37 : index
    %c0_17 = arith.constant 0 : index
    %36 = vector.load %arg10[%c37, %c0_17] : memref<232x16xf32, #tpu.memory_space<vmem>>, vector<7x16xf32>
    tpu.vector_store %arg10[%c37, %c0_17], %35 {strides = array<i32>} : memref<232x16xf32, #tpu.memory_space<vmem>>, vector<7x16xf32>,
    %37 = vector.extract_strided_slice %26 {offsets = [8, 0], sizes = [7, 16], strides = [1, 1]} : vector<112x16xf32> to vector<7x16xf32>
    %c37_18 = arith.constant 37 : index
    %c0_19 = arith.constant 0 : index
    %38 = vector.load %arg11[%c37_18, %c0_19] : memref<232x16xf32, #tpu.memory_space<vmem>>, vector<7x16xf32>
    tpu.vector_store %arg11[%c37_18, %c0_19], %37 {strides = array<i32>} : memref<232x16xf32, #tpu.memory_space<vmem>>, vector<7x16xf32>,
    %39 = vector.extract_strided_slice %15 {offsets = [16, 0], sizes = [7, 16], strides = [1, 1]} : vector<112x16xf32> to vector<7x16xf32>
    %c49 = arith.constant 49 : index
    %c0_20 = arith.constant 0 : index
    %40 = vector.load %arg10[%c49, %c0_20] : memref<232x16xf32, #tpu.memory_space<vmem>>, vector<7x16xf32>
    tpu.vector_store %arg10[%c49, %c0_20], %39 {strides = array<i32>} : memref<232x16xf32, #tpu.memory_space<vmem>>, vector<7x16xf32>,
    %41 = vector.extract_strided_slice %26 {offsets = [16, 0], sizes = [7, 16], strides = [1, 1]} : vector<112x16xf32> to vector<7x16xf32>
    %c49_21 = arith.constant 49 : index
    %c0_22 = arith.constant 0 : index
    %42 = vector.load %arg11[%c49_21, %c0_22] : memref<232x16xf32, #tpu.memory_space<vmem>>, vector<7x16xf32>
    tpu.vector_store %arg11[%c49_21, %c0_22], %41 {strides = array<i32>} : memref<232x16xf32, #tpu.memory_space<vmem>>, vector<7x16xf32>,
    %43 = vector.extract_strided_slice %15 {offsets = [24, 0], sizes = [7, 16], strides = [1, 1]} : vector<112x16xf32> to vector<7x16xf32>
    %c61 = arith.constant 61 : index
    %c0_23 = arith.constant 0 : index
    %44 = vector.load %arg10[%c61, %c0_23] : memref<232x16xf32, #tpu.memory_space<vmem>>, vector<7x16xf32>
    tpu.vector_store %arg10[%c61, %c0_23], %43 {strides = array<i32>} : memref<232x16xf32, #tpu.memory_space<vmem>>, vector<7x16xf32>,
    %45 = vector.extract_strided_slice %26 {offsets = [24, 0], sizes = [7, 16], strides = [1, 1]} : vector<112x16xf32> to vector<7x16xf32>
    %c61_24 = arith.constant 61 : index
    %c0_25 = arith.constant 0 : index
    %46 = vector.load %arg11[%c61_24, %c0_25] : memref<232x16xf32, #tpu.memory_space<vmem>>, vector<7x16xf32>
    tpu.vector_store %arg11[%c61_24, %c0_25], %45 {strides = array<i32>} : memref<232x16xf32, #tpu.memory_space<vmem>>, vector<7x16xf32>,
    %47 = vector.extract_strided_slice %15 {offsets = [32, 0], sizes = [7, 16], strides = [1, 1]} : vector<112x16xf32> to vector<7x16xf32>
    %c73 = arith.constant 73 : index
    %c0_26 = arith.constant 0 : index
    %48 = vector.load %arg10[%c73, %c0_26] : memref<232x16xf32, #tpu.memory_space<vmem>>, vector<7x16xf32>
    tpu.vector_store %arg10[%c73, %c0_26], %47 {strides = array<i32>} : memref<232x16xf32, #tpu.memory_space<vmem>>, vector<7x16xf32>,
    %49 = vector.extract_strided_slice %26 {offsets = [32, 0], sizes = [7, 16], strides = [1, 1]} : vector<112x16xf32> to vector<7x16xf32>
    %c73_27 = arith.constant 73 : index
    %c0_28 = arith.constant 0 : index
    %50 = vector.load %arg11[%c73_27, %c0_28] : memref<232x16xf32, #tpu.memory_space<vmem>>, vector<7x16xf32>
    tpu.vector_store %arg11[%c73_27, %c0_28], %49 {strides = array<i32>} : memref<232x16xf32, #tpu.memory_space<vmem>>, vector<7x16xf32>,
    %51 = vector.extract_strided_slice %15 {offsets = [40, 0], sizes = [7, 16], strides = [1, 1]} : vector<112x16xf32> to vector<7x16xf32>
    %c85 = arith.constant 85 : index
    %c0_29 = arith.constant 0 : index
    %52 = vector.load %arg10[%c85, %c0_29] : memref<232x16xf32, #tpu.memory_space<vmem>>, vector<7x16xf32>
    tpu.vector_store %arg10[%c85, %c0_29], %51 {strides = array<i32>} : memref<232x16xf32, #tpu.memory_space<vmem>>, vector<7x16xf32>,
    %53 = vector.extract_strided_slice %26 {offsets = [40, 0], sizes = [7, 16], strides = [1, 1]} : vector<112x16xf32> to vector<7x16xf32>
    %c85_30 = arith.constant 85 : index
    %c0_31 = arith.constant 0 : index
    %54 = vector.load %arg11[%c85_30, %c0_31] : memref<232x16xf32, #tpu.memory_space<vmem>>, vector<7x16xf32>
    tpu.vector_store %arg11[%c85_30, %c0_31], %53 {strides = array<i32>} : memref<232x16xf32, #tpu.memory_space<vmem>>, vector<7x16xf32>,
    %55 = vector.extract_strided_slice %15 {offsets = [48, 0], sizes = [7, 16], strides = [1, 1]} : vector<112x16xf32> to vector<7x16xf32>
    %c97 = arith.constant 97 : index
    %c0_32 = arith.constant 0 : index
    %56 = vector.load %arg10[%c97, %c0_32] : memref<232x16xf32, #tpu.memory_space<vmem>>, vector<7x16xf32>
    tpu.vector_store %arg10[%c97, %c0_32], %55 {strides = array<i32>} : memref<232x16xf32, #tpu.memory_space<vmem>>, vector<7x16xf32>,
    %57 = vector.extract_strided_slice %26 {offsets = [48, 0], sizes = [7, 16], strides = [1, 1]} : vector<112x16xf32> to vector<7x16xf32>
    %c97_33 = arith.constant 97 : index
    %c0_34 = arith.constant 0 : index
    %58 = vector.load %arg11[%c97_33, %c0_34] : memref<232x16xf32, #tpu.memory_space<vmem>>, vector<7x16xf32>
    tpu.vector_store %arg11[%c97_33, %c0_34], %57 {strides = array<i32>} : memref<232x16xf32, #tpu.memory_space<vmem>>, vector<7x16xf32>,
    %59 = vector.extract_strided_slice %15 {offsets = [56, 0], sizes = [7, 16], strides = [1, 1]} : vector<112x16xf32> to vector<7x16xf32>
    %c109 = arith.constant 109 : index
    %c0_35 = arith.constant 0 : index
    %60 = vector.load %arg10[%c109, %c0_35] : memref<232x16xf32, #tpu.memory_space<vmem>>, vector<7x16xf32>
    tpu.vector_store %arg10[%c109, %c0_35], %59 {strides = array<i32>} : memref<232x16xf32, #tpu.memory_space<vmem>>, vector<7x16xf32>,
    %61 = vector.extract_strided_slice %26 {offsets = [56, 0], sizes = [7, 16], strides = [1, 1]} : vector<112x16xf32> to vector<7x16xf32>
    %c109_36 = arith.constant 109 : index
    %c0_37 = arith.constant 0 : index
    %62 = vector.load %arg11[%c109_36, %c0_37] : memref<232x16xf32, #tpu.memory_space<vmem>>, vector<7x16xf32>
    tpu.vector_store %arg11[%c109_36, %c0_37], %61 {strides = array<i32>} : memref<232x16xf32, #tpu.memory_space<vmem>>, vector<7x16xf32>,
    %63 = vector.extract_strided_slice %15 {offsets = [64, 0], sizes = [7, 16], strides = [1, 1]} : vector<112x16xf32> to vector<7x16xf32>
    %c121 = arith.constant 121 : index
    %c0_38 = arith.constant 0 : index
    %64 = vector.load %arg10[%c121, %c0_38] : memref<232x16xf32, #tpu.memory_space<vmem>>, vector<7x16xf32>
    tpu.vector_store %arg10[%c121, %c0_38], %63 {strides = array<i32>} : memref<232x16xf32, #tpu.memory_space<vmem>>, vector<7x16xf32>,
    %65 = vector.extract_strided_slice %26 {offsets = [64, 0], sizes = [7, 16], strides = [1, 1]} : vector<112x16xf32> to vector<7x16xf32>
    %c121_39 = arith.constant 121 : index
    %c0_40 = arith.constant 0 : index
    %66 = vector.load %arg11[%c121_39, %c0_40] : memref<232x16xf32, #tpu.memory_space<vmem>>, vector<7x16xf32>
    tpu.vector_store %arg11[%c121_39, %c0_40], %65 {strides = array<i32>} : memref<232x16xf32, #tpu.memory_space<vmem>>, vector<7x16xf32>,
    %67 = vector.extract_strided_slice %15 {offsets = [72, 0], sizes = [7, 16], strides = [1, 1]} : vector<112x16xf32> to vector<7x16xf32>
    %c133 = arith.constant 133 : index
    %c0_41 = arith.constant 0 : index
    %68 = vector.load %arg10[%c133, %c0_41] : memref<232x16xf32, #tpu.memory_space<vmem>>, vector<7x16xf32>
    tpu.vector_store %arg10[%c133, %c0_41], %67 {strides = array<i32>} : memref<232x16xf32, #tpu.memory_space<vmem>>, vector<7x16xf32>,
    %69 = vector.extract_strided_slice %26 {offsets = [72, 0], sizes = [7, 16], strides = [1, 1]} : vector<112x16xf32> to vector<7x16xf32>
    %c133_42 = arith.constant 133 : index
    %c0_43 = arith.constant 0 : index
    %70 = vector.load %arg11[%c133_42, %c0_43] : memref<232x16xf32, #tpu.memory_space<vmem>>, vector<7x16xf32>
    tpu.vector_store %arg11[%c133_42, %c0_43], %69 {strides = array<i32>} : memref<232x16xf32, #tpu.memory_space<vmem>>, vector<7x16xf32>,
    %71 = vector.extract_strided_slice %15 {offsets = [80, 0], sizes = [7, 16], strides = [1, 1]} : vector<112x16xf32> to vector<7x16xf32>
    %c145 = arith.constant 145 : index
    %c0_44 = arith.constant 0 : index
    %72 = vector.load %arg10[%c145, %c0_44] : memref<232x16xf32, #tpu.memory_space<vmem>>, vector<7x16xf32>
    tpu.vector_store %arg10[%c145, %c0_44], %71 {strides = array<i32>} : memref<232x16xf32, #tpu.memory_space<vmem>>, vector<7x16xf32>,
    %73 = vector.extract_strided_slice %26 {offsets = [80, 0], sizes = [7, 16], strides = [1, 1]} : vector<112x16xf32> to vector<7x16xf32>
    %c145_45 = arith.constant 145 : index
    %c0_46 = arith.constant 0 : index
    %74 = vector.load %arg11[%c145_45, %c0_46] : memref<232x16xf32, #tpu.memory_space<vmem>>, vector<7x16xf32>
    tpu.vector_store %arg11[%c145_45, %c0_46], %73 {strides = array<i32>} : memref<232x16xf32, #tpu.memory_space<vmem>>, vector<7x16xf32>,
    %75 = vector.extract_strided_slice %15 {offsets = [88, 0], sizes = [7, 16], strides = [1, 1]} : vector<112x16xf32> to vector<7x16xf32>
    %c157 = arith.constant 157 : index
    %c0_47 = arith.constant 0 : index
    %76 = vector.load %arg10[%c157, %c0_47] : memref<232x16xf32, #tpu.memory_space<vmem>>, vector<7x16xf32>
    tpu.vector_store %arg10[%c157, %c0_47], %75 {strides = array<i32>} : memref<232x16xf32, #tpu.memory_space<vmem>>, vector<7x16xf32>,
    %77 = vector.extract_strided_slice %26 {offsets = [88, 0], sizes = [7, 16], strides = [1, 1]} : vector<112x16xf32> to vector<7x16xf32>
    %c157_48 = arith.constant 157 : index
    %c0_49 = arith.constant 0 : index
    %78 = vector.load %arg11[%c157_48, %c0_49] : memref<232x16xf32, #tpu.memory_space<vmem>>, vector<7x16xf32>
    tpu.vector_store %arg11[%c157_48, %c0_49], %77 {strides = array<i32>} : memref<232x16xf32, #tpu.memory_space<vmem>>, vector<7x16xf32>,
    %79 = vector.extract_strided_slice %15 {offsets = [96, 0], sizes = [7, 16], strides = [1, 1]} : vector<112x16xf32> to vector<7x16xf32>
    %c169 = arith.constant 169 : index
    %c0_50 = arith.constant 0 : index
    %80 = vector.load %arg10[%c169, %c0_50] : memref<232x16xf32, #tpu.memory_space<vmem>>, vector<7x16xf32>
    tpu.vector_store %arg10[%c169, %c0_50], %79 {strides = array<i32>} : memref<232x16xf32, #tpu.memory_space<vmem>>, vector<7x16xf32>,
    %81 = vector.extract_strided_slice %26 {offsets = [96, 0], sizes = [7, 16], strides = [1, 1]} : vector<112x16xf32> to vector<7x16xf32>
    %c169_51 = arith.constant 169 : index
    %c0_52 = arith.constant 0 : index
    %82 = vector.load %arg11[%c169_51, %c0_52] : memref<232x16xf32, #tpu.memory_space<vmem>>, vector<7x16xf32>
    tpu.vector_store %arg11[%c169_51, %c0_52], %81 {strides = array<i32>} : memref<232x16xf32, #tpu.memory_space<vmem>>, vector<7x16xf32>,
    %83 = vector.extract_strided_slice %15 {offsets = [104, 0], sizes = [7, 16], strides = [1, 1]} : vector<112x16xf32> to vector<7x16xf32>
    %c181 = arith.constant 181 : index
    %c0_53 = arith.constant 0 : index
    %84 = vector.load %arg10[%c181, %c0_53] : memref<232x16xf32, #tpu.memory_space<vmem>>, vector<7x16xf32>
    tpu.vector_store %arg10[%c181, %c0_53], %83 {strides = array<i32>} : memref<232x16xf32, #tpu.memory_space<vmem>>, vector<7x16xf32>,
    %85 = vector.extract_strided_slice %26 {offsets = [104, 0], sizes = [7, 16], strides = [1, 1]} : vector<112x16xf32> to vector<7x16xf32>
    %c181_54 = arith.constant 181 : index
    %c0_55 = arith.constant 0 : index
    %86 = vector.load %arg11[%c181_54, %c0_55] : memref<232x16xf32, #tpu.memory_space<vmem>>, vector<7x16xf32>
    tpu.vector_store %arg11[%c181_54, %c0_55], %85 {strides = array<i32>} : memref<232x16xf32, #tpu.memory_space<vmem>>, vector<7x16xf32>,
    %c0_56 = arith.constant 0 : index
    %c0_57 = arith.constant 0 : index
    %87 = vector.load %arg10[%c0_56, %c0_57] : memref<232x16xf32, #tpu.memory_space<vmem>>, vector<228x16xf32>
    %c0_58 = arith.constant 0 : index
    %c0_59 = arith.constant 0 : index
    %88 = vector.load %arg11[%c0_58, %c0_59] : memref<232x16xf32, #tpu.memory_space<vmem>>, vector<228x16xf32>
    %c1 = arith.constant 1 : index
    %c0_60 = arith.constant 0 : index
    %89 = vector.load %arg10[%c1, %c0_60] : memref<232x16xf32, #tpu.memory_space<vmem>>, vector<228x16xf32>
    %c1_61 = arith.constant 1 : index
    %c0_62 = arith.constant 0 : index
    %90 = vector.load %arg11[%c1_61, %c0_62] : memref<232x16xf32, #tpu.memory_space<vmem>>, vector<228x16xf32>
    %c2 = arith.constant 2 : index
    %c0_63 = arith.constant 0 : index
    %91 = vector.load %arg10[%c2, %c0_63] : memref<232x16xf32, #tpu.memory_space<vmem>>, vector<228x16xf32>
    %92 = tpu.concatenate %87, %88, %89, %90, %91 in 1 : vector<228x16xf32>, vector<228x16xf32>, vector<228x16xf32>, vector<228x16xf32>, vector<228x16xf32> -> vector<228x80xf32>
    %c0_64 = arith.constant 0 : index
    %c0_65 = arith.constant 0 : index
    %93 = vector.load %arg11[%c0_64, %c0_65] : memref<232x16xf32, #tpu.memory_space<vmem>>, vector<228x16xf32>
    %c1_66 = arith.constant 1 : index
    %c0_67 = arith.constant 0 : index
    %94 = vector.load %arg10[%c1_66, %c0_67] : memref<232x16xf32, #tpu.memory_space<vmem>>, vector<228x16xf32>
    %c1_68 = arith.constant 1 : index
    %c0_69 = arith.constant 0 : index
    %95 = vector.load %arg11[%c1_68, %c0_69] : memref<232x16xf32, #tpu.memory_space<vmem>>, vector<228x16xf32>
    %c2_70 = arith.constant 2 : index
    %c0_71 = arith.constant 0 : index
    %96 = vector.load %arg10[%c2_70, %c0_71] : memref<232x16xf32, #tpu.memory_space<vmem>>, vector<228x16xf32>
    %c2_72 = arith.constant 2 : index
    %c0_73 = arith.constant 0 : index
    %97 = vector.load %arg11[%c2_72, %c0_73] : memref<232x16xf32, #tpu.memory_space<vmem>>, vector<228x16xf32>
    %98 = tpu.concatenate %93, %94, %95, %96, %97 in 1 : vector<228x16xf32>, vector<228x16xf32>, vector<228x16xf32>, vector<228x16xf32>, vector<228x16xf32> -> vector<228x80xf32>
    %99 = vector.extract_strided_slice %92 {offsets = [0, 0], sizes = [168, 80], strides = [1, 1]} : vector<228x80xf32> to vector<168x80xf32>
    %100 = vector.extract_strided_slice %92 {offsets = [12, 0], sizes = [168, 80], strides = [1, 1]} : vector<228x80xf32> to vector<168x80xf32>
    %101 = vector.extract_strided_slice %92 {offsets = [24, 0], sizes = [168, 80], strides = [1, 1]} : vector<228x80xf32> to vector<168x80xf32>
    %102 = vector.extract_strided_slice %92 {offsets = [36, 0], sizes = [168, 80], strides = [1, 1]} : vector<228x80xf32> to vector<168x80xf32>
    %103 = vector.extract_strided_slice %92 {offsets = [48, 0], sizes = [168, 80], strides = [1, 1]} : vector<228x80xf32> to vector<168x80xf32>
    %104 = tpu.concatenate %99, %100, %101, %102, %103 in 1 : vector<168x80xf32>, vector<168x80xf32>, vector<168x80xf32>, vector<168x80xf32>, vector<168x80xf32> -> vector<168x400xf32>
    %105 = vector.extract_strided_slice %98 {offsets = [0, 0], sizes = [168, 80], strides = [1, 1]} : vector<228x80xf32> to vector<168x80xf32>
    %106 = vector.extract_strided_slice %98 {offsets = [12, 0], sizes = [168, 80], strides = [1, 1]} : vector<228x80xf32> to vector<168x80xf32>
    %107 = vector.extract_strided_slice %98 {offsets = [24, 0], sizes = [168, 80], strides = [1, 1]} : vector<228x80xf32> to vector<168x80xf32>
    %108 = vector.extract_strided_slice %98 {offsets = [36, 0], sizes = [168, 80], strides = [1, 1]} : vector<228x80xf32> to vector<168x80xf32>
    %109 = vector.extract_strided_slice %98 {offsets = [48, 0], sizes = [168, 80], strides = [1, 1]} : vector<228x80xf32> to vector<168x80xf32>
    %110 = tpu.concatenate %105, %106, %107, %108, %109 in 1 : vector<168x80xf32>, vector<168x80xf32>, vector<168x80xf32>, vector<168x80xf32>, vector<168x80xf32> -> vector<168x400xf32>
    %111 = vector.extract_strided_slice %92 {offsets = [12, 0], sizes = [168, 80], strides = [1, 1]} : vector<228x80xf32> to vector<168x80xf32>
    %112 = vector.extract_strided_slice %92 {offsets = [24, 0], sizes = [168, 80], strides = [1, 1]} : vector<228x80xf32> to vector<168x80xf32>
    %113 = vector.extract_strided_slice %92 {offsets = [36, 0], sizes = [168, 80], strides = [1, 1]} : vector<228x80xf32> to vector<168x80xf32>
    %114 = vector.extract_strided_slice %92 {offsets = [48, 0], sizes = [168, 80], strides = [1, 1]} : vector<228x80xf32> to vector<168x80xf32>
    %115 = vector.extract_strided_slice %92 {offsets = [60, 0], sizes = [168, 80], strides = [1, 1]} : vector<228x80xf32> to vector<168x80xf32>
    %116 = tpu.concatenate %111, %112, %113, %114, %115 in 1 : vector<168x80xf32>, vector<168x80xf32>, vector<168x80xf32>, vector<168x80xf32>, vector<168x80xf32> -> vector<168x400xf32>
    %117 = vector.extract_strided_slice %98 {offsets = [12, 0], sizes = [168, 80], strides = [1, 1]} : vector<228x80xf32> to vector<168x80xf32>
    %118 = vector.extract_strided_slice %98 {offsets = [24, 0], sizes = [168, 80], strides = [1, 1]} : vector<228x80xf32> to vector<168x80xf32>
    %119 = vector.extract_strided_slice %98 {offsets = [36, 0], sizes = [168, 80], strides = [1, 1]} : vector<228x80xf32> to vector<168x80xf32>
    %120 = vector.extract_strided_slice %98 {offsets = [48, 0], sizes = [168, 80], strides = [1, 1]} : vector<228x80xf32> to vector<168x80xf32>
    %121 = vector.extract_strided_slice %98 {offsets = [60, 0], sizes = [168, 80], strides = [1, 1]} : vector<228x80xf32> to vector<168x80xf32>
    %122 = tpu.concatenate %117, %118, %119, %120, %121 in 1 : vector<168x80xf32>, vector<168x80xf32>, vector<168x80xf32>, vector<168x80xf32>, vector<168x80xf32> -> vector<168x400xf32>
    %123 = tpu.concatenate %104, %110, %116, %122 in 0 : vector<168x400xf32>, vector<168x400xf32>, vector<168x400xf32>, vector<168x400xf32> -> vector<672x400xf32>
    %c0_74 = arith.constant 0 : index
    %c0_75 = arith.constant 0 : index
    %124 = vector.load %arg4[%c0_74, %c0_75] : memref<400x32xf32, #tpu.memory_space<vmem>>, vector<400x32xf32>
    %cst_76 = arith.constant dense<0.000000e+00> : vector<672x32xf32>
    %125 = tpu.matmul %123, %124, %cst_76 {dimension_numbers = #tpu.dot_dimension_numbers<[1], [0], [0], [1], [0, 0, 1, 1], [], []>} : vector<672x400xf32>, vector<400x32xf32>, vector<672x32xf32> -> vector<672x32xf32>
    %126 = vector.extract_strided_slice %125 {offsets = [0, 0], sizes = [168, 32], strides = [1, 1]} : vector<672x32xf32> to vector<168x32xf32>
    %127 = vector.extract_strided_slice %125 {offsets = [168, 0], sizes = [168, 32], strides = [1, 1]} : vector<672x32xf32> to vector<168x32xf32>
    %128 = arith.maximumf %126, %127 : vector<168x32xf32>
    %129 = vector.extract_strided_slice %125 {offsets = [336, 0], sizes = [168, 32], strides = [1, 1]} : vector<672x32xf32> to vector<168x32xf32>
    %130 = vector.extract_strided_slice %125 {offsets = [504, 0], sizes = [168, 32], strides = [1, 1]} : vector<672x32xf32> to vector<168x32xf32>
    %131 = arith.maximumf %129, %130 : vector<168x32xf32>
    %132 = arith.maximumf %128, %131 : vector<168x32xf32>
    %c0_77 = arith.constant 0 : index
    %c0_78 = arith.constant 0 : index
    %133 = vector.load %arg5[%c0_77, %c0_78] : memref<1x32xf32, #tpu.memory_space<vmem>>, vector<1x32xf32>
    %134 = vector.broadcast %133 : vector<1x32xf32> to vector<168x32xf32>
    %135 = arith.addf %132, %134 : vector<168x32xf32>
    %cst_79 = arith.constant 0.000000e+00 : f32
    %136 = vector.broadcast %cst_79 : f32 to vector<168x32xf32>
    %137 = arith.maximumf %135, %136 : vector<168x32xf32>
    %138 = tpu.concatenate %137, %137, %137, %137, %137, %137, %137, %137, %137, %137 in 1 : vector<168x32xf32>, vector<168x32xf32>, vector<168x32xf32>, vector<168x32xf32>, vector<168x32xf32>, vector<168x32xf32>, vector<168x32xf32>, vector<168x32xf32>, vector<168x32xf32>, vector<168x32xf32> -> vector<168x320xf32>
    %c0_80 = arith.constant 0 : index
    %c0_81 = arith.constant 0 : index
    %139 = vector.load %arg6[%c0_80, %c0_81] : memref<168x320xf32, #tpu.memory_space<vmem>>, vector<168x320xf32>
    %140 = arith.mulf %138, %139 : vector<168x320xf32>
    %cst_82 = arith.constant dense<0.000000e+00> : vector<320xf32>
    %141 = vector.multi_reduction <add>, %140, %cst_82 [0] : vector<168x320xf32> to vector<320xf32>
    %142 = vector.shape_cast %141 : vector<320xf32> to vector<1x320xf32>
    %c0_83 = arith.constant 0 : index
    %c0_84 = arith.constant 0 : index
    %143 = vector.load %arg7[%c0_83, %c0_84] : memref<320x10xf32, #tpu.memory_space<vmem>>, vector<320x10xf32>
    %cst_85 = arith.constant dense<0.000000e+00> : vector<1x10xf32>
    %144 = tpu.matmul %142, %143, %cst_85 {dimension_numbers = #tpu.dot_dimension_numbers<[1], [0], [0], [1], [0, 0, 1, 1], [], []>} : vector<1x320xf32>, vector<320x10xf32>, vector<1x10xf32> -> vector<1x10xf32>
    %c0_86 = arith.constant 0 : index
    %c0_87 = arith.constant 0 : index
    %145 = vector.load %arg8[%c0_86, %c0_87] : memref<1x10xf32, #tpu.memory_space<vmem>>, vector<1x10xf32>
    %146 = arith.addf %144, %145 : vector<1x10xf32>
    %c0_88 = arith.constant 0 : index
    %c0_89 = arith.constant 0 : index
    %c0_90 = arith.constant 0 : index
    %147 = vector.load %arg9[%c0_88, %c0_89, %c0_90] : memref<1x1x10xf32, #tpu.memory_space<vmem>>, vector<1x1x10xf32>
    %148 = vector.shape_cast %147 : vector<1x1x10xf32> to vector<1x10xf32>
    %149 = vector.shape_cast %146 : vector<1x10xf32> to vector<1x1x10xf32>
    tpu.vector_store %arg9[%c0_88, %c0_89, %c0_90], %149 {strides = array<i32>} : memref<1x1x10xf32, #tpu.memory_space<vmem>>, vector<1x1x10xf32>,
    return
  }
  func.func @transform_0(%arg0: i32) -> (i32, i32, i32) {
    %c0_i32 = arith.constant 0 : i32
    %c0_i32_0 = arith.constant 0 : i32
    %c0_i32_1 = arith.constant 0 : i32
    return %arg0, %c0_i32, %c0_i32_0 : i32, i32, i32
  }
  func.func @transform_1(%arg0: i32) -> (i32, i32) {
    %c0_i32 = arith.constant 0 : i32
    %c0_i32_0 = arith.constant 0 : i32
    %c0_i32_1 = arith.constant 0 : i32
    return %c0_i32, %c0_i32_0 : i32, i32
  }
  func.func @transform_2(%arg0: i32) -> (i32, i32) {
    %c0_i32 = arith.constant 0 : i32
    %c0_i32_0 = arith.constant 0 : i32
    %c0_i32_1 = arith.constant 0 : i32
    return %c0_i32, %c0_i32_0 : i32, i32
  }
  func.func @transform_3(%arg0: i32) -> (i32, i32) {
    %c0_i32 = arith.constant 0 : i32
    %c0_i32_0 = arith.constant 0 : i32
    %c0_i32_1 = arith.constant 0 : i32
    return %c0_i32, %c0_i32_0 : i32, i32
  }
  func.func @transform_4(%arg0: i32) -> (i32, i32) {
    %c0_i32 = arith.constant 0 : i32
    %c0_i32_0 = arith.constant 0 : i32
    %c0_i32_1 = arith.constant 0 : i32
    return %c0_i32, %c0_i32_0 : i32, i32
  }
  func.func @transform_5(%arg0: i32) -> (i32, i32) {
    %c0_i32 = arith.constant 0 : i32
    %c0_i32_0 = arith.constant 0 : i32
    %c0_i32_1 = arith.constant 0 : i32
    return %c0_i32, %c0_i32_0 : i32, i32
  }
  func.func @transform_6(%arg0: i32) -> (i32, i32) {
    %c0_i32 = arith.constant 0 : i32
    %c0_i32_0 = arith.constant 0 : i32
    %c0_i32_1 = arith.constant 0 : i32
    return %c0_i32, %c0_i32_0 : i32, i32
  }
  func.func @transform_7(%arg0: i32) -> (i32, i32) {
    %c0_i32 = arith.constant 0 : i32
    %c0_i32_0 = arith.constant 0 : i32
    %c0_i32_1 = arith.constant 0 : i32
    return %c0_i32, %c0_i32_0 : i32, i32
  }
  func.func @transform_8(%arg0: i32) -> (i32, i32, i32) {
    %c0_i32 = arith.constant 0 : i32
    %c0_i32_0 = arith.constant 0 : i32
    %c0_i32_1 = arith.constant 0 : i32
    return %arg0, %c0_i32, %c0_i32_0 : i32, i32, i32
  }
}

</mosaic_0001>

<bundles_post_ra>
// kernel: cnn_forward.1
= control target key start
LH: loop header
LB: loop body
LE: loop exit
PB: predicated region body
PF: predicated region fallthrough
CT: control target
= control target key end

     0   :  { %13 = vsyncpa [#allocation5], 0  ;;  %s13152_s0 = inlined_call_operand.vmem [shape: f32[2,896,32], index: 0, kind: input, shape index: {}]   ;;  %s13153_s1 = inlined_call_operand.vmem [shape: f32[32,16], index: 1, kind: input, shape index: {}]   ;;  %s13154_s2 = inlined_call_operand.vmem [shape: f32[1,16], index: 2, kind: input, shape index: {}]   ;;  %s13155_s3 = inlined_call_operand.vmem [shape: f32[400,32], index: 3, kind: input, shape index: {}]   ;;  %s13156_s4 = inlined_call_operand.vmem [shape: f32[1,32], index: 4, kind: input, shape index: {}]   ;;  %s13157_s5 = inlined_call_operand.vmem [shape: f32[168,320], index: 5, kind: input, shape index: {}]   ;;  %s13158_s6 = inlined_call_operand.vmem [shape: f32[320,10], index: 6, kind: input, shape index: {}]   ;;  %s13159_s7 = inlined_call_operand.vmem [shape: f32[1,10], index: 7, kind: input, shape index: {}]   ;;  %s13160_s8 = inlined_call_operand.hbm [shape: f32[2,1,10], index: 8, kind: output, shape index: {}]  }
   0x1   :  { %15 = vsyncpa [#allocation5 + $0x1], 0  ;;  %s7933_s27 = smov 0   ;;  %s7935_s28 = smov 0  }
   0x2   :  { %s7937_s29 = smov 0   ;;  %s7939_s30 = smov 0  }
   0x3 LB: > { %s7954_s9 = sadd.s32 4294967295, %s7875_s30   ;;  %s6437_s10 = sadd.s32 4294967294, %s7875_s30   ;;  %s7875_s30 = sphi %s7939_s30, %s14111_s30   ;;  %s7871_s29 = sphi %s7937_s29, %s14110_s29   ;;  %s7867_s28 = sphi %s7935_s28, %s14109_s28   ;;  %s7863_s27 = sphi %s7933_s27, %s14108_s27  }
   0x4   : > { %s7958_s11 = sadd.s32 1, %s7875_s30   ;;  %s201_s12 = sadd.s32 1, %s7871_s29 }
   0x5   : > { %s198_s13 = ssub.s32 %s7875_s30, %s7958_s11  ;;  %p211_p0 = scmp.ne.s32.totalorder %s7871_s29, %s7867_s28 }
   0x6   : > { %p199_p1 = scmp.eq.s32.totalorder %s198_s13, 0  ;;  %p212_p2 = scmp.eq.s32.totalorder %s7954_s9, 1 }
   0x7   : > { %p217_p3 = scmp.ne.s32.totalorder %s7867_s28, %s7863_s27  ;;  %p218_p4 = scmp.eq.s32.totalorder %s6437_s10, 1 }
   0x8   : > { %s7969_s14 = scalar_select %p199_p1, %s7871_s29, %s201_s12  }
   0x9   : > { %p7971_p5 = por %p212_p2, %p211_p0  ;;  %p7975_p6 = por %p218_p4, %p217_p3 }
   0xa   : > { %p6440_p7 = scmp.ge.s32.totalorder %s7875_s30, 1  ;;  %p265_p8 = scmp.lt.s32.totalorder %s7875_s30, 3 }
   0xc   : > { %p266_p9 = pnand %p6440_p7, %p265_p8 }
   0xe   : > { %269 = sbr.rel (%p266_p9) target bundleno = 2318 (0x90e), region = 52 }
  0x15   : > { %v415_v0 = vld [vmem:[%s13153_s1] sm:$0xff]  ;;  %v416_v1 = vld [vmem:[%s13153_s1 + $0x8] sm:$0xff]  ;;  %v417_v2 = vld [vmem:[%s13153_s1 + $0x10] sm:$0xff]  ;;  %p298_p10 = scmp.lt.s32.totalorder %s7954_s9, 1  ;;  %vm419_vm0 = vcmask 261120   ;;  %vm1528_vm1 = vcmask 130048  }
  0x16   : > { %v6999_v3 = vpack.c.bf16 %v416_v1, %v415_v0  ;;  %v418_v4 = vld [vmem:[%s13153_s1 + $0x18] sm:$0xff]  ;;  %v13161_v62 = vmov 0.0   ;;  %s7878_s17 = smov 16   ;;  %s7879_s18 = smov 32   ;;  %vm2283_vm2 = vcmask 392192   ;;  %vm2313_vm3 = vcmask 523264  }
  0x17   : > { %v7003_v5 = vpack.c.bf16 %v418_v4, %v417_v2  ;;  %s299_s25 = scalar_select %p298_p10, %s7954_s9, 1  ;;  %1582 = vst.msk [vmem:[#allocation3 + $0xc0] sm:$0xff] %vm1528_vm1, %v13161_v62  ;;  %1529 = vst.msk [vmem:[#allocation2] sm:$0xff] %vm1528_vm1, %v13161_v62  ;;  %vm2887_vm4 = vcmask 1043456   ;;  %vm1587_vm5 = vcmask 129024   ;;  %vm3236_vm6 = vcmask 916480  }
  0x18   : > { %7000 = vmatprep.subr.bf16.mxu0 %v6999_v3  ;;  %1530 = vst.msk [vmem:[#allocation2 + $0x8] sm:$0xff] %vm1528_vm1, %v13161_v62  ;;  %1531 = vst.msk [vmem:[#allocation2 + $0x10] sm:$0xff] %vm1528_vm1, %v13161_v62  ;;  %s7880_s19 = smov 48   ;;  %s7881_s20 = smov 64   ;;  %vm3193_vm7 = vcmask 654336   ;;  %vm5936_vm8 = vcmask 785408  }
  0x19   : > { %7002 = vmatpush3.bf16.msra.mxu0 %v6999_v3  ;;  %s7266_s26 = smul.u32 896, %s299_s25  ;;  %1532 = vst.msk [vmem:[#allocation2 + $0x18] sm:$0xff] %vm1528_vm1, %v13161_v62  ;;  %1533 = vst.msk [vmem:[#allocation2 + $0x20] sm:$0xff] %vm1528_vm1, %v13161_v62  ;;  %s7882_s21 = smov 112   ;;  %vm7886_vm9 = vmmov 0   ;;  %vm6367_vm10 = vcmask 73728  }
  0x1a   : > { %7004 = vmatprep.subr.bf16.mxu0 %v7003_v5  ;;  %1534 = vst.msk [vmem:[#allocation2 + $0x28] sm:$0xff] %vm1528_vm1, %v13161_v62  ;;  %1535 = vst.msk [vmem:[#allocation2 + $0x30] sm:$0xff] %vm1528_vm1, %v13161_v62  ;;  %s7883_s24 = smov 80   ;;  %s6641_s25 = sshll.u32 %s7954_s9, 4 }
  0x1b   : > { %s7998_s13 = scalar_lea.vmem %s13152_s0, %s7266_s26  ;;  %1536 = vst.msk [vmem:[#allocation2 + $0x38] sm:$0xff] %vm1528_vm1, %v13161_v62  ;;  %1537 = vst.msk [vmem:[#allocation2 + $0x40] sm:$0xff] %vm1528_vm1, %v13161_v62 }
  0x1c   : > { %v303_v6 = vld [vmem:[%s7998_s13] sm:$0xff]  ;;  %v304_v7 = vld [vmem:[%s7998_s13 + $0x8] sm:$0xff]  ;;  %v305_v8 = vld [vmem:[%s7998_s13 + $0x10] sm:$0xff]  ;;  %1538 = vst.msk [vmem:[#allocation2 + $0x48] sm:$0xff] %vm1528_vm1, %v13161_v62 }
  0x1d   : > { %7006 = vmatpush3.bf16.msra.mxu0 %v7003_v5  ;;  %6812 = vmatprep.mubr.msk.f32.mxu0 %vm419_vm0, %v303_v6  ;;  %v306_v9 = vld [vmem:[%s7998_s13 + $0x18] sm:$0xff]  ;;  %v307_v10 = vld [vmem:[%s7998_s13 + $0x20] sm:$0xff]  ;;  %v308_v11 = vld [vmem:[%s7998_s13 + $0x28] sm:$0xff]  ;;  %1539 = vst.msk [vmem:[#allocation2 + $0x50] sm:$0xff] %vm1528_vm1, %v13161_v62 }
  0x1e   : > { %v309_v12 = vld [vmem:[%s7998_s13 + $0x30] sm:$0xff]  ;;  %v310_v13 = vld [vmem:[%s7998_s13 + $0x38] sm:$0xff]  ;;  %v311_v14 = vld [vmem:[%s7998_s13 + $0x40] sm:$0xff]  ;;  %1540 = vst.msk [vmem:[#allocation2 + $0x58] sm:$0xff] %vm1528_vm1, %v13161_v62 }
  0x1f   : > { %v312_v15 = vld [vmem:[%s7998_s13 + $0x48] sm:$0xff]  ;;  %v313_v16 = vld [vmem:[%s7998_s13 + $0x50] sm:$0xff]  ;;  %v314_v17 = vld [vmem:[%s7998_s13 + $0x58] sm:$0xff]  ;;  %1541 = vst.msk [vmem:[#allocation2 + $0x60] sm:$0xff] %vm1528_vm1, %v13161_v62 }
  0x20   : > { %6813 = vmatmul.mubr.msk.f32.vlgmr.msra.gmra.mrb[0].mxu0 %vm419_vm0, %v304_v7  ;;  %v315_v18 = vld [vmem:[%s7998_s13 + $0x60] sm:$0xff]  ;;  %v316_v19 = vld [vmem:[%s7998_s13 + $0x68] sm:$0xff]  ;;  %v317_v20 = vld [vmem:[%s7998_s13 + $0x70] sm:$0xff]  ;;  %1542 = vst.msk [vmem:[#allocation2 + $0x68] sm:$0xff] %vm1528_vm1, %v13161_v62 }
  0x21   : > { %6815 = vmatprep.mubr.msk.f32.mxu0 %vm419_vm0, %v305_v8  ;;  %v318_v21 = vld [vmem:[%s7998_s13 + $0x78] sm:$0xff]  ;;  %v319_v22 = vld [vmem:[%s7998_s13 + $0x80] sm:$0xff]  ;;  %v320_v23 = vld [vmem:[%s7998_s13 + $0x88] sm:$0xff]  ;;  %1543 = vst.msk [vmem:[#allocation2 + $0x70] sm:$0xff] %vm1528_vm1, %v13161_v62 }
  0x22   : > { %v321_v24 = vld [vmem:[%s7998_s13 + $0x90] sm:$0xff]  ;;  %v322_v25 = vld [vmem:[%s7998_s13 + $0x98] sm:$0xff]  ;;  %v323_v26 = vld [vmem:[%s7998_s13 + $0xa0] sm:$0xff]  ;;  %1544 = vst.msk [vmem:[#allocation2 + $0x78] sm:$0xff] %vm1528_vm1, %v13161_v62 }
  0x23   : > { %v324_v27 = vld [vmem:[%s7998_s13 + $0xa8] sm:$0xff]  ;;  %v325_v28 = vld [vmem:[%s7998_s13 + $0xb0] sm:$0xff]  ;;  %v326_v29 = vld [vmem:[%s7998_s13 + $0xb8] sm:$0xff]  ;;  %1545 = vst.msk [vmem:[#allocation2 + $0x80] sm:$0xff] %vm1528_vm1, %v13161_v62 }
  0x24   : > { %6816 = vmatmul.mubr.msk.f32.gmra.mrb[2].mxu0 %vm419_vm0, %v306_v9  ;;  %v327_v30 = vld [vmem:[%s7998_s13 + $0xc0] sm:$0xff]  ;;  %v328_v31 = vld [vmem:[%s7998_s13 + $0xc8] sm:$0xff]  ;;  %v329_v32 = vld [vmem:[%s7998_s13 + $0xd0] sm:$0xff]  ;;  %1546 = vst.msk [vmem:[#allocation2 + $0x88] sm:$0xff] %vm1528_vm1, %v13161_v62 }
  0x25   : > { %6818 = vmatprep.mubr.msk.f32.mxu0 %vm419_vm0, %v307_v10  ;;  %v330_v33 = vld [vmem:[%s7998_s13 + $0xd8] sm:$0xff]  ;;  %v331_v34 = vld [vmem:[%s7998_s13 + $0xe0] sm:$0xff]  ;;  %v332_v35 = vld [vmem:[%s7998_s13 + $0xe8] sm:$0xff]  ;;  %1547 = vst.msk [vmem:[#allocation2 + $0x90] sm:$0xff] %vm1528_vm1, %v13161_v62 }
  0x26   : > { %v333_v36 = vld [vmem:[%s7998_s13 + $0xf0] sm:$0xff]  ;;  %v334_v37 = vld [vmem:[%s7998_s13 + $0xf8] sm:$0xff]  ;;  %v335_v38 = vld [vmem:[%s7998_s13 + $0x100] sm:$0xff]  ;;  %1548 = vst.msk [vmem:[#allocation2 + $0x98] sm:$0xff] %vm1528_vm1, %v13161_v62 }
  0x27   : > { %v336_v39 = vld [vmem:[%s7998_s13 + $0x108] sm:$0xff]  ;;  %v337_v40 = vld [vmem:[%s7998_s13 + $0x110] sm:$0xff]  ;;  %v338_v41 = vld [vmem:[%s7998_s13 + $0x118] sm:$0xff]  ;;  %1549 = vst.msk [vmem:[#allocation2 + $0xa0] sm:$0xff] %vm1528_vm1, %v13161_v62 }
  0x28   : > { %6819 = vmatmul.mubr.msk.f32.gmra.mrb[4].mxu0 %vm419_vm0, %v308_v11  ;;  %v339_v42 = vld [vmem:[%s7998_s13 + $0x120] sm:$0xff]  ;;  %v340_v43 = vld [vmem:[%s7998_s13 + $0x128] sm:$0xff]  ;;  %v341_v44 = vld [vmem:[%s7998_s13 + $0x130] sm:$0xff]  ;;  %1550 = vst.msk [vmem:[#allocation2 + $0xa8] sm:$0xff] %vm1528_vm1, %v13161_v62 }
  0x29   : > { %6821 = vmatprep.mubr.msk.f32.mxu0 %vm419_vm0, %v309_v12  ;;  %v342_v45 = vld [vmem:[%s7998_s13 + $0x138] sm:$0xff]  ;;  %v343_v46 = vld [vmem:[%s7998_s13 + $0x140] sm:$0xff]  ;;  %v344_v47 = vld [vmem:[%s7998_s13 + $0x148] sm:$0xff]  ;;  %1551 = vst.msk [vmem:[#allocation2 + $0xb0] sm:$0xff] %vm1528_vm1, %v13161_v62 }
  0x2a   : > { %v345_v48 = vld [vmem:[%s7998_s13 + $0x150] sm:$0xff]  ;;  %v346_v49 = vld [vmem:[%s7998_s13 + $0x158] sm:$0xff]  ;;  %v347_v50 = vld [vmem:[%s7998_s13 + $0x160] sm:$0xff]  ;;  %1552 = vst.msk [vmem:[#allocation2 + $0xb8] sm:$0xff] %vm1528_vm1, %v13161_v62 }
  0x2b   : > { %v348_v51 = vld [vmem:[%s7998_s13 + $0x168] sm:$0xff]  ;;  %v349_v52 = vld [vmem:[%s7998_s13 + $0x170] sm:$0xff]  ;;  %v350_v53 = vld [vmem:[%s7998_s13 + $0x178] sm:$0xff]  ;;  %1553 = vst.msk [vmem:[#allocation2 + $0xc0] sm:$0xff] %vm1528_vm1, %v13161_v62 }
  0x2c   : > { %6822 = vmatmul.mubr.msk.f32.gmra.mrb[6].mxu0 %vm419_vm0, %v310_v13  ;;  %v351_v54 = vld [vmem:[%s7998_s13 + $0x180] sm:$0xff]  ;;  %v352_v55 = vld [vmem:[%s7998_s13 + $0x188] sm:$0xff]  ;;  %v353_v56 = vld [vmem:[%s7998_s13 + $0x190] sm:$0xff]  ;;  %1554 = vst.msk [vmem:[#allocation2 + $0xc8] sm:$0xff] %vm1528_vm1, %v13161_v62 }
  0x2d   : > { %6824 = vmatprep.mubr.msk.f32.mxu0 %vm419_vm0, %v311_v14  ;;  %v354_v57 = vld [vmem:[%s7998_s13 + $0x198] sm:$0xff]  ;;  %v355_v58 = vld [vmem:[%s7998_s13 + $0x1a0] sm:$0xff]  ;;  %v356_v59 = vld [vmem:[%s7998_s13 + $0x1a8] sm:$0xff]  ;;  %1555 = vst.msk [vmem:[#allocation2 + $0xd0] sm:$0xff] %vm1528_vm1, %v13161_v62 }
  0x2e   : > { %v357_v60 = vld [vmem:[%s7998_s13 + $0x1b0] sm:$0xff]  ;;  %v358_v61 = vld [vmem:[%s7998_s13 + $0x1b8] sm:$0xff]  ;;  %1556 = vst.msk [vmem:[#allocation2 + $0xd8] sm:$0xff] %vm1528_vm1, %v13161_v62  ;;  %1557 = vst.msk [vmem:[#allocation2 + $0xe0] sm:$0xff] %vm1528_vm1, %v13161_v62 }
  0x2f   : > { %1558 = vst.msk [vmem:[#allocation3] sm:$0xff] %vm1528_vm1, %v13161_v62  ;;  %1559 = vst.msk [vmem:[#allocation3 + $0x8] sm:$0xff] %vm1528_vm1, %v13161_v62  ;;  %v359_v63 = vld [vmem:[%s7998_s13 + $0x1c0] sm:$0xff]  ;;  %v360_v0 = vld [vmem:[%s7998_s13 + $0x1c8] sm:$0xff] }
  0x30   : > { %6825 = vmatmul.mubr.msk.f32.gmra.mrb[8].mxu0 %vm419_vm0, %v312_v15  ;;  %1560 = vst.msk [vmem:[#allocation3 + $0x10] sm:$0xff] %vm1528_vm1, %v13161_v62  ;;  %1561 = vst.msk [vmem:[#allocation3 + $0x18] sm:$0xff] %vm1528_vm1, %v13161_v62  ;;  %v361_v1 = vld [vmem:[%s7998_s13 + $0x1d0] sm:$0xff]  ;;  %v1669_v2 = vld [vmem:[#allocation3 + $0xc0] sm:$0xff] }
  0x31   : > { %6827 = vmatprep.mubr.msk.f32.mxu0 %vm419_vm0, %v313_v16  ;;  %1562 = vst.msk [vmem:[#allocation3 + $0x20] sm:$0xff] %vm1528_vm1, %v13161_v62  ;;  %1563 = vst.msk [vmem:[#allocation3 + $0x28] sm:$0xff] %vm1528_vm1, %v13161_v62  ;;  %v362_v4 = vld [vmem:[%s7998_s13 + $0x1d8] sm:$0xff]  ;;  %1838 = vrot.lane.b32.xlu0 %v1669_v2, %s7878_s17  ;;  %v363_v5 = vld [vmem:[%s7998_s13 + $0x1e0] sm:$0xff] }
  0x32   : > { %1564 = vst.msk [vmem:[#allocation3 + $0x30] sm:$0xff] %vm1528_vm1, %v13161_v62  ;;  %1565 = vst.msk [vmem:[#allocation3 + $0x38] sm:$0xff] %vm1528_vm1, %v13161_v62  ;;  %v364_v8 = vld [vmem:[%s7998_s13 + $0x1e8] sm:$0xff]  ;;  %v365_v9 = vld [vmem:[%s7998_s13 + $0x1f0] sm:$0xff] }
  0x33   : > { %1566 = vst.msk [vmem:[#allocation3 + $0x40] sm:$0xff] %vm1528_vm1, %v13161_v62  ;;  %1567 = vst.msk [vmem:[#allocation3 + $0x48] sm:$0xff] %vm1528_vm1, %v13161_v62  ;;  %v1698_v6 = vld [vmem:[#allocation2 + $0xc1] sm:$0xff]  ;;  %v366_v12 = vld [vmem:[%s7998_s13 + $0x1f8] sm:$0xff] }
  0x34   : > { %6828 = vmatmul.mubr.msk.f32.gmra.mrb[10].mxu0 %vm419_vm0, %v314_v17  ;;  %1568 = vst.msk [vmem:[#allocation3 + $0x50] sm:$0xff] %vm1528_vm1, %v13161_v62  ;;  %1569 = vst.msk [vmem:[#allocation3 + $0x58] sm:$0xff] %vm1528_vm1, %v13161_v62  ;;  %v1699_v7 = vld [vmem:[#allocation2 + $0xc9] sm:$0xff]  ;;  %v367_v13 = vld [vmem:[%s7998_s13 + $0x200] sm:$0xff] }
  0x35   : > { %6830 = vmatprep.mubr.msk.f32.mxu0 %vm419_vm0, %v315_v18  ;;  %1570 = vst.msk [vmem:[#allocation3 + $0x60] sm:$0xff] %vm1528_vm1, %v13161_v62  ;;  %1571 = vst.msk [vmem:[#allocation3 + $0x68] sm:$0xff] %vm1528_vm1, %v13161_v62  ;;  %1954 = vrot.lane.b32.xlu0 %v1698_v6, %s7879_s18  ;;  %v1756_v14 = vld [vmem:[#allocation2 + $0xc2] sm:$0xff]  ;;  %v1757_v15 = vld [vmem:[#allocation2 + $0xca] sm:$0xff] }
  0x36   : > { %1572 = vst.msk [vmem:[#allocation3 + $0x70] sm:$0xff] %vm1528_vm1, %v13161_v62  ;;  %1573 = vst.msk [vmem:[#allocation3 + $0x78] sm:$0xff] %vm1528_vm1, %v13161_v62  ;;  %v368_v16 = vld [vmem:[%s7998_s13 + $0x208] sm:$0xff]  ;;  %v369_v17 = vld [vmem:[%s7998_s13 + $0x210] sm:$0xff] }
  0x37   : > { %1574 = vst.msk [vmem:[#allocation3 + $0x80] sm:$0xff] %vm1528_vm1, %v13161_v62  ;;  %1575 = vst.msk [vmem:[#allocation3 + $0x88] sm:$0xff] %vm1528_vm1, %v13161_v62 }
  0x38   : > { %6831 = vmatmul.mubr.msk.f32.gmra.mrb[12].mxu0 %vm419_vm0, %v316_v19  ;;  %1576 = vst.msk [vmem:[#allocation3 + $0x90] sm:$0xff] %vm1528_vm1, %v13161_v62  ;;  %1577 = vst.msk [vmem:[#allocation3 + $0x98] sm:$0xff] %vm1528_vm1, %v13161_v62  ;;  %v1700_v19 = vld [vmem:[#allocation2 + $0xd1] sm:$0xff] }
  0x39   : > { %6833 = vmatprep.mubr.msk.f32.mxu0 %vm419_vm0, %v317_v20  ;;  %1578 = vst.msk [vmem:[#allocation3 + $0xa0] sm:$0xff] %vm1528_vm1, %v13161_v62  ;;  %1579 = vst.msk [vmem:[#allocation3 + $0xa8] sm:$0xff] %vm1528_vm1, %v13161_v62  ;;  %v370_v20 = vld [vmem:[%s7998_s13 + $0x218] sm:$0xff] }
  0x3a   : > { %1580 = vst.msk [vmem:[#allocation3 + $0xb0] sm:$0xff] %vm1528_vm1, %v13161_v62  ;;  %1581 = vst.msk [vmem:[#allocation3 + $0xb8] sm:$0xff] %vm1528_vm1, %v13161_v62 }
  0x3b   : > { %1583 = vst.msk [vmem:[#allocation3 + $0xc8] sm:$0xff] %vm1528_vm1, %v13161_v62  ;;  %1584 = vst.msk [vmem:[#allocation3 + $0xd0] sm:$0xff] %vm1528_vm1, %v13161_v62 }
  0x3c   : > { %6834 = vmatmul.mubr.msk.f32.gmra.mrb[14].mxu0 %vm419_vm0, %v318_v21  ;;  %1585 = vst.msk [vmem:[#allocation3 + $0xd8] sm:$0xff] %vm1528_vm1, %v13161_v62  ;;  %1586 = vst.msk [vmem:[#allocation3 + $0xe0] sm:$0xff] %vm1528_vm1, %v13161_v62  ;;  %v371_v21 = vld [vmem:[%s7998_s13 + $0x220] sm:$0xff] }
  0x3d   : > { %6836 = vmatprep.mubr.msk.f32.mxu0 %vm419_vm0, %v319_v22 }
  0x40   : > { %6837 = vmatmul.mubr.msk.f32.gmra.mrb[16].mxu0 %vm419_vm0, %v320_v23  ;;  %v1758_v23 = vld [vmem:[#allocation2 + $0xd2] sm:$0xff] }
  0x41   : > { %6839 = vmatprep.mubr.msk.f32.mxu0 %vm419_vm0, %v321_v24  ;;  %v372_v24 = vld [vmem:[%s7998_s13 + $0x228] sm:$0xff] }
  0x42   : > { %v1670_v3 = vld [vmem:[#allocation3 + $0xc8] sm:$0xff]  ;;  %v1671_v18 = vld [vmem:[#allocation3 + $0xd0] sm:$0xff] }
  0x43   : > { %1840 = vrot.lane.b32.xlu1 %v1670_v3, %s7878_s17  ;;  %v1727_v10 = vld [vmem:[#allocation3 + $0xc1] sm:$0xff]  ;;  %v1728_v11 = vld [vmem:[#allocation3 + $0xc9] sm:$0xff]  ;;  %v1729_v22 = vld [vmem:[#allocation3 + $0xd1] sm:$0xff] }
  0x44   : > { %6840 = vmatmul.mubr.msk.f32.gmra.mrb[18].mxu0 %vm419_vm0, %v322_v25  ;;  %2070 = vrot.lane.b32.xlu0 %v1727_v10, %s7880_s19  ;;  %v373_v25 = vld [vmem:[%s7998_s13 + $0x230] sm:$0xff]  ;;  %v412_v3 = vld [vmem:[%s7998_s13 + $0x368] sm:$0xff] }
  0x45   : > { %6842 = vmatprep.mubr.msk.f32.mxu0 %vm419_vm0, %v323_v26  ;;  %v374_v26 = vld [vmem:[%s7998_s13 + $0x238] sm:$0xff] }
  0x47   : > { %1956 = vrot.lane.b32.xlu1 %v1699_v7, %s7879_s18  ;;  %v414_v7 = vld [vmem:[%s7998_s13 + $0x378] sm:$0xff] }
  0x48   : > { %6843 = vmatmul.mubr.msk.f32.gmra.mrb[20].mxu0 %vm419_vm0, %v324_v27  ;;  %2186 = vrot.lane.b32.xlu0 %v1756_v14, %s7881_s20  ;;  %v375_v27 = vld [vmem:[%s7998_s13 + $0x240] sm:$0xff] }
  0x49   : > { %6845 = vmatprep.mubr.msk.f32.mxu0 %vm419_vm0, %v325_v28  ;;  %v376_v28 = vld [vmem:[%s7998_s13 + $0x248] sm:$0xff] }
  0x4b   : > { %2072 = vrot.lane.b32.xlu1 %v1728_v11, %s7880_s19 }
  0x4c   : > { %6846 = vmatmul.mubr.msk.f32.gmra.mrb[22].mxu0 %vm419_vm0, %v326_v29  ;;  %1842 = vrot.lane.b32.xlu0 %v1671_v18, %s7878_s17  ;;  %v377_v29 = vld [vmem:[%s7998_s13 + $0x250] sm:$0xff] }
  0x4d   : > { %6848 = vmatprep.mubr.msk.f32.mxu0 %vm419_vm0, %v327_v30  ;;  %v378_v30 = vld [vmem:[%s7998_s13 + $0x258] sm:$0xff] }
  0x4f   : > { %2188 = vrot.lane.b32.xlu1 %v1757_v15, %s7881_s20 }
  0x50   : > { %6849 = vmatmul.mubr.msk.f32.gmra.mrb[24].mxu0 %vm419_vm0, %v328_v31  ;;  %2074 = vrot.lane.b32.xlu0 %v1729_v22, %s7880_s19  ;;  %v379_v31 = vld [vmem:[%s7998_s13 + $0x260] sm:$0xff] }
  0x51   : > { %6851 = vmatprep.mubr.msk.f32.mxu0 %vm419_vm0, %v329_v32  ;;  %v380_v32 = vld [vmem:[%s7998_s13 + $0x268] sm:$0xff] }
  0x53   : > { %1958 = vrot.lane.b32.xlu1 %v1700_v19, %s7879_s18 }
  0x54   : > { %6852 = vmatmul.mubr.msk.f32.gmra.mrb[26].mxu0 %vm419_vm0, %v330_v33  ;;  %v381_v33 = vld [vmem:[%s7998_s13 + $0x270] sm:$0xff] }
  0x55   : > { %6854 = vmatprep.mubr.msk.f32.mxu0 %vm419_vm0, %v331_v34  ;;  %v382_v34 = vld [vmem:[%s7998_s13 + $0x278] sm:$0xff] }
  0x57   : > { %2190 = vrot.lane.b32.xlu1 %v1758_v23, %s7881_s20 }
  0x58   : > { %6855 = vmatmul.mubr.msk.f32.gmra.mrb[28].mxu0 %vm419_vm0, %v332_v35  ;;  %v383_v35 = vld [vmem:[%s7998_s13 + $0x280] sm:$0xff] }
  0x59   : > { %6857 = vmatprep.mubr.msk.f32.mxu0 %vm419_vm0, %v333_v36  ;;  %v384_v36 = vld [vmem:[%s7998_s13 + $0x288] sm:$0xff] }
  0x5c   : > { %6858 = vmatmul.mubr.msk.f32.gmra.mrb[30].mxu0 %vm419_vm0, %v334_v37  ;;  %v385_v37 = vld [vmem:[%s7998_s13 + $0x290] sm:$0xff] }
  0x5d   : > { %6860 = vmatprep.mubr.msk.f32.mxu0 %vm419_vm0, %v335_v38  ;;  %v386_v38 = vld [vmem:[%s7998_s13 + $0x298] sm:$0xff] }
  0x60   : > { %6861 = vmatmul.mubr.msk.f32.gmra.mrb[32].mxu0 %vm419_vm0, %v336_v39  ;;  %v387_v39 = vld [vmem:[%s7998_s13 + $0x2a0] sm:$0xff] }
  0x61   : > { %6863 = vmatprep.mubr.msk.f32.mxu0 %vm419_vm0, %v337_v40  ;;  %v388_v40 = vld [vmem:[%s7998_s13 + $0x2a8] sm:$0xff] }
  0x64   : > { %6864 = vmatmul.mubr.msk.f32.gmra.mrb[34].mxu0 %vm419_vm0, %v338_v41  ;;  %v389_v41 = vld [vmem:[%s7998_s13 + $0x2b0] sm:$0xff] }
  0x65   : > { %6866 = vmatprep.mubr.msk.f32.mxu0 %vm419_vm0, %v339_v42  ;;  %v390_v42 = vld [vmem:[%s7998_s13 + $0x2b8] sm:$0xff] }
  0x68   : > { %6867 = vmatmul.mubr.msk.f32.gmra.mrb[36].mxu0 %vm419_vm0, %v340_v43  ;;  %v391_v43 = vld [vmem:[%s7998_s13 + $0x2c0] sm:$0xff] }
  0x69   : > { %6869 = vmatprep.mubr.msk.f32.mxu0 %vm419_vm0, %v341_v44  ;;  %v392_v44 = vld [vmem:[%s7998_s13 + $0x2c8] sm:$0xff] }
  0x6c   : > { %6870 = vmatmul.mubr.msk.f32.gmra.mrb[38].mxu0 %vm419_vm0, %v342_v45  ;;  %v393_v45 = vld [vmem:[%s7998_s13 + $0x2d0] sm:$0xff] }
  0x6d   : > { %6872 = vmatprep.mubr.msk.f32.mxu0 %vm419_vm0, %v343_v46  ;;  %v394_v46 = vld [vmem:[%s7998_s13 + $0x2d8] sm:$0xff] }
  0x70   : > { %6873 = vmatmul.mubr.msk.f32.gmra.mrb[40].mxu0 %vm419_vm0, %v344_v47  ;;  %v395_v47 = vld [vmem:[%s7998_s13 + $0x2e0] sm:$0xff] }
  0x71   : > { %6875 = vmatprep.mubr.msk.f32.mxu0 %vm419_vm0, %v345_v48  ;;  %v396_v48 = vld [vmem:[%s7998_s13 + $0x2e8] sm:$0xff] }
  0x74   : > { %6876 = vmatmul.mubr.msk.f32.gmra.mrb[42].mxu0 %vm419_vm0, %v346_v49  ;;  %v397_v49 = vld [vmem:[%s7998_s13 + $0x2f0] sm:$0xff] }
  0x75   : > { %6878 = vmatprep.mubr.msk.f32.mxu0 %vm419_vm0, %v347_v50  ;;  %v398_v50 = vld [vmem:[%s7998_s13 + $0x2f8] sm:$0xff] }
  0x78   : > { %6879 = vmatmul.mubr.msk.f32.gmra.mrb[44].mxu0 %vm419_vm0, %v348_v51  ;;  %v399_v51 = vld [vmem:[%s7998_s13 + $0x300] sm:$0xff] }
  0x79   : > { %6881 = vmatprep.mubr.msk.f32.mxu0 %vm419_vm0, %v349_v52  ;;  %v400_v52 = vld [vmem:[%s7998_s13 + $0x308] sm:$0xff] }
  0x7c   : > { %6882 = vmatmul.mubr.msk.f32.gmra.mrb[46].mxu0 %vm419_vm0, %v350_v53  ;;  %v401_v53 = vld [vmem:[%s7998_s13 + $0x310] sm:$0xff] }
  0x7d   : > { %6884 = vmatprep.mubr.msk.f32.mxu0 %vm419_vm0, %v351_v54  ;;  %v402_v54 = vld [vmem:[%s7998_s13 + $0x318] sm:$0xff] }
  0x80   : > { %6885 = vmatmul.mubr.msk.f32.gmra.mrb[48].mxu0 %vm419_vm0, %v352_v55  ;;  %v403_v55 = vld [vmem:[%s7998_s13 + $0x320] sm:$0xff] }
  0x81   : > { %6887 = vmatprep.mubr.msk.f32.mxu0 %vm419_vm0, %v353_v56  ;;  %v404_v56 = vld [vmem:[%s7998_s13 + $0x328] sm:$0xff] }
  0x84   : > { %6888 = vmatmul.mubr.msk.f32.gmra.mrb[50].mxu0 %vm419_vm0, %v354_v57  ;;  %v405_v57 = vld [vmem:[%s7998_s13 + $0x330] sm:$0xff] }
  0x85   : > { %6890 = vmatprep.mubr.msk.f32.mxu0 %vm419_vm0, %v355_v58  ;;  %v406_v58 = vld [vmem:[%s7998_s13 + $0x338] sm:$0xff] }
  0x88   : > { %6891 = vmatmul.mubr.msk.f32.gmra.mrb[52].mxu0 %vm419_vm0, %v356_v59  ;;  %v407_v59 = vld [vmem:[%s7998_s13 + $0x340] sm:$0xff] }
  0x89   : > { %6893 = vmatprep.mubr.msk.f32.mxu0 %vm419_vm0, %v357_v60  ;;  %v408_v60 = vld [vmem:[%s7998_s13 + $0x348] sm:$0xff] }
  0x8c   : > { %6894 = vmatmul.mubr.msk.f32.gmra.mrb[54].mxu0 %vm419_vm0, %v358_v61  ;;  %v409_v61 = vld [vmem:[%s7998_s13 + $0x350] sm:$0xff] }
  0x8d   : > { %6896 = vmatprep.mubr.msk.f32.mxu0 %vm419_vm0, %v359_v63  ;;  %v410_v63 = vld [vmem:[%s7998_s13 + $0x358] sm:$0xff] }
  0x90   : > { %6897 = vmatmul.mubr.msk.f32.gmra.mrb[56].mxu0 %vm419_vm0, %v360_v0  ;;  %v411_v0 = vld [vmem:[%s7998_s13 + $0x360] sm:$0xff] }
  0x91   : > { %6899 = vmatprep.mubr.msk.f32.mxu0 %vm419_vm0, %v361_v1 }
  0x94   : > { %6900 = vmatmul.mubr.msk.f32.gmra.mrb[58].mxu0 %vm419_vm0, %v362_v4  ;;  %v413_v4 = vld [vmem:[%s7998_s13 + $0x370] sm:$0xff]  ;;  %s296_s13 = sand.u32 1, %s7867_s28  }
  0x95   : > { %6902 = vmatprep.mubr.msk.f32.mxu0 %vm419_vm0, %v363_v5  ;;  %s297_s26 = scalar_lea.vmem [#allocation4], %s296_s13  ;;  %s6370_s10 = scalar_lea.sflag [#allocation5], %s296_s13 }
  0x98   : > { %6903 = vmatmul.mubr.msk.f32.gmra.mrb[60].mxu0 %vm419_vm0, %v364_v8 }
  0x99   : > { %6905 = vmatprep.mubr.msk.f32.mxu0 %vm419_vm0, %v365_v9 }
  0x9c   : > { %6906 = vmatmul.mubr.msk.f32.gmra.mrb[62].mxu0 %vm419_vm0, %v366_v12 }
  0x9d   : > { %6908 = vmatprep.mubr.msk.f32.mxu0 %vm419_vm0, %v367_v13 }
  0xa0   : > { %6909 = vmatmul.mubr.msk.f32.gmra.mrb[64].mxu0 %vm419_vm0, %v368_v16 }
  0xa1   : > { %6911 = vmatprep.mubr.msk.f32.mxu0 %vm419_vm0, %v369_v17 }
  0xa3   : > { %v8370_v13 = vpop.permute.xlu0 %1838 }
  0xa4   : > { %6912 = vmatmul.mubr.msk.f32.gmra.mrb[66].mxu0 %vm419_vm0, %v370_v20  ;;  %13432 = vst [vmem:[#allocation7_spill] sm:$0xff] %v8370_v13  ;;  %v1641_v20 = vld [vmem:[#allocation2 + $0xc8] sm:$0xff] }
  0xa5   : > { %6914 = vmatprep.mubr.msk.f32.mxu0 %vm419_vm0, %v371_v21 }
  0xa7   : > { %v8376_v17 = vpop.permute.xlu0 %1954 }
  0xa8   : > { %6915 = vmatmul.mubr.msk.f32.gmra.mrb[68].mxu0 %vm419_vm0, %v372_v24  ;;  %13433 = vst [vmem:[#allocation8_spill] sm:$0xff] %v8376_v17 }
  0xa9   : > { %6917 = vmatprep.mubr.msk.f32.mxu0 %vm419_vm0, %v373_v25 }
  0xac   : > { %6918 = vmatmul.mubr.msk.f32.gmra.mrb[70].mxu0 %vm419_vm0, %v374_v26 }
  0xad   : > { %6920 = vmatprep.mubr.msk.f32.mxu0 %vm419_vm0, %v375_v27 }
  0xb0   : > { %6921 = vmatmul.mubr.msk.f32.gmra.mrb[72].mxu0 %vm419_vm0, %v376_v28 }
  0xb1   : > { %6923 = vmatprep.mubr.msk.f32.mxu0 %vm419_vm0, %v377_v29 }
  0xb4   : > { %6924 = vmatmul.mubr.msk.f32.gmra.mrb[74].mxu0 %vm419_vm0, %v378_v30 }
  0xb5   : > { %6926 = vmatprep.mubr.msk.f32.mxu0 %vm419_vm0, %v379_v31  ;;  %v1841_v15 = vpop.permute.xlu1 %1840  ;;  %v1642_v31 = vld [vmem:[#allocation2 + $0xd0] sm:$0xff] }
  0xb6   : > { %v8382_v22 = vpop.permute.xlu0 %2070  ;;  %v2250_v24 = vsel %vm1528_vm1, %v1641_v20, %v1841_v15 }
  0xb7   : > { %13434 = vst [vmem:[#allocation9_spill] sm:$0xff] %v8382_v22 }
  0xb8   : > { %6927 = vmatmul.mubr.msk.f32.gmra.mrb[76].mxu0 %vm419_vm0, %v380_v32 }
  0xb9   : > { %6929 = vmatprep.mubr.msk.f32.mxu0 %vm419_vm0, %v381_v33  ;;  %v1957_v19 = vpop.permute.xlu1 %1956 }
  0xba   : > { %v2279_v27 = vsel %vm419_vm0, %v2250_v24, %v1957_v19  ;;  %v8390_v28 = vpop.permute.xlu0 %2186 }
  0xbb   : > { %13435 = vst [vmem:[#allocation10_spill] sm:$0xff] %v8390_v28 }
  0xbc   : > { %6930 = vmatmul.mubr.msk.f32.gmra.mrb[78].mxu0 %vm419_vm0, %v382_v34 }
  0xbd   : > { %6932 = vmatprep.mubr.msk.f32.mxu0 %vm419_vm0, %v383_v35  ;;  %v2073_v25 = vpop.permute.xlu1 %2072 }
  0xbe   : > { %v2309_v32 = vsel %vm2283_vm2, %v2279_v27, %v2073_v25  ;;  %v1843_v34 = vpop.permute.xlu0 %1842 }
  0xc0   : > { %6933 = vmatmul.mubr.msk.f32.gmra.mrb[80].mxu0 %vm419_vm0, %v384_v36  ;;  %v2251_v36 = vsel %vm1528_vm1, %v1642_v31, %v1843_v34 }
  0xc1   : > { %6935 = vmatprep.mubr.msk.f32.mxu0 %vm419_vm0, %v385_v37  ;;  %v2189_v30 = vpop.permute.xlu1 %2188 }
  0xc4   : > { %6936 = vmatmul.mubr.msk.f32.gmra.mrb[82].mxu0 %vm419_vm0, %v386_v38  ;;  %v8401_v38 = vsel %vm2313_vm3, %v2309_v32, %v2189_v30 }
  0xc5   : > { %6938 = vmatprep.mubr.msk.f32.mxu0 %vm419_vm0, %v387_v39  ;;  %v1959_v37 = vpop.permute.xlu1 %1958  ;;  %13436 = vst [vmem:[#allocation11_spill] sm:$0xff] %v8401_v38 }
  0xc6   : > { %v2280_v39 = vsel %vm419_vm0, %v2251_v36, %v1959_v37 }
  0xc8   : > { %6939 = vmatmul.mubr.msk.f32.gmra.mrb[84].mxu0 %vm419_vm0, %v388_v40 }
  0xc9   : > { %6941 = vmatprep.mubr.msk.f32.mxu0 %vm419_vm0, %v389_v41  ;;  %v2075_v41 = vpop.permute.xlu0 %2074 }
  0xcc   : > { %6942 = vmatmul.mubr.msk.f32.gmra.mrb[86].mxu0 %vm419_vm0, %v390_v42 }
  0xcd   : > { %6944 = vmatprep.mubr.msk.f32.mxu0 %vm419_vm0, %v391_v43  ;;  %v13162_v43 = vrot.slane %v8401_v38, 4 }
  0xd0   : > { %6945 = vmatmul.mubr.msk.f32.gmra.mrb[88].mxu0 %vm419_vm0, %v392_v44  ;;  %v2310_v44 = vsel %vm2283_vm2, %v2280_v39, %v2075_v41 }
  0xd1   : > { %6947 = vmatprep.mubr.msk.f32.mxu0 %vm419_vm0, %v393_v45  ;;  %v2191_v45 = vpop.permute.xlu1 %2190 }
  0xd4   : > { %6948 = vmatmul.mubr.msk.f32.gmra.mrb[90].mxu0 %vm419_vm0, %v394_v46  ;;  %v1704_v46 = vld [vmem:[#allocation3 + $0x9] sm:$0xff] }
  0xd5   : > { %6950 = vmatprep.mubr.msk.f32.mxu0 %vm419_vm0, %v395_v47  ;;  %v8411_v47 = vsel %vm2313_vm3, %v2310_v44, %v2191_v45 }
  0xd6   : > { %13437 = vst [vmem:[#allocation12_spill] sm:$0xff] %v8411_v47 }
  0xd8   : > { %6951 = vmatmul.mubr.msk.f32.gmra.mrb[92].mxu0 %vm419_vm0, %v396_v48  ;;  %v7316_v48 = vpack.i.bf16 %v1704_v46, %v8401_v38 }
  0xd9   : > { %6953 = vmatprep.mubr.msk.f32.mxu0 %vm419_vm0, %v397_v49  ;;  %v3705_v49 = vrot.slane %v8411_v47, 4 }
  0xda   : > { %7317 = vrot.lane.b32.xlu0 %v7316_v48, %s7879_s18 }
  0xdc   : > { %6954 = vmatmul.mubr.msk.f32.gmra.mrb[94].mxu0 %vm419_vm0, %v398_v50 }
  0xdd   : > { %6956 = vmatprep.mubr.msk.f32.mxu0 %vm419_vm0, %v399_v51 }
  0xe0   : > { %6957 = vmatmul.mubr.msk.f32.gmra.mrb[96].mxu0 %vm419_vm0, %v400_v52  ;;  %v3706_v52 = vsel %vm2887_vm4, %v13162_v43, %v3705_v49 }
  0xe1   : > { %6959 = vmatprep.mubr.msk.f32.mxu0 %vm419_vm0, %v401_v53  ;;  %v7321_v53 = vpack.i.bf16 %v3705_v49, %v3706_v52 }
  0xe3   : > { %7322 = vrot.lane.b32.xlu0 %v7321_v53, %s7882_s21 }
  0xe4   : > { %6960 = vmatmul.mubr.msk.f32.gmra.mrb[98].mxu0 %vm419_vm0, %v402_v54 }
  0xe5   : > { %6962 = vmatprep.mubr.msk.f32.mxu0 %vm419_vm0, %v403_v55 }
  0xe8   : > { %6963 = vmatmul.mubr.msk.f32.gmra.mrb[100].mxu0 %vm419_vm0, %v404_v56 }
  0xe9   : > { %6965 = vmatprep.mubr.msk.f32.mxu0 %vm419_vm0, %v405_v57 }
  0xec   : > { %6966 = vmatmul.mubr.msk.f32.gmra.mrb[102].mxu0 %vm419_vm0, %v406_v58 }
  0xed   : > { %6968 = vmatprep.mubr.msk.f32.mxu0 %vm419_vm0, %v407_v59 }
  0xf0   : > { %6969 = vmatmul.mubr.msk.f32.gmra.mrb[104].mxu0 %vm419_vm0, %v408_v60 }
  0xf1   : > { %6971 = vmatprep.mubr.msk.f32.mxu0 %vm419_vm0, %v409_v61 }
  0xf3   : > { %v8344_v1 = vpop.f32.mrb[0].mxu0 }
  0xf4   : > { %v8346_v2 = vpop.f32.mrb[1].mxu0  ;;  %6972 = vmatmul.mubr.msk.f32.gmra.mrb[106].mxu0 %vm419_vm0, %v410_v63 }
  0xf5   : > { %6974 = vmatprep.mubr.msk.f32.mxu0 %vm419_vm0, %v411_v0 }
  0xf7   : > { %v8352_v5 = vpop.f32.mrb[2].mxu0 }
  0xf8   : > { %v8354_v6 = vpop.f32.mrb[3].mxu0  ;;  %6975 = vmatmul.mubr.msk.f32.gmra.mrb[108].mxu0 %vm419_vm0, %v412_v3 }
  0xf9   : > { %6977 = vmatprep.mubr.msk.f32.mxu0 %vm419_vm0, %v413_v4 }
  0xfb   : > { %v8359_v8 = vpop.f32.mrb[4].mxu0 }
  0xfc   : > { %v8361_v9 = vpop.f32.mrb[5].mxu0  ;;  %6978 = vmatmul.mubr.msk.f32.gmra.mrb[110].mxu0 %vm419_vm0, %v414_v7 }
  0xff   : > { %v8364_v10 = vpop.f32.mrb[6].mxu0 }
 0x100   : > { %v8366_v11 = vpop.f32.mrb[7].mxu0 }
 0x103   : > { %v8368_v12 = vpop.f32.mrb[8].mxu0 }
 0x104   : > { %v8372_v14 = vpop.f32.mrb[9].mxu0 }
 0x107   : > { %v8374_v16 = vpop.f32.mrb[10].mxu0 }
 0x108   : > { %v8378_v18 = vpop.f32.mrb[11].mxu0 }
 0x10b   : > { %v8380_v21 = vpop.f32.mrb[12].mxu0 }
 0x10c   : > { %v8384_v23 = vpop.f32.mrb[13].mxu0 }
 0x10f   : > { %v8387_v26 = vpop.f32.mrb[14].mxu0 }
 0x110   : > { %v8392_v29 = vpop.f32.mrb[15].mxu0 }
 0x113   : > { %v8395_v33 = vpop.f32.mrb[16].mxu0 }
 0x114   : > { %v8397_v35 = vpop.f32.mrb[17].mxu0 }
 0x117   : > { %v8404_v40 = vpop.f32.mrb[18].mxu0 }
 0x118   : > { %v8406_v42 = vpop.f32.mrb[19].mxu0 }
 0x11b   : > { %v8415_v50 = vpop.f32.mrb[20].mxu0 }
 0x11c   : > { %v8418_v51 = vpop.f32.mrb[21].mxu0 }
 0x11f   : > { %v8423_v54 = vpop.f32.mrb[22].mxu0 }
 0x120   : > { %v8426_v55 = vpop.f32.mrb[23].mxu0 }
 0x123   : > { %v8428_v56 = vpop.f32.mrb[24].mxu0 }
 0x124   : > { %v8430_v57 = vpop.f32.mrb[25].mxu0 }
 0x127   : > { %v8432_v58 = vpop.f32.mrb[26].mxu0 }
 0x128   : > { %v8434_v59 = vpop.f32.mrb[27].mxu0 }
 0x12b   : > { %v6856_v60 = vpop.f32.mrb[28].mxu0 }
 0x12c   : > { %v1383_v61 = vmax.f32 %v8344_v1, %v6856_v60  ;;  %v962_v63 = vpop.f32.mrb[29].mxu0 }
 0x12d   : > { %v1382_v0 = vmax.f32 %v8346_v2, %v962_v63 }
 0x12f   : > { %v6859_v3 = vpop.f32.mrb[30].mxu0 }
 0x130   : > { %v1385_v4 = vmax.f32 %v8352_v5, %v6859_v3  ;;  %v972_v7 = vpop.f32.mrb[31].mxu0 }
 0x131   : > { %v1384_v15 = vmax.f32 %v8354_v6, %v972_v7 }
 0x133   : > { %v6862_v19 = vpop.f32.mrb[32].mxu0 }
 0x134   : > { %v1387_v20 = vmax.f32 %v8359_v8, %v6862_v19  ;;  %v982_v24 = vpop.f32.mrb[33].mxu0 }
 0x135   : > { %v1386_v25 = vmax.f32 %v8361_v9, %v982_v24 }
 0x137   : > { %v6865_v27 = vpop.f32.mrb[34].mxu0 }
 0x138   : > { %v1389_v30 = vmax.f32 %v8364_v10, %v6865_v27  ;;  %v992_v31 = vpop.f32.mrb[35].mxu0 }
 0x139   : > { %v1388_v1 = vmax.f32 %v8366_v11, %v992_v31 }
 0x13b   : > { %v6868_v32 = vpop.f32.mrb[36].mxu0 }
 0x13c   : > { %v1391_v2 = vmax.f32 %v8368_v12, %v6868_v32  ;;  %v1002_v34 = vpop.f32.mrb[37].mxu0 }
 0x13d   : > { %v1390_v5 = vmax.f32 %v8372_v14, %v1002_v34 }
 0x13f   : > { %v6871_v36 = vpop.f32.mrb[38].mxu0 }
 0x140   : > { %v1393_v6 = vmax.f32 %v8374_v16, %v6871_v36  ;;  %v1012_v37 = vpop.f32.mrb[39].mxu0 }
 0x141   : > { %v1392_v8 = vmax.f32 %v8378_v18, %v1012_v37 }
 0x143   : > { %v6874_v39 = vpop.f32.mrb[40].mxu0 }
 0x144   : > { %v1395_v9 = vmax.f32 %v8380_v21, %v6874_v39  ;;  %v1022_v41 = vpop.f32.mrb[41].mxu0 }
 0x145   : > { %v1394_v10 = vmax.f32 %v8384_v23, %v1022_v41 }
 0x147   : > { %v6877_v44 = vpop.f32.mrb[42].mxu0 }
 0x148   : > { %v1459_v11 = vmax.f32 %v8387_v26, %v6877_v44  ;;  %v1032_v45 = vpop.f32.mrb[43].mxu0 }
 0x149   : > { %v1458_v12 = vmax.f32 %v8392_v29, %v1032_v45 }
 0x14b   : > { %v6880_v46 = vpop.f32.mrb[44].mxu0 }
 0x14c   : > { %v1461_v14 = vmax.f32 %v8395_v33, %v6880_v46  ;;  %v1042_v48 = vpop.f32.mrb[45].mxu0 }
 0x14d   : > { %v1460_v16 = vmax.f32 %v8397_v35, %v1042_v48 }
 0x14f   : > { %v6883_v49 = vpop.f32.mrb[46].mxu0 }
 0x150   : > { %v1463_v18 = vmax.f32 %v8404_v40, %v6883_v49  ;;  %v1052_v52 = vpop.f32.mrb[47].mxu0 }
 0x151   : > { %v1462_v21 = vmax.f32 %v8406_v42, %v1052_v52 }
 0x153   : > { %v6886_v53 = vpop.f32.mrb[48].mxu0 }
 0x154   : > { %v1465_v23 = vmax.f32 %v8415_v50, %v6886_v53  ;;  %v1062_v60 = vpop.f32.mrb[49].mxu0 }
 0x155   : > { %v1464_v26 = vmax.f32 %v8418_v51, %v1062_v60 }
 0x157   : > { %v6889_v63 = vpop.f32.mrb[50].mxu0 }
 0x158   : > { %v1467_v29 = vmax.f32 %v8423_v54, %v6889_v63  ;;  %v1072_v3 = vpop.f32.mrb[51].mxu0 }
 0x159   : > { %v1466_v33 = vmax.f32 %v8426_v55, %v1072_v3 }
 0x15b   : > { %v6892_v7 = vpop.f32.mrb[52].mxu0 }
 0x15c   : > { %v1469_v35 = vmax.f32 %v8428_v56, %v6892_v7  ;;  %v1082_v19 = vpop.f32.mrb[53].mxu0 }
 0x15d   : > { %v1468_v40 = vmax.f32 %v8430_v57, %v1082_v19 }
 0x15f   : > { %v6895_v24 = vpop.f32.mrb[54].mxu0 }
 0x160   : > { %v1471_v42 = vmax.f32 %v8432_v58, %v6895_v24  ;;  %v1092_v27 = vpop.f32.mrb[55].mxu0 }
 0x161   : > { %v1470_v50 = vmax.f32 %v8434_v59, %v1092_v27 }
 0x163   : > { %v6898_v31 = vpop.f32.mrb[56].mxu0 }
 0x164   : > { %v1397_v51 = vmax.f32 %v1383_v61, %v6898_v31  ;;  %v1102_v32 = vpop.f32.mrb[57].mxu0 }
 0x165   : > { %v1396_v34 = vmax.f32 %v1382_v0, %v1102_v32 }
 0x167   : > { %v6901_v54 = vpop.f32.mrb[58].mxu0 }
 0x168   : > { %v8464_v36 = vmax.f32 %v1385_v4, %v6901_v54  ;;  %v1112_v55 = vpop.f32.mrb[59].mxu0 }
 0x169   : > { %v8466_v37 = vmax.f32 %v1384_v15, %v1112_v55 }
 0x16b   : > { %v6904_v56 = vpop.f32.mrb[60].mxu0 }
 0x16c   : > { %v8468_v39 = vmax.f32 %v1387_v20, %v6904_v56  ;;  %v1122_v57 = vpop.f32.mrb[61].mxu0 }
 0x16d   : > { %v8470_v41 = vmax.f32 %v1386_v25, %v1122_v57 }
 0x16f   : > { %v6907_v58 = vpop.f32.mrb[62].mxu0 }
 0x170   : > { %v8472_v44 = vmax.f32 %v1389_v30, %v6907_v58  ;;  %v1132_v59 = vpop.f32.mrb[63].mxu0 }
 0x171   : > { %v8474_v45 = vmax.f32 %v1388_v1, %v1132_v59 }
 0x173   : > { %v6910_v61 = vpop.f32.mrb[64].mxu0 }
 0x174   : > { %v8476_v0 = vmax.f32 %v1391_v2, %v6910_v61  ;;  %v1142_v4 = vpop.f32.mrb[65].mxu0 }
 0x175   : > { %v8478_v46 = vmax.f32 %v1390_v5, %v1142_v4 }
 0x177   : > { %v6913_v15 = vpop.f32.mrb[66].mxu0 }
 0x178   : > { %v8480_v48 = vmax.f32 %v1393_v6, %v6913_v15  ;;  %v1152_v20 = vpop.f32.mrb[67].mxu0 }
 0x179   : > { %v8482_v49 = vmax.f32 %v1392_v8, %v1152_v20 }
 0x17b   : > { %v6916_v25 = vpop.f32.mrb[68].mxu0 }
 0x17c   : > { %v8484_v52 = vmax.f32 %v1395_v9, %v6916_v25  ;;  %v1162_v30 = vpop.f32.mrb[69].mxu0 }
 0x17d   : > { %v8486_v53 = vmax.f32 %v1394_v10, %v1162_v30 }
 0x17f   : > { %v6919_v1 = vpop.f32.mrb[70].mxu0 }
 0x180   : > { %v8488_v60 = vmax.f32 %v1459_v11, %v6919_v1  ;;  %v1172_v2 = vpop.f32.mrb[71].mxu0 }
 0x181   : > { %v8490_v63 = vmax.f32 %v1458_v12, %v1172_v2 }
 0x183   : > { %v6922_v5 = vpop.f32.mrb[72].mxu0 }
 0x184   : > { %v8492_v3 = vmax.f32 %v1461_v14, %v6922_v5  ;;  %v1182_v6 = vpop.f32.mrb[73].mxu0 }
 0x185   : > { %v8494_v7 = vmax.f32 %v1460_v16, %v1182_v6 }
 0x187   : > { %v6925_v8 = vpop.f32.mrb[74].mxu0 }
 0x188   : > { %v8496_v19 = vmax.f32 %v1463_v18, %v6925_v8  ;;  %v1192_v9 = vpop.f32.mrb[75].mxu0 }
 0x189   : > { %v8498_v24 = vmax.f32 %v1462_v21, %v1192_v9 }
 0x18b   : > { %v6928_v10 = vpop.f32.mrb[76].mxu0 }
 0x18c   : > { %v8500_v27 = vmax.f32 %v1465_v23, %v6928_v10  ;;  %v1202_v11 = vpop.f32.mrb[77].mxu0  ;;  %v1675_v10 = vld [vmem:[#allocation2 + $0x9] sm:$0xff] }
 0x18d   : > { %v8502_v31 = vmax.f32 %v1464_v26, %v1202_v11 }
 0x18f   : > { %v6931_v12 = vpop.f32.mrb[78].mxu0 }
 0x190   : > { %v8504_v32 = vmax.f32 %v1467_v29, %v6931_v12  ;;  %v1212_v14 = vpop.f32.mrb[79].mxu0  ;;  %v8519_v29 = vld [vmem:[%s13154_s2] ss:$0 sm:$0xff] }
 0x191   : > { %v8506_v54 = vmax.f32 %v1466_v33, %v1212_v14 }
 0x193   : > { %v6934_v16 = vpop.f32.mrb[80].mxu0 }
 0x194   : > { %v8508_v55 = vmax.f32 %v1469_v35, %v6934_v16  ;;  %v1222_v18 = vpop.f32.mrb[81].mxu0  ;;  %v8536_v16 = vld [vmem:[#allocation2 + $0xa] sm:$0xff] }
 0x195   : > { %v8510_v56 = vmax.f32 %v1468_v40, %v1222_v18  ;;  %13438 = vst [vmem:[#allocation13_spill] sm:$0xff] %v8536_v16 }
 0x197   : > { %v6937_v21 = vpop.f32.mrb[82].mxu0 }
 0x198   : > { %v8512_v57 = vmax.f32 %v1471_v42, %v6937_v21  ;;  %v1232_v23 = vpop.f32.mrb[83].mxu0 }
 0x199   : > { %v8514_v58 = vmax.f32 %v1470_v50, %v1232_v23  ;;  %v8539_v23 = vld [vmem:[#allocation2 + $0x11] sm:$0xff] }
 0x19a   : > { %13439 = vst [vmem:[#allocation14_spill] sm:$0xff] %v8539_v23 }
 0x19b   : > { %v6940_v26 = vpop.f32.mrb[84].mxu0 }
 0x19c   : > { %v1411_v33 = vmax.f32 %v1397_v51, %v6940_v26  ;;  %v1242_v59 = vpop.f32.mrb[85].mxu0 }
 0x19d   : > { %v1410_v61 = vmax.f32 %v1396_v34, %v1242_v59 }
 0x19e   : > { %v1431_v35 = vadd.f32 %v8519_v29, %v1411_v33 }
 0x19f   : > { %v1430_v40 = vadd.f32 %v8519_v29, %v1410_v61  ;;  %v6943_v4 = vpop.f32.mrb[86].mxu0 }
 0x1a0   : > { %v1445_v42 = vmax.f32 %v1431_v35, 0.0  ;;  %v1413_v15 = vmax.f32 %v8464_v36, %v6943_v4  ;;  %v1252_v50 = vpop.f32.mrb[87].mxu0 }
 0x1a1   : > { %v1444_v20 = vmax.f32 %v1430_v40, 0.0  ;;  %v1412_v25 = vmax.f32 %v8466_v37, %v1252_v50 }
 0x1a2   : > { %1590 = vst.msk [vmem:[#allocation2 + $0x25] sm:$0x7f] %vm1587_vm5, %v1445_v42  ;;  %v1433_v30 = vadd.f32 %v8519_v29, %v1413_v15 }
 0x1a3   : > { %1588 = vst.msk [vmem:[#allocation2 + $0x19] sm:$0x7f] %vm1587_vm5, %v1444_v20  ;;  %v1432_v51 = vadd.f32 %v8519_v29, %v1412_v25  ;;  %v6946_v34 = vpop.f32.mrb[88].mxu0 }
 0x1a4   : > { %v1447_v1 = vmax.f32 %v1433_v30, 0.0  ;;  %v1415_v2 = vmax.f32 %v8468_v39, %v6946_v34  ;;  %v1262_v5 = vpop.f32.mrb[89].mxu0 }
 0x1a5   : > { %v1446_v6 = vmax.f32 %v1432_v51, 0.0  ;;  %v1414_v36 = vmax.f32 %v8470_v41, %v1262_v5 }
 0x1a6   : > { %1594 = vst.msk [vmem:[#allocation2 + $0x3d] sm:$0x7f] %vm1587_vm5, %v1447_v1  ;;  %v1435_v37 = vadd.f32 %v8519_v29, %v1415_v2 }
 0x1a7   : > { %1592 = vst.msk [vmem:[#allocation2 + $0x31] sm:$0x7f] %vm1587_vm5, %v1446_v6  ;;  %v1434_v8 = vadd.f32 %v8519_v29, %v1414_v36  ;;  %v6949_v9 = vpop.f32.mrb[90].mxu0 }
 0x1a8   : > { %v1449_v11 = vmax.f32 %v1435_v37, 0.0  ;;  %v1417_v12 = vmax.f32 %v8472_v44, %v6949_v9  ;;  %v1272_v14 = vpop.f32.mrb[91].mxu0 }
 0x1a9   : > { %v1448_v39 = vmax.f32 %v1434_v8, 0.0  ;;  %v1416_v18 = vmax.f32 %v8474_v45, %v1272_v14  ;;  %v1679_v41 = vld [vmem:[#allocation2 + $0x29] sm:$0xff]  ;;  %v1678_v21 = vld [vmem:[#allocation2 + $0x21] sm:$0xff] }
 0x1aa   : > { %1598 = vst.msk [vmem:[#allocation2 + $0x55] sm:$0x7f] %vm1587_vm5, %v1449_v11  ;;  %v1437_v26 = vadd.f32 %v8519_v29, %v1417_v12  ;;  %v7326_v33 = vpack.i.bf16 %v1675_v10, %v1679_v41  ;;  %v8543_v59 = vld [vmem:[#allocation2 + $0x19] sm:$0xff]  ;;  %v8554_v20 = vld [vmem:[#allocation2 + $0x22] sm:$0xff] }
 0x1ab   : > { %13440 = vst [vmem:[#allocation15_spill] sm:$0xff] %v8543_v59  ;;  %v8545_v61 = vld [vmem:[#allocation2 + $0x12] sm:$0xff]  ;;  %1596 = vst.msk [vmem:[#allocation2 + $0x49] sm:$0x7f] %vm1587_vm5, %v1448_v39  ;;  %v1436_v44 = vadd.f32 %v8519_v29, %v1416_v18  ;;  %v6952_v35 = vpop.f32.mrb[92].mxu0  ;;  %v7331_v45 = vpack.i.bf16 %v1678_v21, %v8543_v59  ;;  %v1735_v50 = vld [vmem:[#allocation2 + $0x1a] sm:$0xff] }
 0x1ac   : > { %13441 = vst [vmem:[#allocation16_spill] sm:$0xff] %v8545_v61  ;;  %v1451_v4 = vmax.f32 %v1437_v26, 0.0  ;;  %v1419_v42 = vmax.f32 %v8476_v0, %v6952_v35  ;;  %7327 = vrot.lane.b32.xlu1 %v7326_v33, %s7878_s17  ;;  %v1282_v15 = vpop.f32.mrb[93].mxu0  ;;  %v7336_v5 = vpack.i.bf16 %v8554_v20, %v1735_v50 }
 0x1ad   : > { %v1450_v30 = vmax.f32 %v1436_v44, 0.0  ;;  %v1418_v51 = vmax.f32 %v8478_v46, %v1282_v15  ;;  %7332 = vrot.lane.b32.xlu0 %v7331_v45, %s7878_s17  ;;  %v1739_v2 = vld [vmem:[#allocation2 + $0x3a] sm:$0xff] }
 0x1ae   : > { %1602 = vst.msk [vmem:[#allocation2 + $0x6d] sm:$0x7f] %vm1587_vm5, %v1451_v4  ;;  %v1439_v34 = vadd.f32 %v8519_v29, %v1419_v42  ;;  %v1680_v12 = vld [vmem:[#allocation2 + $0x31] sm:$0xff] }
 0x1af   : > { %1600 = vst.msk [vmem:[#allocation2 + $0x61] sm:$0x7f] %vm1587_vm5, %v1450_v30  ;;  %v1438_v0 = vadd.f32 %v8519_v29, %v1418_v51  ;;  %v6955_v1 = vpop.f32.mrb[94].mxu0  ;;  %v1737_v14 = vld [vmem:[#allocation2 + $0x2a] sm:$0xff] }
 0x1b0   : > { %v1453_v6 = vmax.f32 %v1439_v34, 0.0  ;;  %v1421_v36 = vmax.f32 %v8480_v48, %v6955_v1  ;;  %2560 = vrot.lane.b32.xlu1 %v1739_v2, %s7880_s19  ;;  %v1292_v46 = vpop.f32.mrb[95].mxu0  ;;  %v7341_v33 = vpack.i.bf16 %v8536_v16, %v1737_v14  ;;  %v1738_v1 = vld [vmem:[#allocation2 + $0x32] sm:$0xff] }
 0x1b1   : > { %v1452_v37 = vmax.f32 %v1438_v0, 0.0  ;;  %v1420_v8 = vmax.f32 %v8482_v49, %v1292_v46  ;;  %7337 = vrot.lane.b32.xlu0 %v7336_v5, %s7880_s19  ;;  %v1681_v49 = vld [vmem:[#allocation2 + $0x39] sm:$0xff] }
 0x1b2   : > { %1606 = vst.msk [vmem:[#allocation2 + $0x85] sm:$0x7f] %vm1587_vm5, %v1453_v6  ;;  %v1441_v9 = vadd.f32 %v8519_v29, %v1421_v36 }
 0x1b3   : > { %1604 = vst.msk [vmem:[#allocation2 + $0x79] sm:$0x7f] %vm1587_vm5, %v1452_v37  ;;  %v1440_v10 = vadd.f32 %v8519_v29, %v1420_v8  ;;  %v6958_v11 = vpop.f32.mrb[96].mxu0  ;;  %v1684_v8 = vld [vmem:[#allocation2 + $0x51] sm:$0xff] }
 0x1b4   : > { %v1455_v48 = vmax.f32 %v1441_v9, 0.0  ;;  %v1423_v39 = vmax.f32 %v8484_v52, %v6958_v11  ;;  %2384 = vrot.lane.b32.xlu1 %v1680_v12, %s7878_s17  ;;  %v1302_v18 = vpop.f32.mrb[97].mxu0 }
 0x1b5   : > { %v1454_v41 = vmax.f32 %v1440_v10, 0.0  ;;  %v1422_v21 = vmax.f32 %v8486_v53, %v1302_v18  ;;  %2386 = vrot.lane.b32.xlu0 %v1681_v49, %s7878_s17  ;;  %v1682_v53 = vld [vmem:[#allocation2 + $0x41] sm:$0xff]  ;;  %v1742_v18 = vld [vmem:[#allocation2 + $0x52] sm:$0xff] }
 0x1b6   : > { %1610 = vst.msk [vmem:[#allocation2 + $0x9d] sm:$0x7f] %vm1587_vm5, %v1455_v48  ;;  %v1443_v26 = vadd.f32 %v8519_v29, %v1423_v39 }
 0x1b7   : > { %1608 = vst.msk [vmem:[#allocation2 + $0x91] sm:$0x7f] %vm1587_vm5, %v1454_v41  ;;  %v1442_v44 = vadd.f32 %v8519_v29, %v1422_v21  ;;  %v6961_v52 = vpop.f32.mrb[98].mxu0 }
 0x1b8   : > { %v1457_v35 = vmax.f32 %v1443_v26, 0.0  ;;  %v1487_v45 = vmax.f32 %v8488_v60, %v6961_v52  ;;  %7342 = vrot.lane.b32.xlu1 %v7341_v33, %s7880_s19  ;;  %v1312_v4 = vpop.f32.mrb[99].mxu0 }
 0x1b9   : > { %v1456_v42 = vmax.f32 %v1442_v44, 0.0  ;;  %v1486_v15 = vmax.f32 %v8490_v63, %v1312_v4  ;;  %2388 = vrot.lane.b32.xlu0 %v1682_v53, %s7878_s17 }
 0x1ba   : > { %1614 = vst.msk [vmem:[#allocation2 + $0xb5] sm:$0x7f] %vm1587_vm5, %v1457_v35  ;;  %v1501_v50 = vadd.f32 %v8519_v29, %v1487_v45  ;;  %v1685_v35 = vld [vmem:[#allocation2 + $0x59] sm:$0xff] }
 0x1bb   : > { %1612 = vst.msk [vmem:[#allocation2 + $0xa9] sm:$0x7f] %vm1587_vm5, %v1456_v42  ;;  %v1500_v30 = vadd.f32 %v8519_v29, %v1486_v15  ;;  %v6964_v51 = vpop.f32.mrb[100].mxu0 }
 0x1bc   : > { %v1515_v34 = vmax.f32 %v1501_v50, 0.0  ;;  %v1489_v60 = vmax.f32 %v8492_v3, %v6964_v51  ;;  %v1322_v0 = vpop.f32.mrb[101].mxu0  ;;  %v1740_v51 = vld [vmem:[#allocation2 + $0x42] sm:$0xff] }
 0x1bd   : > { %v1514_v2 = vmax.f32 %v1500_v30, 0.0  ;;  %v1488_v5 = vmax.f32 %v8494_v7, %v1322_v0  ;;  %2558 = vrot.lane.b32.xlu0 %v1738_v1, %s7880_s19  ;;  %v8593_v63 = vld [vmem:[#allocation2 + $0x9a] sm:$0xff] }
 0x1be   : > { %1591 = vst.msk [vmem:[#allocation3 + $0x25] sm:$0x7f] %vm1587_vm5, %v1515_v34  ;;  %v1503_v6 = vadd.f32 %v8519_v29, %v1489_v60  ;;  %2584 = vrot.lane.b32.xlu1 %v8593_v63, %s7880_s19  ;;  %v8604_v11 = vld [vmem:[#allocation2 + $0xa1] sm:$0xff] }
 0x1bf   : > { %1589 = vst.msk [vmem:[#allocation3 + $0x19] sm:$0x7f] %vm1587_vm5, %v1514_v2  ;;  %v1502_v3 = vadd.f32 %v8519_v29, %v1488_v5  ;;  %v6967_v36 = vpop.f32.mrb[102].mxu0 }
 0x1c0   : > { %v1517_v46 = vmax.f32 %v1503_v6, 0.0  ;;  %v1491_v37 = vmax.f32 %v8496_v19, %v6967_v36  ;;  %v1332_v7 = vpop.f32.mrb[103].mxu0 }
 0x1c1   : > { %v1516_v9 = vmax.f32 %v1502_v3, 0.0  ;;  %v1490_v10 = vmax.f32 %v8498_v24, %v1332_v7  ;;  %2392 = vrot.lane.b32.xlu0 %v1684_v8, %s7878_s17  ;;  %v8615_v21 = vld [vmem:[#allocation2 + $0xb9] sm:$0xff]  ;;  %v8637_v0 = vld [vmem:[#allocation2 + $0xb1] sm:$0xff]  ;;  %v1683_v3 = vld [vmem:[#allocation2 + $0x49] sm:$0xff] }
 0x1c2   : > { %1595 = vst.msk [vmem:[#allocation3 + $0x3d] sm:$0x7f] %vm1587_vm5, %v1517_v46  ;;  %v1505_v12 = vadd.f32 %v8519_v29, %v1491_v37  ;;  %2412 = vrot.lane.b32.xlu1 %v8604_v11, %s7878_s17  ;;  %v8626_v53 = vld [vmem:[#allocation2 + $0xba] sm:$0xff]  ;;  %v8648_v37 = vld [vmem:[#allocation2 + $0xb2] sm:$0xff] }
 0x1c3   : > { %1593 = vst.msk [vmem:[#allocation3 + $0x31] sm:$0x7f] %vm1587_vm5, %v1516_v9  ;;  %v1504_v19 = vadd.f32 %v8519_v29, %v1490_v10  ;;  %v6970_v14 = vpop.f32.mrb[104].mxu0  ;;  %v1741_v9 = vld [vmem:[#allocation2 + $0x4a] sm:$0xff] }
 0x1c4   : > { %v1519_v48 = vmax.f32 %v1505_v12, 0.0  ;;  %v1493_v39 = vmax.f32 %v8500_v27, %v6970_v14  ;;  %v1342_v24 = vpop.f32.mrb[105].mxu0  ;;  %v1687_v12 = vld [vmem:[#allocation2 + $0x69] sm:$0xff] }
 0x1c5   : > { %v1518_v49 = vmax.f32 %v1504_v19, 0.0  ;;  %v1492_v41 = vmax.f32 %v8502_v31, %v1342_v24  ;;  %2566 = vrot.lane.b32.xlu0 %v1742_v18, %s7880_s19  ;;  %v1753_v19 = vld [vmem:[#allocation2 + $0xaa] sm:$0xff]  ;;  %v1686_v18 = vld [vmem:[#allocation2 + $0x61] sm:$0xff] }
 0x1c6   : > { %1599 = vst.msk [vmem:[#allocation3 + $0x55] sm:$0x7f] %vm1587_vm5, %v1519_v48  ;;  %v1507_v26 = vadd.f32 %v8519_v29, %v1493_v39  ;;  %1952 = vrot.lane.b32.xlu1 %v8615_v21, %s7879_s18  ;;  %v1745_v14 = vld [vmem:[#allocation2 + $0x6a] sm:$0xff]  ;;  %v1743_v39 = vld [vmem:[#allocation2 + $0x5a] sm:$0xff] }
 0x1c7   : > { %1597 = vst.msk [vmem:[#allocation3 + $0x49] sm:$0x7f] %vm1587_vm5, %v1518_v49  ;;  %v1506_v27 = vadd.f32 %v8519_v29, %v1492_v41  ;;  %v6973_v33 = vpop.f32.mrb[106].mxu0  ;;  %v1688_v48 = vld [vmem:[#allocation2 + $0x71] sm:$0xff]  ;;  %v1707_v24 = vld [vmem:[#allocation3 + $0x21] sm:$0xff]  ;;  %v1706_v41 = vld [vmem:[#allocation3 + $0x19] sm:$0xff] }
 0x1c8   : > { %v1521_v44 = vmax.f32 %v1507_v26, 0.0  ;;  %v1495_v52 = vmax.f32 %v8504_v32, %v6973_v33  ;;  %v1352_v31 = vpop.f32.mrb[107].mxu0  ;;  %v7351_v49 = vpack.i.bf16 %v1707_v24, %v8545_v61  ;;  %v1744_v26 = vld [vmem:[#allocation2 + $0x62] sm:$0xff] }
 0x1c9   : > { %v1520_v45 = vmax.f32 %v1506_v27, 0.0  ;;  %v1494_v4 = vmax.f32 %v8506_v54, %v1352_v31  ;;  %2394 = vrot.lane.b32.xlu0 %v1685_v35, %s7878_s17  ;;  %v7356_v27 = vpack.i.bf16 %v1707_v24, %v1706_v41  ;;  %v1690_v33 = vld [vmem:[#allocation2 + $0x81] sm:$0xff]  ;;  %v2344_v35 = vld [vmem:[#allocation3 + $0xa] sm:$0xff] }
 0x1ca   : > { %1603 = vst.msk [vmem:[#allocation3 + $0x6d] sm:$0x7f] %vm1587_vm5, %v1521_v44  ;;  %v1509_v42 = vadd.f32 %v8519_v29, %v1495_v52  ;;  %2184 = vrot.lane.b32.xlu1 %v8626_v53, %s7881_s20  ;;  %v8677_v44 = vld [vmem:[#allocation3 + $0x39] sm:$0xff] }
 0x1cb   : > { %1601 = vst.msk [vmem:[#allocation3 + $0x61] sm:$0x7f] %vm1587_vm5, %v1520_v45  ;;  %v1508_v32 = vadd.f32 %v8519_v29, %v1494_v4  ;;  %v6976_v15 = vpop.f32.mrb[108].mxu0  ;;  %13442 = vst [vmem:[#allocation17_spill] sm:$0xff] %v8677_v44  ;;  %v1748_v52 = vld [vmem:[#allocation2 + $0x82] sm:$0xff]  ;;  %v2348_v45 = vld [vmem:[#allocation3 + $0x2a] sm:$0xff] }
 0x1cc   : > { %v1523_v50 = vmax.f32 %v1509_v42, 0.0  ;;  %v1497_v30 = vmax.f32 %v8508_v55, %v6976_v15  ;;  %v1362_v54 = vpop.f32.mrb[109].mxu0  ;;  %v2350_v31 = vld [vmem:[#allocation3 + $0x3a] sm:$0xff]  ;;  %v7366_v42 = vpack.i.bf16 %v2344_v35, %v2348_v45 }
 0x1cd   : > { %v1522_v34 = vmax.f32 %v1508_v32, 0.0  ;;  %v1496_v60 = vmax.f32 %v8510_v56, %v1362_v54  ;;  %2562 = vrot.lane.b32.xlu0 %v1740_v51, %s7880_s19  ;;  %v1691_v4 = vld [vmem:[#allocation2 + $0x89] sm:$0xff]  ;;  %v1746_v32 = vld [vmem:[#allocation2 + $0x72] sm:$0xff]  ;;  %v1747_v54 = vld [vmem:[#allocation2 + $0x7a] sm:$0xff] }
 0x1ce   : > { %1607 = vst.msk [vmem:[#allocation3 + $0x85] sm:$0x7f] %vm1587_vm5, %v1523_v50  ;;  %v1511_v1 = vadd.f32 %v8519_v29, %v1497_v30  ;;  %2416 = vrot.lane.b32.xlu1 %v8637_v0, %s7878_s17  ;;  %v1713_v15 = vld [vmem:[#allocation3 + $0x51] sm:$0xff]  ;;  %v1714_v51 = vld [vmem:[#allocation3 + $0x59] sm:$0xff] }
 0x1cf   : > { %1605 = vst.msk [vmem:[#allocation3 + $0x79] sm:$0x7f] %vm1587_vm5, %v1522_v34  ;;  %v1510_v55 = vadd.f32 %v8519_v29, %v1496_v60  ;;  %v6979_v2 = vpop.f32.mrb[110].mxu0  ;;  %v1689_v50 = vld [vmem:[#allocation2 + $0x79] sm:$0xff]  ;;  %v2351_v34 = vld [vmem:[#allocation3 + $0x42] sm:$0xff] }
 0x1d0   : > { %v1525_v5 = vmax.f32 %v1511_v1, 0.0  ;;  %v1499_v6 = vmax.f32 %v8512_v57, %v6979_v2  ;;  %v1372_v56 = vpop.f32.mrb[111].mxu0  ;;  %v2353_v30 = vld [vmem:[#allocation3 + $0x52] sm:$0xff]  ;;  %v8695_v1 = vld [vmem:[#allocation3 + $0x49] sm:$0xff]  ;;  %v8701_v2 = vpop.permute.xlu0 %7317 }
 0x1d1   : > { %v1524_v36 = vmax.f32 %v1510_v55, 0.0  ;;  %v1498_v46 = vmax.f32 %v8514_v58, %v1372_v56  ;;  %2390 = vrot.lane.b32.xlu0 %v1683_v3, %s7878_s17  ;;  %v1695_v58 = vld [vmem:[#allocation2 + $0xa9] sm:$0xff]  ;;  %v1693_v60 = vld [vmem:[#allocation2 + $0x99] sm:$0xff]  ;;  %13443 = vst [vmem:[#allocation18_spill] sm:$0xff] %v8695_v1  ;;  %13444 = vst [vmem:[#allocation19_spill] sm:$0xff] %v8701_v2 }
 0x1d2   : > { %1611 = vst.msk [vmem:[#allocation3 + $0x9d] sm:$0x7f] %vm1587_vm5, %v1525_v5  ;;  %v1513_v7 = vadd.f32 %v8519_v29, %v1499_v6  ;;  %2590 = vrot.lane.b32.xlu1 %v8648_v37, %s7880_s19  ;;  %v2352_v55 = vld [vmem:[#allocation3 + $0x4a] sm:$0xff]  ;;  %v1749_v5 = vld [vmem:[#allocation2 + $0x8a] sm:$0xff] }
 0x1d3   : > { %1609 = vst.msk [vmem:[#allocation3 + $0x91] sm:$0x7f] %vm1587_vm5, %v1524_v36  ;;  %v1512_v57 = vadd.f32 %v8519_v29, %v1498_v46  ;;  %v8663_v29 = vld [vmem:[#allocation2 + $0xa2] sm:$0xff]  ;;  %v2356_v6 = vld [vmem:[#allocation3 + $0x6a] sm:$0xff] }
 0x1d4   : > { %v1527_v8 = vmax.f32 %v1513_v7, 0.0  ;;  %v8708_v56 = vpop.permute.xlu0 %7322  ;;  %v1692_v3 = vld [vmem:[#allocation2 + $0x91] sm:$0xff]  ;;  %v1717_v36 = vld [vmem:[#allocation3 + $0x71] sm:$0xff] }
 0x1d5   : > { %v1526_v10 = vmax.f32 %v1512_v57, 0.0  ;;  %2564 = vrot.lane.b32.xlu0 %v1741_v9, %s7880_s19  ;;  %13445 = vst [vmem:[#allocation20_spill] sm:$0xff] %v8708_v56  ;;  %v1750_v7 = vld [vmem:[#allocation2 + $0x92] sm:$0xff]  ;;  %v2354_v57 = vld [vmem:[#allocation3 + $0x5a] sm:$0xff] }
 0x1d6   : > { %1615 = vst.msk [vmem:[#allocation3 + $0xb5] sm:$0x7f] %vm1587_vm5, %v1527_v8  ;;  %1948 = vrot.lane.b32.xlu1 %v1695_v58, %s7879_s18  ;;  %v2357_v35 = vld [vmem:[#allocation3 + $0x72] sm:$0xff] }
 0x1d7   : > { %1613 = vst.msk [vmem:[#allocation3 + $0xa9] sm:$0x7f] %vm1587_vm5, %v1526_v10  ;;  %v1715_v10 = vld [vmem:[#allocation3 + $0x61] sm:$0xff] }
 0x1d9   : > { %2398 = vrot.lane.b32.xlu0 %v1687_v12, %s7878_s17 }
 0x1da   : > { %2180 = vrot.lane.b32.xlu1 %v1753_v19, %s7881_s20 }
 0x1dd   : > { %2572 = vrot.lane.b32.xlu0 %v1745_v14, %s7880_s19  ;;  %v8834_v62 = vld [vmem:[#allocation3 + $0xb8] sm:$0xff] }
 0x1de   : > { %2586 = vrot.lane.b32.xlu1 %v8663_v29, %s7880_s19  ;;  %13461 = vst [vmem:[#allocation36_spill] sm:$0xff] %v8834_v62  ;;  %v2364_v40 = vld [vmem:[#allocation3 + $0xaa] sm:$0xff]  ;;  %v8843_v43 = vld [vmem:[#allocation3 + $0xb9] sm:$0xff] }
 0x1df   : > { %v2365_v59 = vld [vmem:[#allocation3 + $0xb2] sm:$0xff]  ;;  %v1724_v61 = vld [vmem:[#allocation3 + $0xa9] sm:$0xff] }
 0x1e1   : > { %2400 = vrot.lane.b32.xlu0 %v1688_v48, %s7878_s17 }
 0x1e2   : > { %2414 = vrot.lane.b32.xlu1 %v1695_v58, %s7878_s17 }
 0x1e5   : > { %2568 = vrot.lane.b32.xlu0 %v1743_v39, %s7880_s19 }
 0x1e6   : > { %2588 = vrot.lane.b32.xlu1 %v1753_v19, %s7880_s19  ;;  %v2355_v19 = vld [vmem:[#allocation3 + $0x62] sm:$0xff] }
 0x1e9   : > { %2396 = vrot.lane.b32.xlu0 %v1686_v18, %s7878_s17  ;;  %v8743_v18 = vld [vmem:[#allocation3 + $0x20] sm:$0xff] }
 0x1ea   : > { %7352 = vrot.lane.b32.xlu1 %v7351_v49, %s7880_s19 }
 0x1ed   : > { %2570 = vrot.lane.b32.xlu0 %v1744_v26, %s7880_s19  ;;  %v2346_v26 = vld [vmem:[#allocation3 + $0x1a] sm:$0xff] }
 0x1ee   : > { %7357 = vrot.lane.b32.xlu1 %v7356_v27, %s7879_s18  ;;  %v2347_v27 = vld [vmem:[#allocation3 + $0x22] sm:$0xff] }
 0x1f1   : > { %2404 = vrot.lane.b32.xlu0 %v1690_v33, %s7878_s17  ;;  %v1720_v33 = vld [vmem:[#allocation3 + $0x89] sm:$0xff] }
 0x1f2   : > { %2473 = vrot.lane.b32.xlu1 %v8677_v44, %s7879_s18  ;;  %v1648_v44 = vld [vmem:[#allocation3 + $0x18] sm:$0xff] }
 0x1f5   : > { %2578 = vrot.lane.b32.xlu0 %v1748_v52, %s7880_s19 }
 0x1f6   : > { %2676 = vrot.lane.b32.xlu1 %v2350_v31, %s7881_s20 }
 0x1f9   : > { %2406 = vrot.lane.b32.xlu0 %v1691_v4, %s7878_s17 }
 0x1fa   : > { %7367 = vrot.lane.b32.xlu1 %v7366_v42, %s7881_s20  ;;  %v8766_v42 = vld [vmem:[#allocation3 + $0x41] sm:$0xff] }
 0x1fb   : > { %13450 = vst [vmem:[#allocation25_spill] sm:$0xff] %v8766_v42 }
 0x1fd   : > { %2574 = vrot.lane.b32.xlu0 %v1746_v32, %s7880_s19  ;;  %v1718_v32 = vld [vmem:[#allocation3 + $0x79] sm:$0xff] }
 0x1fe   : > { %2479 = vrot.lane.b32.xlu1 %v1713_v15, %s7879_s18 }
 0x201   : > { %2402 = vrot.lane.b32.xlu0 %v1689_v50, %s7878_s17 }
 0x202   : > { %2682 = vrot.lane.b32.xlu1 %v2353_v30, %s7881_s20  ;;  %v8775_v30 = vld [vmem:[#allocation3 + $0x31] sm:$0xff] }
 0x203   : > { %13452 = vst [vmem:[#allocation27_spill] sm:$0xff] %v8775_v30 }
 0x205   : > { %2576 = vrot.lane.b32.xlu0 %v1747_v54, %s7880_s19  ;;  %v2358_v54 = vld [vmem:[#allocation3 + $0x7a] sm:$0xff] }
 0x206   : > { %2481 = vrot.lane.b32.xlu1 %v1714_v51, %s7879_s18 }
 0x209   : > { %1946 = vrot.lane.b32.xlu0 %v8604_v11, %s7879_s18  ;;  %v1716_v11 = vld [vmem:[#allocation3 + $0x69] sm:$0xff] }
 0x20a   : > { %2678 = vrot.lane.b32.xlu1 %v2351_v34, %s7881_s20 }
 0x20d   : > { %2410 = vrot.lane.b32.xlu0 %v1693_v60, %s7878_s17 }
 0x20e   : > { %2477 = vrot.lane.b32.xlu1 %v8695_v1, %s7879_s18 }
 0x211   : > { %1944 = vrot.lane.b32.xlu0 %v1693_v60, %s7879_s18  ;;  %v2349_v60 = vld [vmem:[#allocation3 + $0x32] sm:$0xff] }
 0x212   : > { %2680 = vrot.lane.b32.xlu1 %v2352_v55, %s7881_s20  ;;  %v1722_v55 = vld [vmem:[#allocation3 + $0x99] sm:$0xff] }
 0x215   : > { %2176 = vrot.lane.b32.xlu0 %v8593_v63, %s7881_s20 }
 0x216   : > { %2485 = vrot.lane.b32.xlu1 %v1716_v11, %s7879_s18 }
 0x219   : > { %2580 = vrot.lane.b32.xlu0 %v1749_v5, %s7880_s19  ;;  %v8788_v5 = vld [vmem:[#allocation3 + $0xa0] sm:$0xff] }
 0x21a   : > { %2688 = vrot.lane.b32.xlu1 %v2356_v6, %s7881_s20  ;;  %13454 = vst [vmem:[#allocation29_spill] sm:$0xff] %v8788_v5 }
 0x21d   : > { %2408 = vrot.lane.b32.xlu0 %v1692_v3, %s7878_s17  ;;  %v2362_v3 = vld [vmem:[#allocation3 + $0x9a] sm:$0xff] }
 0x21e   : > { %v8711_v46 = vpop.permute.xlu1 %7327  ;;  %2487 = vrot.lane.b32.xlu1 %v1717_v36, %s7879_s18 }
 0x21f   : > { %v8714_v63 = vpop.permute.xlu0 %7332 }
 0x221   : > { %2582 = vrot.lane.b32.xlu0 %v1750_v7, %s7880_s19 }
 0x222   : > { %v8717_v8 = vpop.permute.xlu1 %2560  ;;  %2684 = vrot.lane.b32.xlu1 %v2354_v57, %s7881_s20  ;;  %v1723_v57 = vld [vmem:[#allocation3 + $0xa1] sm:$0xff] }
 0x223   : > { %v8720_v9 = vpop.permute.xlu0 %7337 }
 0x225   : > { %1950 = vrot.lane.b32.xlu0 %v8637_v0, %s7879_s18  ;;  %v1719_v0 = vld [vmem:[#allocation3 + $0x81] sm:$0xff] }
 0x226   : > { %v8724_v58 = vpop.permute.xlu1 %2384  ;;  %2483 = vrot.lane.b32.xlu1 %v1715_v10, %s7879_s18 }
 0x227   : > { %v8727_v12 = vpop.permute.xlu0 %2386 }
 0x229   : > { %2182 = vrot.lane.b32.xlu0 %v8648_v37, %s7881_s20  ;;  %v2359_v37 = vld [vmem:[#allocation3 + $0x82] sm:$0xff] }
 0x22a   : > { %2686 = vrot.lane.b32.xlu1 %v2355_v19, %s7881_s20  ;;  %v8734_v48 = vpop.permute.xlu1 %7342 }
 0x22b   : > { %v8732_v14 = vpop.permute.xlu0 %2388 }
 0x22d   : > { %2418 = vrot.lane.b32.xlu0 %v8615_v21, %s7878_s17  ;;  %v7346_v21 = vpack.i.bf16 %v8743_v18, %v8539_v23 }
 0x22e   : > { %2491 = vrot.lane.b32.xlu1 %v1719_v0, %s7879_s18  ;;  %v8805_v0 = vld [vmem:[#allocation3 + $0x98] sm:$0xff] }
 0x22f   : > { %v8739_v39 = vpop.permute.xlu0 %2558  ;;  %13456 = vst [vmem:[#allocation31_spill] sm:$0xff] %v8805_v0 }
 0x230   : > { %v8741_v24 = vpop.permute.xlu1 %2584 }
 0x231   : > { %13446 = vst [vmem:[#allocation21_spill] sm:$0xff] %v8741_v24  ;;  %2178 = vrot.lane.b32.xlu0 %v8663_v29, %s7881_s20  ;;  %v7361_v29 = vpack.i.bf16 %v2347_v27, %v2346_v26  ;;  %v1721_v27 = vld [vmem:[#allocation3 + $0x91] sm:$0xff] }
 0x232   : > { %2694 = vrot.lane.b32.xlu1 %v2359_v37, %s7881_s20  ;;  %v2360_v37 = vld [vmem:[#allocation3 + $0x8a] sm:$0xff] }
 0x233   : > { %v8748_v49 = vpop.permute.xlu0 %2392 }
 0x234   : > { %v8752_v41 = vpop.permute.xlu1 %2412 }
 0x235   : > { %13447 = vst [vmem:[#allocation22_spill] sm:$0xff] %v8752_v41  ;;  %7347 = vrot.lane.b32.xlu0 %v7346_v21, %s7878_s17 }
 0x236   : > { %2493 = vrot.lane.b32.xlu1 %v1720_v33, %s7879_s18 }
 0x237   : > { %v8756_v52 = vpop.permute.xlu0 %2566 }
 0x238   : > { %v8758_v31 = vpop.permute.xlu1 %1952 }
 0x239   : > { %13448 = vst [vmem:[#allocation23_spill] sm:$0xff] %v8758_v31  ;;  %7362 = vrot.lane.b32.xlu0 %v7361_v29, %s7881_s20 }
 0x23a   : > { %2690 = vrot.lane.b32.xlu1 %v2357_v35, %s7881_s20  ;;  %v1725_v35 = vld [vmem:[#allocation3 + $0xb1] sm:$0xff] }
 0x23b   : > { %v8762_v45 = vpop.permute.xlu0 %2394 }
 0x23c   : > { %v8764_v4 = vpop.permute.xlu1 %2184 }
 0x23d   : > { %13449 = vst [vmem:[#allocation24_spill] sm:$0xff] %v8764_v4  ;;  %2475 = vrot.lane.b32.xlu0 %v8766_v42, %s7879_s18 }
 0x23e   : > { %2489 = vrot.lane.b32.xlu1 %v1718_v32, %s7879_s18  ;;  %v2361_v32 = vld [vmem:[#allocation3 + $0x92] sm:$0xff] }
 0x23f   : > { %v8771_v15 = vpop.permute.xlu0 %2562 }
 0x240   : > { %v8773_v50 = vpop.permute.xlu1 %2416 }
 0x241   : > { %13451 = vst [vmem:[#allocation26_spill] sm:$0xff] %v8773_v50  ;;  %2471 = vrot.lane.b32.xlu0 %v8775_v30, %s7879_s18 }
 0x242   : > { %2692 = vrot.lane.b32.xlu1 %v2358_v54, %s7881_s20 }
 0x243   : > { %v8780_v51 = vpop.permute.xlu0 %2390 }
 0x244   : > { %v8782_v34 = vpop.permute.xlu1 %2590 }
 0x245   : > { %13453 = vst [vmem:[#allocation28_spill] sm:$0xff] %v8782_v34  ;;  %2674 = vrot.lane.b32.xlu0 %v2349_v60, %s7881_s20  ;;  %v8824_v60 = vld [vmem:[#allocation3 + $0xa8] sm:$0xff] }
 0x246   : > { %2497 = vrot.lane.b32.xlu1 %v1722_v55, %s7879_s18  ;;  %13459 = vst [vmem:[#allocation34_spill] sm:$0xff] %v8824_v60 }
 0x247   : > { %v8786_v11 = vpop.permute.xlu0 %2564 }
 0x248   : > { %v8790_v6 = vpop.permute.xlu1 %1948 }
 0x249   : > { %1830 = vrot.lane.b32.xlu0 %v8788_v5, %s7878_s17 }
 0x24a   : > { %2700 = vrot.lane.b32.xlu1 %v2362_v3, %s7881_s20 }
 0x24b   : > { %v8795_v36 = vpop.permute.xlu0 %2398 }
 0x24c   : > { %v8797_v7 = vpop.permute.xlu1 %2180 }
 0x24d   : > { %2062 = vrot.lane.b32.xlu0 %v1723_v57, %s7880_s19 }
 0x24e   : > { %2499 = vrot.lane.b32.xlu1 %v1723_v57, %s7879_s18 }
 0x24f   : > { %v8801_v10 = vpop.permute.xlu0 %2572 }
 0x250   : > { %v8803_v19 = vpop.permute.xlu1 %2586 }
 0x251   : > { %13455 = vst [vmem:[#allocation30_spill] sm:$0xff] %v8803_v19  ;;  %1828 = vrot.lane.b32.xlu0 %v8805_v0, %s7878_s17 }
 0x252   : > { %2696 = vrot.lane.b32.xlu1 %v2360_v37, %s7881_s20 }
 0x253   : > { %v8810_v21 = vpop.permute.xlu0 %2400 }
 0x254   : > { %v8812_v26 = vpop.permute.xlu1 %2414 }
 0x255   : > { %13457 = vst [vmem:[#allocation32_spill] sm:$0xff] %v8812_v26  ;;  %2060 = vrot.lane.b32.xlu0 %v1722_v55, %s7880_s19  ;;  %v1667_v55 = vld [vmem:[#allocation3 + $0xb0] sm:$0xff] }
 0x256   : > { %2495 = vrot.lane.b32.xlu1 %v1721_v27, %s7879_s18  ;;  %v2363_v27 = vld [vmem:[#allocation3 + $0xa2] sm:$0xff] }
 0x257   : > { %v8816_v33 = vpop.permute.xlu0 %2568 }
 0x258   : > { %v8818_v29 = vpop.permute.xlu1 %2588 }
 0x259   : > { %13458 = vst [vmem:[#allocation33_spill] sm:$0xff] %v8818_v29  ;;  %2066 = vrot.lane.b32.xlu0 %v1725_v35, %s7880_s19 }
 0x25a   : > { %2698 = vrot.lane.b32.xlu1 %v2361_v32, %s7881_s20 }
 0x25b   : > { %v8822_v54 = vpop.permute.xlu0 %2396 }
 0x25c   : > { %v8826_v3 = vpop.permute.xlu1 %7352 }
 0x25d   : > { %13460 = vst [vmem:[#allocation35_spill] sm:$0xff] %v8826_v3  ;;  %1832 = vrot.lane.b32.xlu0 %v8824_v60, %s7878_s17 }
 0x25e   : > { %1834 = vrot.lane.b32.xlu1 %v1667_v55, %s7878_s17 }
 0x25f   : > { %v8831_v57 = vpop.permute.xlu0 %2570 }
 0x260   : > { %v7358_v37 = vpop.permute.xlu1 %7357 }
 0x261   : > { %2702 = vrot.lane.b32.xlu0 %v2363_v27, %s7881_s20  ;;  %v7360_v13 = vunpack.i.h.bf16 %v7358_v37 }
 0x262   : > { %1836 = vrot.lane.b32.xlu1 %v8834_v62, %s7878_s17 }
 0x263   : > { %v8838_v32 = vpop.permute.xlu0 %2404 }
 0x264   : > { %13462 = vst [vmem:[#allocation37_spill] sm:$0xff] %v8838_v32  ;;  %v8840_v25 = vpop.permute.xlu1 %2473  ;;  %v7340_v32 = vunpack.i.h.bf16 %v8720_v9 }
 0x265   : > { %2704 = vrot.lane.b32.xlu0 %v2364_v40, %s7881_s20 }
 0x266   : > { %2068 = vrot.lane.b32.xlu1 %v8843_v43, %s7880_s19 }
 0x267   : > { %v8847_v55 = vpop.permute.xlu0 %2578 }
 0x268   : > { %13463 = vst [vmem:[#allocation38_spill] sm:$0xff] %v8847_v55  ;;  %v8849_v27 = vpop.permute.xlu1 %2676 }
 0x26a   : > { %2503 = vrot.lane.b32.xlu1 %v1725_v35, %s7879_s18 }
 0x26b   : > { %v8852_v47 = vpop.permute.xlu0 %2406 }
 0x26c   : > { %13464 = vst [vmem:[#allocation39_spill] sm:$0xff] %v8852_v47  ;;  %v8854_v23 = vpop.permute.xlu1 %7367 }
 0x26e   : > { %2706 = vrot.lane.b32.xlu1 %v2365_v59, %s7881_s20 }
 0x26f   : > { %v8857_v16 = vpop.permute.xlu0 %2574 }
 0x270   : > { %13465 = vst [vmem:[#allocation40_spill] sm:$0xff] %v8857_v16  ;;  %v8859_v40 = vpop.permute.xlu1 %2479 }
 0x272   : > { %2064 = vrot.lane.b32.xlu1 %v1724_v61, %s7880_s19 }
 0x273   : > { %v8862_v56 = vpop.permute.xlu0 %2402 }
 0x274   : > { %v8864_v2 = vpop.permute.xlu1 %2682 }
 0x276   : > { %2501 = vrot.lane.b32.xlu1 %v1724_v61, %s7879_s18 }
 0x277   : > { %v8867_v35 = vpop.permute.xlu0 %2576 }
 0x278   : > { %v8869_v3 = vpop.permute.xlu1 %2481 }
 0x27b   : > { %v8871_v34 = vpop.permute.xlu0 %1946 }
 0x27c   : > { %v2679_v59 = vpop.permute.xlu1 %2678 }
 0x27f   : > { %v8873_v50 = vpop.permute.xlu0 %2410 }
 0x280   : > { %13466 = vst [vmem:[#allocation41_spill] sm:$0xff] %v8873_v50  ;;  %v8875_v62 = vpop.permute.xlu1 %2477  ;;  %v7334_v50 = vunpack.i.l.bf16 %v8714_v63 }
 0x283   : > { %v8877_v19 = vpop.permute.xlu0 %1944 }
 0x284   : > { %13467 = vst [vmem:[#allocation42_spill] sm:$0xff] %v8877_v19  ;;  %v8879_v29 = vpop.permute.xlu1 %2680 }
 0x287   : > { %v8881_v5 = vpop.permute.xlu0 %2176 }
 0x288   : > { %13468 = vst [vmem:[#allocation43_spill] sm:$0xff] %v8881_v5  ;;  %v8883_v41 = vpop.permute.xlu1 %2485 }
 0x28b   : > { %v8885_v61 = vpop.permute.xlu0 %2580 }
 0x28c   : > { %13469 = vst [vmem:[#allocation44_spill] sm:$0xff] %v8885_v61  ;;  %v8887_v60 = vpop.permute.xlu1 %2688  ;;  %v2752_v61 = vsel %vm1528_vm1, %v1648_v44, %v7334_v50  ;;  %v8930_v50 = vld [vmem:[#allocation3 + $0x40] sm:$0xff] }
 0x28f   : > { %v8889_v26 = vpop.permute.xlu0 %2408 }
 0x290   : > { %13470 = vst [vmem:[#allocation45_spill] sm:$0xff] %v8889_v26  ;;  %v8891_v38 = vpop.permute.xlu1 %2487  ;;  %v7359_v26 = vunpack.i.l.bf16 %v7358_v37  ;;  %v1705_v37 = vld [vmem:[#allocation3 + $0x11] sm:$0xff] }
 0x293   : > { %v8893_v28 = vpop.permute.xlu0 %2582 }
 0x294   : > { %13471 = vst [vmem:[#allocation46_spill] sm:$0xff] %v8893_v28  ;;  %v8895_v4 = vpop.permute.xlu1 %2684  ;;  %v7335_v28 = vunpack.i.h.bf16 %v8714_v63  ;;  %v7339_v63 = vunpack.i.l.bf16 %v8720_v9 }
 0x297   : > { %v8897_v22 = vpop.permute.xlu0 %1950 }
 0x298   : > { %v8899_v19 = vpop.permute.xlu1 %2483 }
 0x29b   : > { %v8901_v24 = vpop.permute.xlu0 %2182 }
 0x29c   : > { %v8903_v5 = vpop.permute.xlu1 %2686 }
 0x29f   : > { %v8905_v1 = vpop.permute.xlu0 %2418 }
 0x2a0   : > { %13472 = vst [vmem:[#allocation47_spill] sm:$0xff] %v8905_v1  ;;  %v8907_v31 = vpop.permute.xlu1 %2491  ;;  %v2753_v1 = vsel %vm1528_vm1, %v8743_v18, %v7335_v28 }
 0x2a1   : > { %13473 = vst [vmem:[#allocation48_spill] sm:$0xff] %v8907_v31  ;;  %v2782_v31 = vsel %vm419_vm0, %v2753_v1, %v7360_v13  ;;  %v2757_v1 = vsel %vm1528_vm1, %v8930_v50, %v8732_v14 }
 0x2a2   : > { %v2811_v44 = vsel %vm2283_vm2, %v2782_v31, %v7340_v32 }
 0x2a3   : > { %v8909_v17 = vpop.permute.xlu0 %2178 }
 0x2a4   : > { %v8911_v0 = vpop.permute.xlu1 %2694 }
 0x2a5   : > { %13474 = vst [vmem:[#allocation49_spill] sm:$0xff] %v8911_v0  ;;  %v2781_v0 = vsel %vm419_vm0, %v2752_v61, %v7359_v26 }
 0x2a7   : > { %v8915_v55 = vpop.permute.xlu0 %7347 }
 0x2a8   : > { %13475 = vst [vmem:[#allocation50_spill] sm:$0xff] %v8915_v55  ;;  %v8917_v42 = vpop.permute.xlu1 %2493 }
 0x2a9   : > { %13476 = vst [vmem:[#allocation51_spill] sm:$0xff] %v8917_v42  ;;  %v2810_v42 = vsel %vm2283_vm2, %v2781_v0, %v7339_v63  ;;  %v8946_v0 = vld [vmem:[#allocation3 + $0x38] sm:$0xff] }
 0x2ab   : > { %v7363_v47 = vpop.permute.xlu0 %7362 }
 0x2ac   : > { %v7365_v30 = vunpack.i.h.bf16 %v7363_v47  ;;  %v7364_v55 = vunpack.i.l.bf16 %v7363_v47  ;;  %v8926_v16 = vpop.permute.xlu1 %2690 }
 0x2ae   : > { %v8933_v13 = vsel %vm2313_vm3, %v2810_v42, %v7364_v55  ;;  %v8936_v28 = vsel %vm2313_vm3, %v2811_v44, %v7365_v30  ;;  %v2756_v30 = vsel %vm1528_vm1, %v8946_v0, %v8727_v12  ;;  %v8961_v55 = vld [vmem:[#allocation3 + $0x30] sm:$0xff] }
 0x2af   : > { %13477 = vst [vmem:[#allocation52_spill] sm:$0xff] %v8933_v13  ;;  %v8942_v47 = vrot.slane %v8933_v13, 4  ;;  %v13183_v9 = vrot.slane %v8936_v28, 4  ;;  %v2476_v18 = vpop.permute.xlu0 %2475  ;;  %v7371_v31 = vpack.i.bf16 %v8936_v28, %v1705_v37  ;;  %v2785_v61 = vsel %vm419_vm0, %v2756_v30, %v8840_v25 }
 0x2b0   : > { %v2786_v42 = vsel %vm419_vm0, %v2757_v1, %v2476_v18  ;;  %v8949_v26 = vpop.permute.xlu1 %2489  ;;  %v2755_v12 = vsel %vm1528_vm1, %v8961_v55, %v8724_v58  ;;  %v2814_v18 = vsel %vm2283_vm2, %v2785_v61, %v8717_v8 }
 0x2b1   : > { %13478 = vst [vmem:[#allocation53_spill] sm:$0xff] %v8942_v47  ;;  %v2815_v14 = vsel %vm2283_vm2, %v2786_v42, %v8771_v15  ;;  %7372 = vrot.lane.b32.xlu0 %v7371_v31, %s7879_s18  ;;  %v3307_v32 = vsel %vm2887_vm4, %v8942_v47, %v13183_v9  ;;  %v8980_v25 = vsel %vm2313_vm3, %v2814_v18, %v8849_v27  ;;  %v1638_v9 = vld [vmem:[#allocation2 + $0xb0] sm:$0xff] }
 0x2b2   : > { %v7376_v63 = vpack.i.bf16 %v8942_v47, %v3307_v32  ;;  %v8970_v15 = vsel %vm2313_vm3, %v2815_v14, %v2679_v59  ;;  %v3312_v8 = vrot.slane %v8980_v25, 4 }
 0x2b3   : > { %v2472_v37 = vpop.permute.xlu0 %2471  ;;  %v13182_v58 = vrot.slane %v8970_v15, 4 }
 0x2b4   : > { %v2784_v44 = vsel %vm419_vm0, %v2755_v12, %v2472_v37  ;;  %v8973_v1 = vpop.permute.xlu1 %2692 }
 0x2b5   : > { %7377 = vrot.lane.b32.xlu0 %v7376_v63, %s7883_s24  ;;  %v2813_v59 = vsel %vm2283_vm2, %v2784_v44, %v8739_v39  ;;  %v9003_v39 = vsel %vm2887_vm4, %v3312_v8, %v13182_v58  ;;  %v2366_v44 = vld [vmem:[#allocation3 + $0xba] sm:$0xff] }
 0x2b7   : > { %v2675_v31 = vpop.permute.xlu0 %2674 }
 0x2b8   : > { %v8986_v42 = vsel %vm2313_vm3, %v2813_v59, %v2675_v31  ;;  %v8988_v30 = vpop.permute.xlu1 %2497 }
 0x2b9   : > { %13479 = vst [vmem:[#allocation54_spill] sm:$0xff] %v8988_v30  ;;  %v8992_v14 = vrot.slane %v8986_v42, 4  ;;  %2505 = vrot.lane.b32.xlu0 %v8843_v43, %s7879_s18 }
 0x2bb   : > { %v1831_v27 = vpop.permute.xlu0 %1830  ;;  %v8998_v32 = vsel %vm2887_vm4, %v8992_v14, %v3312_v8 }
 0x2bc   : > { %v9005_v61 = vpop.permute.xlu1 %2700  ;;  %v7396_v63 = vpack.i.bf16 %v8992_v14, %v8998_v32 }
 0x2bd   : > { %13480 = vst [vmem:[#allocation55_spill] sm:$0xff] %v9005_v61  ;;  %v9035_v61 = vld [vmem:[#allocation3 + $0x29] sm:$0xff] }
 0x2be   : > { %7397 = vrot.lane.b32.xlu0 %v7396_v63, %s7882_s21 }
 0x2bf   : > { %v2063_v43 = vpop.permute.xlu0 %2062 }
 0x2c0   : > { %v9012_v37 = vpop.permute.xlu1 %2499 }
 0x2c1   : > { %13481 = vst [vmem:[#allocation56_spill] sm:$0xff] %v9012_v37 }
 0x2c2   : > { %2708 = vrot.lane.b32.xlu0 %v2366_v44, %s7881_s20 }
 0x2c3   : > { %v9017_v31 = vpop.permute.xlu0 %1828 }
 0x2c4   : > { %v9015_v18 = vpop.permute.xlu1 %2696  ;;  %13482 = vst [vmem:[#allocation57_spill] sm:$0xff] %v9017_v31 }
 0x2c7   : > { %v9021_v8 = vpop.permute.xlu0 %2060 }
 0x2c8   : > { %v9019_v59 = vpop.permute.xlu1 %2495  ;;  %13483 = vst [vmem:[#allocation58_spill] sm:$0xff] %v9021_v8 }
 0x2cb   : > { %v2067_v47 = vpop.permute.xlu0 %2066 }
 0x2cc   : > { %v9023_v58 = vpop.permute.xlu1 %2698 }
 0x2cd   : > { %13484 = vst [vmem:[#allocation59_spill] sm:$0xff] %v9023_v58 }
 0x2d0   : > { %v1835_v12 = vpop.permute.xlu1 %1834 }
 0x2d1   : > { %v2247_v63 = vsel %vm1528_vm1, %v1638_v9, %v1835_v12  ;;  %v1636_v12 = vld [vmem:[#allocation2 + $0xa0] sm:$0xff] }
 0x2d2   : > { %v2276_v13 = vsel %vm419_vm0, %v2247_v63, %v8897_v22  ;;  %v2245_v22 = vsel %vm1528_vm1, %v1636_v12, %v1831_v27 }
 0x2d3   : > { %v2306_v44 = vsel %vm2283_vm2, %v2276_v13, %v2067_v47  ;;  %v1833_v13 = vpop.permute.xlu0 %1832  ;;  %v1637_v47 = vld [vmem:[#allocation2 + $0xa8] sm:$0xff] }
 0x2d4   : > { %v9031_v37 = vsel %vm2313_vm3, %v2306_v44, %v8901_v24  ;;  %v9033_v31 = vpop.permute.xlu1 %1836  ;;  %v2274_v24 = vsel %vm419_vm0, %v2245_v22, %v8871_v34  ;;  %v2246_v30 = vsel %vm1528_vm1, %v1637_v47, %v1833_v13  ;;  %v9083_v47 = vld [vmem:[#allocation3 + $0x28] sm:$0xff] }
 0x2d5   : > { %v7381_v8 = vpack.i.bf16 %v9031_v37, %v9035_v61  ;;  %v2304_v44 = vsel %vm2283_vm2, %v2274_v24, %v2063_v43  ;;  %v13188_v43 = vrot.slane %v9031_v37, 4 }
 0x2d7   : > { %7382 = vrot.lane.b32.xlu1 %v7381_v8, %s7879_s18  ;;  %v9053_v8 = vsel %vm2313_vm3, %v2304_v44, %v8909_v17 }
 0x2d8   : > { %v9040_v9 = vpop.permute.xlu1 %2068  ;;  %13487 = vst [vmem:[#allocation62_spill] sm:$0xff] %v9053_v8  ;;  %v13187_v12 = vrot.slane %v9053_v8, 4  ;;  %v2345_v8 = vld [vmem:[#allocation3 + $0x12] sm:$0xff] }
 0x2d9   : > { %13485 = vst [vmem:[#allocation60_spill] sm:$0xff] %v9040_v9 }
 0x2dc   : > { %v9042_v58 = vpop.permute.xlu1 %2503 }
 0x2dd   : > { %13486 = vst [vmem:[#allocation61_spill] sm:$0xff] %v9042_v58  ;;  %v2275_v58 = vsel %vm419_vm0, %v2246_v30, %v8790_v6 }
 0x2e0   : > { %v9047_v63 = vpop.permute.xlu1 %2706 }
 0x2e4   : > { %v2065_v9 = vpop.permute.xlu1 %2064 }
 0x2e5   : > { %v2305_v27 = vsel %vm2283_vm2, %v2275_v58, %v2065_v9  ;;  %v9076_v9 = vld [vmem:[#allocation3 + $0x48] sm:$0xff] }
 0x2e6   : > { %v9060_v34 = vsel %vm2313_vm3, %v2305_v27, %v8797_v7  ;;  %v7329_v7 = vunpack.i.l.bf16 %v8711_v46  ;;  %v2758_v13 = vsel %vm1528_vm1, %v9076_v9, %v8780_v51 }
 0x2e7   : > { %13488 = vst [vmem:[#allocation63_spill] sm:$0xff] %v9060_v34  ;;  %v2927_v22 = vrot.slane %v9060_v34, 4  ;;  %v2787_v44 = vsel %vm419_vm0, %v2758_v13, %v8875_v62 }
 0x2e8   : > { %v9073_v58 = vpop.permute.xlu1 %2501  ;;  %v2816_v51 = vsel %vm2283_vm2, %v2787_v44, %v8786_v11  ;;  %v13490_v11 = vrot.slane %v8936_v28, 4  ;;  %v7391_v44 = vpack.i.bf16 %v8554_v20, %v2345_v8  ;;  %v2367_v20 = vld [vmem:[#allocation3 + $0xc2] sm:$0xff]  ;;  %v7751_v8 = vld [vmem:[#allocation2 + $0xc1] sm:$0xff] }
 0x2e9   : > { %v2928_v17 = vsel %vm2887_vm4, %v13187_v12, %v2927_v22  ;;  %v2930_v6 = vsel %vm2887_vm4, %v2927_v22, %v13188_v43  ;;  %v2754_v22 = vsel %vm1528_vm1, %v9083_v47, %v7329_v7  ;;  %v9098_v34 = vsel %vm2313_vm3, %v2816_v51, %v8879_v29  ;;  %v7752_v51 = vld [vmem:[#allocation3 + $0xc1] sm:$0xff] }
 0x2ea   : > { %v9071_v30 = vpack.i.bf16 %v2930_v6, %v2928_v17  ;;  %v7344_v17 = vunpack.i.l.bf16 %v8734_v48  ;;  %v7369_v6 = vunpack.i.l.bf16 %v8854_v23 }
 0x2ec   : > { %13489 = vst [vmem:[#allocation64_spill] sm:$0xff] %v9071_v30 }
 0x349   : > { %v9081_v24 = vpop.permute.xlu1 %7382 }
 0x34a   : > { %v7384_v27 = vunpack.i.l.bf16 %v9081_v24 }
 0x34c   : > { %v2783_v12 = vsel %vm419_vm0, %v2754_v22, %v7384_v27  ;;  %v3316_v27 = vrot.slane %v9098_v34, 4  ;;  %v13493_v22 = vrot.slane %v8970_v15, 4 }
 0x34d   : > { %v2812_v43 = vsel %vm2283_vm2, %v2783_v12, %v7344_v17 }
 0x34e   : > { %v9101_v62 = vsel %vm2313_vm3, %v2812_v43, %v7369_v6  ;;  %v9125_v17 = vsel %vm2887_vm4, %v13493_v22, %v3316_v27  ;;  %v7411_v6 = vpack.i.bf16 %v8970_v15, %v8980_v25  ;;  %v9152_v22 = vld [vmem:[#allocation3 + $0x68] sm:$0xff] }
 0x34f   : > { %v7386_v7 = vpack.i.bf16 %v8986_v42, %v9101_v62  ;;  %v3308_v13 = vrot.slane %v9101_v62, 4 }
 0x351   : > { %7387 = vrot.lane.b32.xlu1 %v7386_v7, %s7879_s18  ;;  %v9111_v12 = vsel %vm2887_vm4, %v13490_v11, %v3308_v13  ;;  %v9115_v29 = vsel %vm2887_vm4, %v3308_v13, %v8992_v14  ;;  %v7406_v14 = vpack.i.bf16 %v9125_v17, %v9003_v39  ;;  %v7753_v7 = vld [vmem:[#allocation2 + $0xca] sm:$0xff]  ;;  %v7754_v13 = vld [vmem:[#allocation2 + $0xc2] sm:$0xff] }
 0x352   : > { %13491 = vst [vmem:[#allocation65_spill] sm:$0xff] %v9111_v12  ;;  %13492 = vst [vmem:[#allocation66_spill] sm:$0xff] %v9115_v29  ;;  %v7401_v43 = vpack.i.bf16 %v9115_v29, %v9111_v12  ;;  %v9144_v11 = vld [vmem:[#allocation3 + $0x58] sm:$0xff]  ;;  %v7780_v12 = vld [vmem:[#allocation2 + $0x69] sm:$0xff] }
 0x354   : > { %7402 = vrot.lane.b32.xlu0 %v7401_v43, %s7883_s24 }
 0x355   : > { %7392 = vrot.lane.b32.xlu1 %v7391_v44, %s7881_s20  ;;  %v2760_v44 = vsel %vm1528_vm1, %v9144_v11, %v8762_v45 }
 0x358   : > { %7407 = vrot.lane.b32.xlu0 %v7406_v14, %s7882_s21 }
 0x359   : > { %2592 = vrot.lane.b32.xlu1 %v8626_v53, %s7880_s19  ;;  %v9142_v53 = vld [vmem:[#allocation3 + $0x60] sm:$0xff] }
 0x35a   : > { %v2761_v43 = vsel %vm1528_vm1, %v9142_v53, %v8822_v54  ;;  %v2789_v54 = vsel %vm419_vm0, %v2760_v44, %v8869_v3 }
 0x35b   : > { %v2790_v14 = vsel %vm419_vm0, %v2761_v43, %v8899_v19  ;;  %v7757_v43 = vld [vmem:[#allocation3 + $0xd1] sm:$0xff] }
 0x35c   : > { %2710 = vrot.lane.b32.xlu0 %v2367_v20, %s7881_s20  ;;  %v7755_v20 = vld [vmem:[#allocation2 + $0xd1] sm:$0xff] }
 0x35d   : > { %2420 = vrot.lane.b32.xlu1 %v7751_v8, %s7878_s17  ;;  %v9157_v8 = vld [vmem:[#allocation3 + $0x50] sm:$0xff] }
 0x35e   : > { %v2759_v45 = vsel %vm1528_vm1, %v9157_v8, %v8748_v49 }
 0x360   : > { %7412 = vrot.lane.b32.xlu0 %v7411_v6, %s7879_s18  ;;  %v2762_v6 = vsel %vm1528_vm1, %v9152_v22, %v8795_v36  ;;  %v2818_v36 = vsel %vm2283_vm2, %v2789_v54, %v8816_v33 }
 0x361   : > { %2507 = vrot.lane.b32.xlu1 %v7752_v51, %s7879_s18  ;;  %v7756_v51 = vld [vmem:[#allocation2 + $0xc9] sm:$0xff]  ;;  %v2791_v19 = vsel %vm419_vm0, %v2762_v6, %v8883_v41  ;;  %v9185_v41 = vsel %vm2313_vm3, %v2818_v36, %v8895_v4  ;;  %v7760_v36 = vld [vmem:[#allocation2 + $0x21] sm:$0xff] }
 0x362   : > { %v2820_v49 = vsel %vm2283_vm2, %v2791_v19, %v8801_v10  ;;  %13495 = vst [vmem:[#allocation68_spill] sm:$0xff] %v9185_v41  ;;  %v3320_v4 = vrot.slane %v9185_v41, 4 }
 0x364   : > { %2596 = vrot.lane.b32.xlu0 %v7753_v7, %s7880_s19  ;;  %v2788_v7 = vsel %vm419_vm0, %v2759_v45, %v8859_v40  ;;  %v7758_v40 = vld [vmem:[#allocation3 + $0xc9] sm:$0xff] }
 0x365   : > { %2594 = vrot.lane.b32.xlu1 %v7754_v13, %s7880_s19  ;;  %v2819_v13 = vsel %vm2283_vm2, %v2790_v14, %v8831_v57  ;;  %v2817_v33 = vsel %vm2283_vm2, %v2788_v7, %v8756_v52  ;;  %v2368_v57 = vld [vmem:[#allocation3 + $0xca] sm:$0xff] }
 0x366   : > { %v9178_v3 = vsel %vm2313_vm3, %v2819_v13, %v8903_v5  ;;  %v9192_v5 = vsel %vm2313_vm3, %v2820_v49, %v8887_v60  ;;  %v9196_v44 = vsel %vm2313_vm3, %v2817_v33, %v8864_v2  ;;  %v7759_v14 = vld [vmem:[#allocation2 + $0xd2] sm:$0xff]  ;;  %v9222_v13 = vld [vmem:[#allocation3 + $0x78] sm:$0xff] }
 0x367   : > { %13494 = vst [vmem:[#allocation67_spill] sm:$0xff] %v9178_v3  ;;  %13496 = vst [vmem:[#allocation69_spill] sm:$0xff] %v9192_v5  ;;  %v3322_v10 = vrot.slane %v9178_v3, 4  ;;  %v3318_v52 = vrot.slane %v9196_v44, 4  ;;  %v7426_v60 = vpack.i.bf16 %v9196_v44, %v9098_v34  ;;  %v2369_v49 = vld [vmem:[#allocation3 + $0xd2] sm:$0xff] }
 0x368   : > { %2424 = vrot.lane.b32.xlu0 %v7755_v20, %s7878_s17  ;;  %v3324_v20 = vrot.slane %v9192_v5, 4 }
 0x369   : > { %2422 = vrot.lane.b32.xlu1 %v7756_v51, %s7878_s17  ;;  %v3323_v6 = vsel %vm2887_vm4, %v3320_v4, %v3322_v10  ;;  %v3321_v54 = vsel %vm2887_vm4, %v3318_v52, %v3320_v4  ;;  %v13497_v51 = vpack.i.bf16 %v9003_v39, %v8998_v32  ;;  %v3319_v19 = vsel %vm2887_vm4, %v3316_v27, %v3318_v52  ;;  %v9228_v39 = vld [vmem:[#allocation3 + $0x70] sm:$0xff]  ;;  %v4386_v52 = vld [vmem:[%s13155_s3 + $0x10] sm:$0xff] }
 0x36a   : > { %v9208_v2 = vsel %vm2887_vm4, %v3322_v10, %v3324_v20  ;;  %v7421_v7 = vpack.i.bf16 %v3321_v54, %v3319_v19  ;;  %v2764_v32 = vsel %vm1528_vm1, %v9222_v13, %v8862_v56  ;;  %v7431_v56 = vpack.i.bf16 %v3319_v19, %v9125_v17  ;;  %v7762_v19 = vld [vmem:[#allocation2 + $0x29] sm:$0xff] }
 0x36b   : > { %v7436_v45 = vpack.i.bf16 %v9208_v2, %v3323_v6  ;;  %v2793_v27 = vsel %vm419_vm0, %v2764_v32, %v8949_v26  ;;  %v13499_v26 = vld [vmem:[#allocation40_spill] sm:$0xff]  ;;  %v13193_v17 = vmov 0.0|0.0   ;;  %v4390_v32 = vld [vmem:[%s13155_s3 + $0x30] sm:$0xff] }
 0x36c   : > { %2511 = vrot.lane.b32.xlu0 %v7757_v43, %s7879_s18  ;;  %v7441_v43 = vpack.i.bf16 %v7760_v36, %v9185_v41  ;;  %7126 = vmatprep.subr.bf16.mxu1 %v13193_v17 }
 0x36d   : > { %2509 = vrot.lane.b32.xlu1 %v7758_v40, %s7879_s18  ;;  %v2763_v40 = vsel %vm1528_vm1, %v9228_v39, %v8810_v21  ;;  %v4384_v21 = vld [vmem:[%s13155_s3] sm:$0xff]  ;;  %7007 = vmatprep.subr.bf16.mxu0 %v13193_v17 }
 0x36e   : > { %v2792_v33 = vsel %vm419_vm0, %v2763_v40, %v8891_v38  ;;  %v4385_v38 = vld [vmem:[%s13155_s3 + $0x8] sm:$0xff]  ;;  %v4392_v40 = vld [vmem:[%s13155_s3 + $0x40] sm:$0xff] }
 0x370   : > { %2598 = vrot.lane.b32.xlu0 %v7759_v14, %s7880_s19  ;;  %v7761_v14 = vld [vmem:[#allocation2 + $0x2a] sm:$0xff] }
 0x371   : > { %2712 = vrot.lane.b32.xlu1 %v2368_v57, %s7881_s20  ;;  %v2822_v57 = vsel %vm2283_vm2, %v2793_v27, %v8867_v35  ;;  %v2821_v35 = vsel %vm2283_vm2, %v2792_v33, %v13499_v26  ;;  %v4393_v33 = vld [vmem:[%s13155_s3 + $0x48] sm:$0xff] }
 0x372   : > { %v9244_v10 = vsel %vm2313_vm3, %v2822_v57, %v8973_v1  ;;  %v7008_v1 = vpack.c.bf16 %v4385_v38, %v4384_v21  ;;  %v7763_v57 = vld [vmem:[#allocation2 + $0x31] sm:$0xff] }
 0x373   : > { %13498 = vst [vmem:[#allocation70_spill] sm:$0xff] %v9244_v10  ;;  %v3328_v4 = vrot.slane %v9244_v10, 4  ;;  %v4395_v21 = vld [vmem:[%s13155_s3 + $0x58] sm:$0xff] }
 0x374   : > { %7427 = vrot.lane.b32.xlu0 %v7426_v60, %s7879_s18  ;;  %7142 = vmatpush1.bf16.msra.mxu1 %v7008_v1  ;;  %v13501_v38 = vld [vmem:[#allocation27_spill] sm:$0xff] }
 0x375   : > { %7417 = vrot.lane.b32.xlu1 %v13497_v51, %s7883_s24  ;;  %7009 = vmatpush1.bf16.msra.mxu0 %v7008_v1  ;;  %v4396_v1 = vld [vmem:[%s13155_s3 + $0x60] sm:$0xff] }
 0x376   : > { %7127 = vmatprep.subr.bf16.mxu1 %v13193_v17  ;;  %7010 = vmatprep.subr.bf16.mxu0 %v13193_v17 }
 0x378   : > { %7437 = vrot.lane.b32.xlu0 %v7436_v45, %s7882_s21  ;;  %v7451_v45 = vpack.i.bf16 %v3323_v6, %v3321_v54  ;;  %v4389_v6 = vld [vmem:[%s13155_s3 + $0x28] sm:$0xff] }
 0x379   : > { %7422 = vrot.lane.b32.xlu1 %v7421_v7, %s7882_s21  ;;  %v7446_v7 = vpack.i.bf16 %v9178_v3, %v7762_v19  ;;  %v7766_v19 = vld [vmem:[#allocation2 + $0x41] sm:$0xff] }
 0x37c   : > { %7442 = vrot.lane.b32.xlu0 %v7441_v43, %s7879_s18 }
 0x37d   : > { %2714 = vrot.lane.b32.xlu1 %v2369_v49, %s7881_s20 }
 0x380   : > { %2032 = vrot.lane.b32.xlu0 %v9035_v61, %s7880_s19  ;;  %v9260_v61 = vsel %vm2313_vm3, %v2821_v35, %v8926_v16  ;;  %v4387_v16 = vld [vmem:[%s13155_s3 + $0x18] sm:$0xff] }
 0x381   : > { %7432 = vrot.lane.b32.xlu1 %v7431_v56, %s7883_s24  ;;  %13500 = vst [vmem:[#allocation40_spill] sm:$0xff] %v9260_v61  ;;  %v3326_v60 = vrot.slane %v9260_v61, 4  ;;  %v7011_v51 = vpack.c.bf16 %v4387_v16, %v4386_v52  ;;  %v7461_v56 = vpack.i.bf16 %v9260_v61, %v9192_v5  ;;  %v7764_v35 = vld [vmem:[#allocation2 + $0x3a] sm:$0xff]  ;;  %v7765_v52 = vld [vmem:[#allocation2 + $0x32] sm:$0xff] }
 0x383   : > { %v9280_v36 = vsel %vm2887_vm4, %v3326_v60, %v3328_v4  ;;  %7143 = vmatpush1.bf16.msra.mxu1 %v7011_v51  ;;  %7012 = vmatpush1.bf16.msra.mxu0 %v7011_v51  ;;  %v9292_v54 = vsel %vm2887_vm4, %v3324_v20, %v3326_v60  ;;  %v4391_v20 = vld [vmem:[%s13155_s3 + $0x38] sm:$0xff]  ;;  %v9342_v60 = vld [vmem:[#allocation3 + $0x88] sm:$0xff] }
 0x384   : > { %2148 = vrot.lane.b32.xlu0 %v7761_v14, %s7881_s20  ;;  %7128 = vmatprep.subr.bf16.mxu1 %v13193_v17  ;;  %v7456_v49 = vpack.i.bf16 %v9280_v36, %v9292_v54  ;;  %v7017_v27 = vpack.c.bf16 %v4391_v20, %v4390_v32  ;;  %v4397_v14 = vld [vmem:[%s13155_s3 + $0x68] sm:$0xff]  ;;  %v13502_v51 = vld [vmem:[#allocation39_spill] sm:$0xff] }
 0x385   : > { %1800 = vrot.lane.b32.xlu1 %v9083_v47, %s7878_s17  ;;  %v4388_v47 = vld [vmem:[%s13155_s3 + $0x20] sm:$0xff]  ;;  %7013 = vmatprep.subr.bf16.mxu0 %v13193_v17  ;;  %v7026_v16 = vpack.c.bf16 %v4397_v14, %v4396_v1 }
 0x386   : > { %v7014_v43 = vpack.c.bf16 %v4389_v6, %v4388_v47  ;;  %v4399_v47 = vld [vmem:[%s13155_s3 + $0x78] sm:$0xff]  ;;  %v9355_v6 = vld [vmem:[#allocation3 + $0x80] sm:$0xff] }
 0x387   : > { %v7767_v32 = vld [vmem:[#allocation2 + $0x39] sm:$0xff]  ;;  %v13509_v1 = vld [vmem:[#allocation17_spill] sm:$0xff] }
 0x388   : > { %7452 = vrot.lane.b32.xlu0 %v7451_v45, %s7883_s24  ;;  %7144 = vmatpush1.bf16.msra.mxu1 %v7014_v43  ;;  %v2766_v45 = vsel %vm1528_vm1, %v9342_v60, %v13502_v51  ;;  %v13511_v51 = vld [vmem:[#allocation49_spill] sm:$0xff] }
 0x389   : > { %7447 = vrot.lane.b32.xlu1 %v7446_v7, %s7879_s18  ;;  %7015 = vmatpush1.bf16.msra.mxu0 %v7014_v43  ;;  %v4398_v7 = vld [vmem:[%s13155_s3 + $0x70] sm:$0xff] }
 0x38a   : > { %7129 = vmatprep.subr.bf16.mxu1 %v13193_v17  ;;  %7016 = vmatprep.subr.bf16.mxu0 %v13193_v17  ;;  %v13503_v43 = vld [vmem:[#allocation51_spill] sm:$0xff]  ;;  %v7029_v20 = vpack.c.bf16 %v4399_v47, %v4398_v7  ;;  %v7768_v7 = vld [vmem:[#allocation2 + $0x42] sm:$0xff] }
 0x38b   : > { %v4403_v47 = vld [vmem:[%s13155_s3 + $0x98] sm:$0xff] }
 0x38c   : > { %7457 = vrot.lane.b32.xlu0 %v7456_v49, %s7882_s21  ;;  %7145 = vmatpush1.bf16.msra.mxu1 %v7017_v27  ;;  %v2795_v49 = vsel %vm419_vm0, %v2766_v45, %v13503_v43  ;;  %v1640_v43 = vld [vmem:[#allocation2 + $0xc0] sm:$0xff] }
 0x38d   : > { %1802 = vrot.lane.b32.xlu1 %v8961_v55, %s7878_s17  ;;  %7018 = vmatpush1.bf16.msra.mxu0 %v7017_v27  ;;  %v7020_v55 = vpack.c.bf16 %v4393_v33, %v4392_v40  ;;  %v13504_v27 = vld [vmem:[#allocation37_spill] sm:$0xff]  ;;  %v13505_v33 = vld [vmem:[#allocation48_spill] sm:$0xff] }
 0x38e   : > { %7130 = vmatprep.subr.bf16.mxu1 %v13193_v17  ;;  %7019 = vmatprep.subr.bf16.mxu0 %v13193_v17  ;;  %v2765_v40 = vsel %vm1528_vm1, %v9355_v6, %v13504_v27 }
 0x390   : > { %1804 = vrot.lane.b32.xlu0 %v8946_v0, %s7878_s17  ;;  %7146 = vmatpush1.bf16.msra.mxu1 %v7020_v55  ;;  %v4394_v0 = vld [vmem:[%s13155_s3 + $0x50] sm:$0xff] }
 0x391   : > { %1918 = vrot.lane.b32.xlu1 %v7763_v57, %s7879_s18  ;;  %7021 = vmatpush1.bf16.msra.mxu0 %v7020_v55  ;;  %v7023_v26 = vpack.c.bf16 %v4395_v21, %v4394_v0  ;;  %v2794_v57 = vsel %vm419_vm0, %v2765_v40, %v13505_v33  ;;  %v13506_v55 = vld [vmem:[#allocation44_spill] sm:$0xff]  ;;  %v9368_v0 = vpop.permute.xlu0 %2702  ;;  %v13507_v21 = vld [vmem:[#allocation25_spill] sm:$0xff] }
 0x392   : > { %7131 = vmatprep.subr.bf16.mxu1 %v13193_v17  ;;  %7022 = vmatprep.subr.bf16.mxu0 %v13193_v17  ;;  %v13513_v40 = vld [vmem:[#allocation45_spill] sm:$0xff] }
 0x394   : > { %7462 = vrot.lane.b32.xlu0 %v7461_v56, %s7879_s18  ;;  %7147 = vmatpush1.bf16.msra.mxu1 %v7023_v26  ;;  %v2824_v56 = vsel %vm2283_vm2, %v2795_v49, %v13506_v55  ;;  %v13514_v55 = vld [vmem:[#allocation7_spill] sm:$0xff] }
 0x395   : > { %2034 = vrot.lane.b32.xlu1 %v13501_v38, %s7880_s19  ;;  %7024 = vmatpush1.bf16.msra.mxu0 %v7023_v26  ;;  %v4400_v38 = vld [vmem:[%s13155_s3 + $0x80] sm:$0xff]  ;;  %v4401_v26 = vld [vmem:[%s13155_s3 + $0x88] sm:$0xff]  ;;  %v9407_v27 = vpop.permute.xlu0 %2704 }
 0x396   : > { %7132 = vmatprep.subr.bf16.mxu1 %v13193_v17  ;;  %7025 = vmatprep.subr.bf16.mxu0 %v13193_v17  ;;  %v7032_v14 = vpack.c.bf16 %v4401_v26, %v4400_v38  ;;  %v7769_v38 = vld [vmem:[#allocation2 + $0x49] sm:$0xff] }
 0x398   : > { %2152 = vrot.lane.b32.xlu0 %v7764_v35, %s7881_s20  ;;  %7148 = vmatpush1.bf16.msra.mxu1 %v7026_v16  ;;  %v9381_v35 = vsel %vm2313_vm3, %v2824_v56, %v9015_v18  ;;  %v4402_v18 = vld [vmem:[%s13155_s3 + $0x90] sm:$0xff] }
 0x399   : > { %2150 = vrot.lane.b32.xlu1 %v7765_v52, %s7881_s20  ;;  %7027 = vmatpush1.bf16.msra.mxu0 %v7026_v16  ;;  %13508 = vst [vmem:[#allocation27_spill] sm:$0xff] %v9381_v35  ;;  %v13510_v52 = vld [vmem:[#allocation38_spill] sm:$0xff]  ;;  %v7035_v49 = vpack.c.bf16 %v4403_v47, %v4402_v18  ;;  %v9440_v18 = vpop.permute.xlu0 %7372 }
 0x39a   : > { %7133 = vmatprep.subr.bf16.mxu1 %v13193_v17  ;;  %7028 = vmatprep.subr.bf16.mxu0 %v13193_v17  ;;  %v2823_v16 = vsel %vm2283_vm2, %v2794_v57, %v13510_v52  ;;  %v7466_v57 = vpack.i.bf16 %v9292_v54, %v9208_v2  ;;  %v4404_v2 = vld [vmem:[%s13155_s3 + $0xa0] sm:$0xff]  ;;  %v4405_v54 = vld [vmem:[%s13155_s3 + $0xa8] sm:$0xff]  ;;  %13518 = vst [vmem:[#allocation51_spill] sm:$0xff] %v9440_v18 }
 0x39b   : > { %v9390_v45 = vsel %vm2313_vm3, %v2823_v16, %v13511_v51  ;;  %v7038_v16 = vpack.c.bf16 %v4405_v54, %v4404_v2  ;;  %v13517_v51 = vld [vmem:[#allocation54_spill] sm:$0xff]  ;;  %v13526_v54 = vld [vmem:[#allocation60_spill] sm:$0xff] }
 0x39c   : > { %1922 = vrot.lane.b32.xlu0 %v7766_v19, %s7879_s18  ;;  %7149 = vmatpush1.bf16.msra.mxu1 %v7029_v20  ;;  %13512 = vst [vmem:[#allocation39_spill] sm:$0xff] %v9390_v45  ;;  %v3332_v19 = vrot.slane %v9381_v35, 4  ;;  %v13524_v2 = vld [vmem:[#allocation18_spill] sm:$0xff] }
 0x39d   : > { %1920 = vrot.lane.b32.xlu1 %v7767_v32, %s7879_s18  ;;  %7030 = vmatpush1.bf16.msra.mxu0 %v7029_v20  ;;  %v9404_v32 = vld [vmem:[#allocation3 + $0x90] sm:$0xff]  ;;  %v3330_v20 = vrot.slane %v9390_v45, 4 }
 0x39e   : > { %7134 = vmatprep.subr.bf16.mxu1 %v13193_v17  ;;  %7031 = vmatprep.subr.bf16.mxu0 %v13193_v17  ;;  %v2767_v33 = vsel %vm1528_vm1, %v9404_v32, %v13513_v40 }
 0x39f   : > { %v2796_v56 = vsel %vm419_vm0, %v2767_v33, %v9019_v59  ;;  %v9422_v26 = vsel %vm2887_vm4, %v3330_v20, %v3332_v19  ;;  %v13515_v59 = vld [vmem:[#allocation41_spill] sm:$0xff]  ;;  %v3331_v47 = vsel %vm2887_vm4, %v3328_v4, %v3330_v20  ;;  %v4406_v4 = vld [vmem:[%s13155_s3 + $0xb0] sm:$0xff]  ;;  %v4407_v20 = vld [vmem:[%s13155_s3 + $0xb8] sm:$0xff] }
 0x3a0   : > { %2038 = vrot.lane.b32.xlu0 %v13507_v21, %s7880_s19  ;;  %7150 = vmatpush1.bf16.msra.mxu1 %v7032_v14  ;;  %v1639_v21 = vld [vmem:[#allocation2 + $0xb8] sm:$0xff]  ;;  %v7471_v40 = vpack.i.bf16 %v9422_v26, %v3331_v47 }
 0x3a1   : > { %2036 = vrot.lane.b32.xlu1 %v13509_v1, %s7880_s19  ;;  %7033 = vmatpush1.bf16.msra.mxu0 %v7032_v14  ;;  %v13516_v1 = vld [vmem:[#allocation31_spill] sm:$0xff]  ;;  %v2248_v52 = vsel %vm1528_vm1, %v1639_v21, %v9033_v31  ;;  %v13520_v31 = vld [vmem:[#allocation8_spill] sm:$0xff] }
 0x3a2   : > { %7135 = vmatprep.subr.bf16.mxu1 %v13193_v17  ;;  %7034 = vmatprep.subr.bf16.mxu0 %v13193_v17  ;;  %v2768_v14 = vsel %vm1528_vm1, %v13516_v1, %v13515_v59  ;;  %v13523_v21 = vld [vmem:[#allocation23_spill] sm:$0xff]  ;;  %v7041_v1 = vpack.c.bf16 %v4407_v20, %v4406_v4  ;;  %v7476_v4 = vpack.i.bf16 %v9390_v45, %v9244_v10 }
 0x3a3   : > { %v7789_v45 = vld [vmem:[#allocation2 + $0x79] sm:$0xff] }
 0x3a4   : > { %2154 = vrot.lane.b32.xlu0 %v7768_v7, %s7881_s20  ;;  %7151 = vmatpush1.bf16.msra.mxu1 %v7035_v49  ;;  %v2797_v7 = vsel %vm419_vm0, %v2768_v14, %v13517_v51  ;;  %v13527_v14 = vld [vmem:[#allocation55_spill] sm:$0xff] }
 0x3a5   : > { %1806 = vrot.lane.b32.xlu1 %v8930_v50, %s7878_s17  ;;  %7036 = vmatpush1.bf16.msra.mxu0 %v7035_v49  ;;  %v2249_v50 = vsel %vm1528_vm1, %v1640_v43, %v13514_v55  ;;  %v13519_v43 = vld [vmem:[#allocation46_spill] sm:$0xff]  ;;  %v7796_v10 = vld [vmem:[#allocation3 + $0xd0] sm:$0xff] }
 0x3a6   : > { %7136 = vmatprep.subr.bf16.mxu1 %v13193_v17  ;;  %7037 = vmatprep.subr.bf16.mxu0 %v13193_v17  ;;  %v2825_v49 = vsel %vm2283_vm2, %v2796_v56, %v13519_v43  ;;  %v2278_v33 = vsel %vm419_vm0, %v2249_v50, %v13520_v31  ;;  %v13525_v50 = vld [vmem:[#allocation21_spill] sm:$0xff]  ;;  %v9482_v31 = vpop.permute.xlu0 %7377 }
 0x3a7   : > { %v2826_v56 = vsel %vm2283_vm2, %v2797_v7, %v13525_v50  ;;  %v13530_v7 = vld [vmem:[#allocation24_spill] sm:$0xff] }
 0x3a8   : > { %1924 = vrot.lane.b32.xlu0 %v7769_v38, %s7879_s18  ;;  %7152 = vmatpush1.bf16.msra.mxu1 %v7038_v16  ;;  %v2277_v38 = vsel %vm419_vm0, %v2248_v52, %v13523_v21  ;;  %v9473_v52 = vsel %vm2313_vm3, %v2826_v56, %v13527_v14  ;;  %v4412_v14 = vld [vmem:[%s13155_s3 + $0xe0] sm:$0xff] }
 0x3a9   : > { %7467 = vrot.lane.b32.xlu1 %v7466_v57, %s7883_s24  ;;  %7039 = vmatpush1.bf16.msra.mxu0 %v7038_v16  ;;  %v13521_v57 = vld [vmem:[#allocation59_spill] sm:$0xff]  ;;  %v2307_v59 = vsel %vm2283_vm2, %v2277_v38, %v13526_v54  ;;  %13528 = vst [vmem:[#allocation48_spill] sm:$0xff] %v9473_v52  ;;  %v13529_v16 = vld [vmem:[#allocation9_spill] sm:$0xff]  ;;  %v13532_v38 = vld [vmem:[#allocation10_spill] sm:$0xff] }
 0x3aa   : > { %v9452_v55 = vsel %vm2313_vm3, %v2825_v49, %v13521_v57  ;;  %7137 = vmatprep.subr.bf16.mxu1 %v13193_v17  ;;  %7040 = vmatprep.subr.bf16.mxu0 %v13193_v17  ;;  %v2308_v51 = vsel %vm2283_vm2, %v2278_v33, %v13529_v16  ;;  %v9480_v49 = vsel %vm2313_vm3, %v2307_v59, %v13530_v7  ;;  %v4409_v33 = vld [vmem:[%s13155_s3 + $0xc8] sm:$0xff]  ;;  %v13195_v57 = vrot.slane %v9473_v52, 4  ;;  %v9526_v54 = vpop.permute.xlu0 %2505 }
 0x3ab   : > { %13522 = vst [vmem:[#allocation37_spill] sm:$0xff] %v9452_v55  ;;  %v3334_v43 = vrot.slane %v9452_v55, 4  ;;  %13531 = vst [vmem:[#allocation44_spill] sm:$0xff] %v9480_v49  ;;  %v3060_v20 = vrot.slane %v9480_v49, 4  ;;  %v4413_v16 = vld [vmem:[%s13155_s3 + $0xe8] sm:$0xff] }
 0x3ac   : > { %2040 = vrot.lane.b32.xlu0 %v13524_v2, %s7880_s19  ;;  %7153 = vmatpush1.bf16.msra.mxu1 %v7041_v1  ;;  %v7481_v2 = vpack.i.bf16 %v3331_v47, %v9280_v36  ;;  %v4410_v36 = vld [vmem:[%s13155_s3 + $0xd0] sm:$0xff] }
 0x3ad   : > { %7472 = vrot.lane.b32.xlu1 %v7471_v40, %s7882_s21  ;;  %7042 = vmatpush1.bf16.msra.mxu0 %v7041_v1  ;;  %v4408_v40 = vld [vmem:[%s13155_s3 + $0xc0] sm:$0xff]  ;;  %v9508_v50 = vsel %vm2887_vm4, %v3332_v19, %v3334_v43  ;;  %v4411_v19 = vld [vmem:[%s13155_s3 + $0xd8] sm:$0xff] }
 0x3ae   : > { %7138 = vmatprep.subr.bf16.mxu1 %v13193_v17  ;;  %v7044_v21 = vpack.c.bf16 %v4409_v33, %v4408_v40  ;;  %7043 = vmatprep.subr.bf16.mxu0 %v13193_v17  ;;  %v7047_v56 = vpack.c.bf16 %v4411_v19, %v4410_v36  ;;  %v7050_v33 = vpack.c.bf16 %v4413_v16, %v4412_v14  ;;  %v4414_v36 = vld [vmem:[%s13155_s3 + $0xf0] sm:$0xff]  ;;  %v4415_v19 = vld [vmem:[%s13155_s3 + $0xf8] sm:$0xff] }
 0x3b0   : > { %1810 = vrot.lane.b32.xlu0 %v9157_v8, %s7878_s17  ;;  %v9499_v8 = vsel %vm2313_vm3, %v2308_v51, %v13532_v38  ;;  %7154 = vmatpush1.bf16.msra.mxu1 %v7044_v21  ;;  %v7770_v51 = vld [vmem:[#allocation2 + $0x4a] sm:$0xff]  ;;  %v13536_v38 = vrot.slane %v9031_v37, 4 }
 0x3b1   : > { %1808 = vrot.lane.b32.xlu1 %v9076_v9, %s7878_s17  ;;  %13533 = vst [vmem:[#allocation25_spill] sm:$0xff] %v9499_v8  ;;  %v9513_v9 = vsel %vm2887_vm4, %v3334_v43, %v13195_v57  ;;  %7045 = vmatpush1.bf16.msra.mxu0 %v7044_v21  ;;  %v3062_v47 = vrot.slane %v9499_v8, 4  ;;  %v13534_v43 = vld [vmem:[#allocation11_spill] sm:$0xff]  ;;  %v7491_v16 = vpack.i.bf16 %v9499_v8, %v9480_v49 }
 0x3b2   : > { %7139 = vmatprep.subr.bf16.mxu1 %v13193_v17  ;;  %7046 = vmatprep.subr.bf16.mxu0 %v13193_v17  ;;  %v7486_v59 = vpack.i.bf16 %v9513_v9, %v9508_v50  ;;  %v13535_v7 = vrot.slane %v13534_v43, 4 }
 0x3b3   : > { %v3063_v1 = vsel %vm2887_vm4, %v3060_v20, %v3062_v47 }
 0x3b4   : > { %7482 = vrot.lane.b32.xlu0 %v7481_v2, %s7883_s24  ;;  %7155 = vmatpush1.bf16.msra.mxu1 %v7047_v56  ;;  %v3065_v40 = vsel %vm2887_vm4, %v3062_v47, %v13535_v7  ;;  %v9547_v2 = vsel %vm2887_vm4, %v13536_v38, %v3060_v20  ;;  %v7771_v47 = vld [vmem:[#allocation2 + $0x51] sm:$0xff] }
 0x3b5   : > { %7477 = vrot.lane.b32.xlu1 %v7476_v4, %s7879_s18  ;;  %7048 = vmatpush1.bf16.msra.mxu0 %v7047_v56  ;;  %v7496_v21 = vpack.i.bf16 %v3065_v40, %v3063_v1  ;;  %13537 = vst [vmem:[#allocation17_spill] sm:$0xff] %v9547_v2  ;;  %v9549_v4 = vpop.permute.xlu0 %7397  ;;  %v7053_v56 = vpack.c.bf16 %v4415_v19, %v4414_v36  ;;  %v7772_v1 = vld [vmem:[#allocation3 + $0x51] sm:$0xff] }
 0x3b6   : > { %7140 = vmatprep.subr.bf16.mxu1 %v13193_v17  ;;  %7049 = vmatprep.subr.bf16.mxu0 %v13193_v17  ;;  %13538 = vst [vmem:[#allocation38_spill] sm:$0xff] %v9549_v4  ;;  %v7773_v40 = vld [vmem:[#allocation2 + $0x52] sm:$0xff]  ;;  %v7511_v36 = vpack.i.bf16 %v9452_v55, %v9381_v35 }
 0x3b8   : > { %7487 = vrot.lane.b32.xlu0 %v7486_v59, %s7882_s21  ;;  %7156 = vmatpush1.bf16.msra.mxu1 %v7050_v33  ;;  %v7501_v59 = vpack.i.bf16 %v3060_v20, %v9547_v2 }
 0x3b9   : > { %2156 = vrot.lane.b32.xlu1 %v7770_v51, %s7881_s20  ;;  %7051 = vmatpush1.bf16.msra.mxu0 %v7050_v33  ;;  %v9565_v14 = vpop.permute.xlu0 %2708  ;;  %v13539_v33 = vld [vmem:[#allocation32_spill] sm:$0xff] }
 0x3ba   : > { %7141 = vmatprep.subr.bf16.mxu1 %v13193_v17  ;;  %7052 = vmatprep.subr.bf16.mxu0 %v13193_v17 }
 0x3bc   : > { %7497 = vrot.lane.b32.xlu0 %v7496_v21, %s7882_s21  ;;  %7157 = vmatpush1.bf16.msra.mxu1 %v7053_v56  ;;  %v13540_v21 = vld [vmem:[#allocation34_spill] sm:$0xff] }
 0x3bd   : > { %1926 = vrot.lane.b32.xlu1 %v7771_v47, %s7879_s18  ;;  %7054 = vmatpush1.bf16.msra.mxu0 %v7053_v56  ;;  %v2770_v38 = vsel %vm1528_vm1, %v13540_v21, %v13539_v33 }
 0x3be   : > { %7055 = vmatprep.subr.bf16.mxu1 %v13193_v17  ;;  %v2799_v47 = vsel %vm419_vm0, %v2770_v38, %v9073_v58  ;;  %v13545_v17 = vld [vmem:[#allocation56_spill] sm:$0xff] }
 0x3bf   : > { %v7775_v58 = vld [vmem:[#allocation2 + $0x5a] sm:$0xff] }
 0x3c0   : > { %7502 = vrot.lane.b32.xlu0 %v7501_v59, %s7883_s24  ;;  %v7774_v59 = vld [vmem:[#allocation2 + $0x59] sm:$0xff] }
 0x3c1   : > { %2042 = vrot.lane.b32.xlu1 %v7772_v1, %s7880_s19  ;;  %v13543_v1 = vld [vmem:[#allocation29_spill] sm:$0xff] }
 0x3c3   : > { %v9569_v51 = vpop.permute.xlu1 %7387 }
 0x3c4   : > { %7507 = vrot.lane.b32.xlu0 %v9071_v30, %s7883_s24  ;;  %v7779_v30 = vld [vmem:[#allocation2 + $0x62] sm:$0xff] }
 0x3c5   : > { %7492 = vrot.lane.b32.xlu1 %v7491_v16, %s7879_s18 }
 0x3c6   : > { %v9574_v20 = vpop.permute.xlu0 %7402 }
 0x3c7   : > { %v9576_v7 = vpop.permute.xlu1 %7392 }
 0x3c8   : > { %1812 = vrot.lane.b32.xlu0 %v9144_v11, %s7878_s17  ;;  %v13542_v11 = vld [vmem:[#allocation22_spill] sm:$0xff] }
 0x3c9   : > { %2158 = vrot.lane.b32.xlu1 %v7773_v40, %s7881_s20  ;;  %v2769_v16 = vsel %vm1528_vm1, %v13543_v1, %v13542_v11  ;;  %v13544_v40 = vld [vmem:[#allocation33_spill] sm:$0xff] }
 0x3ca   : > { %v9586_v19 = vpop.permute.xlu0 %7407  ;;  %v2828_v33 = vsel %vm2283_vm2, %v2799_v47, %v13544_v40  ;;  %v2798_v57 = vsel %vm419_vm0, %v2769_v16, %v13545_v17  ;;  %v7777_v40 = vld [vmem:[#allocation2 + $0x61] sm:$0xff] }
 0x3cb   : > { %13541 = vst [vmem:[#allocation49_spill] sm:$0xff] %v9586_v19  ;;  %v2593_v56 = vpop.permute.xlu1 %2592  ;;  %v9606_v38 = vsel %vm2313_vm3, %v2828_v33, %v9407_v27 }
 0x3cc   : > { %7512 = vrot.lane.b32.xlu0 %v7511_v36, %s7879_s18  ;;  %13546 = vst [vmem:[#allocation45_spill] sm:$0xff] %v9606_v38  ;;  %v7776_v36 = vld [vmem:[#allocation3 + $0x59] sm:$0xff]  ;;  %v3340_v16 = vrot.slane %v9606_v38, 4 }
 0x3cd   : > { %1928 = vrot.lane.b32.xlu1 %v7774_v59, %s7879_s18  ;;  %v13547_v59 = vld [vmem:[#allocation30_spill] sm:$0xff] }
 0x3ce   : > { %v9597_v21 = vpop.permute.xlu0 %2710  ;;  %v2827_v47 = vsel %vm2283_vm2, %v2798_v57, %v13547_v59 }
 0x3cf   : > { %v9601_v29 = vpop.permute.xlu1 %2420  ;;  %v9615_v17 = vsel %vm2313_vm3, %v2827_v47, %v9368_v0  ;;  %v7516_v0 = vpack.i.bf16 %v9508_v50, %v9422_v26  ;;  %v13550_v50 = vld [vmem:[#allocation47_spill] sm:$0xff] }
 0x3d0   : > { %2160 = vrot.lane.b32.xlu0 %v7775_v58, %s7881_s20  ;;  %13548 = vst [vmem:[#allocation7_spill] sm:$0xff] %v9615_v17  ;;  %v3338_v27 = vrot.slane %v9615_v17, 4  ;;  %v7778_v58 = vld [vmem:[#allocation3 + $0x61] sm:$0xff] }
 0x3d1   : > { %2044 = vrot.lane.b32.xlu1 %v7776_v36, %s7880_s19 }
 0x3d2   : > { %v9611_v11 = vpop.permute.xlu0 %7412  ;;  %v9632_v36 = vsel %vm2887_vm4, %v3338_v27, %v3340_v16 }
 0x3d3   : > { %v9617_v1 = vpop.permute.xlu1 %2507 }
 0x3d4   : > { %1930 = vrot.lane.b32.xlu0 %v7777_v40, %s7879_s18 }
 0x3d5   : > { %1814 = vrot.lane.b32.xlu1 %v9142_v53, %s7878_s17  ;;  %v13549_v53 = vrot.slane %v9473_v52, 4 }
 0x3d6   : > { %v9624_v33 = vpop.permute.xlu0 %2596 }
 0x3d7   : > { %v9626_v57 = vpop.permute.xlu1 %2594  ;;  %v3339_v47 = vsel %vm2887_vm4, %v13549_v53, %v3338_v27  ;;  %v7781_v27 = vld [vmem:[#allocation3 + $0xb0] sm:$0xff]  ;;  %v13552_v53 = vld [vmem:[#allocation26_spill] sm:$0xff] }
 0x3d8   : > { %2046 = vrot.lane.b32.xlu0 %v7778_v58, %s7880_s19  ;;  %v7521_v8 = vpack.i.bf16 %v9632_v36, %v3339_v47  ;;  %v13551_v58 = vld [vmem:[#allocation36_spill] sm:$0xff]  ;;  %v2771_v2 = vsel %vm1528_vm1, %v7781_v27, %v13552_v53 }
 0x3d9   : > { %7517 = vrot.lane.b32.xlu1 %v7516_v0, %s7883_s24  ;;  %v2772_v0 = vsel %vm1528_vm1, %v13551_v58, %v13550_v50 }
 0x3da   : > { %v9635_v59 = vpop.permute.xlu0 %2424  ;;  %v2801_v49 = vsel %vm419_vm0, %v2772_v0, %v9526_v54  ;;  %v7526_v54 = vpack.i.bf16 %v9615_v17, %v9473_v52  ;;  %v7782_v0 = vld [vmem:[#allocation3 + $0x69] sm:$0xff] }
 0x3db   : > { %v2423_v40 = vpop.permute.xlu1 %2422 }
 0x3dc   : > { %2162 = vrot.lane.b32.xlu0 %v7779_v30, %s7881_s20  ;;  %v2830_v30 = vsel %vm2283_vm2, %v2801_v49, %v2593_v56  ;;  %v13555_v49 = vld [vmem:[#allocation28_spill] sm:$0xff] }
 0x3dd   : > { %7522 = vrot.lane.b32.xlu1 %v7521_v8, %s7882_s21  ;;  %v13553_v8 = vld [vmem:[#allocation61_spill] sm:$0xff] }
 0x3de   : > { %v9643_v26 = vpop.permute.xlu0 %2511  ;;  %v2800_v55 = vsel %vm419_vm0, %v2771_v2, %v13553_v8 }
 0x3df   : > { %v2510_v43 = vpop.permute.xlu1 %2509  ;;  %v2829_v56 = vsel %vm2283_vm2, %v2800_v55, %v13555_v49 }
 0x3e0   : > { %1932 = vrot.lane.b32.xlu0 %v7780_v12, %s7879_s18  ;;  %v9664_v12 = vsel %vm2313_vm3, %v2830_v30, %v9565_v14  ;;  %v7783_v30 = vld [vmem:[#allocation2 + $0x6a] sm:$0xff] }
 0x3e1   : > { %1816 = vrot.lane.b32.xlu1 %v9152_v22, %s7878_s17  ;;  %13554 = vst [vmem:[#allocation41_spill] sm:$0xff] %v9664_v12  ;;  %v9672_v22 = vsel %vm2313_vm3, %v2829_v56, %v9047_v63  ;;  %v9677_v27 = vrot.slane %v9664_v12, 4  ;;  %v7531_v63 = vpack.i.bf16 %v3339_v47, %v9513_v9  ;;  %v7785_v9 = vld [vmem:[#allocation3 + $0x71] sm:$0xff] }
 0x3e2   : > { %v9658_v50 = vpop.permute.xlu0 %2598  ;;  %13556 = vst [vmem:[#allocation31_spill] sm:$0xff] %v9672_v22  ;;  %v3342_v14 = vrot.slane %v9672_v22, 4 }
 0x3e3   : > { %v2713_v58 = vpop.permute.xlu1 %2712 }
 0x3e4   : > { %2048 = vrot.lane.b32.xlu0 %v7782_v0, %s7880_s19  ;;  %v7784_v0 = vld [vmem:[#allocation2 + $0x71] sm:$0xff] }
 0x3e5   : > { %7527 = vrot.lane.b32.xlu1 %v7526_v54, %s7879_s18  ;;  %v9692_v54 = vsel %vm2887_vm4, %v3342_v14, %v9677_v27 }
 0x3e6   : > { %v9674_v2 = vpop.permute.xlu0 %7427 }
 0x3e7   : > { %v9679_v53 = vpop.permute.xlu1 %7417 }
 0x3e8   : > { %1818 = vrot.lane.b32.xlu0 %v9228_v39, %s7878_s17  ;;  %v3343_v39 = vsel %vm2887_vm4, %v3340_v16, %v3342_v14  ;;  %v7787_v16 = vld [vmem:[#allocation3 + $0xc8] sm:$0xff] }
 0x3e9   : > { %2164 = vrot.lane.b32.xlu1 %v7783_v30, %s7881_s20  ;;  %v7536_v56 = vpack.i.bf16 %v9692_v54, %v3343_v39  ;;  %v2774_v14 = vsel %vm1528_vm1, %v7787_v16, %v2423_v40 }
 0x3ea   : > { %v9685_v55 = vpop.permute.xlu0 %7437 }
 0x3eb   : > { %13557 = vst [vmem:[#allocation54_spill] sm:$0xff] %v9685_v55  ;;  %v9688_v8 = vpop.permute.xlu1 %7422 }
 0x3ec   : > { %13558 = vst [vmem:[#allocation46_spill] sm:$0xff] %v9688_v8  ;;  %7532 = vrot.lane.b32.xlu0 %v7531_v63, %s7883_s24  ;;  %v7786_v63 = vld [vmem:[#allocation2 + $0x72] sm:$0xff] }
 0x3ed   : > { %1934 = vrot.lane.b32.xlu1 %v7784_v0, %s7879_s18 }
 0x3ee   : > { %v9697_v49 = vpop.permute.xlu0 %7442 }
 0x3ef   : > { %v9700_v30 = vpop.permute.xlu1 %2714 }
 0x3f0   : > { %7537 = vrot.lane.b32.xlu0 %v7536_v56, %s7882_s21  ;;  %v7541_v56 = vpack.i.bf16 %v9672_v22, %v9606_v38 }
 0x3f1   : > { %2050 = vrot.lane.b32.xlu1 %v7785_v9, %s7880_s19  ;;  %v7788_v9 = vld [vmem:[#allocation3 + $0xc0] sm:$0xff] }
 0x3f2   : > { %v9704_v47 = vpop.permute.xlu0 %2032  ;;  %v2773_v35 = vsel %vm1528_vm1, %v7788_v9, %v9601_v29  ;;  %v7790_v9 = vld [vmem:[#allocation2 + $0x7a] sm:$0xff] }
 0x3f3   : > { %v9706_v17 = vpop.permute.xlu1 %7432  ;;  %v2802_v40 = vsel %vm419_vm0, %v2773_v35, %v9617_v1 }
 0x3f4   : > { %1820 = vrot.lane.b32.xlu0 %v9222_v13, %s7878_s17  ;;  %v2803_v13 = vsel %vm419_vm0, %v2774_v14, %v2510_v43  ;;  %v2831_v22 = vsel %vm2283_vm2, %v2802_v40, %v9626_v57  ;;  %v7546_v40 = vpack.i.bf16 %v3343_v39, %v9632_v36 }
 0x3f5   : > { %2166 = vrot.lane.b32.xlu1 %v7786_v63, %s7881_s20  ;;  %v2832_v29 = vsel %vm2283_vm2, %v2803_v13, %v9624_v33  ;;  %v9740_v35 = vsel %vm2313_vm3, %v2831_v22, %v9597_v21 }
 0x3f6   : > { %v9712_v0 = vpop.permute.xlu0 %2148  ;;  %v9733_v43 = vsel %vm2313_vm3, %v2832_v29, %v2713_v58  ;;  %13561 = vst [vmem:[#allocation23_spill] sm:$0xff] %v9740_v35  ;;  %v3475_v33 = vrot.slane %v9740_v35, 4  ;;  %v7793_v29 = vld [vmem:[#allocation3 + $0x81] sm:$0xff] }
 0x3f7   : > { %v1801_v52 = vpop.permute.xlu1 %1800  ;;  %13559 = vst [vmem:[#allocation8_spill] sm:$0xff] %v9733_v43  ;;  %v13216_v57 = vrot.slane %v9733_v43, 4 }
 0x3f8   : > { %7542 = vrot.lane.b32.xlu0 %v7541_v56, %s7879_s18  ;;  %v7792_v56 = vld [vmem:[#allocation2 + $0x81] sm:$0xff] }
 0x3f9   : > { %1936 = vrot.lane.b32.xlu1 %v7789_v45, %s7879_s18  ;;  %v7791_v45 = vld [vmem:[#allocation3 + $0x79] sm:$0xff]  ;;  %v3478_v21 = vsel %vm2887_vm4, %v3475_v33, %v13216_v57 }
 0x3fa   : > { %v9721_v63 = vpop.permute.xlu0 %7452 }
 0x3fb   : > { %v9725_v16 = vpop.permute.xlu1 %7447 }
 0x3fc   : > { %2168 = vrot.lane.b32.xlu0 %v7790_v9, %s7881_s20  ;;  %v7449_v36 = vunpack.i.l.bf16 %v9725_v16 }
 0x3fd   : > { %2052 = vrot.lane.b32.xlu1 %v7791_v45, %s7880_s19 }
 0x3fe   : > { %v9736_v14 = vpop.permute.xlu0 %7457 }
 0x3ff   : > { %13560 = vst [vmem:[#allocation59_spill] sm:$0xff] %v9736_v14  ;;  %v1803_v1 = vpop.permute.xlu1 %1802 }
 0x400   : > { %1938 = vrot.lane.b32.xlu0 %v7792_v56, %s7879_s18  ;;  %v7794_v56 = vld [vmem:[#allocation2 + $0x82] sm:$0xff] }
 0x401   : > { %1822 = vrot.lane.b32.xlu1 %v9355_v6, %s7878_s17  ;;  %v3476_v6 = vsel %vm2887_vm4, %v9677_v27, %v3475_v33  ;;  %v2775_v33 = vsel %vm1528_vm1, %v7796_v10, %v9635_v59 }
 0x402   : > { %v1805_v58 = vpop.permute.xlu0 %1804  ;;  %v7551_v45 = vpack.i.bf16 %v3478_v21, %v3476_v6  ;;  %v1622_v6 = vld [vmem:[#allocation2 + $0x30] sm:$0xff] }
 0x403   : > { %v1919_v13 = vpop.permute.xlu1 %1918 }
 0x404   : > { %2054 = vrot.lane.b32.xlu0 %v7793_v29, %s7880_s19  ;;  %v1621_v29 = vld [vmem:[#allocation2 + $0x28] sm:$0xff] }
 0x405   : > { %7547 = vrot.lane.b32.xlu1 %v7546_v40, %s7883_s24  ;;  %v2230_v57 = vsel %vm1528_vm1, %v1621_v29, %v1801_v52  ;;  %v7795_v40 = vld [vmem:[#allocation2 + $0x89] sm:$0xff]  ;;  %v7556_v52 = vpack.i.bf16 %v9740_v35, %v9664_v12 }
 0x406   : > { %v9753_v22 = vpop.permute.xlu0 %7462  ;;  %v2259_v21 = vsel %vm419_vm0, %v2230_v57, %v7449_v36  ;;  %v1623_v36 = vld [vmem:[#allocation2 + $0x38] sm:$0xff]  ;;  %v13583_v12 = vld [vmem:[#allocation42_spill] sm:$0xff] }
 0x407   : > { %v2035_v9 = vpop.permute.xlu1 %2034 }
 0x408   : > { %2170 = vrot.lane.b32.xlu0 %v7794_v56, %s7881_s20  ;;  %v2231_v56 = vsel %vm1528_vm1, %v1622_v6, %v1803_v1  ;;  %v7797_v1 = vld [vmem:[#allocation3 + $0x89] sm:$0xff]  ;;  %v7445_v6 = vunpack.i.h.bf16 %v9697_v49 }
 0x409   : > { %7552 = vrot.lane.b32.xlu1 %v7551_v45, %s7882_s21  ;;  %v2804_v45 = vsel %vm419_vm0, %v2775_v33, %v9643_v26  ;;  %v2260_v10 = vsel %vm419_vm0, %v2231_v56, %v1919_v13  ;;  %v2232_v33 = vsel %vm1528_vm1, %v1623_v36, %v1805_v58  ;;  %v1620_v58 = vld [vmem:[#allocation2 + $0x20] sm:$0xff] }
 0x40a   : > { %v2153_v39 = vpop.permute.xlu0 %2152  ;;  %v2833_v29 = vsel %vm2283_vm2, %v2804_v45, %v9658_v50  ;;  %v2290_v26 = vsel %vm2283_vm2, %v2260_v10, %v2035_v9  ;;  %v13564_v50 = vld [vmem:[#allocation50_spill] sm:$0xff]  ;;  %v1624_v36 = vld [vmem:[#allocation2 + $0x40] sm:$0xff] }
 0x40b   : > { %v2151_v38 = vpop.permute.xlu1 %2150  ;;  %v9777_v57 = vsel %vm2313_vm3, %v2833_v29, %v9700_v30  ;;  %v7350_v13 = vunpack.i.h.bf16 %v13564_v50  ;;  %v7798_v29 = vld [vmem:[#allocation2 + $0x8a] sm:$0xff] }
 0x40c   : > { %1940 = vrot.lane.b32.xlu0 %v7795_v40, %s7879_s18  ;;  %13562 = vst [vmem:[#allocation18_spill] sm:$0xff] %v9777_v57  ;;  %v9784_v40 = vsel %vm2313_vm3, %v2290_v26, %v2151_v38 }
 0x40d   : > { %1824 = vrot.lane.b32.xlu1 %v9342_v60, %s7878_s17  ;;  %v2289_v60 = vsel %vm2283_vm2, %v2259_v21, %v9704_v47  ;;  %13563 = vst [vmem:[#allocation21_spill] sm:$0xff] %v9784_v40  ;;  %v3751_v47 = vrot.slane %v9777_v57, 4  ;;  %v9797_v38 = vrot.slane %v9784_v40, 4 }
 0x40e   : > { %v1923_v61 = vpop.permute.xlu0 %1922  ;;  %v9793_v9 = vsel %vm2313_vm3, %v2289_v60, %v9712_v0  ;;  %v2229_v0 = vsel %vm1528_vm1, %v1620_v58, %v7350_v13  ;;  %v7561_v60 = vpack.i.bf16 %v9677_v27, %v9692_v54 }
 0x40f   : > { %v1921_v59 = vpop.permute.xlu1 %1920  ;;  %13565 = vst [vmem:[#allocation60_spill] sm:$0xff] %v9793_v9  ;;  %13566 = vst [vmem:[#allocation55_spill] sm:$0xff] %v9797_v38  ;;  %v2895_v26 = vrot.slane %v9793_v9, 4  ;;  %v13585_v9 = vld [vmem:[#allocation20_spill] sm:$0xff] }
 0x410   : > { %2056 = vrot.lane.b32.xlu0 %v7797_v1, %s7880_s19  ;;  %v2261_v21 = vsel %vm419_vm0, %v2232_v33, %v1921_v59  ;;  %v2258_v1 = vsel %vm419_vm0, %v2229_v0, %v7445_v6  ;;  %v7799_v6 = vld [vmem:[#allocation2 + $0x91] sm:$0xff] }
 0x411   : > { %7557 = vrot.lane.b32.xlu1 %v7556_v52, %s7879_s18 }
 0x412   : > { %v2039_v30 = vpop.permute.xlu0 %2038 }
 0x413   : > { %v2037_v45 = vpop.permute.xlu1 %2036 }
 0x414   : > { %v2291_v56 = vsel %vm2283_vm2, %v2261_v21, %v2037_v45  ;;  %1826 = vrot.lane.b32.xlu0 %v9404_v32, %s7878_s17  ;;  %v13568_v32 = vrot.slane %v9733_v43, 4  ;;  %v13569_v21 = vld [vmem:[#allocation35_spill] sm:$0xff] }
 0x415   : > { %v9803_v52 = vsel %vm2313_vm3, %v2291_v56, %v2153_v39  ;;  %2172 = vrot.lane.b32.xlu1 %v7798_v29, %s7881_s20  ;;  %v7355_v45 = vunpack.i.h.bf16 %v13569_v21  ;;  %v9820_v56 = vsel %vm2887_vm4, %v2895_v26, %v9797_v38 }
 0x416   : > { %13567 = vst [vmem:[#allocation9_spill] sm:$0xff] %v9803_v52  ;;  %v2899_v10 = vrot.slane %v9803_v52, 4  ;;  %v2155_v59 = vpop.permute.xlu0 %2154  ;;  %v3752_v39 = vsel %vm2887_vm4, %v13568_v32, %v3751_v47  ;;  %13570 = vst [vmem:[#allocation24_spill] sm:$0xff] %v9820_v56 }
 0x417   : > { %v1807_v33 = vpop.permute.xlu1 %1806  ;;  %v2288_v29 = vsel %vm2283_vm2, %v2258_v1, %v7355_v45  ;;  %v7566_v0 = vpack.i.bf16 %v3751_v47, %v3752_v39  ;;  %v7801_v1 = vld [vmem:[#allocation2 + $0x9] sm:$0xff] }
 0x418   : > { %v2233_v13 = vsel %vm1528_vm1, %v1624_v36, %v1807_v33  ;;  %7562 = vrot.lane.b32.xlu0 %v7561_v60, %s7883_s24  ;;  %v9824_v27 = vsel %vm2887_vm4, %v9797_v38, %v2899_v10  ;;  %v7395_v36 = vunpack.i.h.bf16 %v9576_v7  ;;  %v7571_v47 = vpack.i.bf16 %v7801_v1, %v9733_v43  ;;  %v13578_v43 = vld [vmem:[#allocation19_spill] sm:$0xff] }
 0x419   : > { %13571 = vst [vmem:[#allocation10_spill] sm:$0xff] %v9824_v27  ;;  %v2262_v54 = vsel %vm419_vm0, %v2233_v13, %v1923_v61  ;;  %1942 = vrot.lane.b32.xlu1 %v7799_v6, %s7879_s18  ;;  %v7800_v13 = vld [vmem:[#allocation3 + $0x91] sm:$0xff]  ;;  %v7320_v35 = vunpack.i.h.bf16 %v13578_v43 }
 0x41a   : > { %v2292_v60 = vsel %vm2283_vm2, %v2262_v54, %v2039_v30  ;;  %v1925_v32 = vpop.permute.xlu0 %1924  ;;  %v9840_v61 = vsel %vm2313_vm3, %v2288_v29, %v7395_v36  ;;  %v7802_v54 = vld [vmem:[#allocation2 + $0x92] sm:$0xff] }
 0x41b   : > { %v9833_v33 = vpop.permute.xlu1 %7467  ;;  %v9836_v57 = vsel %vm2313_vm3, %v2292_v60, %v2155_v59  ;;  %13573 = vst [vmem:[#allocation34_spill] sm:$0xff] %v9840_v61  ;;  %v13222_v59 = vrot.slane %v9840_v61, 4 }
 0x41c   : > { %13572 = vst [vmem:[#allocation32_spill] sm:$0xff] %v9836_v57  ;;  %7567 = vrot.lane.b32.xlu0 %v7566_v0, %s7882_s21  ;;  %v2901_v39 = vrot.slane %v9836_v57, 4 }
 0x41d   : > { %2058 = vrot.lane.b32.xlu1 %v7800_v13, %s7880_s19  ;;  %v9855_v29 = vsel %vm2887_vm4, %v13222_v59, %v2895_v26  ;;  %v1625_v13 = vld [vmem:[#allocation2 + $0x48] sm:$0xff]  ;;  %v9877_v59 = vld [vmem:[#allocation3 + $0x8] sm:$0xff] }
 0x41e   : > { %v2041_v30 = vpop.permute.xlu0 %2040  ;;  %13575 = vst [vmem:[#allocation29_spill] sm:$0xff] %v9855_v29  ;;  %v7576_v60 = vpack.i.bf16 %v9820_v56, %v9855_v29  ;;  %v9860_v36 = vsel %vm2887_vm4, %v2899_v10, %v2901_v39  ;;  %v7330_v10 = vunpack.i.h.bf16 %v8711_v46  ;;  %v9903_v46 = vld [vmem:[#allocation3 + $0x11] sm:$0xff]  ;;  %v7345_v56 = vunpack.i.h.bf16 %v8734_v48 }
 0x41f   : > { %v9845_v45 = vpop.permute.xlu1 %7472  ;;  %13576 = vst [vmem:[#allocation33_spill] sm:$0xff] %v9860_v36  ;;  %v7581_v26 = vpack.i.bf16 %v9860_v36, %v9824_v27 }
 0x420   : > { %13574 = vst [vmem:[#allocation22_spill] sm:$0xff] %v9845_v45  ;;  %7572 = vrot.lane.b32.xlu0 %v7571_v47, %s7879_s18 }
 0x421   : > { %2174 = vrot.lane.b32.xlu1 %v7802_v54, %s7881_s20 }
 0x422   : > { %v9850_v6 = vpop.permute.xlu0 %1810 }
 0x423   : > { %v1809_v0 = vpop.permute.xlu1 %1808 }
 0x424   : > { %3130 = vrot.lane.b32.xlu0 %v9784_v40, %s7881_s20  ;;  %v2234_v1 = vsel %vm1528_vm1, %v1625_v13, %v1809_v0  ;;  %v7370_v40 = vunpack.i.h.bf16 %v8854_v23 }
 0x425   : > { %7577 = vrot.lane.b32.xlu1 %v7576_v60, %s7882_s21  ;;  %v2263_v58 = vsel %vm419_vm0, %v2234_v1, %v1925_v32  ;;  %v2750_v32 = vsel %vm1528_vm1, %v9877_v59, %v7330_v10  ;;  %v7349_v1 = vunpack.i.l.bf16 %v13564_v50  ;;  %v7374_v10 = vunpack.i.l.bf16 %v9440_v18  ;;  %v9901_v50 = vld [vmem:[#allocation3 + $0x9] sm:$0xff] }
 0x426   : > { %v9866_v47 = vpop.permute.xlu0 %7482  ;;  %v2293_v13 = vsel %vm2283_vm2, %v2263_v58, %v2041_v30  ;;  %v9894_v58 = vld [vmem:[#allocation3 + $0x10] sm:$0xff]  ;;  %v13579_v30 = vld [vmem:[#allocation57_spill] sm:$0xff] }
 0x427   : > { %v9870_v54 = vpop.permute.xlu1 %7477 }
 0x428   : > { %7582 = vrot.lane.b32.xlu0 %v7581_v26, %s7882_s21  ;;  %v1635_v26 = vld [vmem:[#allocation2 + $0x98] sm:$0xff] }
 0x429   : > { %3132 = vrot.lane.b32.xlu1 %v9803_v52, %s7881_s20 }
 0x42a   : > { %v9879_v0 = vpop.permute.xlu0 %7487 }
 0x42b   : > { %13577 = vst [vmem:[#allocation56_spill] sm:$0xff] %v9879_v0  ;;  %v2157_v60 = vpop.permute.xlu1 %2156 }
 0x42c   : > { %v9883_v38 = vsel %vm2313_vm3, %v2293_v13, %v2157_v60  ;;  %v2244_v60 = vsel %vm1528_vm1, %v1635_v26, %v13579_v30  ;;  %v2779_v30 = vsel %vm419_vm0, %v2750_v32, %v7320_v35  ;;  %v13243_v35 = vunpack.i.h.bf16 %v9440_v18 }
 0x42d   : > { %3136 = vrot.lane.b32.xlu0 %v9883_v38, %s7881_s20  ;;  %3134 = vrot.lane.b32.xlu1 %v9836_v57, %s7881_s20  ;;  %v7319_v57 = vunpack.i.l.bf16 %v13578_v43  ;;  %v13581_v52 = vrot.slane %v9883_v38, 4  ;;  %v2751_v43 = vsel %vm1528_vm1, %v9894_v58, %v7349_v1  ;;  %v2273_v48 = vsel %vm419_vm0, %v2244_v60, %v13583_v12 }
 0x42e   : > { %v9899_v13 = vpop.permute.xlu0 %7497  ;;  %v2780_v23 = vsel %vm419_vm0, %v2751_v43, %v7374_v10  ;;  %v7389_v32 = vunpack.i.l.bf16 %v9569_v51  ;;  %v2808_v12 = vsel %vm2283_vm2, %v2779_v30, %v7345_v56  ;;  %v7354_v60 = vunpack.i.l.bf16 %v13569_v21  ;;  %v1626_v30 = vld [vmem:[#allocation2 + $0x50] sm:$0xff] }
 0x42f   : > { %13580 = vst [vmem:[#allocation30_spill] sm:$0xff] %v9899_v13  ;;  %v1927_v27 = vpop.permute.xlu1 %1926  ;;  %v9912_v26 = vsel %vm2887_vm4, %v2901_v39, %v13581_v52  ;;  %v13584_v52 = vld [vmem:[#allocation58_spill] sm:$0xff]  ;;  %v9936_v5 = vsel %vm2313_vm3, %v2808_v12, %v7370_v40  ;;  %v13586_v10 = vunpack.i.h.bf16 %v9482_v31  ;;  %v13589_v40 = vunpack.i.h.bf16 %v9549_v4 }
 0x430   : > { %13582 = vst [vmem:[#allocation47_spill] sm:$0xff] %v9912_v26  ;;  %v2303_v39 = vsel %vm2283_vm2, %v2273_v48, %v13584_v52  ;;  %v13247_v48 = vunpack.i.l.bf16 %v9482_v31  ;;  %v13587_v52 = vld [vmem:[#allocation43_spill] sm:$0xff]  ;;  %v2809_v21 = vsel %vm2283_vm2, %v2780_v23, %v7354_v60  ;;  %v7385_v1 = vunpack.i.h.bf16 %v9081_v24 }
 0x431   : > { %v3773_v43 = vsel %vm419_vm0, %v13586_v10, %v13243_v35  ;;  %v9946_v36 = vsel %vm2313_vm3, %v2303_v39, %v13587_v52  ;;  %v2235_v39 = vsel %vm1528_vm1, %v1626_v30, %v9850_v6  ;;  %v7591_v35 = vpack.i.bf16 %v9894_v58, %v9877_v59  ;;  %v13591_v58 = vld [vmem:[#allocation62_spill] sm:$0xff] }
 0x432   : > { %v9929_v29 = vpop.permute.xlu0 %7502  ;;  %13588 = vst [vmem:[#allocation36_spill] sm:$0xff] %v9946_v36  ;;  %v9953_v12 = vsel %vm3236_vm6, %v3773_v43, %v13589_v40  ;;  %v3629_v10 = vsel %vm419_vm0, %v13247_v48, %v7389_v32  ;;  %v2264_v48 = vsel %vm419_vm0, %v2235_v39, %v1927_v27  ;;  %v13595_v39 = vunpack.i.h.bf16 %v9899_v13 }
 0x433   : > { %v2043_v61 = vpop.permute.xlu1 %2042  ;;  %v7505_v24 = vunpack.i.h.bf16 %v9929_v29  ;;  %v7504_v18 = vunpack.i.l.bf16 %v9929_v29  ;;  %v13603_v41 = vrot.slane %v9883_v38, 4 }
 0x436   : > { %v7508_v52 = vpop.permute.xlu0 %7507 }
 0x437   : > { %v7510_v56 = vunpack.i.h.bf16 %v7508_v52  ;;  %v7509_v43 = vunpack.i.l.bf16 %v7508_v52  ;;  %v7493_v40 = vpop.permute.xlu1 %7492  ;;  %v2294_v52 = vsel %vm2283_vm2, %v2264_v48, %v2043_v61  ;;  %v4416_v48 = vld [vmem:[%s13155_s3 + $0x100] sm:$0xff]  ;;  %v7390_v61 = vunpack.i.h.bf16 %v9569_v51 }
 0x438   : > { %v7495_v3 = vunpack.i.h.bf16 %v7493_v40  ;;  %v7494_v32 = vunpack.i.l.bf16 %v7493_v40  ;;  %v13593_v40 = vunpack.i.l.bf16 %v9899_v13 }
 0x439   : > { %v3234_v6 = vsel %vm419_vm0, %v7509_v43, %v7385_v1  ;;  %v9971_v59 = vsel %vm3193_vm7, %v9946_v36, %v7509_v43  ;;  %v9975_v30 = vsel %vm3193_vm7, %v13591_v58, %v7510_v56  ;;  %v7394_v58 = vunpack.i.l.bf16 %v9576_v7  ;;  %v13600_v36 = vld [vmem:[#allocation63_spill] sm:$0xff] }
 0x43a   : > { %13590 = vst [vmem:[#allocation26_spill] sm:$0xff] %v9971_v59  ;;  %13592 = vst [vmem:[#allocation61_spill] sm:$0xff] %v9975_v30  ;;  %v3728_v23 = vsel %vm419_vm0, %v7504_v18, %v7495_v3  ;;  %v1813_v60 = vpop.permute.xlu0 %1812  ;;  %v3235_v29 = vsel %vm419_vm0, %v7510_v56, %v7494_v32  ;;  %v9983_v27 = vsel %vm3236_vm6, %v3234_v6, %v13593_v40  ;;  %v3996_v3 = vrot.slane %v9975_v30, 4  ;;  %v4417_v56 = vld [vmem:[%s13155_s3 + $0x108] sm:$0xff] }
 0x43b   : > { %13594 = vst [vmem:[#allocation28_spill] sm:$0xff] %v9983_v27  ;;  %v2159_v1 = vpop.permute.xlu1 %2158  ;;  %v9988_v43 = vsel %vm3236_vm6, %v3235_v29, %v13595_v39  ;;  %v3729_v32 = vsel %vm419_vm0, %v7505_v24, %v7319_v57  ;;  %v13597_v40 = vunpack.i.l.bf16 %v13585_v9  ;;  %v7404_v57 = vunpack.i.l.bf16 %v9574_v20 }
 0x43c   : > { %13596 = vst [vmem:[#allocation50_spill] sm:$0xff] %v9988_v43  ;;  %v10001_v6 = vsel %vm2313_vm3, %v2294_v52, %v2159_v1  ;;  %v3998_v29 = vrot.slane %v9988_v43, 4  ;;  %v13599_v1 = vrot.slane %v9983_v27, 4  ;;  %v7056_v51 = vpack.c.bf16 %v4417_v56, %v4416_v48  ;;  %v4419_v56 = vld [vmem:[%s13155_s3 + $0x118] sm:$0xff] }
 0x43d   : > { %v3731_v39 = vsel %vm3236_vm6, %v3728_v23, %v13597_v40  ;;  %3138 = vrot.lane.b32.xlu0 %v10001_v6, %s7881_s20  ;;  %v3725_v23 = vsel %vm3193_vm7, %v13600_v36, %v7504_v18  ;;  %v13601_v7 = vrot.slane %v9971_v59, 4  ;;  %v13604_v27 = vunpack.i.h.bf16 %v13585_v9  ;;  %v1627_v9 = vld [vmem:[#allocation2 + $0x58] sm:$0xff] }
 0x43e   : > { %v4006_v13 = vrot.slane %v3731_v39, 4  ;;  %v10013_v52 = vpop.permute.xlu0 %7512  ;;  %v3999_v43 = vsel %vm2887_vm4, %v13599_v1, %v3998_v29  ;;  %v13602_v39 = vrot.slane %v10001_v6, 4  ;;  %v13605_v18 = vunpack.i.l.bf16 %v9549_v4 }
 0x43f   : > { %13598 = vst [vmem:[#allocation35_spill] sm:$0xff] %v10013_v52  ;;  %v1929_v40 = vpop.permute.xlu1 %1928  ;;  %4966 = vmatprep.mubr.f32.mxu1 %v3999_v43  ;;  %v3997_v30 = vsel %vm2887_vm4, %v13601_v7, %v3996_v3  ;;  %v3732_v1 = vsel %vm3236_vm6, %v3729_v32, %v13604_v27  ;;  %v4418_v43 = vld [vmem:[%s13155_s3 + $0x110] sm:$0xff]  ;;  %v7405_v32 = vunpack.i.h.bf16 %v9574_v20 }
 0x440   : > { %v10028_v52 = vsel %vm2887_vm4, %v13603_v41, %v13602_v39  ;;  %v10036_v48 = vsel %vm3236_vm6, %v3629_v10, %v13605_v18  ;;  %v7414_v41 = vunpack.i.l.bf16 %v9611_v11  ;;  %4967 = vmatmul.mubr.f32.vlgmr.msra.gmra.mrb[0].mxu1 %v3997_v30  ;;  %v4007_v7 = vsel %vm2887_vm4, %v3998_v29, %v4006_v13 }
 0x441   : > { %13606 = vst [vmem:[#allocation19_spill] sm:$0xff] %v10036_v48  ;;  %v7586_v27 = vpack.i.bf16 %v10028_v52, %v9912_v26  ;;  %v3726_v10 = vsel %vm3193_vm7, %v9031_v37, %v7505_v24  ;;  %v10052_v39 = vsel %vm2313_vm3, %v2809_v21, %v7394_v58  ;;  %4971 = vmatprep.mubr.f32.mxu1 %v4007_v7  ;;  %v4004_v30 = vrot.slane %v3725_v23, 4 }
 0x442   : > { %7592 = vrot.lane.b32.xlu0 %v7591_v35, %s7878_s17  ;;  %v2236_v29 = vsel %vm1528_vm1, %v1627_v9, %v1813_v60  ;;  %v2161_v59 = vpop.permute.xlu0 %2160  ;;  %v4014_v4 = vrot.slane %v3732_v1, 4  ;;  %v4153_v24 = vrot.slane %v10036_v48, 4  ;;  %7057 = vmatpush1.bf16.msra.mxu1 %v7056_v51  ;;  %v7059_v20 = vpack.c.bf16 %v4419_v56, %v4418_v43  ;;  %v4420_v9 = vld [vmem:[%s13155_s3 + $0x120] sm:$0xff]  ;;  %v4421_v60 = vld [vmem:[%s13155_s3 + $0x128] sm:$0xff] }
 0x443   : > { %7587 = vrot.lane.b32.xlu1 %v7586_v27, %s7882_s21  ;;  %v3630_v21 = vsel %vm419_vm0, %v7404_v57, %v7390_v61  ;;  %v2265_v58 = vsel %vm419_vm0, %v2236_v29, %v1929_v40  ;;  %v2045_v18 = vpop.permute.xlu1 %2044  ;;  %v4005_v7 = vsel %vm2887_vm4, %v3996_v3, %v4004_v30  ;;  %v4012_v26 = vrot.slane %v3726_v10, 4  ;;  %v1628_v29 = vld [vmem:[#allocation2 + $0x60] sm:$0xff] }
 0x444   : > { %v13607_v35 = vmov 0.0|0.0   ;;  %v3631_v23 = vsel %vm419_vm0, %v7405_v32, %v7414_v41  ;;  %v2295_v61 = vsel %vm2283_vm2, %v2265_v58, %v2045_v18  ;;  %4972 = vmatmul.mubr.f32.gmra.mrb[2].mxu1 %v4005_v7  ;;  %v4015_v51 = vsel %vm2887_vm4, %v4006_v13, %v4014_v4 }
 0x445   : > { %7058 = vmatprep.subr.bf16.mxu1 %v13607_v35  ;;  %v13608_v3 = vunpack.i.l.bf16 %v9482_v31  ;;  %v13265_v1 = vunpack.i.h.bf16 %v9586_v19  ;;  %4976 = vmatprep.mubr.f32.mxu1 %v4015_v51  ;;  %v13610_v43 = vpack.i.bf16 %v9903_v46, %v9901_v50  ;;  %v10084_v56 = vsel %vm2313_vm3, %v2295_v61, %v2161_v59  ;;  %v13614_v50 = vld [vmem:[#allocation52_spill] sm:$0xff] }
 0x446   : > { %v4152_v41 = vrot.slane %v9953_v12, 4  ;;  %v13611_v4 = vunpack.i.l.bf16 %v9586_v19  ;;  %v1931_v27 = vpop.permute.xlu0 %1930  ;;  %v13266_v10 = vrot.slane %v10084_v56, 4  ;;  %v13613_v18 = vunpack.i.h.bf16 %v9482_v31  ;;  %7060 = vmatpush1.bf16.msra.mxu1 %v7059_v20 }
 0x447   : > { %v10076_v40 = vsel %vm3193_vm7, %v10052_v39, %v13608_v3  ;;  %7602 = vrot.lane.b32.xlu0 %v13610_v43, %s7880_s19  ;;  %3140 = vrot.lane.b32.xlu1 %v10084_v56, %s7881_s20  ;;  %v10101_v59 = vsel %vm3193_vm7, %v13614_v50, %v7404_v57  ;;  %v7062_v12 = vpack.c.bf16 %v4421_v60, %v4420_v9  ;;  %v4422_v57 = vld [vmem:[%s13155_s3 + $0x130] sm:$0xff]  ;;  %v13617_v60 = vrot.slane %v10001_v6, 4  ;;  %v13618_v3 = vld [vmem:[#allocation16_spill] sm:$0xff]  ;;  %v13619_v43 = vld [vmem:[#allocation13_spill] sm:$0xff] }
 0x448   : > { %13609 = vst [vmem:[#allocation57_spill] sm:$0xff] %v10076_v40  ;;  %v10090_v13 = vsel %vm3236_vm6, %v3630_v21, %v13611_v4  ;;  %v3770_v46 = vsel %vm3193_vm7, %v9936_v5, %v13613_v18  ;;  %13615 = vst [vmem:[#allocation58_spill] sm:$0xff] %v10101_v59  ;;  %v1815_v21 = vpop.permute.xlu1 %1814  ;;  %v4013_v58 = vsel %vm2887_vm4, %v4004_v30, %v4012_v26  ;;  %v4150_v61 = vrot.slane %v10076_v40, 4  ;;  %v4423_v26 = vld [vmem:[%s13155_s3 + $0x138] sm:$0xff] }
 0x449   : > { %13612 = vst [vmem:[#allocation42_spill] sm:$0xff] %v10090_v13  ;;  %v4154_v7 = vsel %vm2887_vm4, %v4152_v41, %v4153_v24  ;;  %v10111_v31 = vsel %vm3236_vm6, %v3631_v23, %v13265_v1  ;;  %7061 = vmatprep.subr.bf16.mxu1 %v13607_v35  ;;  %v7419_v30 = vunpack.i.l.bf16 %v9679_v53  ;;  %v2237_v20 = vsel %vm1528_vm1, %v1628_v29, %v1815_v21  ;;  %v13623_v1 = vld [vmem:[#allocation14_spill] sm:$0xff] }
 0x44a   : > { %13616 = vst [vmem:[#allocation43_spill] sm:$0xff] %v10111_v31  ;;  %4977 = vmatmul.mubr.f32.gmra.mrb[4].mxu1 %v4013_v58  ;;  %v4163_v9 = vrot.slane %v10090_v13, 4  ;;  %v10128_v23 = vsel %vm2887_vm4, %v13617_v60, %v13266_v10  ;;  %v13268_v51 = vunpack.i.l.bf16 %v9688_v8  ;;  %v13620_v41 = vpack.i.bf16 %v13618_v3, %v13619_v43  ;;  %v2047_v58 = vpop.permute.xlu0 %2046  ;;  %v13622_v60 = vld [vmem:[#allocation15_spill] sm:$0xff] }
 0x44b   : > { %4981 = vmatprep.mubr.f32.mxu1 %v4154_v7  ;;  %v4149_v4 = vrot.slane %v3770_v46, 4  ;;  %v10137_v18 = vsel %vm3193_vm7, %v8936_v28, %v7405_v32  ;;  %v7415_v21 = vunpack.i.h.bf16 %v9611_v11  ;;  %v13624_v7 = vpack.i.bf16 %v13622_v60, %v13623_v1  ;;  %7063 = vmatpush1.bf16.msra.mxu1 %v7062_v12  ;;  %v4424_v1 = vld [vmem:[%s13155_s3 + $0x140] sm:$0xff]  ;;  %v4425_v12 = vld [vmem:[%s13155_s3 + $0x148] sm:$0xff] }
 0x44c   : > { %7607 = vrot.lane.b32.xlu0 %v13620_v41, %s7881_s20  ;;  %13621 = vst [vmem:[#allocation63_spill] sm:$0xff] %v10137_v18  ;;  %v4161_v10 = vrot.slane %v10101_v59, 4  ;;  %v4171_v3 = vrot.slane %v10111_v31, 4  ;;  %v7065_v46 = vpack.c.bf16 %v4423_v26, %v4422_v57  ;;  %v7429_v28 = vunpack.i.l.bf16 %v9674_v2  ;;  %v10151_v41 = vpop.permute.xlu1 %7517  ;;  %7064 = vmatprep.subr.bf16.mxu1 %v13607_v35 }
 0x44d   : > { %7597 = vrot.lane.b32.xlu1 %v13624_v7, %s7879_s18  ;;  %v7420_v32 = vunpack.i.h.bf16 %v9679_v53  ;;  %v2266_v43 = vsel %vm419_vm0, %v2237_v20, %v1931_v27  ;;  %v4151_v11 = vsel %vm2887_vm4, %v4149_v4, %v4150_v61  ;;  %v3632_v57 = vsel %vm419_vm0, %v7419_v30, %v7415_v21  ;;  %v7805_v7 = vld [vmem:[#allocation3 + $0x18] sm:$0xff] }
 0x44e   : > { %v13267_v53 = vunpack.i.h.bf16 %v9688_v8  ;;  %4982 = vmatmul.mubr.f32.gmra.mrb[6].mxu1 %v4151_v11  ;;  %v4164_v27 = vsel %vm2887_vm4, %v4153_v24, %v4163_v9  ;;  %v13270_v26 = vunpack.i.l.bf16 %v9706_v17  ;;  %v4162_v20 = vsel %vm2887_vm4, %v4150_v61, %v4161_v10  ;;  %v2163_v21 = vpop.permute.xlu0 %2162 }
 0x44f   : > { %4986 = vmatprep.mubr.f32.mxu1 %v4164_v27  ;;  %v10171_v4 = vsel %vm3236_vm6, %v3632_v57, %v13268_v51  ;;  %v2296_v60 = vsel %vm2283_vm2, %v2266_v43, %v2047_v58  ;;  %v4172_v24 = vsel %vm2887_vm4, %v4163_v9, %v4171_v3  ;;  %v4169_v11 = vrot.slane %v10137_v18, 4  ;;  %7066 = vmatpush1.bf16.msra.mxu1 %v7065_v46  ;;  %v4426_v9 = vld [vmem:[%s13155_s3 + $0x150] sm:$0xff] }
 0x450   : > { %13625 = vst [vmem:[#allocation52_spill] sm:$0xff] %v10171_v4  ;;  %v7068_v27 = vpack.c.bf16 %v4425_v12, %v4424_v1  ;;  %v7430_v61 = vunpack.i.h.bf16 %v9674_v2  ;;  %v3633_v29 = vsel %vm419_vm0, %v7420_v32, %v7429_v28  ;;  %v10182_v57 = vsel %vm2313_vm3, %v2296_v60, %v2163_v21  ;;  %v10184_v58 = vpop.permute.xlu1 %7522  ;;  %7067 = vmatprep.subr.bf16.mxu1 %v13607_v35  ;;  %v4427_v2 = vld [vmem:[%s13155_s3 + $0x158] sm:$0xff] }
 0x451   : > { %1796 = vrot.lane.b32.xlu1 %v7805_v7, %s7878_s17  ;;  %13626 = vst [vmem:[#allocation16_spill] sm:$0xff] %v10184_v58  ;;  %v10188_v43 = vsel %vm3193_vm7, %v9101_v62, %v7419_v30  ;;  %v13273_v46 = vunpack.i.h.bf16 %v9706_v17  ;;  %v13269_v28 = vrot.slane %v10182_v57, 4  ;;  %3142 = vrot.lane.b32.xlu0 %v10182_v57, %s7881_s20  ;;  %v4179_v62 = vrot.slane %v10171_v4, 4 }
 0x452   : > { %13627 = vst [vmem:[#allocation13_spill] sm:$0xff] %v10188_v43  ;;  %4987 = vmatmul.mubr.f32.gmra.mrb[8].mxu1 %v4162_v20  ;;  %v10205_v30 = vsel %vm3236_vm6, %v3633_v29, %v13267_v53  ;;  %v3634_v12 = vsel %vm419_vm0, %v13270_v26, %v7430_v61  ;;  %v7444_v60 = vunpack.i.l.bf16 %v9697_v49  ;;  %v1933_v20 = vpop.permute.xlu0 %1932  ;;  %v13629_v21 = vrot.slane %v10084_v56, 4 }
 0x453   : > { %13628 = vst [vmem:[#allocation15_spill] sm:$0xff] %v10205_v30  ;;  %4991 = vmatprep.mubr.f32.mxu1 %v4172_v24  ;;  %v4177_v29 = vrot.slane %v10188_v43, 4  ;;  %7069 = vmatpush1.bf16.msra.mxu1 %v7068_v27  ;;  %v7071_v53 = vpack.c.bf16 %v4427_v2, %v4426_v9  ;;  %v4170_v1 = vsel %vm2887_vm4, %v4161_v10, %v4169_v11  ;;  %v4187_v49 = vrot.slane %v10205_v30, 4  ;;  %v4429_v27 = vld [vmem:[%s13155_s3 + $0x168] sm:$0xff]  ;;  %v7806_v2 = vld [vmem:[#allocation2 + $0x1a] sm:$0xff] }
 0x454   : > { %v10217_v7 = vsel %vm2887_vm4, %v13629_v21, %v13269_v28  ;;  %v1817_v51 = vpop.permute.xlu1 %1816  ;;  %v10226_v61 = vsel %vm3193_vm7, %v8986_v42, %v7420_v32  ;;  %7070 = vmatprep.subr.bf16.mxu1 %v13607_v35  ;;  %v4428_v21 = vld [vmem:[%s13155_s3 + $0x160] sm:$0xff]  ;;  %v3635_v10 = vsel %vm419_vm0, %v13273_v46, %v7444_v60  ;;  %v1629_v9 = vld [vmem:[#allocation2 + $0x68] sm:$0xff]  ;;  %v4180_v32 = vsel %vm2887_vm4, %v4171_v3, %v4179_v62 }
 0x455   : > { %v7611_v24 = vpack.i.bf16 %v10217_v7, %v10128_v23  ;;  %13630 = vst [vmem:[#allocation14_spill] sm:$0xff] %v10226_v61  ;;  %2144 = vrot.lane.b32.xlu0 %v7806_v2, %s7881_s20  ;;  %v13631_v28 = vunpack.i.l.bf16 %v9685_v55  ;;  %v13275_v30 = vunpack.i.h.bf16 %v9685_v55  ;;  %v2238_v43 = vsel %vm1528_vm1, %v1629_v9, %v1817_v51 }
 0x456   : > { %4992 = vmatmul.mubr.f32.gmra.mrb[10].mxu1 %v4170_v1  ;;  %v2049_v1 = vpop.permute.xlu0 %2048  ;;  %v4178_v60 = vsel %vm2887_vm4, %v4169_v11, %v4177_v29  ;;  %v4185_v2 = vrot.slane %v10226_v61, 4  ;;  %v7074_v46 = vpack.c.bf16 %v4429_v27, %v4428_v21  ;;  %v4188_v4 = vsel %vm2887_vm4, %v4179_v62, %v4187_v49  ;;  %v4431_v62 = vld [vmem:[%s13155_s3 + $0x178] sm:$0xff] }
 0x457   : > { %v10245_v26 = vsel %vm3236_vm6, %v3634_v12, %v13631_v28  ;;  %4996 = vmatprep.mubr.f32.mxu1 %v4180_v32  ;;  %7612 = vrot.lane.b32.xlu1 %v7611_v24, %s7882_s21  ;;  %v13633_v12 = vunpack.i.l.bf16 %v9706_v17  ;;  %v10265_v11 = vsel %vm3236_vm6, %v3635_v10, %v13275_v30  ;;  %v7454_v24 = vunpack.i.l.bf16 %v9721_v63  ;;  %v7807_v32 = vld [vmem:[#allocation3 + $0x19] sm:$0xff] }
 0x458   : > { %13632 = vst [vmem:[#allocation71_spill] sm:$0xff] %v10245_v26  ;;  %7072 = vmatpush1.bf16.msra.mxu1 %v7071_v53  ;;  %v10252_v3 = vpop.permute.xlu1 %7527  ;;  %v4195_v28 = vrot.slane %v10245_v26, 4  ;;  %13635 = vst [vmem:[#allocation73_spill] sm:$0xff] %v10265_v11  ;;  %v4430_v53 = vld [vmem:[%s13155_s3 + $0x170] sm:$0xff]  ;;  %v7450_v21 = vunpack.i.h.bf16 %v9725_v16  ;;  %v7464_v27 = vunpack.i.l.bf16 %v9753_v22  ;;  %v2267_v9 = vsel %vm419_vm0, %v2238_v43, %v1933_v20 }
 0x459   : > { %v10260_v51 = vsel %vm3193_vm7, %v8980_v25, %v13633_v12  ;;  %7073 = vmatprep.subr.bf16.mxu1 %v13607_v35  ;;  %v13281_v10 = vunpack.i.l.bf16 %v9736_v14  ;;  %v7455_v12 = vunpack.i.h.bf16 %v9721_v63  ;;  %v4186_v26 = vsel %vm2887_vm4, %v4177_v29, %v4185_v2  ;;  %v4432_v63 = vld [vmem:[%s13155_s3 + $0x180] sm:$0xff] }
 0x45a   : > { %13634 = vst [vmem:[#allocation72_spill] sm:$0xff] %v10260_v51  ;;  %4997 = vmatmul.mubr.f32.gmra.mrb[12].mxu1 %v4178_v60  ;;  %v1819_v30 = vpop.permute.xlu0 %1818  ;;  %v7077_v61 = vpack.c.bf16 %v4431_v62, %v4430_v53  ;;  %v2297_v16 = vsel %vm2283_vm2, %v2267_v9, %v2049_v1  ;;  %v4193_v31 = vrot.slane %v10260_v51, 4  ;;  %v4203_v43 = vrot.slane %v10265_v11, 4  ;;  %v1631_v11 = vld [vmem:[#allocation2 + $0x78] sm:$0xff] }
 0x45b   : > { %5001 = vmatprep.mubr.f32.mxu1 %v4188_v4  ;;  %2028 = vrot.lane.b32.xlu1 %v7807_v32, %s7880_s19  ;;  %v13636_v20 = vunpack.i.h.bf16 %v9706_v17  ;;  %v3636_v29 = vsel %vm419_vm0, %v7454_v24, %v7450_v21  ;;  %v3637_v1 = vsel %vm419_vm0, %v7455_v12, %v7464_v27  ;;  %v4196_v60 = vsel %vm2887_vm4, %v4187_v49, %v4195_v28 }
 0x45c   : > { %7075 = vmatpush1.bf16.msra.mxu1 %v7074_v46  ;;  %v2165_v18 = vpop.permute.xlu1 %2164  ;;  %v4433_v46 = vld [vmem:[%s13155_s3 + $0x188] sm:$0xff]  ;;  %v13280_v53 = vunpack.i.h.bf16 %v9736_v14  ;;  %v10311_v21 = vsel %vm3236_vm6, %v3636_v29, %v13281_v10  ;;  %v4194_v9 = vsel %vm2887_vm4, %v4185_v2, %v4193_v31  ;;  %v10319_v32 = vsel %vm3193_vm7, %v9098_v34, %v7454_v24 }
 0x45d   : > { %v10289_v4 = vsel %vm3193_vm7, %v8970_v15, %v13636_v20  ;;  %7076 = vmatprep.subr.bf16.mxu1 %v13607_v35  ;;  %v10301_v17 = vsel %vm2313_vm3, %v2297_v16, %v2165_v18  ;;  %13638 = vst [vmem:[#allocation75_spill] sm:$0xff] %v10311_v21  ;;  %13639 = vst [vmem:[#allocation76_spill] sm:$0xff] %v10319_v32  ;;  %v13641_v20 = vrot.slane %v10182_v57, 4  ;;  %v4211_v24 = vrot.slane %v10311_v21, 4  ;;  %v13687_v14 = vld [vmem:[#allocation45_spill] sm:$0xff] }
 0x45e   : > { %13637 = vst [vmem:[#allocation74_spill] sm:$0xff] %v10289_v4  ;;  %5002 = vmatmul.mubr.f32.gmra.mrb[14].mxu1 %v4186_v26  ;;  %v13282_v62 = vrot.slane %v10301_v17, 4  ;;  %v10313_v27 = vpop.permute.xlu0 %7532  ;;  %v4201_v18 = vrot.slane %v10289_v4, 4  ;;  %v7080_v26 = vpack.c.bf16 %v4433_v46, %v4432_v63  ;;  %v10324_v16 = vsel %vm3236_vm6, %v3637_v1, %v13280_v53 }
 0x45f   : > { %5006 = vmatprep.mubr.f32.mxu1 %v4196_v60  ;;  %3144 = vrot.lane.b32.xlu1 %v10301_v17, %s7881_s20  ;;  %13640 = vst [vmem:[#allocation77_spill] sm:$0xff] %v10324_v16  ;;  %v4204_v2 = vsel %vm2887_vm4, %v4195_v28, %v4203_v43  ;;  %v10342_v1 = vsel %vm3193_vm7, %v9196_v44, %v7455_v12  ;;  %v7465_v60 = vunpack.i.h.bf16 %v9753_v22  ;;  %v4209_v28 = vrot.slane %v10319_v32, 4  ;;  %v1630_v12 = vld [vmem:[#allocation2 + $0x70] sm:$0xff] }
 0x460   : > { %7078 = vmatpush1.bf16.msra.mxu1 %v7077_v61  ;;  %v1935_v49 = vpop.permute.xlu1 %1934  ;;  %v10331_v29 = vsel %vm2887_vm4, %v13641_v20, %v13282_v62  ;;  %v7469_v61 = vunpack.i.l.bf16 %v9833_v33  ;;  %13642 = vst [vmem:[#allocation78_spill] sm:$0xff] %v10342_v1  ;;  %v7479_v20 = vunpack.i.l.bf16 %v9870_v54  ;;  %v4202_v63 = vsel %vm2887_vm4, %v4193_v31, %v4201_v18 }
 0x461   : > { %7079 = vmatprep.subr.bf16.mxu1 %v13607_v35  ;;  %v4212_v22 = vsel %vm2887_vm4, %v4203_v43, %v4211_v24  ;;  %v2239_v46 = vsel %vm1528_vm1, %v1630_v12, %v1819_v30  ;;  %v4217_v35 = vrot.slane %v10342_v1, 4  ;;  %v13644_v32 = vunpack.i.l.bf16 %v9845_v45 }
 0x462   : > { %5007 = vmatmul.mubr.f32.gmra.mrb[16].mxu1 %v4194_v9  ;;  %v10346_v53 = vpop.permute.xlu0 %7537  ;;  %v4219_v9 = vrot.slane %v10324_v16, 4  ;;  %v3638_v62 = vsel %vm419_vm0, %v7469_v61, %v7465_v60  ;;  %v4210_v60 = vsel %vm2887_vm4, %v4201_v18, %v4209_v28  ;;  %v7484_v30 = vunpack.i.l.bf16 %v9866_v47  ;;  %v13646_v18 = vld [vmem:[#allocation68_spill] sm:$0xff] }
 0x463   : > { %5011 = vmatprep.mubr.f32.mxu1 %v4204_v2  ;;  %13643 = vst [vmem:[#allocation79_spill] sm:$0xff] %v10346_v53  ;;  %v7470_v2 = vunpack.i.h.bf16 %v9833_v33  ;;  %v2268_v33 = vsel %vm419_vm0, %v2239_v46, %v1935_v49  ;;  %v7480_v12 = vunpack.i.h.bf16 %v9870_v54  ;;  %v13648_v46 = vld [vmem:[#allocation35_spill] sm:$0xff]  ;;  %v13649_v54 = vunpack.i.h.bf16 %v9845_v45 }
 0x464   : > { %7081 = vmatpush1.bf16.msra.mxu1 %v7080_v26  ;;  %v2051_v10 = vpop.permute.xlu1 %2050  ;;  %v10359_v26 = vsel %vm3236_vm6, %v3638_v62, %v13644_v32 }
 0x465   : > { %13645 = vst [vmem:[#allocation80_spill] sm:$0xff] %v10359_v26  ;;  %v3639_v31 = vsel %vm419_vm0, %v7470_v2, %v7479_v20  ;;  %v4227_v49 = vrot.slane %v10359_v26, 4  ;;  %v7514_v20 = vunpack.i.l.bf16 %v13648_v46  ;;  %v13653_v26 = vrot.slane %v10301_v17, 4 }
 0x466   : > { %5012 = vmatmul.mubr.f32.gmra.mrb[18].mxu1 %v4202_v63  ;;  %v1821_v16 = vpop.permute.xlu0 %1820  ;;  %v4220_v63 = vsel %vm2887_vm4, %v4211_v24, %v4219_v9  ;;  %v10376_v24 = vsel %vm3193_vm7, %v13646_v18, %v7469_v61 }
 0x467   : > { %5016 = vmatprep.mubr.f32.mxu1 %v4212_v22  ;;  %v2298_v22 = vsel %vm2283_vm2, %v2268_v33, %v2051_v10  ;;  %13647 = vst [vmem:[#allocation68_spill] sm:$0xff] %v10376_v24  ;;  %v10385_v10 = vsel %vm3236_vm6, %v3639_v31, %v13649_v54  ;;  %v4218_v33 = vsel %vm2887_vm4, %v4209_v28, %v4217_v35  ;;  %v4225_v31 = vrot.slane %v10376_v24, 4 }
 0x468   : > { %v2167_v1 = vpop.permute.xlu1 %2166  ;;  %13650 = vst [vmem:[#allocation35_spill] sm:$0xff] %v10385_v10  ;;  %v4228_v54 = vsel %vm2887_vm4, %v4219_v9, %v4227_v49 }
 0x469   : > { %v10371_v32 = vsel %vm2313_vm3, %v2298_v22, %v2167_v1  ;;  %v7485_v22 = vunpack.i.h.bf16 %v9866_v47  ;;  %v13654_v47 = vunpack.i.l.bf16 %v9879_v0  ;;  %v4226_v59 = vsel %vm2887_vm4, %v4217_v35, %v4225_v31 }
 0x46a   : > { %5017 = vmatmul.mubr.f32.gmra.mrb[20].mxu1 %v4210_v60  ;;  %v2913_v43 = vrot.slane %v10371_v32, 4  ;;  %3146 = vrot.lane.b32.xlu1 %v10371_v32, %s7881_s20  ;;  %v10387_v1 = vpop.permute.xlu0 %7542  ;;  %v13651_v60 = vld [vmem:[#allocation67_spill] sm:$0xff] }
 0x46b   : > { %5021 = vmatprep.mubr.f32.mxu1 %v4220_v63  ;;  %v10392_v61 = vsel %vm3193_vm7, %v13651_v60, %v7470_v2  ;;  %v3640_v63 = vsel %vm419_vm0, %v7484_v30, %v7480_v12  ;;  %v4235_v2 = vrot.slane %v10385_v10, 4  ;;  %v3641_v4 = vsel %vm419_vm0, %v7485_v22, %v7514_v20 }
 0x46c   : > { %13652 = vst [vmem:[#allocation67_spill] sm:$0xff] %v10392_v61  ;;  %v1937_v62 = vpop.permute.xlu1 %1936  ;;  %v10399_v21 = vsel %vm2887_vm4, %v13653_v26, %v2913_v43  ;;  %v10409_v12 = vsel %vm3236_vm6, %v3640_v63, %v13654_v47  ;;  %v13296_v26 = vunpack.i.h.bf16 %v9879_v0  ;;  %v4233_v9 = vrot.slane %v10392_v61, 4  ;;  %v13656_v47 = vld [vmem:[#allocation69_spill] sm:$0xff] }
 0x46d   : > { %v7616_v28 = vpack.i.bf16 %v10399_v21, %v10331_v29  ;;  %13655 = vst [vmem:[#allocation81_spill] sm:$0xff] %v10409_v12  ;;  %v4243_v63 = vrot.slane %v10409_v12, 4  ;;  %v10421_v20 = vsel %vm3193_vm7, %v13656_v47, %v7484_v30  ;;  %v7515_v30 = vunpack.i.h.bf16 %v13648_v46 }
 0x46e   : > { %5022 = vmatmul.mubr.f32.gmra.mrb[22].mxu1 %v4218_v33  ;;  %v2240_v33 = vsel %vm1528_vm1, %v1631_v11, %v1821_v16  ;;  %v2169_v24 = vpop.permute.xlu0 %2168  ;;  %13657 = vst [vmem:[#allocation69_spill] sm:$0xff] %v10421_v20  ;;  %v4236_v16 = vsel %vm2887_vm4, %v4227_v49, %v4235_v2  ;;  %v7544_v13 = vunpack.i.l.bf16 %v10387_v1 }
 0x46f   : > { %5026 = vmatprep.mubr.f32.mxu1 %v4228_v54  ;;  %7617 = vrot.lane.b32.xlu0 %v7616_v28, %s7882_s21  ;;  %v2269_v10 = vsel %vm419_vm0, %v2240_v33, %v1937_v62  ;;  %v7519_v54 = vunpack.i.l.bf16 %v10151_v41  ;;  %v10429_v62 = vsel %vm3236_vm6, %v3641_v4, %v13296_v26  ;;  %v7529_v33 = vunpack.i.l.bf16 %v10252_v3  ;;  %v1632_v4 = vld [vmem:[#allocation2 + $0x80] sm:$0xff] }
 0x470   : > { %v2053_v51 = vpop.permute.xlu1 %2052  ;;  %13658 = vst [vmem:[#allocation82_spill] sm:$0xff] %v10429_v62  ;;  %v7520_v26 = vunpack.i.h.bf16 %v10151_v41 }
 0x471   : > { %v2299_v11 = vsel %vm2283_vm2, %v2269_v10, %v2053_v51  ;;  %v4234_v51 = vsel %vm2887_vm4, %v4225_v31, %v4233_v9  ;;  %v4244_v10 = vsel %vm2887_vm4, %v4235_v2, %v4243_v63  ;;  %v3642_v35 = vsel %vm419_vm0, %v7519_v54, %v7515_v30 }
 0x472   : > { %5027 = vmatmul.mubr.f32.gmra.mrb[24].mxu1 %v4226_v59  ;;  %v10433_v28 = vsel %vm2313_vm3, %v2299_v11, %v2169_v24  ;;  %v1939_v12 = vpop.permute.xlu0 %1938  ;;  %v4251_v24 = vrot.slane %v10429_v62, 4  ;;  %v13659_v11 = vld [vmem:[#allocation40_spill] sm:$0xff]  ;;  %v13661_v2 = vunpack.i.l.bf16 %v10184_v58  ;;  %v3643_v62 = vsel %vm419_vm0, %v7520_v26, %v7529_v33 }
 0x473   : > { %5031 = vmatprep.mubr.f32.mxu1 %v4236_v16  ;;  %3148 = vrot.lane.b32.xlu0 %v10433_v28, %s7881_s20  ;;  %v2915_v59 = vrot.slane %v10433_v28, 4  ;;  %v4241_v16 = vrot.slane %v10421_v20, 4  ;;  %v10446_v46 = vsel %vm3193_vm7, %v13659_v11, %v7485_v22  ;;  %v13663_v22 = vld [vmem:[#allocation70_spill] sm:$0xff] }
 0x474   : > { %v1823_v49 = vpop.permute.xlu1 %1822  ;;  %13660 = vst [vmem:[#allocation40_spill] sm:$0xff] %v10446_v46  ;;  %v10457_v20 = vsel %vm3236_vm6, %v3642_v35, %v13661_v2  ;;  %v4249_v30 = vrot.slane %v10446_v46, 4  ;;  %v4252_v2 = vsel %vm2887_vm4, %v4243_v63, %v4251_v24  ;;  %v10474_v46 = vsel %vm3193_vm7, %v13663_v22, %v7519_v54  ;;  %v13667_v35 = vld [vmem:[#allocation39_spill] sm:$0xff] }
 0x475   : > { %v2241_v61 = vsel %vm1528_vm1, %v1632_v4, %v1823_v49  ;;  %v10452_v31 = vsel %vm2887_vm4, %v2913_v43, %v2915_v59  ;;  %13662 = vst [vmem:[#allocation83_spill] sm:$0xff] %v10457_v20  ;;  %v4259_v33 = vrot.slane %v10457_v20, 4  ;;  %13664 = vst [vmem:[#allocation70_spill] sm:$0xff] %v10474_v46  ;;  %v7530_v4 = vunpack.i.h.bf16 %v10252_v3 }
 0x476   : > { %5032 = vmatmul.mubr.f32.gmra.mrb[26].mxu1 %v4234_v51  ;;  %v2055_v41 = vpop.permute.xlu0 %2054  ;;  %v7534_v51 = vunpack.i.l.bf16 %v10313_v27  ;;  %v2270_v43 = vsel %vm419_vm0, %v2241_v61, %v1939_v12  ;;  %v13665_v61 = vunpack.i.h.bf16 %v10184_v58  ;;  %v4250_v63 = vsel %vm2887_vm4, %v4241_v16, %v4249_v30 }
 0x477   : > { %5036 = vmatprep.mubr.f32.mxu1 %v4244_v10  ;;  %v4242_v10 = vsel %vm2887_vm4, %v4233_v9, %v4241_v16  ;;  %v2300_v9 = vsel %vm2283_vm2, %v2270_v43, %v2055_v41  ;;  %v10487_v20 = vsel %vm3193_vm7, %v13667_v35, %v7520_v26  ;;  %v7535_v54 = vunpack.i.h.bf16 %v10313_v27 }
 0x478   : > { %v10466_v49 = vpop.permute.xlu1 %7547  ;;  %v10481_v12 = vsel %vm3236_vm6, %v3643_v62, %v13665_v61  ;;  %13668 = vst [vmem:[#allocation39_spill] sm:$0xff] %v10487_v20  ;;  %v3644_v3 = vsel %vm419_vm0, %v7534_v51, %v7530_v4  ;;  %v4257_v62 = vrot.slane %v10474_v46, 4  ;;  %v4260_v26 = vsel %vm2887_vm4, %v4251_v24, %v4259_v33  ;;  %v13672_v46 = vld [vmem:[#allocation27_spill] sm:$0xff] }
 0x479   : > { %13666 = vst [vmem:[#allocation84_spill] sm:$0xff] %v10481_v12  ;;  %v4267_v16 = vrot.slane %v10481_v12, 4  ;;  %v13670_v27 = vunpack.i.l.bf16 %v10346_v53  ;;  %v3645_v43 = vsel %vm419_vm0, %v7535_v54, %v7544_v13  ;;  %v4265_v24 = vrot.slane %v10487_v20, 4 }
 0x47a   : > { %5037 = vmatmul.mubr.f32.gmra.mrb[28].mxu1 %v4242_v10  ;;  %v2171_v10 = vpop.permute.xlu0 %2170  ;;  %v4258_v12 = vsel %vm2887_vm4, %v4249_v30, %v4257_v62  ;;  %v7549_v13 = vunpack.i.l.bf16 %v10466_v49 }
 0x47b   : > { %5041 = vmatprep.mubr.f32.mxu1 %v4252_v2  ;;  %v10492_v2 = vsel %vm2313_vm3, %v2300_v9, %v2171_v10  ;;  %v10505_v4 = vsel %vm3236_vm6, %v3644_v3, %v13670_v27  ;;  %v4268_v61 = vsel %vm2887_vm4, %v4259_v33, %v4267_v16  ;;  %v4266_v33 = vsel %vm2887_vm4, %v4257_v62, %v4265_v24 }
 0x47c   : > { %v10494_v40 = vpop.permute.xlu1 %7552  ;;  %v13306_v41 = vrot.slane %v10492_v2, 4  ;;  %3150 = vrot.lane.b32.xlu0 %v10492_v2, %s7881_s20  ;;  %13671 = vst [vmem:[#allocation86_spill] sm:$0xff] %v10505_v4  ;;  %v4275_v27 = vrot.slane %v10505_v4, 4 }
 0x47d   : > { %13669 = vst [vmem:[#allocation85_spill] sm:$0xff] %v10494_v40  ;;  %v13678_v62 = vunpack.i.l.bf16 %v10494_v40 }
 0x47e   : > { %5042 = vmatmul.mubr.f32.gmra.mrb[30].mxu1 %v4250_v63  ;;  %v1941_v9 = vpop.permute.xlu0 %1940  ;;  %v10512_v10 = vsel %vm2887_vm4, %v2915_v59, %v13306_v41  ;;  %v10523_v59 = vsel %vm3193_vm7, %v13672_v46, %v7534_v51  ;;  %v13674_v41 = vunpack.i.h.bf16 %v10346_v53  ;;  %v4276_v51 = vsel %vm2887_vm4, %v4267_v16, %v4275_v27 }
 0x47f   : > { %5046 = vmatprep.mubr.f32.mxu1 %v4260_v26  ;;  %v7621_v3 = vpack.i.bf16 %v10512_v10, %v10452_v31  ;;  %v1633_v26 = vld [vmem:[#allocation2 + $0x88] sm:$0xff]  ;;  %13673 = vst [vmem:[#allocation27_spill] sm:$0xff] %v10523_v59  ;;  %v4273_v53 = vrot.slane %v10523_v59, 4 }
 0x480   : > { %v1825_v63 = vpop.permute.xlu1 %1824  ;;  %v10528_v20 = vsel %vm3236_vm6, %v3645_v43, %v13674_v41  ;;  %v13676_v43 = vld [vmem:[#allocation37_spill] sm:$0xff] }
 0x481   : > { %13675 = vst [vmem:[#allocation87_spill] sm:$0xff] %v10528_v20  ;;  %v2242_v48 = vsel %vm1528_vm1, %v1633_v26, %v1825_v63  ;;  %7622 = vrot.lane.b32.xlu1 %v7621_v3, %s7882_s21  ;;  %v4283_v41 = vrot.slane %v10528_v20, 4  ;;  %v10540_v30 = vsel %vm3193_vm7, %v13676_v43, %v7535_v54  ;;  %v7550_v63 = vunpack.i.h.bf16 %v10466_v49 }
 0x482   : > { %5047 = vmatmul.mubr.f32.gmra.mrb[32].mxu1 %v4258_v12  ;;  %v7545_v12 = vunpack.i.h.bf16 %v10387_v1  ;;  %v2057_v4 = vpop.permute.xlu0 %2056  ;;  %13677 = vst [vmem:[#allocation37_spill] sm:$0xff] %v10540_v30  ;;  %v2271_v1 = vsel %vm419_vm0, %v2242_v48, %v1941_v9  ;;  %v13317_v54 = vunpack.i.h.bf16 %v10494_v40  ;;  %v4281_v48 = vrot.slane %v10540_v30, 4 }
 0x483   : > { %5051 = vmatprep.mubr.f32.mxu1 %v4268_v61  ;;  %v2301_v59 = vsel %vm2283_vm2, %v2271_v1, %v2057_v4 }
 0x484   : > { %v7558_v58 = vpop.permute.xlu1 %7557  ;;  %v3646_v61 = vsel %vm419_vm0, %v7549_v13, %v7545_v12  ;;  %v4274_v12 = vsel %vm2887_vm4, %v4265_v24, %v4273_v53 }
 0x485   : > { %v7559_v3 = vunpack.i.l.bf16 %v7558_v58  ;;  %v10548_v16 = vsel %vm3236_vm6, %v3646_v61, %v13678_v62  ;;  %v13680_v61 = vld [vmem:[#allocation48_spill] sm:$0xff] }
 0x486   : > { %5052 = vmatmul.mubr.f32.gmra.mrb[34].mxu1 %v4266_v33  ;;  %13679 = vst [vmem:[#allocation88_spill] sm:$0xff] %v10548_v16  ;;  %v1827_v20 = vpop.permute.xlu0 %1826  ;;  %v4284_v33 = vsel %vm2887_vm4, %v4275_v27, %v4283_v41  ;;  %v4282_v27 = vsel %vm2887_vm4, %v4273_v53, %v4281_v48  ;;  %v13688_v53 = vld [vmem:[#allocation36_spill] sm:$0xff] }
 0x487   : > { %5056 = vmatprep.mubr.f32.mxu1 %v4276_v51  ;;  %v3647_v26 = vsel %vm419_vm0, %v7550_v63, %v7559_v3  ;;  %v4291_v51 = vrot.slane %v10548_v16, 4  ;;  %v10562_v3 = vsel %vm3193_vm7, %v13680_v61, %v7549_v13 }
 0x488   : > { %v2173_v49 = vpop.permute.xlu1 %2172  ;;  %13681 = vst [vmem:[#allocation48_spill] sm:$0xff] %v10562_v3  ;;  %v10570_v4 = vsel %vm3236_vm6, %v3647_v26, %v13317_v54  ;;  %v4289_v1 = vrot.slane %v10562_v3, 4  ;;  %v7560_v3 = vunpack.i.h.bf16 %v7558_v58 }
 0x489   : > { %v10556_v9 = vsel %vm2313_vm3, %v2301_v59, %v2173_v49  ;;  %13682 = vst [vmem:[#allocation89_spill] sm:$0xff] %v10570_v4  ;;  %v13683_v49 = vld [vmem:[#allocation7_spill] sm:$0xff]  ;;  %v4292_v26 = vsel %vm2887_vm4, %v4283_v41, %v4291_v51  ;;  %v4299_v54 = vrot.slane %v10570_v4, 4 }
 0x48a   : > { %5057 = vmatmul.mubr.f32.gmra.mrb[36].mxu1 %v4274_v12  ;;  %v2919_v62 = vrot.slane %v10556_v9, 4  ;;  %3152 = vrot.lane.b32.xlu1 %v10556_v9, %s7881_s20  ;;  %v7563_v24 = vpop.permute.xlu0 %7562  ;;  %v10576_v13 = vsel %vm3193_vm7, %v13683_v49, %v7550_v63  ;;  %v13685_v12 = vrot.slane %v10492_v2, 4  ;;  %v4290_v45 = vsel %vm2887_vm4, %v4281_v48, %v4289_v1 }
 0x48b   : > { %5061 = vmatprep.mubr.f32.mxu1 %v4284_v33  ;;  %13684 = vst [vmem:[#allocation7_spill] sm:$0xff] %v10576_v13  ;;  %v7564_v33 = vunpack.i.l.bf16 %v7563_v24  ;;  %v4297_v63 = vrot.slane %v10576_v13, 4  ;;  %v7565_v40 = vunpack.i.h.bf16 %v7563_v24  ;;  %v4300_v4 = vsel %vm2887_vm4, %v4291_v51, %v4299_v54 }
 0x48c   : > { %v1943_v59 = vpop.permute.xlu1 %1942  ;;  %v10581_v16 = vsel %vm2887_vm4, %v13685_v12, %v2919_v62  ;;  %v2923_v13 = vrot.slane %v13688_v53, 4 }
 0x48d   : > { %v3774_v41 = vsel %vm419_vm0, %v7564_v33, %v7560_v3 }
 0x48e   : > { %5062 = vmatmul.mubr.f32.gmra.mrb[38].mxu1 %v4282_v27  ;;  %v10587_v30 = vpop.permute.xlu0 %7567  ;;  %v1634_v27 = vld [vmem:[#allocation2 + $0x90] sm:$0xff] }
 0x48f   : > { %5066 = vmatprep.mubr.f32.mxu1 %v4292_v26  ;;  %13686 = vst [vmem:[#allocation90_spill] sm:$0xff] %v10587_v30  ;;  %v13334_v0 = vunpack.i.l.bf16 %v10587_v30  ;;  %v3771_v26 = vsel %vm3193_vm7, %v13687_v14, %v7564_v33  ;;  %v2243_v58 = vsel %vm1528_vm1, %v1634_v27, %v1827_v20 }
 0x490   : > { %v2059_v12 = vpop.permute.xlu1 %2058  ;;  %v2272_v48 = vsel %vm419_vm0, %v2243_v58, %v1943_v59  ;;  %v4305_v20 = vrot.slane %v3771_v26, 4  ;;  %v13690_v26 = vld [vmem:[#allocation62_spill] sm:$0xff] }
 0x491   : > { %v3777_v24 = vsel %vm3236_vm6, %v3774_v41, %v13334_v0  ;;  %v2302_v51 = vsel %vm2283_vm2, %v2272_v48, %v2059_v12  ;;  %v13337_v41 = vunpack.i.h.bf16 %v10587_v30 }
 0x492   : > { %5067 = vmatmul.mubr.f32.gmra.mrb[40].mxu1 %v4290_v45  ;;  %v10602_v55 = vpop.permute.xlu0 %7572  ;;  %v4298_v45 = vsel %vm2887_vm4, %v4289_v1, %v4297_v63  ;;  %v4307_v3 = vrot.slane %v3777_v24, 4  ;;  %v13691_v24 = vrot.slane %v13690_v26, 4 }
 0x493   : > { %5071 = vmatprep.mubr.f32.mxu1 %v4300_v4  ;;  %v7574_v33 = vunpack.i.l.bf16 %v10602_v55  ;;  %v13689_v4 = vld [vmem:[#allocation31_spill] sm:$0xff] }
 0x494   : > { %v2175_v8 = vpop.permute.xlu1 %2174  ;;  %v3772_v27 = vsel %vm3193_vm7, %v13689_v4, %v7565_v40  ;;  %v4308_v59 = vsel %vm2887_vm4, %v4299_v54, %v4307_v3  ;;  %v10621_v48 = vsel %vm2887_vm4, %v2923_v13, %v13691_v24 }
 0x495   : > { %v10611_v0 = vsel %vm2313_vm3, %v2302_v51, %v2175_v8  ;;  %v3775_v1 = vsel %vm419_vm0, %v7565_v40, %v7574_v33  ;;  %13692 = vst [vmem:[#allocation45_spill] sm:$0xff] %v10621_v48  ;;  %v4306_v40 = vsel %vm2887_vm4, %v4297_v63, %v4305_v20 }
 0x496   : > { %5072 = vmatmul.mubr.f32.gmra.mrb[42].mxu1 %v4298_v45  ;;  %v2921_v58 = vrot.slane %v10611_v0, 4  ;;  %3154 = vrot.lane.b32.xlu1 %v10611_v0, %s7881_s20  ;;  %v3131_v12 = vpop.permute.xlu0 %3130  ;;  %v3778_v8 = vsel %vm3236_vm6, %v3775_v1, %v13337_v41  ;;  %v4313_v45 = vrot.slane %v3772_v27, 4  ;;  %v13700_v41 = vld [vmem:[#allocation17_spill] sm:$0xff] }
 0x497   : > { %5076 = vmatprep.mubr.f32.mxu1 %v4308_v59  ;;  %v4315_v59 = vrot.slane %v3778_v8, 4 }
 0x498   : > { %v10626_v54 = vpop.permute.xlu1 %7577  ;;  %v10630_v51 = vsel %vm2887_vm4, %v2921_v58, %v2923_v13  ;;  %v10633_v33 = vsel %vm2887_vm4, %v2919_v62, %v2921_v58  ;;  %v4314_v58 = vsel %vm2887_vm4, %v4305_v20, %v4313_v45 }
 0x499   : > { %13693 = vst [vmem:[#allocation36_spill] sm:$0xff] %v10626_v54  ;;  %v7631_v24 = vpack.i.bf16 %v10621_v48, %v10630_v51  ;;  %v7626_v30 = vpack.i.bf16 %v10633_v33, %v10581_v16  ;;  %v4316_v27 = vsel %vm2887_vm4, %v4307_v3, %v4315_v59  ;;  %v13342_v62 = vunpack.i.l.bf16 %v10626_v54 }
 0x49a   : > { %5077 = vmatmul.mubr.f32.gmra.mrb[44].mxu1 %v4306_v40  ;;  %v10642_v63 = vpop.permute.xlu0 %7582 }
 0x49b   : > { %13694 = vst [vmem:[#allocation31_spill] sm:$0xff] %v10642_v63  ;;  %7632 = vrot.lane.b32.xlu1 %v7631_v24, %s7882_s21  ;;  %7627 = vrot.lane.b32.xlu0 %v7626_v30, %s7882_s21  ;;  %v13338_v3 = vunpack.i.h.bf16 %v10642_v63  ;;  %v13339_v8 = vunpack.i.l.bf16 %v10642_v63  ;;  %v3258_v20 = vsel %vm2313_vm3, %v13342_v62, %v3131_v12  ;;  %v13341_v24 = vunpack.i.h.bf16 %v10626_v54 }
 0x49c   : > { %5081 = vmatprep.mubr.f32.mxu1 %v4316_v27  ;;  %v10647_v13 = vpop.permute.xlu1 %3132 }
 0x49d   : > { %13695 = vst [vmem:[#allocation62_spill] sm:$0xff] %v10647_v13 }
 0x49e   : > { %5082 = vmatmul.mubr.f32.gmra.mrb[46].mxu1 %v4314_v58  ;;  %v3259_v58 = vsel %vm2313_vm3, %v13341_v24, %v10647_v13 }
 0x49f   : > { %6555 = vmatprep.mubr.msk.f32.mxu1 %vm1528_vm1, %v3131_v12  ;;  %3160 = vrot.lane.b32.xlu1 %v13600_v36, %s7881_s20  ;;  %v10657_v30 = vpop.permute.xlu0 %3136 }
 0x4a0   : > { %3156 = vrot.lane.b32.xlu0 %v13688_v53, %s7881_s20  ;;  %13696 = vst [vmem:[#allocation91_spill] sm:$0xff] %v10657_v30  ;;  %v10659_v40 = vpop.permute.xlu1 %3134  ;;  %v3261_v59 = vsel %vm2313_vm3, %v13338_v3, %v10657_v30  ;;  %v13701_v3 = vld [vmem:[#allocation65_spill] sm:$0xff] }
 0x4a1   : > { %13697 = vst [vmem:[#allocation92_spill] sm:$0xff] %v10659_v40  ;;  %v10668_v45 = vsel %vm2313_vm3, %v13339_v8, %v10659_v40  ;;  %v3864_v12 = vrot.slane %v3261_v59, 4  ;;  %v7636_v8 = vpack.i.bf16 %v13701_v3, %v13700_v41  ;;  %v1645_v41 = vld [vmem:[#allocation3] sm:$0xff] }
 0x4a2   : > { %5152 = vmatmul.mubr.f32.vlgmr.msra.gmra.mrb[48].mxu1 %v3258_v20  ;;  %13698 = vst [vmem:[#allocation93_spill] sm:$0xff] %v10668_v45  ;;  %v13340_v27 = vrot.slane %v10668_v45, 4  ;;  %v13705_v3 = vld [vmem:[#allocation25_spill] sm:$0xff] }
 0x4a3   : > { %6556 = vmatprep.mubr.msk.f32.mxu1 %vm1528_vm1, %v10647_v13  ;;  %3162 = vrot.lane.b32.xlu1 %v9031_v37, %s7881_s20  ;;  %v13702_v37 = vld [vmem:[#allocation44_spill] sm:$0xff]  ;;  %v1618_v13 = vld [vmem:[#allocation2 + $0x10] sm:$0xff] }
 0x4a4   : > { %3158 = vrot.lane.b32.xlu0 %v13690_v26, %s7881_s20  ;;  %v10689_v20 = vsel %vm2887_vm4, %v13340_v27, %v3864_v12  ;;  %v13703_v27 = vld [vmem:[#allocation11_spill] sm:$0xff] }
 0x4a5   : > { %13699 = vst [vmem:[#allocation94_spill] sm:$0xff] %v10689_v20 }
 0x4a6   : > { %5157 = vmatmul.mubr.f32.gmra.mrb[50].mxu1 %v3259_v58  ;;  %v13704_v58 = vld [vmem:[#allocation64_spill] sm:$0xff] }
 0x4a7   : > { %6557 = vmatprep.mubr.msk.f32.mxu1 %vm1528_vm1, %v10659_v40  ;;  %7637 = vrot.lane.b32.xlu1 %v7636_v8, %s7882_s21 }
 0x4a8   : > { %3164 = vrot.lane.b32.xlu0 %v13702_v37, %s7881_s20  ;;  %v13707_v37 = vld [vmem:[#allocation12_spill] sm:$0xff] }
 0x4aa   : > { %5162 = vmatmul.mubr.f32.gmra.mrb[52].mxu1 %v10668_v45 }
 0x4ab   : > { %6558 = vmatprep.mubr.msk.f32.mxu1 %vm1528_vm1, %v10657_v30  ;;  %3168 = vrot.lane.b32.xlu1 %v13703_v27, %s7881_s20 }
 0x4ac   : > { %7642 = vrot.lane.b32.xlu0 %v13704_v58, %s7882_s21 }
 0x4ae   : > { %5167 = vmatmul.mubr.f32.gmra.mrb[54].mxu1 %v3261_v59 }
 0x4af   : > { %1790 = vrot.lane.b32.xlu1 %v1645_v41, %s7878_s17  ;;  %v10708_v8 = vpop.permute.xlu0 %3138 }
 0x4b0   : > { %3166 = vrot.lane.b32.xlu0 %v13705_v3, %s7881_s20  ;;  %13706 = vst [vmem:[#allocation17_spill] sm:$0xff] %v10708_v8  ;;  %6559 = vmatprep.mubr.msk.f32.mxu1 %vm1528_vm1, %v10708_v8 }
 0x4b4   : > { %3170 = vrot.lane.b32.xlu0 %v13707_v37, %s7881_s20  ;;  %v7593_v24 = vpop.permute.xlu0 %7592  ;;  %v10728_v37 = vld [vmem:[#allocation3 + $0x1] sm:$0xff] }
 0x4b5   : > { %v10714_v27 = vpop.permute.xlu1 %7587 }
 0x4b6   : > { %13708 = vst [vmem:[#allocation65_spill] sm:$0xff] %v10714_v27  ;;  %v13343_v58 = vunpack.i.l.bf16 %v10714_v27  ;;  %v13350_v59 = vunpack.i.h.bf16 %v10714_v27  ;;  %v7594_v27 = vunpack.i.l.bf16 %v7593_v24 }
 0x4b8   : > { %3543 = vrot.lane.b32.xlu0 %v8986_v42, %s7881_s20  ;;  %v3262_v41 = vsel %vm2313_vm3, %v13343_v58, %v10708_v8  ;;  %v10739_v8 = vld [vmem:[#allocation2 + $0x2] sm:$0xff] }
 0x4b9   : > { %v7603_v3 = vpop.permute.xlu0 %7602  ;;  %v10724_v62 = vpop.permute.xlu1 %3140  ;;  %v3872_v1 = vrot.slane %v3262_v41, 4  ;;  %5172 = vmatmul.mubr.f32.gmra.mrb[56].mxu1 %v3262_v41  ;;  %13711 = vst [vmem:[#allocation64_spill] sm:$0xff] %v10739_v8  ;;  %v7595_v41 = vunpack.i.h.bf16 %v7593_v24 }
 0x4ba   : > { %13709 = vst [vmem:[#allocation44_spill] sm:$0xff] %v10724_v62  ;;  %6560 = vmatprep.mubr.msk.f32.mxu1 %vm1528_vm1, %v10724_v62  ;;  %v3263_v42 = vsel %vm2313_vm3, %v13350_v59, %v10724_v62  ;;  %v7605_v63 = vunpack.i.h.bf16 %v7603_v3  ;;  %v7604_v54 = vunpack.i.l.bf16 %v7603_v3 }
 0x4bb   : > { %v3880_v20 = vrot.slane %v3263_v42, 4  ;;  %v10737_v58 = vsel %vm2887_vm4, %v3864_v12, %v3872_v1  ;;  %v2227_v62 = vsel %vm1528_vm1, %v1618_v13, %v7595_v41  ;;  %v7575_v13 = vunpack.i.h.bf16 %v10602_v55 }
 0x4bc   : > { %2022 = vrot.lane.b32.xlu0 %v10728_v37, %s7880_s19  ;;  %13710 = vst [vmem:[#allocation11_spill] sm:$0xff] %v10737_v58  ;;  %v1617_v58 = vld [vmem:[#allocation2 + $0x8] sm:$0xff] }
 0x4bd   : > { %5177 = vmatmul.mubr.f32.gmra.mrb[58].mxu1 %v3263_v42  ;;  %v10742_v30 = vsel %vm2887_vm4, %v3872_v1, %v3880_v20 }
 0x4be   : > { %13712 = vst [vmem:[#allocation25_spill] sm:$0xff] %v10742_v30  ;;  %v7608_v40 = vpop.permute.xlu0 %7607  ;;  %v2226_v30 = vsel %vm1528_vm1, %v1617_v58, %v7594_v27 }
 0x4bf   : > { %v7598_v45 = vpop.permute.xlu1 %7597  ;;  %v7610_v24 = vunpack.i.h.bf16 %v7608_v40  ;;  %v7609_v41 = vunpack.i.l.bf16 %v7608_v40  ;;  %v2255_v48 = vsel %vm419_vm0, %v2226_v30, %v7575_v13  ;;  %v10777_v40 = vld [vmem:[#allocation2 + $0x1] sm:$0xff] }
 0x4c0   : > { %2138 = vrot.lane.b32.xlu0 %v10739_v8, %s7881_s20  ;;  %v7599_v59 = vunpack.i.l.bf16 %v7598_v45  ;;  %v7600_v27 = vunpack.i.h.bf16 %v7598_v45 }
 0x4c2   : > { %v2256_v42 = vsel %vm419_vm0, %v2227_v62, %v7599_v59 }
 0x4c3   : > { %v10747_v12 = vpop.permute.xlu0 %3142  ;;  %v1797_v1 = vpop.permute.xlu1 %1796  ;;  %v2286_v19 = vsel %vm2283_vm2, %v2256_v42, %v7605_v63  ;;  %v2285_v63 = vsel %vm2283_vm2, %v2255_v48, %v7604_v54 }
 0x4c4   : > { %3545 = vrot.lane.b32.xlu0 %v8980_v25, %s7881_s20  ;;  %6561 = vmatprep.mubr.msk.f32.mxu1 %vm1528_vm1, %v10747_v12  ;;  %v1619_v25 = vld [vmem:[#allocation2 + $0x18] sm:$0xff]  ;;  %v10765_v58 = vsel %vm2313_vm3, %v2286_v19, %v7610_v24  ;;  %v10775_v55 = vsel %vm2313_vm3, %v2285_v63, %v7609_v41 }
 0x4c5   : > { %v2228_v62 = vsel %vm1528_vm1, %v1619_v25, %v1797_v1  ;;  %13713 = vst [vmem:[#allocation12_spill] sm:$0xff] %v10775_v55  ;;  %v2888_v1 = vrot.slane %v10775_v55, 4 }
 0x4c6   : > { %v2257_v45 = vsel %vm419_vm0, %v2228_v62, %v7600_v27 }
 0x4c7   : > { %v2145_v3 = vpop.permute.xlu0 %2144 }
 0x4c8   : > { %3547 = vrot.lane.b32.xlu0 %v8970_v15, %s7881_s20 }
 0x4c9   : > { %v10759_v8 = vpop.permute.xlu1 %7612 }
 0x4ca   : > { %v13371_v59 = vunpack.i.l.bf16 %v10759_v8  ;;  %v13363_v13 = vunpack.i.h.bf16 %v10759_v8 }
 0x4cc   : > { %3549 = vrot.lane.b32.xlu0 %v9098_v34, %s7881_s20  ;;  %v3264_v15 = vsel %vm2313_vm3, %v13371_v59, %v10747_v12  ;;  %v2889_v34 = vrot.slane %v10765_v58, 4 }
 0x4cd   : > { %v2029_v30 = vpop.permute.xlu1 %2028  ;;  %v3888_v19 = vrot.slane %v3264_v15, 4  ;;  %5182 = vmatmul.mubr.f32.gmra.mrb[60].mxu1 %v3264_v15 }
 0x4ce   : > { %v2287_v48 = vsel %vm2283_vm2, %v2257_v45, %v2029_v30  ;;  %v2890_v62 = vsel %vm2887_vm4, %v2888_v1, %v2889_v34  ;;  %v13714_v30 = vld [vmem:[#allocation66_spill] sm:$0xff] }
 0x4cf   : > { %v10783_v54 = vsel %vm2313_vm3, %v2287_v48, %v2145_v3  ;;  %v10786_v42 = vsel %vm2887_vm4, %v3880_v20, %v3888_v19  ;;  %v13715_v45 = vld [vmem:[#allocation34_spill] sm:$0xff]  ;;  %v13716_v3 = vld [vmem:[#allocation60_spill] sm:$0xff] }
 0x4d0   : > { %v7646_v24 = vpack.i.bf16 %v10783_v54, %v10777_v40  ;;  %v10793_v41 = vrot.slane %v10783_v54, 4  ;;  %3551 = vrot.lane.b32.xlu0 %v9196_v44, %s7881_s20  ;;  %v7656_v48 = vpack.i.bf16 %v13716_v3, %v13715_v45 }
 0x4d1   : > { %v10797_v25 = vpop.permute.xlu1 %3144 }
 0x4d2   : > { %7647 = vrot.lane.b32.xlu1 %v7646_v24, %s7879_s18  ;;  %6562 = vmatprep.mubr.msk.f32.mxu1 %vm1528_vm1, %v10797_v25  ;;  %v3265_v20 = vsel %vm2313_vm3, %v13363_v13, %v10797_v25  ;;  %v2892_v27 = vsel %vm2887_vm4, %v2889_v34, %v10793_v41 }
 0x4d3   : > { %v3896_v63 = vrot.slane %v3265_v20, 4  ;;  %5187 = vmatmul.mubr.f32.gmra.mrb[62].mxu1 %v3265_v20  ;;  %v7651_v44 = vpack.i.bf16 %v2892_v27, %v2890_v62  ;;  %v13719_v20 = vld [vmem:[#allocation21_spill] sm:$0xff] }
 0x4d4   : > { %3553 = vrot.lane.b32.xlu0 %v13646_v18, %s7881_s20  ;;  %v13717_v18 = vrot.slane %v13715_v45, 4  ;;  %v13720_v62 = vld [vmem:[#allocation9_spill] sm:$0xff] }
 0x4d5   : > { %v10812_v15 = vsel %vm2887_vm4, %v3888_v19, %v3896_v63  ;;  %v7666_v27 = vpack.i.bf16 %v13720_v62, %v13719_v20 }
 0x4d6   : > { %7652 = vrot.lane.b32.xlu1 %v7651_v44, %s7883_s24  ;;  %v2894_v19 = vsel %vm2887_vm4, %v10793_v41, %v13717_v18 }
 0x4d8   : > { %3555 = vrot.lane.b32.xlu0 %v13651_v60, %s7881_s20  ;;  %v13718_v60 = vld [vmem:[#allocation29_spill] sm:$0xff] }
 0x4da   : > { %3481 = vrot.lane.b32.xlu1 %v13714_v30, %s7882_s21 }
 0x4dc   : > { %3557 = vrot.lane.b32.xlu0 %v13656_v47, %s7881_s20  ;;  %v10823_v34 = vpop.permute.xlu1 %3146  ;;  %v7661_v47 = vpack.i.bf16 %v13718_v60, %v2894_v19  ;;  %v13721_v60 = vld [vmem:[#allocation10_spill] sm:$0xff] }
 0x4dd   : > { %6563 = vmatprep.mubr.msk.f32.mxu1 %vm1528_vm1, %v10823_v34 }
 0x4de   : > { %7657 = vrot.lane.b32.xlu1 %v7656_v48, %s7879_s18 }
 0x4e0   : > { %3559 = vrot.lane.b32.xlu0 %v13659_v11, %s7881_s20 }
 0x4e1   : > { %v10835_v1 = vpop.permute.xlu0 %7617 }
 0x4e2   : > { %7662 = vrot.lane.b32.xlu1 %v7661_v47, %s7883_s24  ;;  %v13362_v24 = vunpack.i.l.bf16 %v10835_v1  ;;  %v13369_v44 = vunpack.i.h.bf16 %v10835_v1  ;;  %v13722_v47 = vld [vmem:[#allocation24_spill] sm:$0xff] }
 0x4e4   : > { %3561 = vrot.lane.b32.xlu0 %v13663_v22, %s7881_s20  ;;  %v3266_v11 = vsel %vm2313_vm3, %v13362_v24, %v10823_v34  ;;  %v13725_v24 = vld [vmem:[#allocation32_spill] sm:$0xff] }
 0x4e5   : > { %v10848_v30 = vpop.permute.xlu0 %3148  ;;  %v3904_v48 = vrot.slane %v3266_v11, 4  ;;  %5192 = vmatmul.mubr.f32.gmra.mrb[64].mxu1 %v3266_v11  ;;  %v7676_v13 = vpack.i.bf16 %v9883_v38, %v13725_v24 }
 0x4e6   : > { %7667 = vrot.lane.b32.xlu1 %v7666_v27, %s7879_s18  ;;  %6564 = vmatprep.mubr.msk.f32.mxu1 %vm1528_vm1, %v10848_v30  ;;  %v3267_v22 = vsel %vm2313_vm3, %v13369_v44, %v10848_v30  ;;  %v13723_v27 = vpack.i.bf16 %v13721_v60, %v13722_v47 }
 0x4e7   : > { %v3912_v18 = vrot.slane %v3267_v22, 4  ;;  %v10860_v19 = vsel %vm2887_vm4, %v3896_v63, %v3904_v48  ;;  %v13726_v63 = vld [vmem:[#allocation47_spill] sm:$0xff] }
 0x4e8   : > { %3563 = vrot.lane.b32.xlu0 %v13667_v35, %s7881_s20 }
 0x4e9   : > { %5197 = vmatmul.mubr.f32.gmra.mrb[66].mxu1 %v3267_v22  ;;  %v10867_v11 = vsel %vm2887_vm4, %v3904_v48, %v3912_v18  ;;  %v13727_v48 = vld [vmem:[#allocation33_spill] sm:$0xff] }
 0x4ea   : > { %7672 = vrot.lane.b32.xlu1 %v13723_v27, %s7883_s24  ;;  %13724 = vst [vmem:[#allocation66_spill] sm:$0xff] %v10867_v11  ;;  %v13728_v22 = vpack.i.bf16 %v13726_v63, %v13727_v48  ;;  %v7696_v63 = vpack.i.bf16 %v10301_v17, %v10182_v57 }
 0x4ec   : > { %3565 = vrot.lane.b32.xlu0 %v13672_v46, %s7881_s20  ;;  %v7686_v46 = vpack.i.bf16 %v10084_v56, %v10001_v6 }
 0x4ee   : > { %7677 = vrot.lane.b32.xlu1 %v7676_v13, %s7879_s18  ;;  %v10874_v35 = vpop.permute.xlu0 %3150 }
 0x4ef   : > { %6565 = vmatprep.mubr.msk.f32.mxu1 %vm1528_vm1, %v10874_v35 }
 0x4f0   : > { %3567 = vrot.lane.b32.xlu0 %v13676_v43, %s7881_s20 }
 0x4f2   : > { %7682 = vrot.lane.b32.xlu1 %v13728_v22, %s7883_s24  ;;  %v13734_v22 = vld [vmem:[#allocation41_spill] sm:$0xff] }
 0x4f3   : > { %v10888_v13 = vpop.permute.xlu1 %7622 }
 0x4f4   : > { %3569 = vrot.lane.b32.xlu0 %v13680_v61, %s7881_s20  ;;  %v13367_v60 = vunpack.i.l.bf16 %v10888_v13  ;;  %v13729_v61 = vpack.i.bf16 %v10128_v23, %v10028_v52 }
 0x4f6   : > { %7687 = vrot.lane.b32.xlu1 %v7686_v46, %s7879_s18  ;;  %v3268_v43 = vsel %vm2313_vm3, %v13367_v60, %v10874_v35  ;;  %v7706_v46 = vpack.i.bf16 %v10433_v28, %v10371_v32 }
 0x4f7   : > { %v3920_v47 = vrot.slane %v3268_v43, 4  ;;  %5202 = vmatmul.mubr.f32.gmra.mrb[68].mxu1 %v3268_v43  ;;  %v13735_v43 = vld [vmem:[#allocation23_spill] sm:$0xff] }
 0x4f8   : > { %3571 = vrot.lane.b32.xlu0 %v13683_v49, %s7881_s20  ;;  %v13365_v49 = vunpack.i.h.bf16 %v10888_v13 }
 0x4f9   : > { %v10903_v27 = vsel %vm2887_vm4, %v3912_v18, %v3920_v47 }
 0x4fa   : > { %7692 = vrot.lane.b32.xlu1 %v13729_v61, %s7883_s24  ;;  %13730 = vst [vmem:[#allocation34_spill] sm:$0xff] %v10903_v27 }
 0x4fc   : > { %3573 = vrot.lane.b32.xlu0 %v13687_v14, %s7881_s20  ;;  %v10910_v48 = vpop.permute.xlu1 %3152  ;;  %v13733_v14 = vpack.i.bf16 %v10331_v29, %v10217_v7  ;;  %v7716_v7 = vpack.i.bf16 %v10556_v9, %v10492_v2  ;;  %v13738_v29 = vld [vmem:[#allocation8_spill] sm:$0xff] }
 0x4fd   : > { %13731 = vst [vmem:[#allocation60_spill] sm:$0xff] %v10910_v48  ;;  %6566 = vmatprep.mubr.msk.f32.mxu1 %vm1528_vm1, %v10910_v48  ;;  %v3269_v52 = vsel %vm2313_vm3, %v13365_v49, %v10910_v48 }
 0x4fe   : > { %7697 = vrot.lane.b32.xlu1 %v7696_v63, %s7879_s18  ;;  %v3928_v23 = vrot.slane %v3269_v52, 4  ;;  %5207 = vmatmul.mubr.f32.gmra.mrb[70].mxu1 %v3269_v52  ;;  %v3302_v52 = vrot.slane %v10052_v39, 4 }
 0x500   : > { %3575 = vrot.lane.b32.xlu0 %v13689_v4, %s7881_s20  ;;  %v10922_v18 = vsel %vm2887_vm4, %v3920_v47, %v3928_v23  ;;  %v13737_v47 = vpack.i.bf16 %v10452_v31, %v10399_v21  ;;  %v13739_v31 = vld [vmem:[#allocation55_spill] sm:$0xff] }
 0x501   : > { %13732 = vst [vmem:[#allocation29_spill] sm:$0xff] %v10922_v18 }
 0x502   : > { %7702 = vrot.lane.b32.xlu1 %v13733_v14, %s7883_s24  ;;  %v3301_v14 = vrot.slane %v9936_v5, 4 }
 0x504   : > { %3577 = vrot.lane.b32.xlu0 %v13734_v22, %s7881_s20 }
 0x506   : > { %7707 = vrot.lane.b32.xlu1 %v7706_v46, %s7879_s18 }
 0x508   : > { %3579 = vrot.lane.b32.xlu0 %v13735_v43, %s7881_s20  ;;  %v10935_v4 = vpop.permute.xlu1 %3154  ;;  %v7741_v43 = vpack.i.bf16 %v13614_v50, %v10728_v37  ;;  %v3303_v37 = vsel %vm2887_vm4, %v3301_v14, %v3302_v52 }
 0x509   : > { %13736 = vst [vmem:[#allocation21_spill] sm:$0xff] %v10935_v4  ;;  %6567 = vmatprep.mubr.msk.f32.mxu1 %vm1528_vm1, %v10935_v4 }
 0x50a   : > { %7712 = vrot.lane.b32.xlu1 %v13737_v47, %s7883_s24 }
 0x50c   : > { %3581 = vrot.lane.b32.xlu0 %v13738_v29, %s7881_s20 }
 0x50d   : > { %v10947_v61 = vpop.permute.xlu0 %7627  ;;  %v10949_v63 = vpop.permute.xlu1 %7632 }
 0x50e   : > { %7717 = vrot.lane.b32.xlu1 %v7716_v7, %s7879_s18  ;;  %v13364_v21 = vunpack.i.l.bf16 %v10947_v61  ;;  %v13366_v22 = vunpack.i.h.bf16 %v10947_v61  ;;  %v13742_v7 = vpack.i.bf16 %v10581_v16, %v10512_v10  ;;  %v7726_v10 = vpack.i.bf16 %v13688_v53, %v10611_v0 }
 0x510   : > { %3707 = vrot.lane.b32.xlu0 %v13739_v31, %s7882_s21  ;;  %v3270_v46 = vsel %vm2313_vm3, %v13364_v21, %v10935_v4  ;;  %v13368_v31 = vunpack.i.h.bf16 %v10949_v63  ;;  %v13743_v21 = vld [vmem:[#allocation53_spill] sm:$0xff] }
 0x511   : > { %v10966_v39 = vpop.permute.xlu1 %3160  ;;  %v3936_v29 = vrot.slane %v3270_v46, 4  ;;  %5212 = vmatmul.mubr.f32.gmra.mrb[72].mxu1 %v3270_v46  ;;  %v3305_v49 = vsel %vm2887_vm4, %v3302_v52, %v13743_v21 }
 0x512   : > { %v10964_v47 = vpop.permute.xlu0 %3156  ;;  %13741 = vst [vmem:[#allocation10_spill] sm:$0xff] %v10966_v39  ;;  %7722 = vrot.lane.b32.xlu1 %v13742_v7, %s7883_s24  ;;  %v13370_v7 = vunpack.i.l.bf16 %v10949_v63  ;;  %v7746_v53 = vpack.i.bf16 %v3305_v49, %v3303_v37  ;;  %v13749_v49 = vpack.i.bf16 %v10630_v51, %v10633_v33 }
 0x513   : > { %13740 = vst [vmem:[#allocation9_spill] sm:$0xff] %v10964_v47  ;;  %6568 = vmatprep.mubr.msk.f32.mxu1 %vm1528_vm1, %v10964_v47  ;;  %v3271_v50 = vsel %vm2313_vm3, %v13366_v22, %v10964_v47  ;;  %v10986_v46 = vsel %vm2887_vm4, %v3928_v23, %v3936_v29  ;;  %v3273_v22 = vsel %vm2313_vm3, %v13368_v31, %v10966_v39  ;;  %v1672_v31 = vld [vmem:[#allocation3 + $0xd8] sm:$0xff] }
 0x514   : > { %7742 = vrot.lane.b32.xlu0 %v7741_v43, %s7879_s18  ;;  %v3944_v16 = vrot.slane %v3271_v50, 4  ;;  %13744 = vst [vmem:[#allocation24_spill] sm:$0xff] %v10986_v46  ;;  %v3960_v43 = vrot.slane %v3273_v22, 4 }
 0x515   : > { %v10995_v60 = vpop.permute.xlu1 %3162  ;;  %5217 = vmatmul.mubr.f32.gmra.mrb[74].mxu1 %v3271_v50 }
 0x516   : > { %v10993_v14 = vpop.permute.xlu0 %3158  ;;  %13746 = vst [vmem:[#allocation47_spill] sm:$0xff] %v10995_v60  ;;  %7727 = vrot.lane.b32.xlu1 %v7726_v10, %s7879_s18  ;;  %v10999_v52 = vsel %vm2887_vm4, %v3936_v29, %v3944_v16  ;;  %v7736_v10 = vpack.i.bf16 %v13600_v36, %v13690_v26 }
 0x517   : > { %13745 = vst [vmem:[#allocation32_spill] sm:$0xff] %v10993_v14  ;;  %13747 = vst [vmem:[#allocation33_spill] sm:$0xff] %v10999_v52  ;;  %6569 = vmatprep.mubr.msk.f32.mxu1 %vm1528_vm1, %v10993_v14  ;;  %v3272_v23 = vsel %vm2313_vm3, %v13370_v7, %v10993_v14 }
 0x518   : > { %7747 = vrot.lane.b32.xlu0 %v7746_v53, %s7883_s24  ;;  %v3952_v21 = vrot.slane %v3272_v23, 4  ;;  %v1730_v53 = vld [vmem:[#allocation3 + $0xd9] sm:$0xff] }
 0x519   : > { %v11010_v50 = vpop.permute.xlu1 %7637  ;;  %5222 = vmatmul.mubr.f32.gmra.mrb[76].mxu1 %v3272_v23 }
 0x51a   : > { %v11008_v44 = vpop.permute.xlu0 %3164  ;;  %7732 = vrot.lane.b32.xlu1 %v13749_v49, %s7883_s24  ;;  %v11017_v29 = vsel %vm2887_vm4, %v3944_v16, %v3952_v21  ;;  %v11020_v37 = vsel %vm2887_vm4, %v3952_v21, %v3960_v43  ;;  %6570 = vmatprep.mubr.msk.f32.mxu1 %vm1528_vm1, %v10966_v39  ;;  %v1673_v49 = vld [vmem:[#allocation3 + $0xe0] sm:$0xf] }
 0x51b   : > { %13748 = vst [vmem:[#allocation41_spill] sm:$0xff] %v11008_v44  ;;  %13750 = vst [vmem:[#allocation23_spill] sm:$0xff] %v11017_v29 }
 0x51c   : > { %13751 = vst [vmem:[#allocation8_spill] sm:$0xff] %v11020_v37  ;;  %1844 = vrot.lane.b32.xlu0 %v1672_v31, %s7878_s17  ;;  %v13753_v31 = vld [vmem:[#allocation30_spill] sm:$0xff] }
 0x51d   : > { %v11029_v51 = vpop.permute.xlu1 %3168  ;;  %5227 = vmatmul.mubr.f32.gmra.mrb[78].mxu1 %v3273_v22  ;;  %v13754_v23 = vunpack.i.l.bf16 %v13753_v31 }
 0x51e   : > { %v11027_v7 = vpop.permute.xlu0 %7642  ;;  %13752 = vst [vmem:[#allocation55_spill] sm:$0xff] %v11029_v51  ;;  %7737 = vrot.lane.b32.xlu1 %v7736_v10, %s7879_s18  ;;  %6571 = vmatprep.mubr.msk.f32.mxu1 %vm1528_vm1, %v10995_v60 }
 0x51f   : > { %v13372_v33 = vunpack.i.h.bf16 %v11027_v7  ;;  %v13373_v16 = vunpack.i.l.bf16 %v11027_v7  ;;  %v3277_v21 = vsel %vm2313_vm3, %v13754_v23, %v11029_v51 }
 0x520   : > { %2076 = vrot.lane.b32.xlu0 %v1730_v53, %s7880_s19  ;;  %v13756_v53 = vld [vmem:[#allocation45_spill] sm:$0xff]  ;;  %v3992_v29 = vrot.slane %v3277_v21, 4 }
 0x521   : > { %v3274_v26 = vsel %vm2313_vm3, %v13373_v16, %v10995_v60  ;;  %v3275_v22 = vsel %vm2313_vm3, %v13372_v33, %v11008_v44  ;;  %v13757_v33 = vunpack.i.l.bf16 %v11010_v50 }
 0x522   : > { %v11050_v10 = vpop.permute.xlu0 %3166  ;;  %2967 = vrot.lane.b32.xlu1 %v13756_v53, %s7883_s24  ;;  %v3968_v59 = vrot.slane %v3274_v26, 4  ;;  %5232 = vmatmul.mubr.f32.gmra.mrb[80].mxu1 %v3274_v26  ;;  %v3976_v36 = vrot.slane %v3275_v22, 4  ;;  %v1731_v26 = vld [vmem:[#allocation3 + $0xe1] sm:$0xf] }
 0x523   : > { %13755 = vst [vmem:[#allocation53_spill] sm:$0xff] %v11050_v10  ;;  %6572 = vmatprep.mubr.msk.f32.mxu1 %vm1528_vm1, %v11008_v44  ;;  %v3276_v16 = vsel %vm2313_vm3, %v13757_v33, %v11050_v10  ;;  %v13761_v44 = vld [vmem:[#allocation18_spill] sm:$0xff] }
 0x524   : > { %v3984_v37 = vrot.slane %v3276_v16, 4  ;;  %1846 = vrot.lane.b32.xlu0 %v1673_v49, %s7878_s17  ;;  %v11062_v23 = vsel %vm2887_vm4, %v3960_v43, %v3968_v59  ;;  %v11065_v53 = vsel %vm2887_vm4, %v3968_v59, %v3976_v36  ;;  %v13764_v59 = vunpack.i.h.bf16 %v13753_v31  ;;  %v2343_v31 = vld [vmem:[#allocation3 + $0x2] sm:$0xff] }
 0x525   : > { %13758 = vst [vmem:[#allocation30_spill] sm:$0xff] %v11062_v23  ;;  %13759 = vst [vmem:[#allocation45_spill] sm:$0xff] %v11065_v53  ;;  %v1616_v23 = vld [vmem:[#allocation2] sm:$0xff] }
 0x526   : > { %v11067_v60 = vpop.permute.xlu0 %3170  ;;  %3583 = vrot.lane.b32.xlu1 %v13761_v44, %s7881_s20  ;;  %5237 = vmatmul.mubr.f32.gmra.mrb[82].mxu1 %v3275_v22  ;;  %v11072_v39 = vsel %vm2887_vm4, %v3976_v36, %v3984_v37  ;;  %v11075_v33 = vsel %vm2887_vm4, %v3984_v37, %v3992_v29  ;;  %v13767_v22 = vld [vmem:[#allocation64_spill] sm:$0xff] }
 0x527   : > { %13760 = vst [vmem:[#allocation95_spill] sm:$0xff] %v11067_v60  ;;  %13762 = vst [vmem:[#allocation18_spill] sm:$0xff] %v11072_v39  ;;  %6573 = vmatprep.mubr.msk.f32.mxu1 %vm1528_vm1, %v11050_v10  ;;  %v11083_v43 = vsel %vm2313_vm3, %v13764_v59, %v11067_v60  ;;  %v11115_v59 = vld [vmem:[#allocation2 + $0xda] sm:$0xff] }
 0x528   : > { %13763 = vst [vmem:[#allocation96_spill] sm:$0xff] %v11075_v33  ;;  %13765 = vst [vmem:[#allocation97_spill] sm:$0xff] %v11083_v43  ;;  %v13377_v49 = vrot.slane %v11083_v43, 4  ;;  %2078 = vrot.lane.b32.xlu0 %v1731_v26, %s7880_s19  ;;  %v13778_v33 = vld [vmem:[#allocation49_spill] sm:$0xff] }
 0x529   : > { %13770 = vst [vmem:[#allocation100_spill] sm:$0xff] %v11115_v59  ;;  %v13779_v39 = vunpack.i.l.bf16 %v13778_v33  ;;  %v13782_v10 = vunpack.i.h.bf16 %v13778_v33 }
 0x52a   : > { %v3544_v44 = vpop.permute.xlu0 %3543  ;;  %2372 = vrot.lane.b32.xlu1 %v10777_v40, %s7878_s17  ;;  %5242 = vmatmul.mubr.f32.gmra.mrb[84].mxu1 %v3276_v16  ;;  %v11092_v37 = vsel %vm2887_vm4, %v3992_v29, %v13377_v49  ;;  %v13378_v40 = vunpack.i.h.bf16 %v11010_v50  ;;  %v11104_v29 = vld [vmem:[#allocation2 + $0xd9] sm:$0xff] }
 0x52b   : > { %13766 = vst [vmem:[#allocation98_spill] sm:$0xff] %v11092_v37  ;;  %6574 = vmatprep.mubr.msk.f32.mxu1 %vm1528_vm1, %v11029_v51  ;;  %13768 = vst [vmem:[#allocation64_spill] sm:$0xff] %v11104_v29  ;;  %v11133_v37 = vld [vmem:[#allocation2 + $0xe2] sm:$0xf] }
 0x52c   : > { %v3669_v16 = vsel %vm2313_vm3, %v13378_v40, %v3544_v44  ;;  %13777 = vst [vmem:[#allocation105_spill] sm:$0xff] %v11133_v37 }
 0x52e   : > { %v2023_v36 = vpop.permute.xlu0 %2022  ;;  %2546 = vrot.lane.b32.xlu1 %v13767_v22, %s7880_s19  ;;  %5247 = vmatmul.mubr.f32.gmra.mrb[86].mxu1 %v3277_v21 }
 0x52f   : > { %6575 = vmatprep.mubr.msk.f32.mxu1 %vm1528_vm1, %v11067_v60 }
 0x532   : > { %v2139_v26 = vpop.permute.xlu0 %2138  ;;  %2662 = vrot.lane.b32.xlu1 %v2343_v31, %s7881_s20  ;;  %5252 = vmatmul.mubr.f32.gmra.mrb[88].mxu1 %v11083_v43  ;;  %v11121_v31 = vld [vmem:[#allocation2 + $0xe1] sm:$0xf] }
 0x533   : > { %6576 = vmatprep.mubr.msk.f32.mxu1 %vm1528_vm1, %v3544_v44  ;;  %13772 = vst [vmem:[#allocation102_spill] sm:$0xff] %v11121_v31  ;;  %v13773_v44 = vld [vmem:[#allocation38_spill] sm:$0xff] }
 0x534   : > { %v13774_v49 = vunpack.i.l.bf16 %v13773_v44 }
 0x536   : > { %v11109_v21 = vpop.permute.xlu0 %3545  ;;  %1960 = vrot.lane.b32.xlu1 %v11104_v29, %s7879_s18  ;;  %5257 = vmatmul.mubr.f32.gmra.mrb[90].mxu1 %v3669_v16  ;;  %v1791_v16 = vpop.permute.xlu1 %1790 }
 0x537   : > { %13769 = vst [vmem:[#allocation99_spill] sm:$0xff] %v11109_v21  ;;  %6577 = vmatprep.mubr.msk.f32.mxu1 %vm1528_vm1, %v11109_v21  ;;  %v2225_v18 = vsel %vm1528_vm1, %v1616_v23, %v1791_v16 }
 0x53a   : > { %v11117_v22 = vpop.permute.xlu0 %3547  ;;  %2192 = vrot.lane.b32.xlu1 %v11115_v59, %s7881_s20 }
 0x53b   : > { %13771 = vst [vmem:[#allocation101_spill] sm:$0xff] %v11117_v22  ;;  %v11127_v40 = vsel %vm2313_vm3, %v13774_v49, %v11117_v22 }
 0x53c   : > { %13775 = vst [vmem:[#allocation103_spill] sm:$0xff] %v11127_v40  ;;  %v13386_v51 = vrot.slane %v11127_v40, 4 }
 0x53e   : > { %v11129_v43 = vpop.permute.xlu0 %3549  ;;  %1962 = vrot.lane.b32.xlu1 %v11121_v31, %s7879_s18 }
 0x53f   : > { %13776 = vst [vmem:[#allocation104_spill] sm:$0xff] %v11129_v43  ;;  %v3672_v60 = vsel %vm2313_vm3, %v13779_v39, %v11129_v43 }
 0x540   : > { %v4165_v53 = vrot.slane %v3672_v60, 4 }
 0x542   : > { %v11140_v44 = vpop.permute.xlu0 %3551  ;;  %2194 = vrot.lane.b32.xlu1 %v11133_v37, %s7881_s20  ;;  %v11147_v49 = vsel %vm2887_vm4, %v13386_v51, %v4165_v53 }
 0x543   : > { %13780 = vst [vmem:[#allocation49_spill] sm:$0xff] %v11140_v44  ;;  %13781 = vst [vmem:[#allocation106_spill] sm:$0xff] %v11147_v49  ;;  %v11153_v52 = vsel %vm2313_vm3, %v13782_v10, %v11140_v44  ;;  %v13785_v49 = vld [vmem:[#allocation46_spill] sm:$0xff] }
 0x544   : > { %v7648_v39 = vpop.permute.xlu1 %7647  ;;  %v4173_v46 = vrot.slane %v11153_v52, 4  ;;  %v13786_v47 = vunpack.i.l.bf16 %v13785_v49 }
 0x545   : > { %v7649_v14 = vunpack.i.l.bf16 %v7648_v39  ;;  %v7650_v4 = vunpack.i.h.bf16 %v7648_v39 }
 0x546   : > { %v11157_v31 = vpop.permute.xlu0 %3553  ;;  %v11160_v37 = vsel %vm2887_vm4, %v4165_v53, %v4173_v46 }
 0x547   : > { %13783 = vst [vmem:[#allocation107_spill] sm:$0xff] %v11157_v31  ;;  %13784 = vst [vmem:[#allocation108_spill] sm:$0xff] %v11160_v37  ;;  %v2254_v51 = vsel %vm419_vm0, %v2225_v18, %v7649_v14  ;;  %v11167_v33 = vsel %vm2313_vm3, %v13786_v47, %v11157_v31  ;;  %v13789_v47 = vld [vmem:[#allocation36_spill] sm:$0xff] }
 0x548   : > { %v7653_v10 = vpop.permute.xlu1 %7652  ;;  %v2284_v27 = vsel %vm2283_vm2, %v2254_v51, %v2023_v36  ;;  %v4181_v59 = vrot.slane %v11167_v33, 4  ;;  %v13790_v11 = vunpack.i.l.bf16 %v13789_v47  ;;  %v13791_v51 = vunpack.i.h.bf16 %v13785_v49 }
 0x549   : > { %v7654_v23 = vunpack.i.l.bf16 %v7653_v10  ;;  %v2314_v53 = vsel %vm2313_vm3, %v2284_v27, %v2139_v26 }
 0x54a   : > { %v11171_v16 = vpop.permute.xlu0 %3555  ;;  %v11175_v37 = vsel %vm2887_vm4, %v4173_v46, %v4181_v59 }
 0x54b   : > { %13787 = vst [vmem:[#allocation46_spill] sm:$0xff] %v11171_v16  ;;  %13788 = vst [vmem:[#allocation109_spill] sm:$0xff] %v11175_v37  ;;  %v3215_v18 = vsel %vm419_vm0, %v7654_v23, %v7650_v4  ;;  %v11187_v36 = vsel %vm2313_vm3, %v13791_v51, %v11171_v16  ;;  %v3194_v27 = vsel %vm3193_vm7, %v2314_v53, %v7654_v23  ;;  %v13800_v37 = vunpack.i.h.bf16 %v13789_v47 }
 0x54c   : > { %v11178_v14 = vpop.permute.xlu1 %3481  ;;  %v3237_v29 = vsel %vm3236_vm6, %v3215_v18, %v13790_v11  ;;  %v4189_v4 = vrot.slane %v11187_v36, 4  ;;  %v13793_v11 = vld [vmem:[#allocation54_spill] sm:$0xff]  ;;  %v7655_v18 = vunpack.i.h.bf16 %v7653_v10 }
 0x54d   : > { %4666 = vmatprep.mubr.f32.mxu0 %v3237_v29  ;;  %v3670_v46 = vsel %vm2313_vm3, %v11178_v14, %v11109_v21  ;;  %v13794_v49 = vunpack.i.l.bf16 %v13793_v11 }
 0x54e   : > { %v11194_v26 = vpop.permute.xlu0 %3557  ;;  %4667 = vmatmul.mubr.f32.vlgmr.msra.gmra.mrb[112].mxu0 %v3194_v27  ;;  %5262 = vmatmul.mubr.f32.gmra.mrb[92].mxu1 %v3670_v46  ;;  %v11205_v39 = vsel %vm2887_vm4, %v4181_v59, %v4189_v4 }
 0x54f   : > { %13792 = vst [vmem:[#allocation36_spill] sm:$0xff] %v11194_v26  ;;  %6578 = vmatprep.mubr.msk.f32.mxu1 %vm1528_vm1, %v11117_v22  ;;  %v11202_v29 = vsel %vm2313_vm3, %v13794_v49, %v11194_v26  ;;  %13795 = vst [vmem:[#allocation54_spill] sm:$0xff] %v11205_v39  ;;  %v13799_v49 = vunpack.i.h.bf16 %v13793_v11 }
 0x550   : > { %v11207_v23 = vpop.permute.xlu1 %7657  ;;  %v4197_v53 = vrot.slane %v11202_v29, 4 }
 0x551   : > { %13796 = vst [vmem:[#allocation110_spill] sm:$0xff] %v11207_v23  ;;  %v13395_v51 = vunpack.i.l.bf16 %v11207_v23 }
 0x552   : > { %v11211_v27 = vpop.permute.xlu0 %3559  ;;  %5267 = vmatmul.mubr.f32.gmra.mrb[94].mxu1 %v11127_v40  ;;  %v11215_v46 = vsel %vm2887_vm4, %v4189_v4, %v4197_v53 }
 0x553   : > { %13797 = vst [vmem:[#allocation111_spill] sm:$0xff] %v11211_v27  ;;  %13798 = vst [vmem:[#allocation112_spill] sm:$0xff] %v11215_v46  ;;  %6579 = vmatprep.mubr.msk.f32.mxu1 %vm1528_vm1, %v11129_v43  ;;  %v3216_v59 = vsel %vm419_vm0, %v7655_v18, %v13395_v51  ;;  %v11226_v10 = vsel %vm2313_vm3, %v13799_v49, %v11211_v27  ;;  %v7660_v46 = vunpack.i.h.bf16 %v11207_v23  ;;  %v13806_v49 = vld [vmem:[#allocation59_spill] sm:$0xff] }
 0x554   : > { %v7663_v39 = vpop.permute.xlu1 %7662  ;;  %v3238_v40 = vsel %vm3236_vm6, %v3216_v59, %v13800_v37  ;;  %v4205_v4 = vrot.slane %v11226_v10, 4  ;;  %v3195_v51 = vsel %vm3193_vm7, %v10775_v55, %v7655_v18  ;;  %v13804_v18 = vld [vmem:[#allocation31_spill] sm:$0xff] }
 0x555   : > { %v7665_v43 = vunpack.i.h.bf16 %v7663_v39  ;;  %v7664_v21 = vunpack.i.l.bf16 %v7663_v39  ;;  %4671 = vmatprep.mubr.f32.mxu0 %v3238_v40  ;;  %v13805_v59 = vunpack.i.l.bf16 %v13804_v18 }
 0x556   : > { %v11235_v22 = vpop.permute.xlu0 %3561  ;;  %4672 = vmatmul.mubr.f32.gmra.mrb[114].mxu0 %v3195_v51  ;;  %5272 = vmatmul.mubr.f32.gmra.mrb[96].mxu1 %v3672_v60  ;;  %v11238_v11 = vsel %vm2887_vm4, %v4197_v53, %v4205_v4 }
 0x557   : > { %13801 = vst [vmem:[#allocation113_spill] sm:$0xff] %v11235_v22  ;;  %13802 = vst [vmem:[#allocation114_spill] sm:$0xff] %v11238_v11  ;;  %6580 = vmatprep.mubr.msk.f32.mxu1 %vm1528_vm1, %v11140_v44  ;;  %v3217_v37 = vsel %vm419_vm0, %v7664_v21, %v7660_v46  ;;  %v11245_v47 = vsel %vm3193_vm7, %v10765_v58, %v7664_v21  ;;  %v3197_v40 = vsel %vm3193_vm7, %v10783_v54, %v7665_v43 }
 0x558   : > { %13803 = vst [vmem:[#allocation115_spill] sm:$0xff] %v11245_v47  ;;  %v7668_v39 = vpop.permute.xlu1 %7667  ;;  %v11252_v60 = vsel %vm3236_vm6, %v3217_v37, %v13805_v59  ;;  %v13400_v53 = vrot.slane %v11245_v47, 4  ;;  %v3860_v51 = vrot.slane %v3197_v40, 4  ;;  %v13807_v11 = vunpack.i.l.bf16 %v13806_v49 }
 0x559   : > { %v7669_v58 = vunpack.i.l.bf16 %v7668_v39  ;;  %4676 = vmatprep.mubr.f32.mxu0 %v11252_v60  ;;  %v13810_v59 = vunpack.i.h.bf16 %v13806_v49  ;;  %v7670_v55 = vunpack.i.h.bf16 %v7668_v39 }
 0x55a   : > { %v11259_v46 = vsel %vm2313_vm3, %v13807_v11, %v11235_v22  ;;  %v11263_v21 = vpop.permute.xlu0 %3563  ;;  %4677 = vmatmul.mubr.f32.gmra.mrb[116].mxu0 %v11245_v47  ;;  %5277 = vmatmul.mubr.f32.gmra.mrb[98].mxu1 %v11153_v52  ;;  %v11270_v37 = vsel %vm2887_vm4, %v13400_v53, %v3860_v51  ;;  %v13812_v47 = vunpack.i.h.bf16 %v13804_v18 }
 0x55b   : > { %v4213_v54 = vrot.slane %v11259_v46, 4  ;;  %13808 = vst [vmem:[#allocation31_spill] sm:$0xff] %v11263_v21  ;;  %13809 = vst [vmem:[#allocation59_spill] sm:$0xff] %v11270_v37  ;;  %6581 = vmatprep.mubr.msk.f32.mxu1 %vm1528_vm1, %v11157_v31  ;;  %v3218_v11 = vsel %vm419_vm0, %v7665_v43, %v7669_v58  ;;  %v11279_v44 = vsel %vm2313_vm3, %v13810_v59, %v11263_v21 }
 0x55c   : > { %v7673_v52 = vpop.permute.xlu1 %7672  ;;  %v3240_v53 = vsel %vm3236_vm6, %v3218_v11, %v13812_v47  ;;  %v4221_v37 = vrot.slane %v11279_v44, 4 }
 0x55d   : > { %v11282_v23 = vsel %vm2887_vm4, %v4205_v4, %v4213_v54  ;;  %v7675_v31 = vunpack.i.h.bf16 %v7673_v52  ;;  %v7674_v48 = vunpack.i.l.bf16 %v7673_v52  ;;  %4681 = vmatprep.mubr.f32.mxu0 %v3240_v53  ;;  %v3862_v43 = vrot.slane %v3240_v53, 4  ;;  %v13817_v52 = vld [vmem:[#allocation22_spill] sm:$0xff] }
 0x55e   : > { %13811 = vst [vmem:[#allocation116_spill] sm:$0xff] %v11282_v23  ;;  %v11288_v58 = vpop.permute.xlu0 %3565  ;;  %4682 = vmatmul.mubr.f32.gmra.mrb[118].mxu0 %v3197_v40  ;;  %5282 = vmatmul.mubr.f32.gmra.mrb[100].mxu1 %v11167_v33  ;;  %v11292_v4 = vsel %vm2887_vm4, %v4213_v54, %v4221_v37  ;;  %v13815_v40 = vld [vmem:[#allocation65_spill] sm:$0xff]  ;;  %v13818_v49 = vunpack.i.l.bf16 %v13817_v52 }
 0x55f   : > { %13813 = vst [vmem:[#allocation117_spill] sm:$0xff] %v11288_v58  ;;  %13814 = vst [vmem:[#allocation118_spill] sm:$0xff] %v11292_v4  ;;  %6582 = vmatprep.mubr.msk.f32.mxu1 %vm1528_vm1, %v11171_v16  ;;  %v3219_v47 = vsel %vm419_vm0, %v7674_v48, %v7670_v55  ;;  %v3198_v39 = vsel %vm3193_vm7, %v13715_v45, %v7674_v48  ;;  %v3199_v18 = vsel %vm3193_vm7, %v13716_v3, %v7675_v31 }
 0x560   : > { %v7678_v53 = vpop.permute.xlu1 %7677  ;;  %v13816_v11 = vunpack.i.l.bf16 %v13815_v40  ;;  %v3868_v54 = vrot.slane %v3198_v39, 4  ;;  %v3876_v59 = vrot.slane %v3199_v18, 4  ;;  %v11309_v4 = vsel %vm2313_vm3, %v13818_v49, %v11288_v58 }
 0x561   : > { %v7679_v55 = vunpack.i.l.bf16 %v7678_v53  ;;  %v4229_v45 = vrot.slane %v11309_v4, 4  ;;  %v13820_v3 = vrot.slane %v11252_v60, 4 }
 0x562   : > { %v3241_v33 = vsel %vm3236_vm6, %v3219_v47, %v13816_v11  ;;  %v11312_v48 = vpop.permute.xlu0 %3567  ;;  %5287 = vmatmul.mubr.f32.gmra.mrb[102].mxu1 %v11187_v36  ;;  %v11321_v11 = vsel %vm2887_vm4, %v3860_v51, %v3868_v54  ;;  %v11324_v49 = vsel %vm2887_vm4, %v3868_v54, %v3876_v59  ;;  %v13824_v51 = vunpack.i.h.bf16 %v13815_v40 }
 0x563   : > { %v3870_v23 = vrot.slane %v3241_v33, 4  ;;  %4686 = vmatprep.mubr.f32.mxu0 %v3241_v33  ;;  %13819 = vst [vmem:[#allocation65_spill] sm:$0xff] %v11312_v48  ;;  %v11318_v47 = vsel %vm2887_vm4, %v13820_v3, %v3862_v43  ;;  %13821 = vst [vmem:[#allocation22_spill] sm:$0xff] %v11321_v11  ;;  %6583 = vmatprep.mubr.msk.f32.mxu1 %vm1528_vm1, %v11194_v26  ;;  %v3220_v33 = vsel %vm419_vm0, %v7675_v31, %v7679_v55 }
 0x564   : > { %4687 = vmatmul.mubr.f32.gmra.mrb[120].mxu0 %v3198_v39  ;;  %13822 = vst [vmem:[#allocation119_spill] sm:$0xff] %v11324_v49  ;;  %v13823_v39 = vunpack.i.h.bf16 %v13817_v52  ;;  %v7683_v16 = vpop.permute.xlu1 %7682  ;;  %v3242_v54 = vsel %vm3236_vm6, %v3220_v33, %v13824_v51  ;;  %v11343_v26 = vsel %vm2887_vm4, %v4221_v37, %v4229_v45  ;;  %v7680_v31 = vunpack.i.h.bf16 %v7678_v53 }
 0x565   : > { %v11336_v3 = vsel %vm2887_vm4, %v3862_v43, %v3870_v23  ;;  %13825 = vst [vmem:[#allocation120_spill] sm:$0xff] %v11343_v26  ;;  %v7685_v55 = vunpack.i.h.bf16 %v7683_v16  ;;  %v7684_v11 = vunpack.i.l.bf16 %v7683_v16  ;;  %4691 = vmatprep.mubr.f32.mxu0 %v3242_v54  ;;  %v3878_v52 = vrot.slane %v3242_v54, 4 }
 0x566   : > { %v11333_v36 = vsel %vm2313_vm3, %v13823_v39, %v11312_v48  ;;  %v11345_v39 = vpop.permute.xlu0 %3569  ;;  %5292 = vmatmul.mubr.f32.gmra.mrb[104].mxu1 %v11202_v29  ;;  %v13828_v33 = vunpack.i.l.bf16 %v10759_v8 }
 0x567   : > { %v4237_v49 = vrot.slane %v11333_v36, 4  ;;  %13826 = vst [vmem:[#allocation121_spill] sm:$0xff] %v11345_v39  ;;  %6584 = vmatprep.mubr.msk.f32.mxu1 %vm1528_vm1, %v11211_v27  ;;  %v3221_v40 = vsel %vm419_vm0, %v7684_v11, %v7680_v31  ;;  %v3200_v37 = vsel %vm3193_vm7, %v13719_v20, %v7684_v11  ;;  %v3201_v16 = vsel %vm3193_vm7, %v13720_v62, %v7685_v55 }
 0x568   : > { %4692 = vmatmul.mubr.f32.gmra.mrb[122].mxu0 %v3199_v18  ;;  %v7688_v53 = vpop.permute.xlu1 %7687  ;;  %v3243_v18 = vsel %vm3236_vm6, %v3221_v40, %v13828_v33  ;;  %v3884_v29 = vrot.slane %v3200_v37, 4  ;;  %v3892_v51 = vrot.slane %v3201_v16, 4  ;;  %v11372_v62 = vsel %vm2887_vm4, %v3870_v23, %v3878_v52 }
 0x569   : > { %v11349_v43 = vsel %vm2887_vm4, %v4229_v45, %v4237_v49  ;;  %v13829_v45 = vld [vmem:[#allocation56_spill] sm:$0xff]  ;;  %v7689_v31 = vunpack.i.l.bf16 %v7688_v53  ;;  %v3886_v26 = vrot.slane %v3243_v18, 4  ;;  %4696 = vmatprep.mubr.f32.mxu0 %v3243_v18 }
 0x56a   : > { %13827 = vst [vmem:[#allocation122_spill] sm:$0xff] %v11349_v43  ;;  %v13830_v54 = vunpack.i.l.bf16 %v13829_v45  ;;  %v11368_v11 = vpop.permute.xlu0 %3571  ;;  %5297 = vmatmul.mubr.f32.gmra.mrb[106].mxu1 %v11226_v10  ;;  %v11375_v40 = vsel %vm2887_vm4, %v3876_v59, %v3884_v29  ;;  %v11378_v33 = vsel %vm2887_vm4, %v3884_v29, %v3892_v51  ;;  %v13833_v59 = vunpack.i.h.bf16 %v10759_v8 }
 0x56b   : > { %13831 = vst [vmem:[#allocation56_spill] sm:$0xff] %v11378_v33  ;;  %6585 = vmatprep.mubr.msk.f32.mxu1 %vm1528_vm1, %v11235_v22  ;;  %v3222_v18 = vsel %vm419_vm0, %v7685_v55, %v7689_v31  ;;  %v11390_v23 = vsel %vm2887_vm4, %v3878_v52, %v3886_v26  ;;  %v7690_v55 = vunpack.i.h.bf16 %v7688_v53 }
 0x56c   : > { %v11365_v43 = vsel %vm2313_vm3, %v13830_v54, %v11345_v39  ;;  %4697 = vmatmul.mubr.f32.gmra.mrb[124].mxu0 %v3200_v37  ;;  %v13832_v54 = vunpack.i.h.bf16 %v13829_v45  ;;  %v7693_v10 = vpop.permute.xlu1 %7692  ;;  %v3244_v29 = vsel %vm3236_vm6, %v3222_v18, %v13833_v59 }
 0x56d   : > { %v4245_v20 = vrot.slane %v11365_v43, 4  ;;  %v7695_v31 = vunpack.i.h.bf16 %v7693_v10  ;;  %v7694_v33 = vunpack.i.l.bf16 %v7693_v10  ;;  %4701 = vmatprep.mubr.f32.mxu0 %v3244_v29  ;;  %v3894_v45 = vrot.slane %v3244_v29, 4 }
 0x56e   : > { %v11387_v37 = vsel %vm2313_vm3, %v13832_v54, %v11368_v11  ;;  %v11399_v54 = vpop.permute.xlu0 %3573  ;;  %5302 = vmatmul.mubr.f32.gmra.mrb[108].mxu1 %v11259_v46  ;;  %v13837_v10 = vunpack.i.l.bf16 %v10835_v1 }
 0x56f   : > { %v4253_v27 = vrot.slane %v11387_v37, 4  ;;  %v11397_v22 = vsel %vm2887_vm4, %v4237_v49, %v4245_v20  ;;  %13835 = vst [vmem:[#allocation124_spill] sm:$0xff] %v11399_v54  ;;  %6586 = vmatprep.mubr.msk.f32.mxu1 %vm1528_vm1, %v11263_v21  ;;  %v3223_v8 = vsel %vm419_vm0, %v7694_v33, %v7690_v55  ;;  %v3202_v49 = vsel %vm3193_vm7, %v13725_v24, %v7694_v33 }
 0x570   : > { %13834 = vst [vmem:[#allocation123_spill] sm:$0xff] %v11397_v22  ;;  %4702 = vmatmul.mubr.f32.gmra.mrb[126].mxu0 %v3201_v16  ;;  %v3203_v53 = vsel %vm3193_vm7, %v9883_v38, %v7695_v31  ;;  %v7698_v18 = vpop.permute.xlu1 %7697  ;;  %v3245_v16 = vsel %vm3236_vm6, %v3223_v8, %v13837_v10  ;;  %v3900_v46 = vrot.slane %v3202_v49, 4  ;;  %v11426_v38 = vsel %vm2887_vm4, %v3886_v26, %v3894_v45 }
 0x571   : > { %v11403_v52 = vsel %vm2887_vm4, %v4245_v20, %v4253_v27  ;;  %v3908_v59 = vrot.slane %v3203_v53, 4  ;;  %v13838_v20 = vld [vmem:[#allocation16_spill] sm:$0xff]  ;;  %v7699_v55 = vunpack.i.l.bf16 %v7698_v18  ;;  %v3902_v22 = vrot.slane %v3245_v16, 4  ;;  %4706 = vmatprep.mubr.f32.mxu0 %v3245_v16 }
 0x572   : > { %13836 = vst [vmem:[#allocation125_spill] sm:$0xff] %v11403_v52  ;;  %v13839_v29 = vunpack.i.l.bf16 %v13838_v20  ;;  %v11422_v33 = vpop.permute.xlu0 %3575  ;;  %5307 = vmatmul.mubr.f32.gmra.mrb[110].mxu1 %v11279_v44  ;;  %13840 = vst [vmem:[#allocation16_spill] sm:$0xff] %v11426_v38  ;;  %v11429_v8 = vsel %vm2887_vm4, %v3892_v51, %v3900_v46  ;;  %v13845_v51 = vunpack.i.h.bf16 %v10835_v1 }
 0x573   : > { %13841 = vst [vmem:[#allocation126_spill] sm:$0xff] %v11429_v8  ;;  %v11432_v10 = vsel %vm2887_vm4, %v3900_v46, %v3908_v59  ;;  %6587 = vmatprep.mubr.msk.f32.mxu1 %vm1528_vm1, %v11288_v58  ;;  %v3224_v16 = vsel %vm419_vm0, %v7695_v31, %v7699_v55  ;;  %v11444_v44 = vsel %vm2887_vm4, %v3894_v45, %v3902_v22  ;;  %v7700_v31 = vunpack.i.h.bf16 %v7698_v18 }
 0x574   : > { %v11419_v52 = vsel %vm2313_vm3, %v13839_v29, %v11399_v54  ;;  %4707 = vmatmul.mubr.f32.gmra.mrb[128].mxu0 %v3202_v49  ;;  %13842 = vst [vmem:[#allocation127_spill] sm:$0xff] %v11432_v10  ;;  %v13843_v29 = vunpack.i.h.bf16 %v13838_v20  ;;  %13844 = vst [vmem:[#allocation128_spill] sm:$0xff] %v11444_v44  ;;  %v7703_v26 = vpop.permute.xlu1 %7702  ;;  %v3246_v46 = vsel %vm3236_vm6, %v3224_v16, %v13845_v51  ;;  %v13848_v51 = vunpack.i.l.bf16 %v10888_v13 }
 0x575   : > { %v4261_v24 = vrot.slane %v11419_v52, 4  ;;  %v7705_v55 = vunpack.i.h.bf16 %v7703_v26  ;;  %v7704_v10 = vunpack.i.l.bf16 %v7703_v26  ;;  %4711 = vmatprep.mubr.f32.mxu0 %v3246_v46  ;;  %v11453_v20 = vpop.f32.mrb[48].mxu1 }
 0x576   : > { %v11441_v49 = vsel %vm2313_vm3, %v13843_v29, %v11422_v33  ;;  %v3910_v29 = vrot.slane %v3246_v46, 4  ;;  %v11455_v8 = vpop.permute.xlu0 %3577  ;;  %v5155_v45 = vpop.f32.mrb[49].mxu1  ;;  %5312 = vmatmul.mubr.f32.gmra.mrb[112].mxu1 %v11309_v4 }
 0x577   : > { %v4269_v21 = vrot.slane %v11441_v49, 4  ;;  %v11451_v58 = vsel %vm2887_vm4, %v4253_v27, %v4261_v24  ;;  %v4279_v16 = vrot.slane %v11455_v8, 4  ;;  %6588 = vmatprep.mubr.msk.f32.mxu1 %vm1528_vm1, %v11312_v48  ;;  %v3225_v27 = vsel %vm419_vm0, %v7704_v10, %v7700_v31  ;;  %v13849_v45 = vld [vmem:[#allocation79_spill] sm:$0xff] }
 0x578   : > { %13846 = vst [vmem:[#allocation129_spill] sm:$0xff] %v11451_v58  ;;  %4712 = vmatmul.mubr.f32.gmra.mrb[130].mxu0 %v3203_v53  ;;  %v3204_v18 = vsel %vm3193_vm7, %v10001_v6, %v7704_v10  ;;  %v3205_v26 = vsel %vm3193_vm7, %v10084_v56, %v7705_v55  ;;  %v7708_v53 = vpop.permute.xlu1 %7707  ;;  %v3247_v4 = vsel %vm3236_vm6, %v3225_v27, %v13848_v51 }
 0x579   : > { %v11459_v1 = vsel %vm2887_vm4, %v4261_v24, %v4269_v21  ;;  %v3916_v24 = vrot.slane %v3204_v18, 4  ;;  %v3924_v46 = vrot.slane %v3205_v26, 4  ;;  %v7709_v31 = vunpack.i.l.bf16 %v7708_v53  ;;  %4716 = vmatprep.mubr.f32.mxu0 %v3247_v4  ;;  %v11478_v6 = vpop.f32.mrb[50].mxu1 }
 0x57a   : > { %13847 = vst [vmem:[#allocation130_spill] sm:$0xff] %v11459_v1  ;;  %v13850_v1 = vunpack.i.l.bf16 %v13849_v45  ;;  %v3918_v48 = vrot.slane %v3247_v4, 4  ;;  %v11482_v44 = vpop.permute.xlu0 %3579  ;;  %v5160_v27 = vpop.f32.mrb[51].mxu1  ;;  %5317 = vmatmul.mubr.f32.gmra.mrb[114].mxu1 %v11333_v36  ;;  %v11486_v51 = vsel %vm2887_vm4, %v3902_v22, %v3910_v29 }
 0x57b   : > { %v11492_v4 = vsel %vm2887_vm4, %v3916_v24, %v3924_v46  ;;  %v4287_v38 = vrot.slane %v11482_v44, 4  ;;  %6589 = vmatprep.mubr.msk.f32.mxu1 %vm1528_vm1, %v11345_v39  ;;  %v3226_v10 = vsel %vm419_vm0, %v7705_v55, %v7709_v31  ;;  %v13856_v39 = vrot.slane %v11422_v33, 4 }
 0x57c   : > { %v11476_v58 = vsel %vm2313_vm3, %v13850_v1, %v11455_v8  ;;  %4717 = vmatmul.mubr.f32.gmra.mrb[132].mxu0 %v3204_v18  ;;  %v11489_v1 = vsel %vm2887_vm4, %v3908_v59, %v3916_v24  ;;  %13852 = vst [vmem:[#allocation131_spill] sm:$0xff] %v11492_v4  ;;  %v13853_v18 = vunpack.i.h.bf16 %v13849_v45  ;;  %v11505_v22 = vsel %vm2887_vm4, %v3910_v29, %v3918_v48  ;;  %v7713_v59 = vpop.permute.xlu1 %7712 }
 0x57d   : > { %v4277_v56 = vrot.slane %v11476_v58, 4  ;;  %13851 = vst [vmem:[#allocation79_spill] sm:$0xff] %v11489_v1  ;;  %13854 = vst [vmem:[#allocation132_spill] sm:$0xff] %v11505_v22  ;;  %v13855_v24 = vunpack.i.h.bf16 %v10888_v13  ;;  %v11514_v55 = vsel %vm2887_vm4, %v13856_v39, %v4279_v16  ;;  %v7710_v31 = vunpack.i.h.bf16 %v7708_v53  ;;  %v11519_v29 = vpop.f32.mrb[52].mxu1 }
 0x57e   : > { %v11502_v36 = vsel %vm2313_vm3, %v13853_v18, %v11482_v44  ;;  %13857 = vst [vmem:[#allocation133_spill] sm:$0xff] %v11514_v55  ;;  %v7715_v18 = vunpack.i.h.bf16 %v7713_v59  ;;  %v7714_v1 = vunpack.i.l.bf16 %v7713_v59  ;;  %v11522_v13 = vsel %vm2887_vm4, %v4279_v16, %v4287_v38  ;;  %v5165_v22 = vpop.f32.mrb[53].mxu1  ;;  %5322 = vmatmul.mubr.f32.gmra.mrb[116].mxu1 %v11365_v43 }
 0x57f   : > { %v3248_v27 = vsel %vm3236_vm6, %v3226_v10, %v13855_v24  ;;  %v4285_v4 = vrot.slane %v11502_v36, 4  ;;  %v11517_v45 = vsel %vm2887_vm4, %v4269_v21, %v4277_v56  ;;  %13859 = vst [vmem:[#allocation135_spill] sm:$0xff] %v11522_v13  ;;  %v11524_v24 = vpop.permute.xlu0 %3581  ;;  %6590 = vmatprep.mubr.msk.f32.mxu1 %vm1528_vm1, %v11368_v11  ;;  %v13861_v22 = vunpack.i.l.bf16 %v10947_v61  ;;  %v13862_v21 = vld [vmem:[#allocation85_spill] sm:$0xff] }
 0x580   : > { %13858 = vst [vmem:[#allocation134_spill] sm:$0xff] %v11517_v45  ;;  %4721 = vmatprep.mubr.f32.mxu0 %v3248_v27  ;;  %v3926_v10 = vrot.slane %v3248_v27, 4  ;;  %v3227_v53 = vsel %vm419_vm0, %v7714_v1, %v7710_v31  ;;  %v3206_v16 = vsel %vm3193_vm7, %v10182_v57, %v7714_v1  ;;  %v3207_v59 = vsel %vm3193_vm7, %v10301_v17, %v7715_v18 }
 0x581   : > { %4722 = vmatmul.mubr.f32.gmra.mrb[134].mxu0 %v3205_v26  ;;  %v11528_v39 = vsel %vm2887_vm4, %v4277_v56, %v4285_v4  ;;  %v7718_v26 = vpop.permute.xlu1 %7717  ;;  %v3249_v43 = vsel %vm3236_vm6, %v3227_v53, %v13861_v22  ;;  %v3932_v56 = vrot.slane %v3206_v16, 4  ;;  %v3940_v27 = vrot.slane %v3207_v59, 4  ;;  %v11547_v57 = vpop.f32.mrb[54].mxu1 }
 0x582   : > { %13860 = vst [vmem:[#allocation136_spill] sm:$0xff] %v11528_v39  ;;  %v13863_v39 = vunpack.i.l.bf16 %v13862_v21  ;;  %v7719_v31 = vunpack.i.l.bf16 %v7718_v26  ;;  %v3934_v45 = vrot.slane %v3249_v43, 4  ;;  %4726 = vmatprep.mubr.f32.mxu0 %v3249_v43  ;;  %v5170_v1 = vpop.f32.mrb[55].mxu1  ;;  %5327 = vmatmul.mubr.f32.gmra.mrb[118].mxu1 %v11387_v37  ;;  %v11552_v53 = vsel %vm2887_vm4, %v3918_v48, %v3926_v10 }
 0x583   : > { %v11555_v22 = vsel %vm2887_vm4, %v3924_v46, %v3932_v56  ;;  %6591 = vmatprep.mubr.msk.f32.mxu1 %vm1528_vm1, %v11399_v54  ;;  %v13866_v46 = vunpack.i.h.bf16 %v10947_v61  ;;  %v7720_v54 = vunpack.i.h.bf16 %v7718_v26 }
 0x584   : > { %v11545_v13 = vsel %vm2313_vm3, %v13863_v39, %v11524_v24  ;;  %v11558_v39 = vsel %vm2887_vm4, %v3932_v56, %v3940_v27  ;;  %v3228_v43 = vsel %vm419_vm0, %v7715_v18, %v7719_v31  ;;  %v11564_v17 = vsel %vm2887_vm4, %v3926_v10, %v3934_v45 }
 0x585   : > { %4727 = vmatmul.mubr.f32.gmra.mrb[136].mxu0 %v3206_v16  ;;  %v13864_v16 = vrot.slane %v11524_v24, 4  ;;  %v7723_v48 = vpop.permute.xlu1 %7722  ;;  %v3250_v1 = vsel %vm3236_vm6, %v3228_v43, %v13866_v46  ;;  %v13867_v56 = vrot.slane %v11545_v13, 4 }
 0x586   : > { %v7725_v18 = vunpack.i.h.bf16 %v7723_v48  ;;  %v7724_v31 = vunpack.i.l.bf16 %v7723_v48  ;;  %v3942_v10 = vrot.slane %v3250_v1, 4  ;;  %4731 = vmatprep.mubr.f32.mxu0 %v3250_v1  ;;  %5332 = vmatmul.mubr.f32.gmra.mrb[120].mxu1 %v11419_v52 }
 0x587   : > { %v11569_v37 = vsel %vm2887_vm4, %v4287_v38, %v13864_v16  ;;  %v11577_v55 = vsel %vm2887_vm4, %v4285_v4, %v13867_v56  ;;  %6592 = vmatprep.mubr.msk.f32.mxu1 %vm1528_vm1, %v11422_v33  ;;  %v13869_v4 = vunpack.i.l.bf16 %v10949_v63 }
 0x588   : > { %13865 = vst [vmem:[#allocation85_spill] sm:$0xff] %v11569_v37  ;;  %13868 = vst [vmem:[#allocation137_spill] sm:$0xff] %v11577_v55  ;;  %v3229_v61 = vsel %vm419_vm0, %v7724_v31, %v7720_v54  ;;  %v3208_v38 = vsel %vm3193_vm7, %v10371_v32, %v7724_v31  ;;  %v3209_v48 = vsel %vm3193_vm7, %v10433_v28, %v7725_v18  ;;  %v13870_v31 = vunpack.i.h.bf16 %v10949_v63  ;;  %v13875_v55 = vld [vmem:[#allocation62_spill] sm:$0xff] }
 0x589   : > { %4732 = vmatmul.mubr.f32.gmra.mrb[138].mxu0 %v3207_v59  ;;  %v7728_v43 = vpop.permute.xlu1 %7727  ;;  %v3251_v26 = vsel %vm3236_vm6, %v3229_v61, %v13869_v4  ;;  %v3948_v16 = vrot.slane %v3208_v38, 4  ;;  %v11591_v59 = vsel %vm2887_vm4, %v3934_v45, %v3942_v10  ;;  %v3956_v1 = vrot.slane %v3209_v48, 4  ;;  %v11603_v45 = vpop.permute.xlu0 %3707 }
 0x58a   : > { %v7729_v52 = vunpack.i.l.bf16 %v7728_v43  ;;  %v3950_v46 = vrot.slane %v3251_v26, 4  ;;  %4736 = vmatprep.mubr.f32.mxu0 %v3251_v26  ;;  %5337 = vmatmul.mubr.f32.gmra.mrb[122].mxu1 %v11441_v49  ;;  %v13887_v37 = vrot.slane %v11545_v13, 4 }
 0x58b   : > { %v11595_v32 = vsel %vm2887_vm4, %v3940_v27, %v3948_v16  ;;  %6593 = vmatprep.mubr.msk.f32.mxu1 %vm1528_vm1, %v11455_v8  ;;  %v11609_v49 = vsel %vm2887_vm4, %v3948_v16, %v3956_v1  ;;  %v7730_v27 = vunpack.i.h.bf16 %v7728_v43 }
 0x58c   : > { %v3230_v54 = vsel %vm419_vm0, %v7725_v18, %v7729_v52  ;;  %v11601_v28 = vsel %vm2887_vm4, %v3942_v10, %v3950_v46  ;;  %v11611_v8 = vpop.f32.mrb[56].mxu1  ;;  %v13871_v52 = vunpack.i.l.bf16 %v11027_v7 }
 0x58d   : > { %4737 = vmatmul.mubr.f32.gmra.mrb[140].mxu0 %v3208_v38  ;;  %v7733_v56 = vpop.permute.xlu1 %7732  ;;  %v3252_v61 = vsel %vm3236_vm6, %v3230_v54, %v13870_v31  ;;  %v5175_v18 = vpop.f32.mrb[57].mxu1 }
 0x58e   : > { %v7735_v38 = vunpack.i.h.bf16 %v7733_v56  ;;  %v7734_v4 = vunpack.i.l.bf16 %v7733_v56  ;;  %v3958_v26 = vrot.slane %v3252_v61, 4  ;;  %4741 = vmatprep.mubr.f32.mxu0 %v3252_v61  ;;  %5342 = vmatmul.mubr.f32.gmra.mrb[124].mxu1 %v11476_v58 }
 0x58f   : > { %6594 = vmatprep.mubr.msk.f32.mxu1 %vm1528_vm1, %v11482_v44 }
 0x590   : > { %v3231_v63 = vsel %vm419_vm0, %v7734_v4, %v7730_v27  ;;  %v3210_v10 = vsel %vm3193_vm7, %v10492_v2, %v7734_v4  ;;  %v3211_v43 = vsel %vm3193_vm7, %v10556_v9, %v7735_v38  ;;  %v11624_v61 = vpop.f32.mrb[58].mxu1  ;;  %v11627_v44 = vsel %vm2887_vm4, %v3950_v46, %v3958_v26  ;;  %v11629_v27 = vpop.permute.xlu0 %7742 }
 0x591   : > { %4742 = vmatmul.mubr.f32.gmra.mrb[142].mxu0 %v3209_v48  ;;  %v7738_v16 = vpop.permute.xlu1 %7737  ;;  %v3253_v54 = vsel %vm3236_vm6, %v3231_v63, %v13871_v52  ;;  %v3964_v48 = vrot.slane %v3210_v10, 4  ;;  %v3972_v56 = vrot.slane %v3211_v43, 4  ;;  %v5180_v2 = vpop.f32.mrb[59].mxu1 }
 0x592   : > { %v7739_v31 = vunpack.i.l.bf16 %v7738_v16  ;;  %v3966_v58 = vrot.slane %v3253_v54, 4  ;;  %4746 = vmatprep.mubr.f32.mxu0 %v3253_v54  ;;  %5347 = vmatmul.mubr.f32.gmra.mrb[126].mxu1 %v11502_v36  ;;  %v7740_v18 = vunpack.i.h.bf16 %v7738_v16 }
 0x593   : > { %v11633_v9 = vsel %vm2887_vm4, %v3956_v1, %v3964_v48  ;;  %v11636_v4 = vsel %vm2887_vm4, %v3964_v48, %v3972_v56  ;;  %6595 = vmatprep.mubr.msk.f32.mxu1 %vm1528_vm1, %v11524_v24  ;;  %v13874_v48 = vld [vmem:[#allocation92_spill] sm:$0xff] }
 0x594   : > { %v3232_v63 = vsel %vm419_vm0, %v7735_v38, %v7739_v31  ;;  %v11642_v46 = vsel %vm2887_vm4, %v3958_v26, %v3966_v58  ;;  %v3858_v2 = vrot.slane %v13874_v48, 4  ;;  %v3733_v38 = vsel %vm2313_vm3, %v11603_v45, %v13875_v55 }
 0x595   : > { %4747 = vmatmul.mubr.f32.gmra.mrb[144].mxu0 %v3210_v10  ;;  %v2968_v52 = vpop.permute.xlu1 %2967  ;;  %v13872_v10 = vunpack.i.h.bf16 %v11027_v7  ;;  %v13876_v7 = vunpack.i.l.bf16 %v11010_v50 }
 0x596   : > { %v3233_v1 = vsel %vm419_vm0, %v2968_v52, %v7740_v18  ;;  %v11650_v16 = vsel %vm3193_vm7, %v10611_v0, %v2968_v52  ;;  %5352 = vmatmul.mubr.f32.gmra.mrb[128].mxu1 %v11545_v13 }
 0x597   : > { %v3254_v36 = vsel %vm3236_vm6, %v3232_v63, %v13872_v10  ;;  %13873 = vst [vmem:[#allocation138_spill] sm:$0xff] %v11650_v16  ;;  %v11660_v26 = vsel %vm3236_vm6, %v3233_v1, %v13876_v7  ;;  %v13413_v31 = vrot.slane %v11650_v16, 4  ;;  %v11668_v63 = vpop.permute.xlu0 %7747  ;;  %v13882_v7 = vld [vmem:[#allocation91_spill] sm:$0xff]  ;;  %v13883_v1 = vld [vmem:[#allocation28_spill] sm:$0xff] }
 0x598   : > { %v3974_v54 = vrot.slane %v3254_v36, 4  ;;  %4751 = vmatprep.mubr.f32.mxu0 %v3254_v36  ;;  %13877 = vst [vmem:[#allocation92_spill] sm:$0xff] %v11660_v26  ;;  %v13414_v18 = vrot.slane %v11660_v26, 4  ;;  %v3854_v36 = vrot.slane %v3733_v38, 4 }
 0x599   : > { %4752 = vmatmul.mubr.f32.gmra.mrb[146].mxu0 %v3211_v43  ;;  %v11670_v52 = vpop.permute.xlu1 %3583  ;;  %v3857_v43 = vrot.slane %v13875_v55, 4  ;;  %v11676_v10 = vsel %vm2887_vm4, %v3972_v56, %v13413_v31  ;;  %v3866_v56 = vrot.slane %v13882_v7, 4 }
 0x59a   : > { %4756 = vmatprep.mubr.f32.mxu0 %v11660_v26  ;;  %v11666_v0 = vsel %vm2887_vm4, %v3966_v58, %v3974_v54  ;;  %13878 = vst [vmem:[#allocation62_spill] sm:$0xff] %v11670_v52  ;;  %13879 = vst [vmem:[#allocation139_spill] sm:$0xff] %v11676_v10  ;;  %6596 = vmatprep.mubr.msk.f32.mxu1 %vm1528_vm1, %v11670_v52  ;;  %v13880_v58 = vunpack.i.h.bf16 %v13862_v21  ;;  %v11690_v55 = vsel %vm2887_vm4, %v3974_v54, %v13414_v18  ;;  %v13889_v26 = vld [vmem:[#allocation93_spill] sm:$0xff] }
 0x59b   : > { %v3859_v31 = vsel %vm2887_vm4, %v3857_v43, %v3858_v2  ;;  %v7749_v21 = vunpack.i.l.bf16 %v11668_v63  ;;  %v13885_v54 = vrot.slane %v11524_v24, 4  ;;  %v13892_v24 = vld [vmem:[#allocation26_spill] sm:$0xff] }
 0x59c   : > { %v11685_v48 = vsel %vm2313_vm3, %v13880_v58, %v11670_v52  ;;  %v13884_v58 = vrot.slane %v11670_v52, 4  ;;  %v13891_v52 = vld [vmem:[#allocation17_spill] sm:$0xff] }
 0x59d   : > { %13881 = vst [vmem:[#allocation140_spill] sm:$0xff] %v11685_v48  ;;  %4757 = vmatmul.mubr.f32.gmra.mrb[148].mxu0 %v11650_v16  ;;  %v13418_v38 = vrot.slane %v11685_v48, 4  ;;  %5357 = vmatmul.mubr.f32.gmra.mrb[130].mxu1 %v11685_v48  ;;  %v2373_v18 = vpop.permute.xlu1 %2372  ;;  %v7745_v16 = vunpack.i.h.bf16 %v11629_v27  ;;  %v3874_v10 = vrot.slane %v13891_v52, 4  ;;  %v7808_v48 = vld [vmem:[#allocation3] sm:$0xff]  ;;  %v7744_v52 = vunpack.i.l.bf16 %v11629_v27 }
 0x59e   : > { %4761 = vmatprep.mubr.f32.mxu0 %v13883_v1  ;;  %6597 = vmatprep.mubr.msk.f32.mxu1 %vm1528_vm1, %v3859_v31  ;;  %v11705_v7 = vsel %vm2887_vm4, %v13885_v54, %v13884_v58  ;;  %v13890_v1 = vrot.slane %v13889_v26, 4  ;;  %v3867_v58 = vsel %vm2887_vm4, %v3858_v2, %v3866_v56  ;;  %v13893_v54 = vld [vmem:[#allocation50_spill] sm:$0xff]  ;;  %v2749_v26 = vsel %vm1528_vm1, %v7808_v48, %v2373_v18  ;;  %v1643_v48 = vld [vmem:[#allocation2 + $0xd8] sm:$0xff] }
 0x59f   : > { %13886 = vst [vmem:[#allocation91_spill] sm:$0xff] %v11705_v7  ;;  %v11712_v43 = vsel %vm2887_vm4, %v13887_v37, %v13418_v38  ;;  %v3627_v13 = vsel %vm419_vm0, %v7749_v21, %v7745_v16  ;;  %v1845_v37 = vpop.permute.xlu0 %1844  ;;  %v7750_v38 = vunpack.i.h.bf16 %v11668_v63  ;;  %v13895_v7 = vld [vmem:[#allocation61_spill] sm:$0xff]  ;;  %v13897_v16 = vunpack.i.h.bf16 %v11010_v50 }
 0x5a0   : > { %13888 = vst [vmem:[#allocation141_spill] sm:$0xff] %v11712_v43  ;;  %v3856_v31 = vsel %vm2887_vm4, %v3854_v36, %v13890_v1  ;;  %v11726_v1 = vpop.f32.mrb[60].mxu1  ;;  %v13894_v43 = vld [vmem:[#allocation44_spill] sm:$0xff]  ;;  %v3875_v63 = vsel %vm2887_vm4, %v3866_v56, %v3874_v10  ;;  %v2778_v18 = vsel %vm419_vm0, %v2749_v26, %v7744_v52  ;;  %v2252_v56 = vsel %vm1528_vm1, %v1643_v48, %v1845_v37  ;;  %v13900_v26 = vld [vmem:[#allocation11_spill] sm:$0xff] }
 0x5a1   : > { %4762 = vmatmul.mubr.f32.gmra.mrb[150].mxu0 %v13892_v24  ;;  %5362 = vmatmul.mubr.f32.gmra.mrb[132].mxu1 %v3856_v31  ;;  %v2547_v36 = vpop.permute.xlu1 %2546  ;;  %v5185_v31 = vpop.f32.mrb[61].mxu1  ;;  %v3882_v2 = vrot.slane %v13894_v43, 4  ;;  %v13898_v43 = vld [vmem:[#allocation51_spill] sm:$0xff]  ;;  %v3898_v37 = vrot.slane %v10797_v25, 4  ;;  %v1644_v48 = vld [vmem:[#allocation2 + $0xe0] sm:$0xf] }
 0x5a2   : > { %4766 = vmatprep.mubr.f32.mxu0 %v13893_v54  ;;  %6598 = vmatprep.mubr.msk.f32.mxu1 %vm1528_vm1, %v3867_v58  ;;  %v13896_v54 = vld [vmem:[#allocation94_spill] sm:$0xff]  ;;  %v3648_v58 = vsel %vm3236_vm6, %v3627_v13, %v13897_v16  ;;  %v2807_v27 = vsel %vm2283_vm2, %v2778_v18, %v2547_v36  ;;  %v13899_v24 = vunpack.i.h.bf16 %v13898_v43  ;;  %v3890_v13 = vrot.slane %v10747_v12, 4  ;;  %v13901_v18 = vld [vmem:[#allocation25_spill] sm:$0xff]  ;;  %v13902_v43 = vld [vmem:[#allocation19_spill] sm:$0xff] }
 0x5a3   : > { %v2077_v50 = vpop.permute.xlu0 %2076  ;;  %v3883_v36 = vsel %vm2887_vm4, %v3874_v10, %v3882_v2  ;;  %v3906_v25 = vrot.slane %v10823_v34, 4  ;;  %v3914_v34 = vrot.slane %v10848_v30, 4  ;;  %v3922_v30 = vrot.slane %v10874_v35, 4 }
 0x5a4   : > { %v3891_v10 = vsel %vm2887_vm4, %v3882_v2, %v3890_v13 }
 0x5a5   : > { %4767 = vmatmul.mubr.f32.gmra.mrb[152].mxu0 %v13895_v7  ;;  %5367 = vmatmul.mubr.f32.gmra.mrb[134].mxu1 %v13896_v54  ;;  %v2663_v31 = vpop.permute.xlu1 %2662  ;;  %v3628_v7 = vsel %vm419_vm0, %v7750_v38, %v13899_v24 }
 0x5a6   : > { %4771 = vmatprep.mubr.f32.mxu0 %v3648_v58  ;;  %6599 = vmatprep.mubr.msk.f32.mxu1 %vm1528_vm1, %v3875_v63  ;;  %v2836_v54 = vsel %vm2313_vm3, %v2807_v27, %v2663_v31  ;;  %v11745_v16 = vpop.f32.mrb[62].mxu1  ;;  %v3649_v24 = vsel %vm3236_vm6, %v3628_v7, %v11178_v14 }
 0x5a7   : > { %v3606_v52 = vsel %vm3193_vm7, %v2836_v54, %v7749_v21  ;;  %v5190_v58 = vpop.f32.mrb[63].mxu1  ;;  %v3607_v21 = vsel %vm3193_vm7, %v9936_v5, %v7750_v38  ;;  %v1847_v27 = vpop.permute.xlu0 %1846  ;;  %v3899_v5 = vsel %vm2887_vm4, %v3890_v13, %v3898_v37  ;;  %v13903_v38 = vld [vmem:[#allocation57_spill] sm:$0xff]  ;;  %v13905_v13 = vld [vmem:[#allocation58_spill] sm:$0xff] }
 0x5a8   : > { %v2253_v54 = vsel %vm1528_vm1, %v1644_v48, %v1847_v27  ;;  %v13906_v58 = vld [vmem:[#allocation43_spill] sm:$0xff]  ;;  %v13911_v48 = vld [vmem:[#allocation66_spill] sm:$0xff]  ;;  %v3923_v27 = vsel %vm2887_vm4, %v3914_v34, %v3922_v30 }
 0x5a9   : > { %5372 = vmatmul.mubr.f32.gmra.mrb[136].mxu1 %v13900_v26  ;;  %4772 = vmatmul.mubr.f32.gmra.mrb[154].mxu0 %v3606_v52  ;;  %v1961_v63 = vpop.permute.xlu1 %1960 }
 0x5aa   : > { %6600 = vmatprep.mubr.msk.f32.mxu1 %vm1528_vm1, %v3883_v36  ;;  %4776 = vmatprep.mubr.f32.mxu0 %v3649_v24  ;;  %v2281_v12 = vsel %vm419_vm0, %v2252_v56, %v1961_v63  ;;  %v13908_v63 = vld [vmem:[#allocation52_spill] sm:$0xff] }
 0x5ab   : > { %v2311_v14 = vsel %vm2283_vm2, %v2281_v12, %v2077_v50  ;;  %v13904_v50 = vld [vmem:[#allocation42_spill] sm:$0xff]  ;;  %v2079_v26 = vpop.permute.xlu0 %2078  ;;  %v7809_v12 = vld [vmem:[#allocation3 + $0xd9] sm:$0xff] }
 0x5ad   : > { %5377 = vmatmul.mubr.f32.gmra.mrb[138].mxu1 %v13901_v18  ;;  %4777 = vmatmul.mubr.f32.gmra.mrb[156].mxu0 %v3607_v21  ;;  %v2193_v31 = vpop.permute.xlu1 %2192  ;;  %v2370_v18 = vld [vmem:[#allocation3 + $0xda] sm:$0xff]  ;;  %v13909_v21 = vld [vmem:[#allocation60_spill] sm:$0xff] }
 0x5ae   : > { %6601 = vmatprep.mubr.msk.f32.mxu1 %vm1528_vm1, %v3891_v10  ;;  %4781 = vmatprep.mubr.f32.mxu0 %v13902_v43  ;;  %v2341_v7 = vsel %vm2313_vm3, %v2311_v14, %v2193_v31  ;;  %v3930_v35 = vrot.slane %v13909_v21, 4  ;;  %v13910_v10 = vld [vmem:[#allocation64_spill] sm:$0xff]  ;;  %v13912_v14 = vld [vmem:[#allocation13_spill] sm:$0xff]  ;;  %v13913_v31 = vld [vmem:[#allocation15_spill] sm:$0xff] }
 0x5af   : > { %3718 = vrot.lane.b32.xlu0 %v2341_v7, %s7881_s20  ;;  %v13914_v7 = vld [vmem:[#allocation21_spill] sm:$0xff]  ;;  %v13927_v21 = vld [vmem:[#allocation74_spill] sm:$0xff] }
 0x5b1   : > { %5382 = vmatmul.mubr.f32.gmra.mrb[140].mxu1 %v10786_v42  ;;  %4782 = vmatmul.mubr.f32.gmra.mrb[158].mxu0 %v13903_v38  ;;  %v1963_v2 = vpop.permute.xlu1 %1962  ;;  %v3907_v42 = vsel %vm2887_vm4, %v3898_v37, %v3906_v25  ;;  %v13916_v38 = vld [vmem:[#allocation34_spill] sm:$0xff] }
 0x5b2   : > { %6602 = vmatprep.mubr.msk.f32.mxu1 %vm1528_vm1, %v3899_v5  ;;  %4786 = vmatprep.mubr.f32.mxu0 %v13904_v50  ;;  %v2282_v56 = vsel %vm419_vm0, %v2253_v54, %v1963_v2  ;;  %v13915_v54 = vld [vmem:[#allocation100_spill] sm:$0xff]  ;;  %v3931_v2 = vsel %vm2887_vm4, %v3922_v30, %v3930_v35  ;;  %v13917_v50 = vld [vmem:[#allocation14_spill] sm:$0xff]  ;;  %v13923_v30 = vld [vmem:[#allocation73_spill] sm:$0xff] }
 0x5b3   : > { %3690 = vrot.lane.b32.xlu0 %v10793_v41, %s7883_s24  ;;  %v2312_v52 = vsel %vm2283_vm2, %v2282_v56, %v2079_v26  ;;  %v3915_v41 = vsel %vm2887_vm4, %v3906_v25, %v3914_v34  ;;  %v3938_v25 = vrot.slane %v13914_v7, 4  ;;  %v13918_v56 = vld [vmem:[#allocation71_spill] sm:$0xff]  ;;  %v7810_v26 = vld [vmem:[#allocation3 + $0xe1] sm:$0xf] }
 0x5b4   : > { %v2371_v34 = vld [vmem:[#allocation3 + $0xe2] sm:$0xf] }
 0x5b5   : > { %5387 = vmatmul.mubr.f32.gmra.mrb[142].mxu1 %v10812_v15  ;;  %4787 = vmatmul.mubr.f32.gmra.mrb[160].mxu0 %v13905_v13  ;;  %v2195_v36 = vpop.permute.xlu1 %2194  ;;  %v13907_v15 = vld [vmem:[#allocation63_spill] sm:$0xff] }
 0x5b6   : > { %6603 = vmatprep.mubr.msk.f32.mxu1 %vm1528_vm1, %v3907_v42  ;;  %4791 = vmatprep.mubr.f32.mxu0 %v13906_v58  ;;  %v2342_v24 = vsel %vm2313_vm3, %v2312_v52, %v2195_v36  ;;  %v13919_v42 = vld [vmem:[#allocation9_spill] sm:$0xff]  ;;  %v13920_v52 = vld [vmem:[#allocation102_spill] sm:$0xff]  ;;  %v3939_v58 = vsel %vm2887_vm4, %v3930_v35, %v3938_v25  ;;  %v13928_v35 = vld [vmem:[#allocation75_spill] sm:$0xff] }
 0x5b7   : > { %3720 = vrot.lane.b32.xlu1 %v2342_v24, %s7881_s20  ;;  %2513 = vrot.lane.b32.xlu0 %v7809_v12, %s7879_s18  ;;  %v3946_v13 = vrot.slane %v13919_v42, 4  ;;  %v13921_v36 = vld [vmem:[#allocation29_spill] sm:$0xff]  ;;  %v13922_v24 = vld [vmem:[#allocation72_spill] sm:$0xff] }
 0x5b8   : > { %v11790_v37 = vpop.f32.mrb[64].mxu1  ;;  %v13926_v12 = vld [vmem:[#allocation24_spill] sm:$0xff] }
 0x5b9   : > { %5392 = vmatmul.mubr.f32.gmra.mrb[144].mxu1 %v10860_v19  ;;  %4792 = vmatmul.mubr.f32.gmra.mrb[162].mxu0 %v13907_v15  ;;  %v5195_v19 = vpop.f32.mrb[65].mxu1 }
 0x5ba   : > { %6604 = vmatprep.mubr.msk.f32.mxu1 %vm1528_vm1, %v3915_v41  ;;  %4796 = vmatprep.mubr.f32.mxu0 %v13908_v63  ;;  %v13924_v41 = vld [vmem:[#allocation32_spill] sm:$0xff]  ;;  %v13925_v63 = vld [vmem:[#allocation105_spill] sm:$0xff] }
 0x5bb   : > { %2426 = vrot.lane.b32.xlu1 %v13910_v10, %s7878_s17  ;;  %2716 = vrot.lane.b32.xlu0 %v2370_v18, %s7881_s20  ;;  %v3954_v15 = vrot.slane %v13924_v41, 4  ;;  %v3947_v18 = vsel %vm2887_vm4, %v3938_v25, %v3946_v13  ;;  %v13929_v10 = vld [vmem:[#allocation33_spill] sm:$0xff] }
 0x5bc   : > { %v11801_v43 = vpop.f32.mrb[66].mxu1 }
 0x5bd   : > { %5397 = vmatmul.mubr.f32.gmra.mrb[146].mxu1 %v13911_v48  ;;  %4797 = vmatmul.mubr.f32.gmra.mrb[164].mxu0 %v13912_v14  ;;  %v5200_v5 = vpop.f32.mrb[67].mxu1  ;;  %v3955_v19 = vsel %vm2887_vm4, %v3946_v13, %v3954_v15  ;;  %v13930_v48 = vld [vmem:[#allocation76_spill] sm:$0xff] }
 0x5be   : > { %6605 = vmatprep.mubr.msk.f32.mxu1 %vm1528_vm1, %v3923_v27  ;;  %4801 = vmatprep.mubr.f32.mxu0 %v13913_v31  ;;  %v13931_v27 = vld [vmem:[#allocation10_spill] sm:$0xff]  ;;  %v13932_v31 = vld [vmem:[#allocation77_spill] sm:$0xff]  ;;  %v13938_v13 = vld [vmem:[#allocation8_spill] sm:$0xff] }
 0x5bf   : > { %2600 = vrot.lane.b32.xlu1 %v13915_v54, %s7880_s19  ;;  %2515 = vrot.lane.b32.xlu0 %v7810_v26, %s7879_s18  ;;  %v3962_v14 = vrot.slane %v13931_v27, 4  ;;  %v13933_v54 = vld [vmem:[#allocation47_spill] sm:$0xff]  ;;  %v13937_v26 = vld [vmem:[#allocation41_spill] sm:$0xff]  ;;  %v13948_v27 = vld [vmem:[#allocation82_spill] sm:$0xff] }
 0x5c0   : > { %v3970_v5 = vrot.slane %v13933_v54, 4 }
 0x5c1   : > { %5402 = vmatmul.mubr.f32.gmra.mrb[148].mxu1 %v13916_v38  ;;  %4802 = vmatmul.mubr.f32.gmra.mrb[166].mxu0 %v13917_v50  ;;  %v13934_v38 = vld [vmem:[#allocation23_spill] sm:$0xff]  ;;  %v13935_v50 = vld [vmem:[#allocation78_spill] sm:$0xff] }
 0x5c2   : > { %6606 = vmatprep.mubr.msk.f32.mxu1 %vm1528_vm1, %v3931_v2  ;;  %4806 = vmatprep.mubr.f32.mxu0 %v13918_v56  ;;  %v3963_v2 = vsel %vm2887_vm4, %v3954_v15, %v3962_v14  ;;  %v13936_v56 = vld [vmem:[#allocation80_spill] sm:$0xff]  ;;  %v13942_v15 = vld [vmem:[#allocation30_spill] sm:$0xff] }
 0x5c3   : > { %2428 = vrot.lane.b32.xlu1 %v13920_v52, %s7878_s17  ;;  %2718 = vrot.lane.b32.xlu0 %v2371_v34, %s7881_s20  ;;  %v3978_v34 = vrot.slane %v13937_v26, 4  ;;  %v3971_v52 = vsel %vm2887_vm4, %v3962_v14, %v3970_v5  ;;  %v13949_v14 = vld [vmem:[#allocation95_spill] sm:$0xff]  ;;  %v13955_v26 = vld [vmem:[#allocation84_spill] sm:$0xff]  ;;  %s6382_s17 = sshll.u32 %s297_s26, 4  ;;  %s13112_s17 = int_to_ptr.vmem [resolvable:$true] %s6382_s17 }
 0x5c4   : > { %s7813_s9 = scalar_lea.vmem %s13112_s17, 16 }
 0x5c5   : > { %5407 = vmatmul.mubr.f32.gmra.mrb[150].mxu1 %v13921_v36  ;;  %4807 = vmatmul.mubr.f32.gmra.mrb[168].mxu0 %v13922_v24  ;;  %v13939_v36 = vld [vmem:[#allocation68_spill] sm:$0xff]  ;;  %v13940_v24 = vld [vmem:[#allocation35_spill] sm:$0xff]  ;;  %p7814_p11 = scmp.ne.s32.totalorder %s13112_s17, %s7813_s9 }
 0x5c6   : > { %6607 = vmatprep.mubr.msk.f32.mxu1 %vm1528_vm1, %v3939_v58  ;;  %4811 = vmatprep.mubr.f32.mxu0 %v13923_v30  ;;  %v13941_v30 = vld [vmem:[#allocation53_spill] sm:$0xff] }
 0x5c7   : > { %2602 = vrot.lane.b32.xlu1 %v13925_v63, %s7880_s19  ;;  %v3986_v41 = vrot.slane %v13941_v30, 4  ;;  %v3979_v63 = vsel %vm2887_vm4, %v3970_v5, %v3978_v34  ;;  %v13951_v5 = vld [vmem:[#allocation40_spill] sm:$0xff]  ;;  %s7885_s19 = smov 96   ;;  %p7815_p12 = pnand %p7814_p11, %p7971_p5 }
 0x5c9   : > { %5412 = vmatmul.mubr.f32.gmra.mrb[152].mxu1 %v13926_v12  ;;  %4812 = vmatmul.mubr.f32.gmra.mrb[170].mxu0 %v13927_v21  ;;  %v13943_v12 = vld [vmem:[#allocation67_spill] sm:$0xff]  ;;  %v13945_v21 = vld [vmem:[#allocation45_spill] sm:$0xff]  ;;  %p7816_p13 = pneg %p7815_p12 }
 0x5ca   : > { %6608 = vmatprep.mubr.msk.f32.mxu1 %vm1528_vm1, %v3947_v18  ;;  %4816 = vmatprep.mubr.f32.mxu0 %v13928_v35  ;;  %v11835_v7 = vpop.f32.mrb[68].mxu1  ;;  %v13944_v18 = vld [vmem:[#allocation81_spill] sm:$0xff]  ;;  %v3987_v35 = vsel %vm2887_vm4, %v3978_v34, %v3986_v41 }
 0x5cb   : > { %v5205_v25 = vpop.f32.mrb[69].mxu1 }
 0x5cc   : > { %v13950_v25 = vld [vmem:[#allocation18_spill] sm:$0xff] }
 0x5cd   : > { %5417 = vmatmul.mubr.f32.gmra.mrb[154].mxu1 %v13929_v10  ;;  %4817 = vmatmul.mubr.f32.gmra.mrb[172].mxu0 %v13930_v48  ;;  %v13946_v10 = vld [vmem:[#allocation69_spill] sm:$0xff] }
 0x5ce   : > { %6609 = vmatprep.mubr.msk.f32.mxu1 %vm1528_vm1, %v3955_v19  ;;  %4821 = vmatprep.mubr.f32.mxu0 %v13932_v31  ;;  %v13947_v19 = vld [vmem:[#allocation55_spill] sm:$0xff]  ;;  %v4002_v31 = vrot.slane %v13949_v14, 4 }
 0x5cf   : > { %v3994_v48 = vrot.slane %v13947_v19, 4  ;;  %v13963_v19 = vld [vmem:[#allocation48_spill] sm:$0xff] }
 0x5d1   : > { %5422 = vmatmul.mubr.f32.gmra.mrb[156].mxu1 %v13934_v38  ;;  %4822 = vmatmul.mubr.f32.gmra.mrb[174].mxu0 %v13935_v50  ;;  %v11844_v42 = vpop.f32.mrb[70].mxu1  ;;  %v3995_v54 = vsel %vm2887_vm4, %v3986_v41, %v3994_v48  ;;  %v13952_v38 = vld [vmem:[#allocation83_spill] sm:$0xff]  ;;  %v4003_v50 = vsel %vm2887_vm4, %v3994_v48, %v4002_v31  ;;  %v13964_v48 = vld [vmem:[#allocation89_spill] sm:$0xff] }
 0x5d2   : > { %6610 = vmatprep.mubr.msk.f32.mxu1 %vm1528_vm1, %v3963_v2  ;;  %4826 = vmatprep.mubr.f32.mxu0 %v13936_v56  ;;  %v5210_v58 = vpop.f32.mrb[71].mxu1  ;;  %v13953_v2 = vld [vmem:[#allocation96_spill] sm:$0xff]  ;;  %v13954_v56 = vld [vmem:[#allocation70_spill] sm:$0xff]  ;;  %v13959_v41 = vld [vmem:[#allocation27_spill] sm:$0xff] }
 0x5d3   : > { %v13958_v58 = vld [vmem:[#allocation86_spill] sm:$0xff] }
 0x5d5   : > { %5427 = vmatmul.mubr.f32.gmra.mrb[158].mxu1 %v13938_v13  ;;  %4827 = vmatmul.mubr.f32.gmra.mrb[176].mxu0 %v13939_v36  ;;  %v13957_v36 = vld [vmem:[#allocation39_spill] sm:$0xff] }
 0x5d6   : > { %6611 = vmatprep.mubr.msk.f32.mxu1 %vm1528_vm1, %v3971_v52  ;;  %4831 = vmatprep.mubr.f32.mxu0 %v13940_v24  ;;  %v13956_v52 = vld [vmem:[#allocation98_spill] sm:$0xff] }
 0x5d9   : > { %5432 = vmatmul.mubr.f32.gmra.mrb[160].mxu1 %v13942_v15  ;;  %4832 = vmatmul.mubr.f32.gmra.mrb[178].mxu0 %v13943_v12  ;;  %v13960_v15 = vld [vmem:[#allocation87_spill] sm:$0xff] }
 0x5da   : > { %6612 = vmatprep.mubr.msk.f32.mxu1 %vm1528_vm1, %v3979_v63  ;;  %4836 = vmatprep.mubr.f32.mxu0 %v13944_v18  ;;  %v13961_v18 = vld [vmem:[#allocation37_spill] sm:$0xff] }
 0x5dd   : > { %5437 = vmatmul.mubr.f32.gmra.mrb[162].mxu1 %v13945_v21  ;;  %4837 = vmatmul.mubr.f32.gmra.mrb[180].mxu0 %v13946_v10  ;;  %v13962_v21 = vld [vmem:[#allocation88_spill] sm:$0xff] }
 0x5de   : > { %6613 = vmatprep.mubr.msk.f32.mxu1 %vm1528_vm1, %v3987_v35  ;;  %4841 = vmatprep.mubr.f32.mxu0 %v13948_v27 }
 0x5e1   : > { %5442 = vmatmul.mubr.f32.gmra.mrb[164].mxu1 %v13950_v25  ;;  %4842 = vmatmul.mubr.f32.gmra.mrb[182].mxu0 %v13951_v5  ;;  %v13965_v25 = vld [vmem:[#allocation7_spill] sm:$0xff] }
 0x5e2   : > { %6614 = vmatprep.mubr.msk.f32.mxu1 %vm1528_vm1, %v3995_v54  ;;  %4846 = vmatprep.mubr.f32.mxu0 %v13952_v38 }
 0x5e4   : > { %v11874_v34 = vpop.f32.mrb[72].mxu1 }
 0x5e5   : > { %5447 = vmatmul.mubr.f32.gmra.mrb[166].mxu1 %v13953_v2  ;;  %4847 = vmatmul.mubr.f32.gmra.mrb[184].mxu0 %v13954_v56  ;;  %v5215_v13 = vpop.f32.mrb[73].mxu1 }
 0x5e6   : > { %6615 = vmatprep.mubr.msk.f32.mxu1 %vm1528_vm1, %v4003_v50  ;;  %4851 = vmatprep.mubr.f32.mxu0 %v13955_v26 }
 0x5e8   : > { %v11879_v24 = vpop.f32.mrb[74].mxu1 }
 0x5e9   : > { %5452 = vmatmul.mubr.f32.gmra.mrb[0].mxu1 %v13956_v52  ;;  %4852 = vmatmul.mubr.f32.gmra.mrb[186].mxu0 %v13957_v36  ;;  %v5220_v30 = vpop.f32.mrb[75].mxu1 }
 0x5ea   : > { %4856 = vmatprep.mubr.f32.mxu0 %v13958_v58  ;;  %v13968_v30 = vld [vmem:[#allocation20_spill] sm:$0xff] }
 0x5ec   : > { %v11883_v63 = vpop.f32.mrb[76].mxu1 }
 0x5ed   : > { %4857 = vmatmul.mubr.f32.gmra.mrb[188].mxu0 %v13959_v41  ;;  %v5225_v12 = vpop.f32.mrb[77].mxu1  ;;  %v13969_v41 = vunpack.i.l.bf16 %v13968_v30 }
 0x5ee   : > { %4861 = vmatprep.mubr.f32.mxu0 %v13960_v15 }
 0x5f0   : > { %v11887_v35 = vpop.f32.mrb[78].mxu1 }
 0x5f1   : > { %4862 = vmatmul.mubr.f32.gmra.mrb[190].mxu0 %v13961_v18  ;;  %v5230_v10 = vpop.f32.mrb[79].mxu1 }
 0x5f2   : > { %4866 = vmatprep.mubr.f32.mxu0 %v13962_v21 }
 0x5f5   : > { %4867 = vmatmul.mubr.f32.gmra.mrb[192].mxu0 %v13963_v19  ;;  %v11891_v27 = vpop.f32.mrb[80].mxu1 }
 0x5f6   : > { %4871 = vmatprep.mubr.f32.mxu0 %v13964_v48  ;;  %v5235_v14 = vpop.f32.mrb[81].mxu1 }
 0x5f9   : > { %4872 = vmatmul.mubr.f32.gmra.mrb[194].mxu0 %v13965_v25  ;;  %v11894_v54 = vpop.f32.mrb[82].mxu1 }
 0x5fa   : > { %v5240_v5 = vpop.f32.mrb[83].mxu1 }
 0x5fd   : > { %v11896_v38 = vpop.f32.mrb[84].mxu1 }
 0x5fe   : > { %v5245_v2 = vpop.f32.mrb[85].mxu1 }
 0x5ff   : > { %v13972_v2 = vld [vmem:[#allocation97_spill] sm:$0xff] }
 0x601   : > { %v11898_v50 = vpop.f32.mrb[86].mxu1 }
 0x602   : > { %v5250_v56 = vpop.f32.mrb[87].mxu1 }
 0x603   : > { %v13973_v56 = vrot.slane %v13972_v2, 4  ;;  %v13977_v2 = vld [vmem:[#allocation101_spill] sm:$0xff] }
 0x605   : > { %v11900_v26 = vpop.f32.mrb[88].mxu1 }
 0x606   : > { %13966 = vst [vmem:[#allocation93_spill] sm:$0xff] %v11900_v26  ;;  %v5255_v13 = vpop.f32.mrb[89].mxu1 }
 0x609   : > { %v11902_v52 = vpop.f32.mrb[90].mxu1 }
 0x60a   : > { %13967 = vst [vmem:[#allocation17_spill] sm:$0xff] %v11902_v52  ;;  %v5260_v36 = vpop.f32.mrb[91].mxu1 }
 0x60b   : > { %v13974_v36 = vld [vmem:[#allocation12_spill] sm:$0xff] }
 0x621   : > { %v3719_v58 = vpop.permute.xlu0 %3718  ;;  %v4668_v18 = vpop.f32.mrb[112].mxu0 }
 0x622   : > { %v3734_v15 = vsel %vm2313_vm3, %v13969_v41, %v3719_v58  ;;  %v4010_v12 = vrot.slane %v3719_v58, 4  ;;  %v11907_v21 = vpop.f32.mrb[92].mxu1  ;;  %v11910_v19 = vadd.f32 %v11453_v20, %v4668_v18  ;;  %v4670_v48 = vpop.f32.mrb[113].mxu0  ;;  %v13975_v41 = vld [vmem:[#allocation110_spill] sm:$0xff] }
 0x623   : > { %13970 = vst [vmem:[#allocation50_spill] sm:$0xff] %v11907_v21  ;;  %v4008_v10 = vrot.slane %v3734_v15, 4  ;;  %v5265_v14 = vpop.f32.mrb[93].mxu1  ;;  %v13976_v21 = vunpack.i.l.bf16 %v13975_v41 }
 0x624   : > { %13971 = vst [vmem:[#allocation44_spill] sm:$0xff] %v11910_v19  ;;  %v4011_v25 = vsel %vm2887_vm4, %v4002_v31, %v4010_v12  ;;  %v4159_v19 = vrot.slane %v13977_v2, 4 }
 0x625   : > { %v3691_v5 = vpop.permute.xlu0 %3690  ;;  %6616 = vmatprep.mubr.msk.f32.mxu1 %vm1528_vm1, %v4011_v25  ;;  %v4009_v13 = vsel %vm2887_vm4, %v13973_v56, %v4008_v10  ;;  %v11922_v20 = vpop.f32.mrb[94].mxu1  ;;  %v13978_v56 = vunpack.i.h.bf16 %v13968_v30 }
 0x626   : > { %v3724_v58 = vsel %vm3193_vm7, %v13974_v36, %v3691_v5  ;;  %v3727_v15 = vsel %vm419_vm0, %v3691_v5, %v13976_v21  ;;  %5457 = vmatmul.mubr.f32.gmra.mrb[2].mxu1 %v4009_v13  ;;  %v5270_v48 = vpop.f32.mrb[95].mxu1  ;;  %v13980_v21 = vrot.slane %v11252_v60, 4  ;;  %v13984_v60 = vld [vmem:[#allocation38_spill] sm:$0xff] }
 0x627   : > { %v3730_v31 = vsel %vm3236_vm6, %v3727_v15, %v11603_v45  ;;  %v3848_v18 = vrot.slane %v3724_v58, 4 }
 0x628   : > { %v3851_v14 = vrot.slane %v3730_v31, 4  ;;  %v13981_v31 = vld [vmem:[#allocation115_spill] sm:$0xff] }
 0x629   : > { %v3721_v25 = vpop.permute.xlu1 %3720  ;;  %v4673_v41 = vpop.f32.mrb[114].mxu0  ;;  %v13982_v48 = vrot.slane %v13981_v31, 4 }
 0x62a   : > { %v3735_v36 = vsel %vm2313_vm3, %v13978_v56, %v3721_v25  ;;  %v4018_v52 = vrot.slane %v3721_v25, 4  ;;  %v11930_v26 = vpop.f32.mrb[96].mxu1  ;;  %v3853_v5 = vsel %vm2887_vm4, %v3851_v14, %v13980_v21  ;;  %v11936_v45 = vadd.f32 %v11478_v6, %v4673_v41  ;;  %v4675_v58 = vpop.f32.mrb[115].mxu0  ;;  %v13983_v56 = vld [vmem:[#allocation99_spill] sm:$0xff]  ;;  %v13986_v21 = vld [vmem:[#allocation104_spill] sm:$0xff] }
 0x62b   : > { %13979 = vst [vmem:[#allocation61_spill] sm:$0xff] %v11930_v26  ;;  %v4016_v13 = vrot.slane %v3735_v36, 4  ;;  %4876 = vmatprep.mubr.f32.mxu0 %v3853_v5  ;;  %v5275_v15 = vpop.f32.mrb[97].mxu1  ;;  %v3850_v30 = vsel %vm2887_vm4, %v3848_v18, %v13982_v48  ;;  %v2514_v2 = vpop.permute.xlu0 %2513  ;;  %v4158_v26 = vrot.slane %v13983_v56, 4  ;;  %v13985_v14 = vunpack.i.h.bf16 %v13984_v60  ;;  %v7811_v5 = vld [vmem:[#allocation3 + $0xd8] sm:$0xff]  ;;  %v13988_v60 = vld [vmem:[#allocation103_spill] sm:$0xff] }
 0x62c   : > { %4877 = vmatmul.mubr.f32.gmra.mrb[196].mxu0 %v3850_v30  ;;  %v4019_v25 = vsel %vm2887_vm4, %v4010_v12, %v4018_v52  ;;  %v4167_v18 = vrot.slane %v13986_v21, 4 }
 0x62d   : > { %v3779_v36 = vsel %vm2313_vm3, %v13985_v14, %v13983_v56  ;;  %v2427_v6 = vpop.permute.xlu1 %2426  ;;  %4881 = vmatprep.mubr.f32.mxu0 %v11318_v47  ;;  %6617 = vmatprep.mubr.msk.f32.mxu1 %vm1528_vm1, %v4019_v25  ;;  %v4017_v41 = vsel %vm2887_vm4, %v4008_v10, %v4016_v13  ;;  %v4678_v12 = vpop.f32.mrb[116].mxu0  ;;  %v4160_v15 = vsel %vm2887_vm4, %v4158_v26, %v4159_v19  ;;  %v13987_v10 = vld [vmem:[#allocation59_spill] sm:$0xff]  ;;  %v13989_v14 = vrot.slane %v13988_v60, 4 }
 0x62e   : > { %v2776_v52 = vsel %vm1528_vm1, %v7811_v5, %v2427_v6  ;;  %v11952_v58 = vpop.f32.mrb[98].mxu1  ;;  %5462 = vmatmul.mubr.f32.gmra.mrb[4].mxu1 %v4017_v41  ;;  %v11956_v31 = vadd.f32 %v11519_v29, %v4678_v12  ;;  %v4680_v48 = vpop.f32.mrb[117].mxu0  ;;  %v4155_v30 = vrot.slane %v3779_v36, 4  ;;  %v13990_v6 = vld [vmem:[#allocation49_spill] sm:$0xff]  ;;  %v4168_v36 = vsel %vm2887_vm4, %v4159_v19, %v4167_v18 }
 0x62f   : > { %v5280_v47 = vpop.f32.mrb[99].mxu1  ;;  %6618 = vmatprep.mubr.msk.f32.mxu1 %vm1528_vm1, %v4160_v15  ;;  %v2717_v13 = vpop.permute.xlu0 %2716  ;;  %v2805_v25 = vsel %vm419_vm0, %v2776_v52, %v2514_v2  ;;  %v4175_v29 = vrot.slane %v13990_v6, 4  ;;  %v13991_v15 = vld [vmem:[#allocation22_spill] sm:$0xff] }
 0x630   : > { %4882 = vmatmul.mubr.f32.gmra.mrb[198].mxu0 %v13987_v10  ;;  %v4157_v26 = vsel %vm2887_vm4, %v4155_v30, %v13989_v14  ;;  %v13992_v30 = vld [vmem:[#allocation107_spill] sm:$0xff]  ;;  %v7812_v19 = vld [vmem:[#allocation3 + $0xe0] sm:$0xf] }
 0x631   : > { %v2601_v56 = vpop.permute.xlu1 %2600  ;;  %4886 = vmatprep.mubr.f32.mxu0 %v11336_v3  ;;  %v4683_v21 = vpop.f32.mrb[118].mxu0  ;;  %v4183_v10 = vrot.slane %v13992_v30, 4  ;;  %v4176_v60 = vsel %vm2887_vm4, %v4167_v18, %v4175_v29 }
 0x632   : > { %v2834_v41 = vsel %vm2283_vm2, %v2805_v25, %v2601_v56  ;;  %v11967_v5 = vpop.f32.mrb[100].mxu1  ;;  %5467 = vmatmul.mubr.f32.gmra.mrb[6].mxu1 %v4157_v26  ;;  %v11972_v2 = vadd.f32 %v11547_v57, %v4683_v21  ;;  %v4685_v3 = vpop.f32.mrb[119].mxu0  ;;  %v13993_v56 = vld [vmem:[#allocation106_spill] sm:$0xff] }
 0x633   : > { %v2863_v12 = vsel %vm2313_vm3, %v2834_v41, %v2717_v13  ;;  %v5285_v52 = vpop.f32.mrb[101].mxu1  ;;  %6619 = vmatprep.mubr.msk.f32.mxu1 %vm1528_vm1, %v4168_v36  ;;  %v2516_v48 = vpop.permute.xlu0 %2515 }
 0x634   : > { %3764 = vrot.lane.b32.xlu1 %v2863_v12, %s7881_s20  ;;  %4887 = vmatmul.mubr.f32.gmra.mrb[200].mxu0 %v13991_v15  ;;  %v13995_v12 = vld [vmem:[#allocation46_spill] sm:$0xff] }
 0x635   : > { %v2429_v47 = vpop.permute.xlu1 %2428  ;;  %4891 = vmatprep.mubr.f32.mxu0 %v11372_v62  ;;  %v11980_v57 = vpop.f32.mrb[102].mxu1  ;;  %v13994_v62 = vld [vmem:[#allocation119_spill] sm:$0xff]  ;;  %v4191_v3 = vrot.slane %v13995_v12, 4 }
 0x636   : > { %v2777_v13 = vsel %vm1528_vm1, %v7812_v19, %v2429_v47  ;;  %5472 = vmatmul.mubr.f32.gmra.mrb[8].mxu1 %v13993_v56  ;;  %v5290_v6 = vpop.f32.mrb[103].mxu1  ;;  %v4184_v47 = vsel %vm2887_vm4, %v4175_v29, %v4183_v10  ;;  %v13999_v29 = vld [vmem:[#allocation109_spill] sm:$0xff] }
 0x637   : > { %v4688_v25 = vpop.f32.mrb[120].mxu0  ;;  %6620 = vmatprep.mubr.msk.f32.mxu1 %vm1528_vm1, %v4176_v60  ;;  %v2719_v41 = vpop.permute.xlu0 %2718  ;;  %v2806_v21 = vsel %vm419_vm0, %v2777_v13, %v2516_v48 }
 0x638   : > { %v11985_v14 = vadd.f32 %v11611_v8, %v4688_v25  ;;  %v4690_v26 = vpop.f32.mrb[121].mxu0  ;;  %4892 = vmatmul.mubr.f32.gmra.mrb[202].mxu0 %v13994_v62  ;;  %v13996_v8 = vld [vmem:[#allocation108_spill] sm:$0xff] }
 0x639   : > { %v2603_v36 = vpop.permute.xlu1 %2602  ;;  %4896 = vmatprep.mubr.f32.mxu0 %v11390_v23  ;;  %v11993_v15 = vpop.f32.mrb[104].mxu1  ;;  %v13997_v23 = vld [vmem:[#allocation16_spill] sm:$0xff] }
 0x63a   : > { %v2835_v52 = vsel %vm2283_vm2, %v2806_v21, %v2603_v36  ;;  %5477 = vmatmul.mubr.f32.gmra.mrb[10].mxu1 %v13996_v8  ;;  %v5295_v13 = vpop.f32.mrb[105].mxu1  ;;  %v13998_v25 = vld [vmem:[#allocation36_spill] sm:$0xff]  ;;  %v14002_v36 = vld [vmem:[#allocation111_spill] sm:$0xff]  ;;  %v14003_v8 = vld [vmem:[#allocation54_spill] sm:$0xff] }
 0x63b   : > { %v4693_v18 = vpop.f32.mrb[122].mxu0  ;;  %v2864_v30 = vsel %vm2313_vm3, %v2835_v52, %v2719_v41  ;;  %6621 = vmatprep.mubr.msk.f32.mxu1 %vm1528_vm1, %v4184_v47  ;;  %v4199_v56 = vrot.slane %v13998_v25, 4  ;;  %v14000_v21 = vld [vmem:[#allocation56_spill] sm:$0xff]  ;;  %v4207_v12 = vrot.slane %v14002_v36, 4  ;;  %v14005_v13 = vld [vmem:[#allocation113_spill] sm:$0xff] }
 0x63c   : > { %v11999_v19 = vadd.f32 %v11624_v61, %v4693_v18  ;;  %v4695_v48 = vpop.f32.mrb[123].mxu0  ;;  %3766 = vrot.lane.b32.xlu0 %v2864_v30, %s7881_s20  ;;  %4897 = vmatmul.mubr.f32.gmra.mrb[204].mxu0 %v11375_v40  ;;  %v4192_v61 = vsel %vm2887_vm4, %v4183_v10, %v4191_v3  ;;  %v14001_v40 = vld [vmem:[#allocation128_spill] sm:$0xff] }
 0x63d   : > { %4901 = vmatprep.mubr.f32.mxu0 %v13997_v23  ;;  %v12006_v26 = vpop.f32.mrb[106].mxu1  ;;  %v4200_v10 = vsel %vm2887_vm4, %v4191_v3, %v4199_v56  ;;  %v14004_v48 = vld [vmem:[#allocation126_spill] sm:$0xff]  ;;  %v4215_v23 = vrot.slane %v14005_v13, 4  ;;  %v4208_v3 = vsel %vm2887_vm4, %v4199_v56, %v4207_v12 }
 0x63e   : > { %5482 = vmatmul.mubr.f32.gmra.mrb[12].mxu1 %v13999_v29  ;;  %v5300_v41 = vpop.f32.mrb[107].mxu1  ;;  %v14006_v29 = vld [vmem:[#allocation112_spill] sm:$0xff] }
 0x63f   : > { %v4698_v60 = vpop.f32.mrb[124].mxu0  ;;  %6622 = vmatprep.mubr.msk.f32.mxu1 %vm1528_vm1, %v4192_v61  ;;  %v14007_v41 = vld [vmem:[#allocation127_spill] sm:$0xff]  ;;  %v4216_v56 = vsel %vm2887_vm4, %v4207_v12, %v4215_v23 }
 0x640   : > { %v12011_v6 = vadd.f32 %v11726_v1, %v4698_v60  ;;  %v4700_v62 = vpop.f32.mrb[125].mxu0  ;;  %4902 = vmatmul.mubr.f32.gmra.mrb[206].mxu0 %v14000_v21  ;;  %v14008_v21 = vld [vmem:[#allocation132_spill] sm:$0xff] }
 0x641   : > { %4906 = vmatprep.mubr.f32.mxu0 %v14001_v40  ;;  %v12017_v18 = vpop.f32.mrb[108].mxu1 }
 0x642   : > { %5487 = vmatmul.mubr.f32.gmra.mrb[14].mxu1 %v14003_v8  ;;  %v5305_v30 = vpop.f32.mrb[109].mxu1  ;;  %v14010_v8 = vld [vmem:[#allocation114_spill] sm:$0xff] }
 0x643   : > { %v4703_v52 = vpop.f32.mrb[126].mxu0  ;;  %6623 = vmatprep.mubr.msk.f32.mxu1 %vm1528_vm1, %v4200_v10  ;;  %v14012_v30 = vld [vmem:[#allocation79_spill] sm:$0xff] }
 0x644   : > { %v12022_v1 = vadd.f32 %v11745_v16, %v4703_v52  ;;  %v4705_v47 = vpop.f32.mrb[127].mxu0  ;;  %4907 = vmatmul.mubr.f32.gmra.mrb[208].mxu0 %v14004_v48  ;;  %v14013_v48 = vld [vmem:[#allocation117_spill] sm:$0xff] }
 0x645   : > { %4911 = vmatprep.mubr.f32.mxu0 %v11486_v51  ;;  %v12028_v60 = vpop.f32.mrb[110].mxu1  ;;  %v14009_v51 = vld [vmem:[#allocation31_spill] sm:$0xff]  ;;  %v4231_v13 = vrot.slane %v14013_v48, 4 }
 0x646   : > { %5492 = vmatmul.mubr.f32.gmra.mrb[16].mxu1 %v14006_v29  ;;  %v5310_v62 = vpop.f32.mrb[111].mxu1  ;;  %v4223_v40 = vrot.slane %v14009_v51, 4 }
 0x647   : > { %v4708_v25 = vpop.f32.mrb[128].mxu0  ;;  %6624 = vmatprep.mubr.msk.f32.mxu1 %vm1528_vm1, %v4208_v3  ;;  %v14014_v3 = vld [vmem:[#allocation116_spill] sm:$0xff] }
 0x648   : > { %v12033_v16 = vadd.f32 %v11790_v37, %v4708_v25  ;;  %v4710_v61 = vpop.f32.mrb[129].mxu0  ;;  %4912 = vmatmul.mubr.f32.gmra.mrb[210].mxu0 %v14007_v41  ;;  %v4224_v12 = vsel %vm2887_vm4, %v4215_v23, %v4223_v40  ;;  %v14015_v41 = vld [vmem:[#allocation131_spill] sm:$0xff]  ;;  %v4232_v23 = vsel %vm2887_vm4, %v4223_v40, %v4231_v13 }
 0x649   : > { %4916 = vmatprep.mubr.f32.mxu0 %v14008_v21  ;;  %v12039_v52 = vpop.f32.mrb[112].mxu1 }
 0x64a   : > { %5497 = vmatmul.mubr.f32.gmra.mrb[18].mxu1 %v14010_v8  ;;  %v5315_v47 = vpop.f32.mrb[113].mxu1  ;;  %v14017_v8 = vld [vmem:[#allocation118_spill] sm:$0xff] }
 0x64b   : > { %v4713_v36 = vpop.f32.mrb[130].mxu0  ;;  %6625 = vmatprep.mubr.msk.f32.mxu1 %vm1528_vm1, %v4216_v56 }
 0x64c   : > { %v12044_v37 = vadd.f32 %v11801_v43, %v4713_v36  ;;  %v4715_v10 = vpop.f32.mrb[131].mxu0  ;;  %4917 = vmatmul.mubr.f32.gmra.mrb[212].mxu0 %v14012_v30 }
 0x64d   : > { %4921 = vmatprep.mubr.f32.mxu0 %v11552_v53  ;;  %v12050_v29 = vpop.f32.mrb[114].mxu1  ;;  %v14016_v53 = vld [vmem:[#allocation65_spill] sm:$0xff] }
 0x64e   : > { %14011 = vst [vmem:[#allocation94_spill] sm:$0xff] %v12044_v37  ;;  %5502 = vmatmul.mubr.f32.gmra.mrb[20].mxu1 %v14014_v3  ;;  %v5320_v62 = vpop.f32.mrb[115].mxu1  ;;  %v4239_v21 = vrot.slane %v14016_v53, 4 }
 0x64f   : > { %v4718_v25 = vpop.f32.mrb[132].mxu0  ;;  %6626 = vmatprep.mubr.msk.f32.mxu1 %vm1528_vm1, %v4224_v12  ;;  %v14020_v62 = vld [vmem:[#allocation122_spill] sm:$0xff] }
 0x650   : > { %v12055_v43 = vadd.f32 %v11835_v7, %v4718_v25  ;;  %v4720_v61 = vpop.f32.mrb[133].mxu0  ;;  %4922 = vmatmul.mubr.f32.gmra.mrb[214].mxu0 %v14015_v41  ;;  %v14019_v25 = vld [vmem:[#allocation120_spill] sm:$0xff]  ;;  %v4240_v40 = vsel %vm2887_vm4, %v4231_v13, %v4239_v21 }
 0x651   : > { %4926 = vmatprep.mubr.f32.mxu0 %v11564_v17  ;;  %v12061_v36 = vpop.f32.mrb[116].mxu1  ;;  %v14018_v17 = vld [vmem:[#allocation121_spill] sm:$0xff] }
 0x652   : > { %5507 = vmatmul.mubr.f32.gmra.mrb[22].mxu1 %v14017_v8  ;;  %v5325_v10 = vpop.f32.mrb[117].mxu1  ;;  %v4247_v47 = vrot.slane %v14018_v17, 4  ;;  %v14022_v8 = vld [vmem:[#allocation123_spill] sm:$0xff] }
 0x653   : > { %6627 = vmatprep.mubr.msk.f32.mxu1 %vm1528_vm1, %v4232_v23  ;;  %v14023_v10 = vld [vmem:[#allocation125_spill] sm:$0xff] }
 0x654   : > { %v4723_v51 = vpop.f32.mrb[134].mxu0  ;;  %4927 = vmatmul.mubr.f32.gmra.mrb[216].mxu0 %v11555_v22  ;;  %v4255_v22 = vrot.slane %v11368_v11, 4  ;;  %v4248_v13 = vsel %vm2887_vm4, %v4239_v21, %v4247_v47 }
 0x655   : > { %v12066_v7 = vadd.f32 %v11844_v42, %v4723_v51  ;;  %v4725_v56 = vpop.f32.mrb[135].mxu0  ;;  %4931 = vmatprep.mubr.f32.mxu0 %v11591_v59  ;;  %v12072_v48 = vpop.f32.mrb[118].mxu1 }
 0x656   : > { %5512 = vmatmul.mubr.f32.gmra.mrb[24].mxu1 %v14019_v25  ;;  %v5330_v12 = vpop.f32.mrb[119].mxu1  ;;  %v4256_v21 = vsel %vm2887_vm4, %v4247_v47, %v4255_v22  ;;  %v14024_v25 = vld [vmem:[#allocation129_spill] sm:$0xff] }
 0x657   : > { %6628 = vmatprep.mubr.msk.f32.mxu1 %vm1528_vm1, %v4240_v40  ;;  %v14025_v40 = vrot.slane %v11422_v33, 4 }
 0x658   : > { %v4728_v30 = vpop.f32.mrb[136].mxu0  ;;  %4932 = vmatmul.mubr.f32.gmra.mrb[218].mxu0 %v11558_v39  ;;  %v14021_v39 = vld [vmem:[#allocation124_spill] sm:$0xff] }
 0x659   : > { %v12077_v42 = vadd.f32 %v11874_v34, %v4728_v30  ;;  %v4730_v3 = vpop.f32.mrb[137].mxu0  ;;  %4936 = vmatprep.mubr.f32.mxu0 %v11601_v28  ;;  %v12083_v61 = vpop.f32.mrb[120].mxu1  ;;  %v4263_v11 = vrot.slane %v14021_v39, 4 }
 0x65a   : > { %5517 = vmatmul.mubr.f32.gmra.mrb[26].mxu1 %v14020_v62  ;;  %v5335_v53 = vpop.f32.mrb[121].mxu1 }
 0x65b   : > { %6629 = vmatprep.mubr.msk.f32.mxu1 %vm1528_vm1, %v4248_v13  ;;  %v4264_v17 = vsel %vm2887_vm4, %v4255_v22, %v4263_v11  ;;  %v4272_v3 = vsel %vm2887_vm4, %v4263_v11, %v14025_v40  ;;  %v14029_v53 = vld [vmem:[#allocation28_spill] sm:$0xff] }
 0x65c   : > { %v4733_v59 = vpop.f32.mrb[138].mxu0  ;;  %4937 = vmatmul.mubr.f32.gmra.mrb[220].mxu0 %v11595_v32  ;;  %v14030_v39 = vrot.slane %v14029_v53, 4 }
 0x65d   : > { %v12088_v34 = vadd.f32 %v11879_v24, %v4733_v59  ;;  %v4735_v41 = vpop.f32.mrb[139].mxu0  ;;  %4941 = vmatprep.mubr.f32.mxu0 %v11627_v44  ;;  %v12094_v51 = vpop.f32.mrb[122].mxu1  ;;  %v14026_v59 = vld [vmem:[#allocation130_spill] sm:$0xff] }
 0x65e   : > { %5522 = vmatmul.mubr.f32.gmra.mrb[28].mxu1 %v14022_v8  ;;  %v5340_v56 = vpop.f32.mrb[123].mxu1  ;;  %v14028_v41 = vld [vmem:[#allocation139_spill] sm:$0xff] }
 0x65f   : > { %6630 = vmatprep.mubr.msk.f32.mxu1 %vm1528_vm1, %v4256_v21  ;;  %v14033_v21 = vld [vmem:[#allocation134_spill] sm:$0xff] }
 0x660   : > { %v4738_v28 = vpop.f32.mrb[140].mxu0  ;;  %4942 = vmatmul.mubr.f32.gmra.mrb[222].mxu0 %v11609_v49 }
 0x661   : > { %v12099_v24 = vadd.f32 %v11883_v63, %v4738_v28  ;;  %v4740_v23 = vpop.f32.mrb[141].mxu0  ;;  %4946 = vmatprep.mubr.f32.mxu0 %v11642_v46  ;;  %v12104_v44 = vpop.f32.mrb[124].mxu1 }
 0x662   : > { %5527 = vmatmul.mubr.f32.gmra.mrb[30].mxu1 %v14023_v10  ;;  %v5345_v30 = vpop.f32.mrb[125].mxu1  ;;  %v14035_v10 = vld [vmem:[#allocation26_spill] sm:$0xff] }
 0x663   : > { %6631 = vmatprep.mubr.msk.f32.mxu1 %vm1528_vm1, %v4264_v17  ;;  %v14036_v17 = vrot.slane %v14035_v10, 4 }
 0x664   : > { %v4743_v32 = vpop.f32.mrb[142].mxu0  ;;  %4947 = vmatmul.mubr.f32.gmra.mrb[224].mxu0 %v11633_v9 }
 0x665   : > { %v12109_v47 = vadd.f32 %v11887_v35, %v4743_v32  ;;  %v4745_v63 = vpop.f32.mrb[143].mxu0  ;;  %4951 = vmatprep.mubr.f32.mxu0 %v11666_v0  ;;  %v12114_v46 = vpop.f32.mrb[126].mxu1  ;;  %v14034_v32 = vld [vmem:[#allocation135_spill] sm:$0xff] }
 0x666   : > { %5532 = vmatmul.mubr.f32.gmra.mrb[32].mxu1 %v14024_v25  ;;  %v5350_v22 = vpop.f32.mrb[127].mxu1  ;;  %v14037_v63 = vld [vmem:[#allocation138_spill] sm:$0xff] }
 0x667   : > { %6632 = vmatprep.mubr.msk.f32.mxu1 %vm1528_vm1, %v4272_v3  ;;  %v14038_v30 = vrot.slane %v14037_v63, 4  ;;  %v14039_v3 = vld [vmem:[#allocation136_spill] sm:$0xff] }
 0x668   : > { %v4748_v49 = vpop.f32.mrb[144].mxu0  ;;  %4952 = vmatmul.mubr.f32.gmra.mrb[226].mxu0 %v11636_v4  ;;  %v14031_v4 = vld [vmem:[#allocation92_spill] sm:$0xff] }
 0x669   : > { %v12121_v35 = vadd.f32 %v11891_v27, %v4748_v49  ;;  %v4750_v12 = vpop.f32.mrb[145].mxu0  ;;  %4956 = vmatprep.mubr.f32.mxu0 %v11690_v55  ;;  %v12126_v0 = vpop.f32.mrb[128].mxu1  ;;  %v14027_v27 = vld [vmem:[#allocation133_spill] sm:$0xff]  ;;  %v14032_v11 = vrot.slane %v14031_v4, 4  ;;  %v3989_v49 = vsel %vm2887_vm4, %v14038_v30, %v14036_v17  ;;  %v14045_v4 = vld [vmem:[#allocation91_spill] sm:$0xff] }
 0x66a   : > { %5537 = vmatmul.mubr.f32.gmra.mrb[34].mxu1 %v14026_v59  ;;  %v5355_v13 = vpop.f32.mrb[129].mxu1 }
 0x66b   : > { %6633 = vmatprep.mubr.msk.f32.mxu1 %vm1528_vm1, %v14027_v27  ;;  %v3991_v55 = vsel %vm2887_vm4, %v14032_v11, %v14030_v39  ;;  %v14042_v13 = vld [vmem:[#allocation137_spill] sm:$0xff] }
 0x66c   : > { %v4753_v9 = vpop.f32.mrb[146].mxu0  ;;  %4957 = vmatmul.mubr.f32.gmra.mrb[228].mxu0 %v14028_v41  ;;  %v14043_v27 = vld [vmem:[#allocation93_spill] sm:$0xff] }
 0x66d   : > { %v12130_v33 = vadd.f32 %v11894_v54, %v4753_v9  ;;  %v4755_v62 = vpop.f32.mrb[147].mxu0  ;;  %4961 = vmatprep.mubr.f32.mxu0 %v3991_v55  ;;  %v14041_v9 = vld [vmem:[#allocation85_spill] sm:$0xff] }
 0x66e   : > { %5542 = vmatmul.mubr.f32.gmra.mrb[36].mxu1 %v14033_v21  ;;  %v14046_v11 = vld [vmem:[#allocation141_spill] sm:$0xff] }
 0x66f   : > { %6634 = vmatprep.mubr.msk.f32.mxu1 %vm1528_vm1, %v14034_v32  ;;  %v14047_v21 = vld [vmem:[#allocation17_spill] sm:$0xff]  ;;  %v14048_v32 = vld [vmem:[#allocation44_spill] sm:$0xff] }
 0x670   : > { %v4758_v28 = vpop.f32.mrb[148].mxu0  ;;  %v12140_v8 = vpop.f32.mrb[130].mxu1  ;;  %4962 = vmatmul.mubr.f32.gmra.mrb[230].mxu0 %v3989_v49  ;;  %v14049_v49 = vld [vmem:[#allocation50_spill] sm:$0xff] }
 0x671   : > { %v12144_v54 = vadd.f32 %v11896_v38, %v4758_v28  ;;  %v4760_v23 = vpop.f32.mrb[149].mxu0  ;;  %v5360_v56 = vpop.f32.mrb[131].mxu1 }
 0x672   : > { %5547 = vmatmul.mubr.f32.gmra.mrb[38].mxu1 %v14039_v3 }
 0x673   : > { %6635 = vmatprep.mubr.msk.f32.mxu1 %vm1528_vm1, %v14041_v9 }
 0x674   : > { %v4763_v25 = vpop.f32.mrb[150].mxu0  ;;  %v12153_v40 = vpop.f32.mrb[132].mxu1 }
 0x675   : > { %v12157_v38 = vadd.f32 %v11898_v50, %v4763_v25  ;;  %v4765_v12 = vpop.f32.mrb[151].mxu0  ;;  %v5365_v22 = vpop.f32.mrb[133].mxu1 }
 0x676   : > { %5552 = vmatmul.mubr.f32.gmra.mrb[40].mxu1 %v14042_v13 }
 0x677   : > { %14040 = vst [vmem:[#allocation51_spill] sm:$0xff] %v12157_v38  ;;  %6636 = vmatprep.mubr.msk.f32.mxu1 %vm1528_vm1, %v14045_v4 }
 0x678   : > { %v4768_v59 = vpop.f32.mrb[152].mxu0  ;;  %v12161_v62 = vpop.f32.mrb[134].mxu1 }
 0x679   : > { %v12165_v41 = vadd.f32 %v14043_v27, %v4768_v59  ;;  %v4770_v53 = vpop.f32.mrb[153].mxu0  ;;  %v5370_v39 = vpop.f32.mrb[135].mxu1 }
 0x67a   : > { %5557 = vmatmul.mubr.f32.gmra.mrb[42].mxu1 %v14046_v11 }
 0x67b   : > { %14044 = vst [vmem:[#allocation11_spill] sm:$0xff] %v12165_v41 }
 0x67c   : > { %v12169_v50 = vpop.f32.mrb[136].mxu1  ;;  %v4773_v55 = vpop.f32.mrb[154].mxu0 }
 0x67d   : > { %v5375_v28 = vpop.f32.mrb[137].mxu1  ;;  %v12173_v23 = vadd.f32 %v14047_v21, %v4773_v55  ;;  %v4775_v56 = vpop.f32.mrb[155].mxu0  ;;  %v14050_v55 = vld [vmem:[#allocation61_spill] sm:$0xff] }
 0x680   : > { %v12177_v17 = vpop.f32.mrb[138].mxu1  ;;  %v4778_v63 = vpop.f32.mrb[156].mxu0 }
 0x681   : > { %v5380_v30 = vpop.f32.mrb[139].mxu1  ;;  %v12180_v25 = vadd.f32 %v14049_v49, %v4778_v63  ;;  %v4780_v3 = vpop.f32.mrb[157].mxu0 }
 0x684   : > { %v12184_v22 = vpop.f32.mrb[140].mxu1  ;;  %v4783_v9 = vpop.f32.mrb[158].mxu0 }
 0x685   : > { %v5385_v59 = vpop.f32.mrb[141].mxu1  ;;  %v12187_v13 = vadd.f32 %v11922_v20, %v4783_v9  ;;  %v4785_v27 = vpop.f32.mrb[159].mxu0 }
 0x688   : > { %v12191_v39 = vpop.f32.mrb[142].mxu1  ;;  %v4788_v4 = vpop.f32.mrb[160].mxu0 }
 0x689   : > { %v5390_v11 = vpop.f32.mrb[143].mxu1  ;;  %v12194_v28 = vadd.f32 %v14050_v55, %v4788_v4  ;;  %v4790_v21 = vpop.f32.mrb[161].mxu0 }
 0x68c   : > { %v12198_v63 = vpop.f32.mrb[144].mxu1  ;;  %v4793_v30 = vpop.f32.mrb[162].mxu0 }
 0x68d   : > { %v5395_v20 = vpop.f32.mrb[145].mxu1  ;;  %v12201_v49 = vadd.f32 %v11952_v58, %v4793_v30  ;;  %v4795_v3 = vpop.f32.mrb[163].mxu0 }
 0x690   : > { %v12205_v59 = vpop.f32.mrb[146].mxu1  ;;  %v4798_v27 = vpop.f32.mrb[164].mxu0 }
 0x691   : > { %v5400_v4 = vpop.f32.mrb[147].mxu1  ;;  %v12208_v11 = vadd.f32 %v11967_v5, %v4798_v27  ;;  %v4800_v55 = vpop.f32.mrb[165].mxu0 }
 0x694   : > { %v12212_v56 = vpop.f32.mrb[148].mxu1  ;;  %v4803_v20 = vpop.f32.mrb[166].mxu0 }
 0x695   : > { %v5405_v58 = vpop.f32.mrb[149].mxu1  ;;  %v12215_v30 = vadd.f32 %v11980_v57, %v4803_v20  ;;  %v4805_v3 = vpop.f32.mrb[167].mxu0 }
 0x698   : > { %v12219_v53 = vpop.f32.mrb[150].mxu1  ;;  %v4808_v4 = vpop.f32.mrb[168].mxu0 }
 0x699   : > { %v5410_v5 = vpop.f32.mrb[151].mxu1  ;;  %v12222_v27 = vadd.f32 %v11993_v15, %v4808_v4  ;;  %v4810_v55 = vpop.f32.mrb[169].mxu0 }
 0x69c   : > { %v12226_v12 = vpop.f32.mrb[152].mxu1  ;;  %v4813_v58 = vpop.f32.mrb[170].mxu0 }
 0x69d   : > { %14051 = vst [vmem:[#allocation25_spill] sm:$0xff] %v12226_v12  ;;  %v5415_v57 = vpop.f32.mrb[153].mxu1  ;;  %v12229_v20 = vadd.f32 %v12006_v26, %v4813_v58  ;;  %v4815_v3 = vpop.f32.mrb[171].mxu0 }
 0x69f   : > { %14052 = vst [vmem:[#allocation19_spill] sm:$0xff] %v12229_v20 }
 0x6a0   : > { %v12233_v10 = vpop.f32.mrb[154].mxu1  ;;  %v4818_v5 = vpop.f32.mrb[172].mxu0 }
 0x6a1   : > { %14053 = vst [vmem:[#allocation57_spill] sm:$0xff] %v12233_v10  ;;  %v5420_v15 = vpop.f32.mrb[155].mxu1  ;;  %v12236_v4 = vadd.f32 %v12017_v18, %v4818_v5  ;;  %v4820_v55 = vpop.f32.mrb[173].mxu0  ;;  %v14058_v18 = vld [vmem:[#allocation90_spill] sm:$0xff] }
 0x6a2   : > { %v14059_v5 = vunpack.i.l.bf16 %v14058_v18 }
 0x6a3   : > { %14054 = vst [vmem:[#allocation42_spill] sm:$0xff] %v12236_v4 }
 0x6a4   : > { %v12240_v12 = vpop.f32.mrb[156].mxu1  ;;  %v4823_v57 = vpop.f32.mrb[174].mxu0 }
 0x6a5   : > { %14055 = vst [vmem:[#allocation58_spill] sm:$0xff] %v12240_v12  ;;  %v5425_v26 = vpop.f32.mrb[157].mxu1  ;;  %v12243_v58 = vadd.f32 %v12028_v60, %v4823_v57  ;;  %v4825_v3 = vpop.f32.mrb[175].mxu0  ;;  %v14061_v57 = vld [vmem:[#allocation62_spill] sm:$0xff] }
 0x6a6   : > { %v3765_v10 = vpop.permute.xlu1 %3764  ;;  %v14062_v3 = vrot.slane %v14061_v57, 4  ;;  %v6200_v57 = vld [vmem:[%s13158_s6 + $0x88] sm:$0xff] }
 0x6a7   : > { %14056 = vst [vmem:[#allocation43_spill] sm:$0xff] %v12243_v58  ;;  %v3780_v55 = vsel %vm2313_vm3, %v14059_v5, %v3765_v10  ;;  %v4311_v20 = vrot.slane %v3765_v10, 4  ;;  %v14064_v5 = vld [vmem:[#allocation140_spill] sm:$0xff] }
 0x6a8   : > { %v12247_v15 = vpop.f32.mrb[158].mxu1  ;;  %v4828_v21 = vpop.f32.mrb[176].mxu0  ;;  %v4309_v12 = vrot.slane %v3780_v55, 4  ;;  %v14065_v10 = vrot.slane %v14064_v5, 4 }
 0x6a9   : > { %14057 = vst [vmem:[#allocation63_spill] sm:$0xff] %v12247_v15  ;;  %v5430_v4 = vpop.f32.mrb[159].mxu1  ;;  %v12253_v26 = vadd.f32 %v12039_v52, %v4828_v21  ;;  %v4830_v60 = vpop.f32.mrb[177].mxu0  ;;  %v4312_v37 = vsel %vm2887_vm4, %v14062_v3, %v4311_v20 }
 0x6aa   : > { %6637 = vmatprep.mubr.msk.f32.mxu1 %vm1528_vm1, %v4312_v37  ;;  %v4310_v4 = vsel %vm2887_vm4, %v14065_v10, %v4309_v12  ;;  %v6199_v60 = vld [vmem:[%s13158_s6 + $0x80] sm:$0xff] }
 0x6ab   : > { %14060 = vst [vmem:[#allocation52_spill] sm:$0xff] %v12253_v26  ;;  %5562 = vmatmul.mubr.f32.gmra.mrb[44].mxu1 %v4310_v4  ;;  %v7082_v37 = vpack.c.bf16 %v6200_v57, %v6199_v60  ;;  %v6183_v60 = vld [vmem:[%s13158_s6] sm:$0xff]  ;;  %v6184_v57 = vld [vmem:[%s13158_s6 + $0x8] sm:$0xff] }
 0x6ac   : > { %v12260_v15 = vpop.f32.mrb[160].mxu1  ;;  %v4833_v55 = vpop.f32.mrb[178].mxu0 }
 0x6ad   : > { %14063 = vst [vmem:[#allocation60_spill] sm:$0xff] %v12260_v15  ;;  %v5435_v58 = vpop.f32.mrb[161].mxu1  ;;  %v12267_v52 = vadd.f32 %v12050_v29, %v4833_v55  ;;  %v4835_v21 = vpop.f32.mrb[179].mxu0  ;;  %7083 = vmatprep.subr.bf16.mxu0 %v7082_v37 }
 0x6ae   : > { %v3767_v5 = vpop.permute.xlu0 %3766  ;;  %v14066_v58 = vunpack.i.h.bf16 %v14058_v18 }
 0x6af   : > { %v4319_v4 = vrot.slane %v3767_v5, 4 }
 0x6b0   : > { %v12277_v10 = vpop.f32.mrb[162].mxu1  ;;  %v3781_v29 = vsel %vm2313_vm3, %v14066_v58, %v3767_v5  ;;  %v4838_v55 = vpop.f32.mrb[180].mxu0  ;;  %v7084_v58 = vpack.c.bf16 %v6184_v57, %v6183_v60 }
 0x6b1   : > { %v5440_v21 = vpop.f32.mrb[163].mxu1  ;;  %v4317_v9 = vrot.slane %v3781_v29, 4  ;;  %v12283_v15 = vadd.f32 %v12061_v36, %v4838_v55  ;;  %v4840_v26 = vpop.f32.mrb[181].mxu0  ;;  %v4320_v18 = vsel %vm2887_vm4, %v4311_v20, %v4319_v4 }
 0x6b2   : > { %6638 = vmatprep.mubr.msk.f32.mxu1 %vm1528_vm1, %v4320_v18  ;;  %7085 = vmatpush3.bf16.msra.mxu0 %v7084_v58 }
 0x6b3   : > { %v4318_v36 = vsel %vm2887_vm4, %v4309_v12, %v4317_v9 }
 0x6b4   : > { %v12294_v37 = vpop.f32.mrb[164].mxu1  ;;  %v4843_v26 = vpop.f32.mrb[182].mxu0  ;;  %5567 = vmatmul.mubr.f32.gmra.mrb[46].mxu1 %v4318_v36 }
 0x6b5   : > { %v5445_v29 = vpop.f32.mrb[165].mxu1  ;;  %v12299_v55 = vadd.f32 %v12072_v48, %v4843_v26  ;;  %v4845_v21 = vpop.f32.mrb[183].mxu0 }
 0x6b8   : > { %v12303_v4 = vpop.f32.mrb[166].mxu1  ;;  %v4848_v60 = vpop.f32.mrb[184].mxu0 }
 0x6b9   : > { %v5450_v57 = vpop.f32.mrb[167].mxu1  ;;  %v12306_v5 = vadd.f32 %v12083_v61, %v4848_v60  ;;  %v4850_v18 = vpop.f32.mrb[185].mxu0 }
 0x6bc   : > { %v12310_v9 = vpop.f32.mrb[0].mxu1  ;;  %v4853_v58 = vpop.f32.mrb[186].mxu0 }
 0x6bd   : > { %v5455_v48 = vpop.f32.mrb[1].mxu1  ;;  %v12313_v36 = vadd.f32 %v12094_v51, %v4853_v58  ;;  %v4855_v26 = vpop.f32.mrb[187].mxu0 }
 0x6c0   : > { %v4858_v21 = vpop.f32.mrb[188].mxu0 }
 0x6c1   : > { %v12318_v57 = vadd.f32 %v12104_v44, %v4858_v21  ;;  %v4860_v61 = vpop.f32.mrb[189].mxu0 }
 0x6c4   : > { %v4863_v18 = vpop.f32.mrb[190].mxu0 }
 0x6c5   : > { %v12323_v12 = vadd.f32 %v12114_v46, %v4863_v18  ;;  %v4865_v48 = vpop.f32.mrb[191].mxu0  ;;  %v6201_v46 = vld [vmem:[%s13158_s6 + $0x90] sm:$0xff]  ;;  %v6202_v18 = vld [vmem:[%s13158_s6 + $0x98] sm:$0xff] }
 0x6c6   : > { %v6186_v48 = vld [vmem:[%s13158_s6 + $0x18] sm:$0xff] }
 0x6c8   : > { %v4868_v58 = vpop.f32.mrb[192].mxu0 }
 0x6c9   : > { %v12328_v26 = vadd.f32 %v12126_v0, %v4868_v58  ;;  %v4870_v29 = vpop.f32.mrb[193].mxu0  ;;  %v6185_v0 = vld [vmem:[%s13158_s6 + $0x10] sm:$0xff]  ;;  %v6203_v58 = vld [vmem:[%s13158_s6 + $0xa0] sm:$0xff] }
 0x6ca   : > { %v7086_v29 = vpack.c.bf16 %v6202_v18, %v6201_v46  ;;  %v6187_v46 = vld [vmem:[%s13158_s6 + $0x20] sm:$0xff] }
 0x6cb   : > { %14067 = vst [vmem:[#allocation64_spill] sm:$0xff] %v12328_v26 }
 0x6cc   : > { %v4873_v21 = vpop.f32.mrb[194].mxu0  ;;  %7087 = vmatprep.subr.bf16.mxu0 %v7086_v29 }
 0x6cd   : > { %v12333_v61 = vadd.f32 %v12140_v8, %v4873_v21  ;;  %v4875_v60 = vpop.f32.mrb[195].mxu0  ;;  %v6204_v21 = vld [vmem:[%s13158_s6 + $0xa8] sm:$0xff] }
 0x6ce   : > { %v7088_v60 = vpack.c.bf16 %v6186_v48, %v6185_v0  ;;  %v7090_v18 = vpack.c.bf16 %v6204_v21, %v6203_v58  ;;  %v6188_v8 = vld [vmem:[%s13158_s6 + $0x28] sm:$0xff] }
 0x6cf   : > { %14068 = vst [vmem:[#allocation66_spill] sm:$0xff] %v12333_v61  ;;  %v7092_v0 = vpack.c.bf16 %v6188_v8, %v6187_v46  ;;  %v6205_v8 = vld [vmem:[%s13158_s6 + $0xb0] sm:$0xff]  ;;  %v6206_v46 = vld [vmem:[%s13158_s6 + $0xb8] sm:$0xff] }
 0x6d0   : > { %7089 = vmatpush3.bf16.msra.mxu0 %v7088_v60 }
 0x6d1   : > { %7091 = vmatprep.subr.bf16.mxu0 %v7090_v18 }
 0x6d4   : > { %7093 = vmatpush3.bf16.msra.mxu0 %v7092_v0 }
 0x6f9   : > { %v12361_v29 = vpop.f32.mrb[2].mxu1 }
 0x6fa   : > { %v5460_v48 = vpop.f32.mrb[3].mxu1 }
 0x6ff   : > { %v4878_v60 = vpop.f32.mrb[196].mxu0 }
 0x700   : > { %v5364_v44 = vadd.f32 %v12153_v40, %v4878_v60  ;;  %v4880_v51 = vpop.f32.mrb[197].mxu0  ;;  %v6189_v40 = vld [vmem:[%s13158_s6 + $0x30] sm:$0xff]  ;;  %v14070_v60 = vmax.f32 %v14048_v32, %v12173_v23 }
 0x701   : > { %v12364_v20 = vpop.f32.mrb[4].mxu1 }
 0x702   : > { %14069 = vst [vmem:[#allocation13_spill] sm:$0xff] %v12364_v20  ;;  %v5465_v3 = vpop.f32.mrb[5].mxu1 }
 0x703   : > { %v4883_v61 = vpop.f32.mrb[198].mxu0  ;;  %v7094_v3 = vpack.c.bf16 %v6206_v46, %v6205_v8 }
 0x704   : > { %v5369_v58 = vadd.f32 %v12161_v62, %v4883_v61  ;;  %v4885_v21 = vpop.f32.mrb[199].mxu0  ;;  %v6190_v62 = vld [vmem:[%s13158_s6 + $0x38] sm:$0xff]  ;;  %v12382_v61 = vld [vmem:[%s13156_s4] ss:$0 sm:$0xff] }
 0x705   : > { %v5468_v41 = vpop.f32.mrb[6].mxu1  ;;  %v7096_v48 = vpack.c.bf16 %v6190_v62, %v6189_v40  ;;  %7095 = vmatprep.subr.bf16.mxu0 %v7094_v3  ;;  %v14071_v40 = vmax.f32 %v11936_v45, %v12180_v25  ;;  %v14072_v45 = vmax.f32 %v11956_v31, %v12187_v13 }
 0x706   : > { %v5593_v51 = vmax.f32 %v5364_v44, %v5468_v41  ;;  %v5470_v18 = vpop.f32.mrb[7].mxu1 }
 0x707   : > { %v4888_v0 = vpop.f32.mrb[200].mxu0  ;;  %7097 = vmatpush3.bf16.msra.mxu0 %v7096_v48 }
 0x708   : > { %v5614_v21 = vmax.f32 %v14070_v60, %v5593_v51  ;;  %v5374_v20 = vadd.f32 %v12169_v50, %v4888_v0  ;;  %v4890_v41 = vpop.f32.mrb[201].mxu0 }
 0x709   : > { %v5473_v44 = vpop.f32.mrb[8].mxu1 }
 0x70a   : > { %v5642_v8 = vadd.f32 %v12382_v61, %v5614_v21  ;;  %v5594_v46 = vmax.f32 %v5369_v58, %v5473_v44  ;;  %v5475_v18 = vpop.f32.mrb[9].mxu1 }
 0x70b   : > { %v4893_v26 = vpop.f32.mrb[202].mxu0 }
 0x70c   : > { %v12389_v38 = vmax.f32 %v5642_v8, 0.0  ;;  %v5615_v62 = vmax.f32 %v14071_v40, %v5594_v46  ;;  %v5379_v23 = vadd.f32 %v12177_v17, %v4893_v26  ;;  %v4895_v32 = vpop.f32.mrb[203].mxu0  ;;  %v14073_v8 = vmax.f32 %v11972_v2, %v12194_v28 }
 0x70d   : > { %v5478_v51 = vpop.f32.mrb[10].mxu1  ;;  %v14074_v2 = vmax.f32 %v11985_v14, %v12201_v49  ;;  %v14075_v14 = vmax.f32 %v11999_v19, %v12208_v11 }
 0x70e   : > { %v5643_v50 = vadd.f32 %v12382_v61, %v5615_v62  ;;  %v5595_v3 = vmax.f32 %v5374_v20, %v5478_v51  ;;  %v5480_v0 = vpop.f32.mrb[11].mxu1  ;;  %5831 = vrot.lane.b32.xlu0 %v12389_v38, %s7885_s19  ;;  %5705 = vrot.lane.b32.xlu1 %v12389_v38, %s7879_s18 }
 0x70f   : > { %v4898_v58 = vpop.f32.mrb[204].mxu0 }
 0x710   : > { %v12400_v48 = vmax.f32 %v5643_v50, 0.0  ;;  %v5616_v17 = vmax.f32 %v14072_v45, %v5595_v3  ;;  %v5384_v25 = vadd.f32 %v12184_v22, %v4898_v58  ;;  %v4900_v26 = vpop.f32.mrb[205].mxu0 }
 0x711   : > { %v5483_v60 = vpop.f32.mrb[12].mxu1 }
 0x712   : > { %v5596_v20 = vmax.f32 %v5379_v23, %v5483_v60  ;;  %v5485_v21 = vpop.f32.mrb[13].mxu1  ;;  %5707 = vrot.lane.b32.xlu0 %v12400_v48, %s7879_s18  ;;  %5768 = vrot.lane.b32.xlu1 %v12389_v38, %s7881_s20  ;;  %v5644_v44 = vadd.f32 %v12382_v61, %v5616_v17 }
 0x713   : > { %v4903_v41 = vpop.f32.mrb[206].mxu0 }
 0x714   : > { %v5617_v31 = vmax.f32 %v14073_v8, %v5596_v20  ;;  %v5389_v13 = vadd.f32 %v12191_v39, %v4903_v41  ;;  %v4905_v22 = vpop.f32.mrb[207].mxu0  ;;  %v12419_v23 = vmax.f32 %v5644_v44, 0.0  ;;  %v14076_v44 = vmax.f32 %v12011_v6, %v12215_v30 }
 0x715   : > { %v5488_v46 = vpop.f32.mrb[14].mxu1 }
 0x716   : > { %v5597_v18 = vmax.f32 %v5384_v25, %v5488_v46  ;;  %v5490_v40 = vpop.f32.mrb[15].mxu1  ;;  %5770 = vrot.lane.b32.xlu0 %v12400_v48, %s7881_s20  ;;  %5833 = vrot.lane.b32.xlu1 %v12400_v48, %s7885_s19  ;;  %v5645_v32 = vadd.f32 %v12382_v61, %v5617_v31  ;;  %v6207_v31 = vld [vmem:[%s13158_s6 + $0xc0] sm:$0xff] }
 0x717   : > { %v4908_v62 = vpop.f32.mrb[208].mxu0 }
 0x718   : > { %v5618_v28 = vmax.f32 %v14074_v2, %v5597_v18  ;;  %v5394_v39 = vadd.f32 %v12198_v63, %v4908_v62  ;;  %v4910_v51 = vpop.f32.mrb[209].mxu0  ;;  %v12430_v45 = vmax.f32 %v5645_v32, 0.0  ;;  %v14077_v18 = vmax.f32 %v12022_v1, %v12222_v27 }
 0x719   : > { %v5493_v50 = vpop.f32.mrb[16].mxu1 }
 0x71a   : > { %v5598_v3 = vmax.f32 %v5389_v13, %v5493_v50  ;;  %v5495_v0 = vpop.f32.mrb[17].mxu1  ;;  %5772 = vrot.lane.b32.xlu0 %v12419_v23, %s7881_s20  ;;  %5709 = vrot.lane.b32.xlu1 %v12419_v23, %s7879_s18  ;;  %v5646_v17 = vadd.f32 %v12382_v61, %v5618_v28  ;;  %v6208_v13 = vld [vmem:[%s13158_s6 + $0xc8] sm:$0xff]  ;;  %v6191_v28 = vld [vmem:[%s13158_s6 + $0x40] sm:$0xff] }
 0x71b   : > { %v4913_v58 = vpop.f32.mrb[210].mxu0  ;;  %v7098_v6 = vpack.c.bf16 %v6208_v13, %v6207_v31  ;;  %v14078_v0 = vld [vmem:[#allocation19_spill] sm:$0xff] }
 0x71c   : > { %v5619_v49 = vmax.f32 %v14075_v14, %v5598_v3  ;;  %v5399_v63 = vadd.f32 %v12205_v59, %v4913_v58  ;;  %v4915_v25 = vpop.f32.mrb[211].mxu0  ;;  %v12441_v41 = vmax.f32 %v5646_v17, 0.0  ;;  %v14079_v58 = vmax.f32 %v12033_v16, %v14078_v0  ;;  %v14080_v14 = vld [vmem:[#allocation25_spill] sm:$0xff] }
 0x71d   : > { %v5498_v26 = vpop.f32.mrb[18].mxu1  ;;  %7099 = vmatprep.subr.bf16.mxu0 %v7098_v6 }
 0x71e   : > { %v5599_v60 = vmax.f32 %v5394_v39, %v5498_v26  ;;  %v5500_v20 = vpop.f32.mrb[19].mxu1  ;;  %5835 = vrot.lane.b32.xlu0 %v12419_v23, %s7885_s19  ;;  %5711 = vrot.lane.b32.xlu1 %v12430_v45, %s7879_s18  ;;  %v5647_v30 = vadd.f32 %v12382_v61, %v5619_v49  ;;  %v6192_v39 = vld [vmem:[%s13158_s6 + $0x48] sm:$0xff] }
 0x71f   : > { %v4918_v21 = vpop.f32.mrb[212].mxu0  ;;  %v7100_v1 = vpack.c.bf16 %v6192_v39, %v6191_v28 }
 0x720   : > { %v5620_v19 = vmax.f32 %v14076_v44, %v5599_v60  ;;  %v5404_v11 = vadd.f32 %v12212_v56, %v4918_v21  ;;  %v4920_v59 = vpop.f32.mrb[213].mxu0  ;;  %v12472_v27 = vmax.f32 %v5647_v30, 0.0  ;;  %v14081_v44 = vld [vmem:[#allocation94_spill] sm:$0xff]  ;;  %v14085_v30 = vld [vmem:[#allocation43_spill] sm:$0xff] }
 0x721   : > { %v5503_v8 = vpop.f32.mrb[20].mxu1  ;;  %7101 = vmatpush3.bf16.msra.mxu0 %v7100_v1  ;;  %v14084_v59 = vld [vmem:[#allocation57_spill] sm:$0xff] }
 0x722   : > { %v5600_v22 = vmax.f32 %v5399_v63, %v5503_v8  ;;  %v5505_v46 = vpop.f32.mrb[21].mxu1  ;;  %5713 = vrot.lane.b32.xlu0 %v12441_v41, %s7879_s18  ;;  %5774 = vrot.lane.b32.xlu1 %v12430_v45, %s7881_s20  ;;  %v5648_v3 = vadd.f32 %v12382_v61, %v5620_v19  ;;  %v14082_v19 = vld [vmem:[#allocation42_spill] sm:$0xff] }
 0x723   : > { %v4923_v56 = vpop.f32.mrb[214].mxu0  ;;  %v14083_v16 = vmax.f32 %v14081_v44, %v14082_v19  ;;  %v14092_v44 = vld [vmem:[#allocation60_spill] sm:$0xff] }
 0x724   : > { %v5621_v40 = vmax.f32 %v14077_v18, %v5600_v22  ;;  %v5409_v62 = vadd.f32 %v12219_v53, %v4923_v56  ;;  %v4925_v32 = vpop.f32.mrb[215].mxu0  ;;  %v12483_v21 = vmax.f32 %v5648_v3, 0.0  ;;  %v14086_v18 = vmax.f32 %v12055_v43, %v14085_v30  ;;  %v14088_v43 = vld [vmem:[#allocation52_spill] sm:$0xff] }
 0x725   : > { %v5508_v2 = vpop.f32.mrb[22].mxu1  ;;  %v14087_v32 = vld [vmem:[#allocation58_spill] sm:$0xff]  ;;  %v14089_v3 = vmax.f32 %v12066_v7, %v14088_v43 }
 0x726   : > { %v5601_v51 = vmax.f32 %v5404_v11, %v5508_v2  ;;  %v5510_v50 = vpop.f32.mrb[23].mxu1  ;;  %5776 = vrot.lane.b32.xlu0 %v12441_v41, %s7881_s20  ;;  %5837 = vrot.lane.b32.xlu1 %v12430_v45, %s7885_s19  ;;  %v5649_v56 = vadd.f32 %v12382_v61, %v5621_v40 }
 0x727   : > { %v4928_v53 = vpop.f32.mrb[216].mxu0 }
 0x728   : > { %v5622_v17 = vmax.f32 %v14079_v58, %v5601_v51  ;;  %v5414_v49 = vadd.f32 %v14080_v14, %v4928_v53  ;;  %v4930_v63 = vpop.f32.mrb[217].mxu0  ;;  %v12502_v53 = vmax.f32 %v5649_v56, 0.0  ;;  %v14090_v58 = vld [vmem:[#allocation63_spill] sm:$0xff] }
 0x729   : > { %v5513_v25 = vpop.f32.mrb[24].mxu1 }
 0x72a   : > { %v5602_v26 = vmax.f32 %v5409_v62, %v5513_v25  ;;  %v5515_v60 = vpop.f32.mrb[25].mxu1  ;;  %5839 = vrot.lane.b32.xlu0 %v12441_v41, %s7885_s19  ;;  %5715 = vrot.lane.b32.xlu1 %v12472_v27, %s7879_s18  ;;  %v5650_v40 = vadd.f32 %v12382_v61, %v5622_v17  ;;  %v14091_v17 = vmax.f32 %v12077_v42, %v12267_v52 }
 0x72b   : > { %v4933_v20 = vpop.f32.mrb[218].mxu0 }
 0x72c   : > { %v5623_v11 = vmax.f32 %v14083_v16, %v5602_v26  ;;  %v5419_v8 = vadd.f32 %v14084_v59, %v4933_v20  ;;  %v4935_v31 = vpop.f32.mrb[219].mxu0  ;;  %v12513_v20 = vmax.f32 %v5650_v40, 0.0 }
 0x72d   : > { %v5518_v13 = vpop.f32.mrb[26].mxu1 }
 0x72e   : > { %v5603_v22 = vmax.f32 %v5414_v49, %v5518_v13  ;;  %v5520_v46 = vpop.f32.mrb[27].mxu1  ;;  %5717 = vrot.lane.b32.xlu0 %v12483_v21, %s7879_s18  ;;  %5778 = vrot.lane.b32.xlu1 %v12472_v27, %s7881_s20 }
 0x72f   : > { %v4938_v6 = vpop.f32.mrb[220].mxu0  ;;  %v14093_v46 = vmax.f32 %v12088_v34, %v12283_v15  ;;  %v14094_v34 = vmax.f32 %v12099_v24, %v12299_v55  ;;  %v6194_v24 = vld [vmem:[%s13158_s6 + $0x58] sm:$0xff] }
 0x730   : > { %v5624_v62 = vmax.f32 %v14086_v18, %v5603_v22  ;;  %v5424_v2 = vadd.f32 %v14087_v32, %v4938_v6  ;;  %v4940_v28 = vpop.f32.mrb[221].mxu0  ;;  %v5651_v22 = vadd.f32 %v12382_v61, %v5623_v11 }
 0x731   : > { %v5523_v39 = vpop.f32.mrb[28].mxu1 }
 0x732   : > { %v5604_v51 = vmax.f32 %v5419_v8, %v5523_v39  ;;  %v5525_v50 = vpop.f32.mrb[29].mxu1  ;;  %5780 = vrot.lane.b32.xlu0 %v12483_v21, %s7881_s20  ;;  %5841 = vrot.lane.b32.xlu1 %v12472_v27, %s7885_s19  ;;  %v5652_v11 = vadd.f32 %v12382_v61, %v5624_v62  ;;  %v6209_v39 = vld [vmem:[%s13158_s6 + $0xd0] sm:$0xff] }
 0x733   : > { %v4943_v1 = vpop.f32.mrb[222].mxu0  ;;  %v6193_v50 = vld [vmem:[%s13158_s6 + $0x50] sm:$0xff] }
 0x734   : > { %v5625_v0 = vmax.f32 %v14089_v3, %v5604_v51  ;;  %v5429_v14 = vadd.f32 %v14090_v58, %v4943_v1  ;;  %v4945_v49 = vpop.f32.mrb[223].mxu0  ;;  %v6210_v51 = vld [vmem:[%s13158_s6 + $0xd8] sm:$0xff]  ;;  %v7104_v40 = vpack.c.bf16 %v6194_v24, %v6193_v50  ;;  %v12555_v3 = vmax.f32 %v5652_v11, 0.0 }
 0x735   : > { %v5528_v63 = vpop.f32.mrb[30].mxu1  ;;  %v7102_v1 = vpack.c.bf16 %v6210_v51, %v6209_v39  ;;  %v14095_v58 = vmax.f32 %v12109_v47, %v12306_v5  ;;  %v6213_v51 = vld [vmem:[%s13158_s6 + $0xf0] sm:$0xff]  ;;  %v6214_v50 = vld [vmem:[%s13158_s6 + $0xf8] sm:$0xff] }
 0x736   : > { %v5605_v25 = vmax.f32 %v5424_v2, %v5528_v63  ;;  %v5530_v26 = vpop.f32.mrb[31].mxu1  ;;  %5843 = vrot.lane.b32.xlu0 %v12483_v21, %s7885_s19  ;;  %5719 = vrot.lane.b32.xlu1 %v12502_v53, %s7879_s18  ;;  %v12532_v2 = vmax.f32 %v5651_v22, 0.0  ;;  %v14098_v22 = vmax.f32 %v12144_v54, %v12323_v12  ;;  %v6211_v12 = vld [vmem:[%s13158_s6 + $0xe0] sm:$0xff] }
 0x737   : > { %v4948_v60 = vpop.f32.mrb[224].mxu0  ;;  %7103 = vmatprep.subr.bf16.mxu0 %v7102_v1 }
 0x738   : > { %v5626_v7 = vmax.f32 %v14091_v17, %v5605_v25  ;;  %v5434_v19 = vadd.f32 %v14092_v44, %v4948_v60  ;;  %v4950_v16 = vpop.f32.mrb[225].mxu0  ;;  %7105 = vmatpush3.bf16.msra.mxu0 %v7104_v40  ;;  %v5653_v17 = vadd.f32 %v12382_v61, %v5625_v0  ;;  %v14096_v44 = vmax.f32 %v12121_v35, %v12313_v36 }
 0x739   : > { %v5533_v59 = vpop.f32.mrb[32].mxu1  ;;  %v14097_v0 = vmax.f32 %v12130_v33, %v12318_v57 }
 0x73a   : > { %v5606_v8 = vmax.f32 %v5429_v14, %v5533_v59  ;;  %v5535_v31 = vpop.f32.mrb[33].mxu1  ;;  %5721 = vrot.lane.b32.xlu0 %v12513_v20, %s7879_s18  ;;  %5782 = vrot.lane.b32.xlu1 %v12502_v53, %s7881_s20  ;;  %v12573_v16 = vmax.f32 %v5653_v17, 0.0  ;;  %v5654_v59 = vadd.f32 %v12382_v61, %v5626_v7  ;;  %v5963_v17 = vld [vmem:[%s13157_s5 + $0x28] sm:$0xff] }
 0x73b   : > { %v4953_v13 = vpop.f32.mrb[226].mxu0 }
 0x73c   : > { %v5627_v42 = vmax.f32 %v14093_v46, %v5606_v8  ;;  %v5439_v52 = vadd.f32 %v12277_v10, %v4953_v13  ;;  %v4955_v6 = vpop.f32.mrb[227].mxu0  ;;  %v12584_v13 = vmax.f32 %v5654_v59, 0.0  ;;  %v6212_v46 = vld [vmem:[%s13158_s6 + $0xe8] sm:$0xff] }
 0x73d   : > { %v5538_v56 = vpop.f32.mrb[34].mxu1  ;;  %v6195_v6 = vld [vmem:[%s13158_s6 + $0x60] sm:$0xff] }
 0x73e   : > { %v5607_v30 = vmax.f32 %v5434_v19, %v5538_v56  ;;  %v5540_v18 = vpop.f32.mrb[35].mxu1  ;;  %5784 = vrot.lane.b32.xlu0 %v12513_v20, %s7881_s20  ;;  %5845 = vrot.lane.b32.xlu1 %v12502_v53, %s7885_s19  ;;  %v5655_v33 = vadd.f32 %v12382_v61, %v5627_v42  ;;  %v7106_v42 = vpack.c.bf16 %v6212_v46, %v6211_v12  ;;  %v6196_v56 = vld [vmem:[%s13158_s6 + $0x68] sm:$0xff]  ;;  %v5961_v46 = vld [vmem:[%s13157_s5 + $0x18] sm:$0xff] }
 0x73f   : > { %v4958_v32 = vpop.f32.mrb[228].mxu0 }
 0x740   : > { %v5628_v15 = vmax.f32 %v14094_v34, %v5607_v30  ;;  %v5444_v10 = vadd.f32 %v12294_v37, %v4958_v32  ;;  %v4960_v28 = vpop.f32.mrb[229].mxu0  ;;  %7107 = vmatprep.subr.bf16.mxu0 %v7106_v42  ;;  %v7108_v30 = vpack.c.bf16 %v6196_v56, %v6195_v6  ;;  %v5962_v42 = vld [vmem:[%s13157_s5 + $0x20] sm:$0xff]  ;;  %v14104_v56 = vld [vmem:[#allocation11_spill] sm:$0xff] }
 0x741   : > { %v5543_v62 = vpop.f32.mrb[36].mxu1 }
 0x742   : > { %v5608_v37 = vmax.f32 %v5439_v52, %v5543_v62  ;;  %v5545_v55 = vpop.f32.mrb[37].mxu1  ;;  %5847 = vrot.lane.b32.xlu0 %v12513_v20, %s7885_s19  ;;  %5723 = vrot.lane.b32.xlu1 %v12532_v2, %s7879_s18  ;;  %v5656_v57 = vadd.f32 %v12382_v61, %v5628_v15  ;;  %v6197_v62 = vld [vmem:[%s13158_s6 + $0x70] sm:$0xff] }
 0x743   : > { %v4963_v43 = vpop.f32.mrb[230].mxu0  ;;  %7109 = vmatpush3.bf16.msra.mxu0 %v7108_v30  ;;  %v6198_v55 = vld [vmem:[%s13158_s6 + $0x78] sm:$0xff]  ;;  %v14105_v30 = vld [vmem:[#allocation66_spill] sm:$0xff] }
 0x744   : > { %v5629_v14 = vmax.f32 %v14095_v58, %v5608_v37  ;;  %v5449_v49 = vadd.f32 %v12303_v4, %v4963_v43  ;;  %v4965_v63 = vpop.f32.mrb[231].mxu0  ;;  %v12605_v54 = vmax.f32 %v5656_v57, 0.0  ;;  %v7110_v37 = vpack.c.bf16 %v6214_v50, %v6213_v51  ;;  %v5959_v57 = vld [vmem:[%s13157_s5 + $0x8] sm:$0xff] }
 0x745   : > { %v5548_v25 = vpop.f32.mrb[38].mxu1  ;;  %v7112_v58 = vpack.c.bf16 %v6198_v55, %v6197_v62 }
 0x746   : > { %v5609_v26 = vmax.f32 %v5444_v10, %v5548_v25  ;;  %v5550_v60 = vpop.f32.mrb[39].mxu1  ;;  %5725 = vrot.lane.b32.xlu0 %v12555_v3, %s7879_s18  ;;  %5786 = vrot.lane.b32.xlu1 %v12532_v2, %s7881_s20  ;;  %v5657_v52 = vadd.f32 %v12382_v61, %v5629_v14  ;;  %v14099_v14 = vld [vmem:[#allocation51_spill] sm:$0xff] }
 0x747   : > { %7111 = vmatprep.subr.bf16.mxu0 %v7110_v37  ;;  %v5966_v37 = vld [vmem:[%s13157_s5 + $0x40] sm:$0xff] }
 0x748   : > { %v5630_v47 = vmax.f32 %v14096_v44, %v5609_v26  ;;  %v12628_v18 = vmax.f32 %v5657_v52, 0.0  ;;  %v5960_v26 = vld [vmem:[%s13157_s5 + $0x10] sm:$0xff]  ;;  %7113 = vmatpush3.bf16.msra.mxu0 %v7112_v58  ;;  %v14102_v44 = vmov 0.0|0.0  }
 0x749   : > { %v5553_v5 = vpop.f32.mrb[40].mxu1  ;;  %7114 = vmatprep.subr.bf16.mxu0 %v14102_v44 }
 0x74a   : > { %v5610_v19 = vmax.f32 %v5449_v49, %v5553_v5  ;;  %v5555_v4 = vpop.f32.mrb[41].mxu1  ;;  %5788 = vrot.lane.b32.xlu0 %v12555_v3, %s7881_s20  ;;  %5849 = vrot.lane.b32.xlu1 %v12532_v2, %s7885_s19  ;;  %v5658_v32 = vadd.f32 %v12382_v61, %v5630_v47  ;;  %v14100_v49 = vld [vmem:[#allocation64_spill] sm:$0xff] }
 0x74b   : > { %v14101_v63 = vmax.f32 %v14099_v14, %v14100_v49 }
 0x74c   : > { %v5631_v8 = vmax.f32 %v14097_v0, %v5610_v19  ;;  %v12635_v11 = vmax.f32 %v5658_v32, 0.0  ;;  %v14106_v32 = vmax.f32 %v14104_v56, %v14105_v30 }
 0x74d   : > { %v5558_v31 = vpop.f32.mrb[42].mxu1 }
 0x74e   : > { %v5611_v35 = vmax.f32 %v12310_v9, %v5558_v31  ;;  %v5560_v36 = vpop.f32.mrb[43].mxu1  ;;  %5851 = vrot.lane.b32.xlu0 %v12555_v3, %s7885_s19  ;;  %5727 = vrot.lane.b32.xlu1 %v12573_v16, %s7879_s18  ;;  %v12598_v9 = vmax.f32 %v5655_v33, 0.0  ;;  %v5659_v34 = vadd.f32 %v12382_v61, %v5631_v8 }
 0x74f   : > { %v14103_v36 = vld [vmem:[#allocation13_spill] sm:$0xff] }
 0x750   : > { %v5632_v7 = vmax.f32 %v14098_v22, %v5611_v35  ;;  %v12646_v15 = vmax.f32 %v5659_v34, 0.0  ;;  %v5958_v35 = vld [vmem:[%s13157_s5] sm:$0xff] }
 0x752   : > { %5729 = vrot.lane.b32.xlu0 %v12584_v13, %s7879_s18  ;;  %5790 = vrot.lane.b32.xlu1 %v12573_v16, %s7881_s20  ;;  %v5660_v10 = vadd.f32 %v12382_v61, %v5632_v7 }
 0x754   : > { %v12653_v28 = vmax.f32 %v5660_v10, 0.0 }
 0x756   : > { %5792 = vrot.lane.b32.xlu0 %v12584_v13, %s7881_s20  ;;  %5853 = vrot.lane.b32.xlu1 %v12573_v16, %s7885_s19 }
 0x75a   : > { %5855 = vrot.lane.b32.xlu0 %v12584_v13, %s7885_s19  ;;  %5731 = vrot.lane.b32.xlu1 %v12598_v9, %s7879_s18 }
 0x75e   : > { %5733 = vrot.lane.b32.xlu0 %v12605_v54, %s7879_s18  ;;  %5794 = vrot.lane.b32.xlu1 %v12598_v9, %s7881_s20 }
 0x762   : > { %5796 = vrot.lane.b32.xlu0 %v12605_v54, %s7881_s20  ;;  %5857 = vrot.lane.b32.xlu1 %v12598_v9, %s7885_s19 }
 0x766   : > { %5859 = vrot.lane.b32.xlu0 %v12605_v54, %s7885_s19  ;;  %5735 = vrot.lane.b32.xlu1 %v12628_v18, %s7879_s18 }
 0x76a   : > { %5737 = vrot.lane.b32.xlu0 %v12635_v11, %s7879_s18  ;;  %5798 = vrot.lane.b32.xlu1 %v12628_v18, %s7881_s20 }
 0x76e   : > { %5800 = vrot.lane.b32.xlu0 %v12635_v11, %s7881_s20  ;;  %5861 = vrot.lane.b32.xlu1 %v12628_v18, %s7885_s19 }
 0x772   : > { %5863 = vrot.lane.b32.xlu0 %v12635_v11, %s7885_s19  ;;  %5739 = vrot.lane.b32.xlu1 %v12646_v15, %s7879_s18 }
 0x776   : > { %5741 = vrot.lane.b32.xlu0 %v12653_v28, %s7879_s18  ;;  %5802 = vrot.lane.b32.xlu1 %v12646_v15, %s7881_s20 }
 0x77a   : > { %5804 = vrot.lane.b32.xlu0 %v12653_v28, %s7881_s20  ;;  %5865 = vrot.lane.b32.xlu1 %v12646_v15, %s7885_s19 }
 0x77e   : > { %v5563_v39 = vpop.f32.mrb[44].mxu1  ;;  %5867 = vrot.lane.b32.xlu0 %v12653_v28, %s7885_s19 }
 0x77f   : > { %v5612_v1 = vmax.f32 %v12361_v29, %v5563_v39  ;;  %v5565_v24 = vpop.f32.mrb[45].mxu1 }
 0x780   : > { %v5832_v40 = vpop.permute.xlu0 %5831  ;;  %v5706_v43 = vpop.permute.xlu1 %5705 }
 0x781   : > { %v5633_v25 = vmax.f32 %v14101_v63, %v5612_v1  ;;  %v5894_v29 = vsel %vm419_vm0, %v12389_v38, %v5706_v43 }
 0x782   : > { %v6023_v47 = vmul.f32 %v5960_v26, %v5894_v29  ;;  %v5965_v26 = vld [vmem:[%s13157_s5 + $0x38] sm:$0xff] }
 0x783   : > { %v5661_v60 = vadd.f32 %v12382_v61, %v5633_v25 }
 0x784   : > { %v5708_v5 = vpop.permute.xlu0 %5707  ;;  %v5769_v19 = vpop.permute.xlu1 %5768  ;;  %v6136_v33 = vsel %vm2313_vm3, %v6023_v47, 0.0 }
 0x785   : > { %v12691_v4 = vmax.f32 %v5661_v60, 0.0  ;;  %v5895_v59 = vsel %vm419_vm0, %v12400_v48, %v5708_v5  ;;  %v5915_v38 = vsel %vm2313_vm3, %v5894_v29, %v5769_v19 }
 0x786   : > { %v6026_v0 = vmul.f32 %v5963_v17, %v5895_v59  ;;  %v5937_v8 = vsel %vm5936_vm8, %v5915_v38, %v5832_v40 }
 0x787   : > { %v5568_v31 = vpop.f32.mrb[46].mxu1  ;;  %5743 = vrot.lane.b32.xlu1 %v12691_v4, %s7879_s18  ;;  %v6021_v39 = vmul.f32 %v5958_v35, %v5937_v8  ;;  %v6022_v50 = vmul.f32 %v5959_v57, %v5937_v8  ;;  %v5972_v8 = vld [vmem:[%s13157_s5 + $0x70] sm:$0xff] }
 0x788   : > { %v5613_v22 = vmax.f32 %v14103_v36, %v5568_v31  ;;  %v5570_v7 = vpop.f32.mrb[47].mxu1  ;;  %v6137_v48 = vsel %vm2313_vm3, %v6026_v0, 0.0  ;;  %v5771_v12 = vpop.permute.xlu0 %5770 }
 0x789   : > { %v5834_v52 = vpop.permute.xlu1 %5833  ;;  %v6138_v6 = vadd.f32 %v6137_v48, %v6136_v33  ;;  %v5916_v10 = vsel %vm2313_vm3, %v5895_v59, %v5771_v12  ;;  %v5967_v12 = vld [vmem:[%s13157_s5 + $0x48] sm:$0xff] }
 0x78a   : > { %v5634_v34 = vmax.f32 %v14106_v32, %v5613_v22  ;;  %v5938_v51 = vsel %vm5936_vm8, %v5916_v10, %v5834_v52  ;;  %v5970_v10 = vld [vmem:[%s13157_s5 + $0x60] sm:$0xff] }
 0x78b   : > { %v6024_v1 = vmul.f32 %v5961_v46, %v5938_v51  ;;  %v6025_v24 = vmul.f32 %v5962_v42, %v5938_v51  ;;  %5806 = vrot.lane.b32.xlu1 %v12691_v4, %s7881_s20  ;;  %v5968_v46 = vld [vmem:[%s13157_s5 + $0x50] sm:$0xff]  ;;  %v5975_v51 = vld [vmem:[%s13157_s5 + $0x88] sm:$0xff] }
 0x78c   : > { %v5662_v62 = vadd.f32 %v12382_v61, %v5634_v34  ;;  %v5773_v55 = vpop.permute.xlu0 %5772  ;;  %v5964_v61 = vld [vmem:[%s13157_s5 + $0x30] sm:$0xff] }
 0x78d   : > { %v5710_v40 = vpop.permute.xlu1 %5709  ;;  %v6084_v58 = vadd.f32 %v6024_v1, %v6021_v39  ;;  %v6110_v14 = vadd.f32 %v6025_v24, %v6022_v50  ;;  %v5971_v39 = vld [vmem:[%s13157_s5 + $0x68] sm:$0xff] }
 0x78e   : > { %v12725_v43 = vmax.f32 %v5662_v62, 0.0  ;;  %v5896_v49 = vsel %vm419_vm0, %v12419_v23, %v5710_v40  ;;  %v5969_v23 = vld [vmem:[%s13157_s5 + $0x58] sm:$0xff] }
 0x78f   : > { %v6029_v63 = vmul.f32 %v5966_v37, %v5896_v49  ;;  %v5917_v25 = vsel %vm2313_vm3, %v5896_v49, %v5773_v55  ;;  %5869 = vrot.lane.b32.xlu1 %v12691_v4, %s7885_s19 }
 0x790   : > { %5745 = vrot.lane.b32.xlu0 %v12725_v43, %s7879_s18  ;;  %v5836_v60 = vpop.permute.xlu0 %5835  ;;  %s13110_s18 = scalar_lea.hbm %s13160_s8, %s6641_s25 }
 0x791   : > { %v6139_v29 = vsel %vm2313_vm3, %v6029_v63, 0.0  ;;  %v5712_v17 = vpop.permute.xlu1 %5711  ;;  %v5939_v5 = vsel %vm5936_vm8, %v5917_v25, %v5836_v60  ;;  %v5974_v60 = vld [vmem:[%s13157_s5 + $0x80] sm:$0xff] }
 0x792   : > { %v6140_v47 = vadd.f32 %v6139_v29, %v6138_v6  ;;  %v5897_v19 = vsel %vm419_vm0, %v12430_v45, %v5712_v17  ;;  %v6027_v59 = vmul.f32 %v5964_v61, %v5939_v5  ;;  %v6028_v38 = vmul.f32 %v5965_v26, %v5939_v5  ;;  %v5973_v29 = vld [vmem:[%s13157_s5 + $0x78] sm:$0xff] }
 0x793   : > { %v6032_v0 = vmul.f32 %v5969_v23, %v5897_v19  ;;  %5871 = vrot.lane.b32.xlu1 %v12725_v43, %s7885_s19 }
 0x794   : > { %5808 = vrot.lane.b32.xlu0 %v12725_v43, %s7881_s20  ;;  %v6085_v31 = vadd.f32 %v6084_v58, %v6027_v59  ;;  %v6111_v35 = vadd.f32 %v6110_v14, %v6028_v38  ;;  %v5714_v22 = vpop.permute.xlu0 %5713  ;;  %s7887_s20 = smov [#allocation4]  }
 0x795   : > { %v6141_v36 = vsel %vm2313_vm3, %v6032_v0, 0.0  ;;  %v5775_v7 = vpop.permute.xlu1 %5774  ;;  %v5898_v33 = vsel %vm419_vm0, %v12441_v41, %v5714_v22  ;;  %s7817_s12 = sshll.u32 %s7887_s20, 4  ;;  %s7818_s12 = int_to_ptr.vmem [resolvable:$false] %s7817_s12 }
 0x796   : > { %v6142_v45 = vadd.f32 %v6141_v36, %v6140_v47  ;;  %v5918_v48 = vsel %vm2313_vm3, %v5897_v19, %v5775_v7  ;;  %v6035_v57 = vmul.f32 %v5972_v8, %v5898_v33  ;;  %s7819_s19 = scalar_lea.vmem %s7818_s12, 32  ;;  %p7820_p0 = scmp.lt.s32.totalorder %s13112_s17, %s7818_s12 }
 0x797   : > { %p7821_p1 = scmp.lt.s32.totalorder %s7819_s19, %s7813_s9 }
 0x798   : > { %v6143_v42 = vsel %vm2313_vm3, %v6035_v57, 0.0  ;;  %v5777_v52 = vpop.permute.xlu0 %5776 }
 0x799   : > { %v5838_v6 = vpop.permute.xlu1 %5837  ;;  %v6144_v56 = vadd.f32 %v6143_v42, %v6142_v45  ;;  %v5919_v30 = vsel %vm2313_vm3, %v5898_v33, %v5777_v52  ;;  %p7822_p2 = por %p7821_p1, %p7820_p0 }
 0x79a   : > { %v5940_v41 = vsel %vm5936_vm8, %v5918_v48, %v5838_v6 }
 0x79b   : > { %v6030_v32 = vmul.f32 %v5967_v12, %v5940_v41  ;;  %v6031_v34 = vmul.f32 %v5968_v46, %v5940_v41  ;;  %p7823_p3 = pnand %p7822_p2, %p7816_p13 }
 0x79c   : > { %v5840_v1 = vpop.permute.xlu0 %5839 }
 0x79d   : > { %v6086_v50 = vadd.f32 %v6085_v31, %v6030_v32  ;;  %v6112_v62 = vadd.f32 %v6111_v35, %v6031_v34  ;;  %v5716_v24 = vpop.permute.xlu1 %5715  ;;  %v5941_v37 = vsel %vm5936_vm8, %v5919_v30, %v5840_v1 }
 0x79e   : > { %v5899_v55 = vsel %vm419_vm0, %v12472_v27, %v5716_v24  ;;  %v6033_v40 = vmul.f32 %v5970_v10, %v5941_v37  ;;  %v6034_v58 = vmul.f32 %v5971_v39, %v5941_v37  ;;  %v5978_v37 = vld [vmem:[%s13157_s5 + $0xa0] sm:$0xff] }
 0x79f   : > { %v6038_v14 = vmul.f32 %v5975_v51, %v5899_v55 }
 0x7a0   : > { %v6087_v49 = vadd.f32 %v6086_v50, %v6033_v40  ;;  %v6113_v63 = vadd.f32 %v6112_v62, %v6034_v58  ;;  %v5718_v25 = vpop.permute.xlu0 %5717 }
 0x7a1   : > { %v6145_v61 = vsel %vm2313_vm3, %v6038_v14, 0.0  ;;  %v5779_v26 = vpop.permute.xlu1 %5778 }
 0x7a2   : > { %v12780_v23 = vadd.f32 %v6145_v61, %v6144_v56  ;;  %v5920_v27 = vsel %vm2313_vm3, %v5899_v55, %v5779_v26  ;;  %v5900_v55 = vsel %vm419_vm0, %v12483_v21, %v5718_v25  ;;  %v5976_v61 = vld [vmem:[%s13157_s5 + $0x90] sm:$0xff]  ;;  %v5977_v21 = vld [vmem:[%s13157_s5 + $0x98] sm:$0xff] }
 0x7a3   : > { %v6041_v58 = vmul.f32 %v5978_v37, %v5900_v55  ;;  %v5984_v25 = vld [vmem:[%s13157_s5 + $0xd0] sm:$0xff] }
 0x7a4   : > { %v5781_v17 = vpop.permute.xlu0 %5780 }
 0x7a5   : > { %v5842_v47 = vpop.permute.xlu1 %5841  ;;  %v5921_v14 = vsel %vm2313_vm3, %v5900_v55, %v5781_v17 }
 0x7a6   : > { %v5942_v5 = vsel %vm5936_vm8, %v5920_v27, %v5842_v47  ;;  %v6147_v27 = vsel %vm2313_vm3, %v6041_v58, 0.0 }
 0x7a7   : > { %v6036_v19 = vmul.f32 %v5973_v29, %v5942_v5  ;;  %v6037_v59 = vmul.f32 %v5974_v60, %v5942_v5  ;;  %v6148_v55 = vadd.f32 %v6147_v27, %v12780_v23 }
 0x7a8   : > { %v5844_v8 = vpop.permute.xlu0 %5843 }
 0x7a9   : > { %v12790_v38 = vadd.f32 %v6087_v49, %v6036_v19  ;;  %v12792_v0 = vadd.f32 %v6113_v63, %v6037_v59  ;;  %v5720_v31 = vpop.permute.xlu1 %5719  ;;  %v5981_v49 = vld [vmem:[%s13157_s5 + $0xb8] sm:$0xff]  ;;  %v5943_v26 = vsel %vm5936_vm8, %v5921_v14, %v5844_v8  ;;  %v5979_v19 = vld [vmem:[%s13157_s5 + $0xa8] sm:$0xff] }
 0x7aa   : > { %v5901_v63 = vsel %vm419_vm0, %v12502_v53, %v5720_v31  ;;  %v6039_v5 = vmul.f32 %v5976_v61, %v5943_v26  ;;  %v6040_v8 = vmul.f32 %v5977_v21, %v5943_v26  ;;  %v5985_v21 = vld [vmem:[%s13157_s5 + $0xd8] sm:$0xff] }
 0x7ab   : > { %v6044_v17 = vmul.f32 %v5981_v49, %v5901_v63  ;;  %v5983_v49 = vld [vmem:[%s13157_s5 + $0xc8] sm:$0xff] }
 0x7ac   : > { %v5722_v35 = vpop.permute.xlu0 %5721  ;;  %v6115_v27 = vadd.f32 %v12792_v0, %v6040_v8  ;;  %v5986_v0 = vld [vmem:[%s13157_s5 + $0xe0] sm:$0xff]  ;;  %v5988_v8 = vld [vmem:[%s13157_s5 + $0xf0] sm:$0xff] }
 0x7ad   : > { %v5783_v36 = vpop.permute.xlu1 %5782  ;;  %v5902_v60 = vsel %vm419_vm0, %v12513_v20, %v5722_v35  ;;  %v5980_v20 = vld [vmem:[%s13157_s5 + $0xb0] sm:$0xff]  ;;  %v5987_v35 = vld [vmem:[%s13157_s5 + $0xe8] sm:$0xff] }
 0x7ae   : > { %v5922_v47 = vsel %vm2313_vm3, %v5901_v63, %v5783_v36  ;;  %v6047_v31 = vmul.f32 %v5984_v25, %v5902_v60  ;;  %v5990_v63 = vld [vmem:[%s13157_s5 + $0x100] sm:$0xff] }
 0x7b0   : > { %v5785_v22 = vpop.permute.xlu0 %5784 }
 0x7b1   : > { %v5846_v7 = vpop.permute.xlu1 %5845  ;;  %v5923_v37 = vsel %vm2313_vm3, %v5902_v60, %v5785_v22  ;;  %v6149_v22 = vsel %vm2313_vm3, %v6044_v17, 0.0 }
 0x7b2   : > { %v5944_v59 = vsel %vm5936_vm8, %v5922_v47, %v5846_v7  ;;  %v5982_v7 = vld [vmem:[%s13157_s5 + $0xc0] sm:$0xff]  ;;  %v6150_v17 = vadd.f32 %v6149_v22, %v6148_v55  ;;  %v5996_v55 = vld [vmem:[%s13157_s5 + $0x130] sm:$0xff] }
 0x7b3   : > { %v6042_v14 = vmul.f32 %v5979_v19, %v5944_v59  ;;  %v6043_v61 = vmul.f32 %v5980_v20, %v5944_v59 }
 0x7b4   : > { %v5848_v45 = vpop.permute.xlu0 %5847 }
 0x7b5   : > { %v5724_v33 = vpop.permute.xlu1 %5723  ;;  %v5945_v58 = vsel %vm5936_vm8, %v5923_v37, %v5848_v45  ;;  %v6089_v45 = vadd.f32 %v12790_v38, %v6039_v5 }
 0x7b6   : > { %v5903_v36 = vsel %vm419_vm0, %v12532_v2, %v5724_v33  ;;  %v6046_v47 = vmul.f32 %v5983_v49, %v5945_v58 }
 0x7b7   : > { %v6050_v26 = vmul.f32 %v5987_v35, %v5903_v36  ;;  %v6090_v19 = vadd.f32 %v6089_v45, %v6042_v14 }
 0x7b8   : > { %v5726_v48 = vpop.permute.xlu0 %5725 }
 0x7b9   : > { %v5787_v57 = vpop.permute.xlu1 %5786  ;;  %v5904_v2 = vsel %vm419_vm0, %v12555_v3, %v5726_v48  ;;  %v6151_v3 = vsel %vm2313_vm3, %v6047_v31, 0.0  ;;  %v6045_v48 = vmul.f32 %v5982_v7, %v5945_v58  ;;  %v6153_v37 = vsel %vm2313_vm3, %v6050_v26, 0.0 }
 0x7ba   : > { %v5924_v23 = vsel %vm2313_vm3, %v5903_v36, %v5787_v57  ;;  %v5993_v57 = vld [vmem:[%s13157_s5 + $0x118] sm:$0xff]  ;;  %v6053_v5 = vmul.f32 %v5990_v63, %v5904_v2  ;;  %v5991_v63 = vld [vmem:[%s13157_s5 + $0x108] sm:$0xff] }
 0x7bb   : > { %v6091_v35 = vadd.f32 %v6090_v19, %v6045_v48 }
 0x7bc   : > { %v12794_v12 = vpop.permute.xlu0 %5788  ;;  %v6155_v14 = vsel %vm2313_vm3, %v6053_v5, 0.0 }
 0x7bd   : > { %v5850_v46 = vpop.permute.xlu1 %5849 }
 0x7be   : > { %v5946_v25 = vsel %vm5936_vm8, %v5924_v23, %v5850_v46  ;;  %v5925_v46 = vsel %vm2313_vm3, %v5904_v2, %v12794_v12  ;;  %v5989_v12 = vld [vmem:[%s13157_s5 + $0xf8] sm:$0xff] }
 0x7bf   : > { %v6048_v59 = vmul.f32 %v5985_v21, %v5946_v25  ;;  %v6049_v36 = vmul.f32 %v5986_v0, %v5946_v25  ;;  %v5994_v25 = vld [vmem:[%s13157_s5 + $0x120] sm:$0xff] }
 0x7c0   : > { %v12796_v42 = vpop.permute.xlu0 %5851 }
 0x7c1   : > { %v5728_v52 = vpop.permute.xlu1 %5727  ;;  %v5947_v31 = vsel %vm5936_vm8, %v5925_v46, %v12796_v42 }
 0x7c2   : > { %v5905_v38 = vsel %vm419_vm0, %v12573_v16, %v5728_v52  ;;  %v6152_v16 = vadd.f32 %v6151_v3, %v6150_v17  ;;  %v6116_v52 = vadd.f32 %v6115_v27, %v6043_v61  ;;  %v6051_v49 = vmul.f32 %v5988_v8, %v5947_v31  ;;  %v5992_v61 = vld [vmem:[%s13157_s5 + $0x110] sm:$0xff] }
 0x7c3   : > { %v6056_v20 = vmul.f32 %v5993_v57, %v5905_v38  ;;  %v5995_v57 = vld [vmem:[%s13157_s5 + $0x128] sm:$0xff] }
 0x7c4   : > { %v12798_v6 = vpop.permute.xlu0 %5729  ;;  %v6117_v22 = vadd.f32 %v6116_v52, %v6046_v47  ;;  %v6154_v45 = vadd.f32 %v6153_v37, %v6152_v16 }
 0x7c5   : > { %v12800_v56 = vpop.permute.xlu1 %5790  ;;  %v5906_v7 = vsel %vm419_vm0, %v12584_v13, %v12798_v6  ;;  %v6092_v13 = vadd.f32 %v6091_v35, %v6048_v59  ;;  %v6052_v6 = vmul.f32 %v5989_v12, %v5947_v31  ;;  %v6157_v26 = vsel %vm2313_vm3, %v6056_v20, 0.0  ;;  %v5998_v59 = vld [vmem:[%s13157_s5 + $0x140] sm:$0xff]  ;;  %v6000_v31 = vld [vmem:[%s13157_s5 + $0x150] sm:$0xff]  ;;  %v6001_v20 = vld [vmem:[%s13157_s5 + $0x158] sm:$0xff] }
 0x7c6   : > { %v5926_v42 = vsel %vm2313_vm3, %v5905_v38, %v12800_v56  ;;  %v6059_v21 = vmul.f32 %v5996_v55, %v5906_v7  ;;  %v6156_v3 = vadd.f32 %v6155_v14, %v6154_v45 }
 0x7c7   : > { %v6093_v17 = vadd.f32 %v6092_v13, %v6051_v49 }
 0x7c8   : > { %v12802_v30 = vpop.permute.xlu0 %5792  ;;  %v6158_v0 = vadd.f32 %v6157_v26, %v6156_v3 }
 0x7c9   : > { %v12804_v41 = vpop.permute.xlu1 %5853  ;;  %v5927_v56 = vsel %vm2313_vm3, %v5906_v7, %v12802_v30  ;;  %v6118_v30 = vadd.f32 %v6117_v22, %v6049_v36  ;;  %v6002_v22 = vld [vmem:[%s13157_s5 + $0x160] sm:$0xff] }
 0x7ca   : > { %v5948_v2 = vsel %vm5936_vm8, %v5926_v42, %v12804_v41 }
 0x7cb   : > { %v6054_v48 = vmul.f32 %v5991_v63, %v5948_v2  ;;  %v6055_v47 = vmul.f32 %v5992_v61, %v5948_v2  ;;  %v6119_v46 = vadd.f32 %v6118_v30, %v6052_v6  ;;  %v6006_v2 = vld [vmem:[%s13157_s5 + $0x180] sm:$0xff]  ;;  %v6007_v61 = vld [vmem:[%s13157_s5 + $0x188] sm:$0xff] }
 0x7cc   : > { %v12806_v32 = vpop.permute.xlu0 %5855 }
 0x7cd   : > { %v12808_v34 = vpop.permute.xlu1 %5731  ;;  %v5949_v41 = vsel %vm5936_vm8, %v5927_v56, %v12806_v32  ;;  %v5999_v32 = vld [vmem:[%s13157_s5 + $0x148] sm:$0xff]  ;;  %v6094_v52 = vadd.f32 %v6093_v17, %v6054_v48  ;;  %v6120_v36 = vadd.f32 %v6119_v46, %v6055_v47 }
 0x7ce   : > { %v5907_v27 = vsel %vm419_vm0, %v12598_v9, %v12808_v34  ;;  %v5997_v34 = vld [vmem:[%s13157_s5 + $0x138] sm:$0xff] }
 0x7cf   : > { %v6062_v37 = vmul.f32 %v5999_v32, %v5907_v27 }
 0x7d0   : > { %v12810_v10 = vpop.permute.xlu0 %5733 }
 0x7d1   : > { %v12812_v39 = vpop.permute.xlu1 %5794  ;;  %v5908_v9 = vsel %vm419_vm0, %v12605_v54, %v12810_v10  ;;  %v6159_v54 = vsel %vm2313_vm3, %v6059_v21, 0.0  ;;  %v6058_v10 = vmul.f32 %v5995_v57, %v5949_v41  ;;  %v6161_v13 = vsel %vm2313_vm3, %v6062_v37, 0.0  ;;  %v6010_v57 = vld [vmem:[%s13157_s5 + $0x1a0] sm:$0xff]  ;;  %v6015_v37 = vld [vmem:[%s13157_s5 + $0x1c8] sm:$0xff] }
 0x7d2   : > { %v5928_v38 = vsel %vm2313_vm3, %v5907_v27, %v12812_v39  ;;  %v6057_v39 = vmul.f32 %v5994_v25, %v5949_v41  ;;  %v6160_v7 = vadd.f32 %v6159_v54, %v6158_v0  ;;  %v6065_v21 = vmul.f32 %v6002_v22, %v5908_v9 }
 0x7d3   : > { %v6121_v49 = vadd.f32 %v6120_v36, %v6058_v10 }
 0x7d4   : > { %v12814_v51 = vpop.permute.xlu0 %5796  ;;  %v6095_v42 = vadd.f32 %v6094_v52, %v6057_v39  ;;  %v6162_v17 = vadd.f32 %v6161_v13, %v6160_v7 }
 0x7d5   : > { %v12816_v50 = vpop.permute.xlu1 %5857  ;;  %v5929_v19 = vsel %vm2313_vm3, %v5908_v9, %v12814_v51  ;;  %v6011_v9 = vld [vmem:[%s13157_s5 + $0x1a8] sm:$0xff] }
 0x7d6   : > { %v5950_v5 = vsel %vm5936_vm8, %v5928_v38, %v12816_v50 }
 0x7d7   : > { %v6060_v12 = vmul.f32 %v5997_v34, %v5950_v5  ;;  %v6061_v55 = vmul.f32 %v5998_v59, %v5950_v5 }
 0x7d8   : > { %v12818_v62 = vpop.permute.xlu0 %5859 }
 0x7d9   : > { %v12820_v1 = vpop.permute.xlu1 %5735  ;;  %v5951_v50 = vsel %vm5936_vm8, %v5929_v19, %v12818_v62  ;;  %v6096_v6 = vadd.f32 %v6095_v42, %v6060_v12  ;;  %v6122_v25 = vadd.f32 %v6121_v49, %v6061_v55  ;;  %v6163_v19 = vsel %vm2313_vm3, %v6065_v21, 0.0  ;;  %v6016_v12 = vld [vmem:[%s13157_s5 + $0x1d0] sm:$0xff]  ;;  %v6017_v42 = vld [vmem:[%s13157_s5 + $0x1d8] sm:$0xff] }
 0x7da   : > { %v5909_v16 = vsel %vm419_vm0, %v12628_v18, %v12820_v1  ;;  %v6003_v18 = vld [vmem:[%s13157_s5 + $0x168] sm:$0xff]  ;;  %v6064_v63 = vmul.f32 %v6001_v20, %v5951_v50 }
 0x7dc   : > { %v12829_v40 = vpop.permute.xlu0 %5737  ;;  %v6123_v47 = vadd.f32 %v6122_v25, %v6064_v63 }
 0x7dd   : > { %v12822_v24 = vpop.permute.xlu1 %5798  ;;  %v5910_v62 = vsel %vm419_vm0, %v12635_v11, %v12829_v40  ;;  %v6004_v11 = vld [vmem:[%s13157_s5 + $0x170] sm:$0xff] }
 0x7de   : > { %v5930_v35 = vsel %vm2313_vm3, %v5909_v16, %v12822_v24  ;;  %v6063_v24 = vmul.f32 %v6000_v31, %v5951_v50 }
 0x7e0   : > { %v12851_v53 = vpop.permute.xlu0 %5800  ;;  %v6097_v3 = vadd.f32 %v6096_v6, %v6063_v24  ;;  %v6020_v24 = vld [vmem:[%s13157_s5 + $0x1f0] sm:$0xff] }
 0x7e1   : > { %v12841_v29 = vpop.permute.xlu1 %5861  ;;  %v5931_v14 = vsel %vm2313_vm3, %v5910_v62, %v12851_v53 }
 0x7e2   : > { %v5952_v1 = vsel %vm5936_vm8, %v5930_v35, %v12841_v29  ;;  %v6005_v29 = vld [vmem:[%s13157_s5 + $0x178] sm:$0xff] }
 0x7e3   : > { %v6066_v56 = vmul.f32 %v6003_v18, %v5952_v1  ;;  %v6067_v41 = vmul.f32 %v6004_v11, %v5952_v1  ;;  %v6068_v30 = vmul.f32 %v6005_v29, %v5909_v16 }
 0x7e4   : > { %v12890_v60 = vpop.permute.xlu0 %5863 }
 0x7e5   : > { %v12883_v33 = vpop.permute.xlu1 %5739  ;;  %v5953_v45 = vsel %vm5936_vm8, %v5931_v14, %v12890_v60  ;;  %v6008_v60 = vld [vmem:[%s13157_s5 + $0x190] sm:$0xff]  ;;  %v6098_v46 = vadd.f32 %v6097_v3, %v6066_v56  ;;  %v6124_v59 = vadd.f32 %v6123_v47, %v6067_v41  ;;  %v6165_v31 = vsel %vm2313_vm3, %v6068_v30, 0.0 }
 0x7e6   : > { %v5911_v53 = vsel %vm419_vm0, %v12646_v15, %v12883_v33  ;;  %v6009_v15 = vld [vmem:[%s13157_s5 + $0x198] sm:$0xff]  ;;  %v6069_v48 = vmul.f32 %v6006_v2, %v5953_v45  ;;  %v6070_v32 = vmul.f32 %v6007_v61, %v5953_v45  ;;  %v6071_v5 = vmul.f32 %v6008_v60, %v5910_v62  ;;  %v6018_v2 = vld [vmem:[%s13157_s5 + $0x1e0] sm:$0xff]  ;;  %v6019_v45 = vld [vmem:[%s13157_s5 + $0x1e8] sm:$0xff] }
 0x7e7   : > { %v6074_v16 = vmul.f32 %v6011_v9, %v5911_v53  ;;  %v6164_v62 = vadd.f32 %v6163_v19, %v6162_v17  ;;  %v6216_v19 = vld [vmem:[%s13158_s6 + $0x108] sm:$0xff] }
 0x7e8   : > { %v12929_v23 = vpop.permute.xlu0 %5741  ;;  %v6099_v50 = vadd.f32 %v6098_v46, %v6069_v48  ;;  %v6125_v35 = vadd.f32 %v6124_v59, %v6070_v32  ;;  %v6167_v18 = vsel %vm2313_vm3, %v6071_v5, 0.0 }
 0x7e9   : > { %v12921_v58 = vpop.permute.xlu1 %5802  ;;  %v6166_v49 = vadd.f32 %v6165_v31, %v6164_v62  ;;  %v6169_v63 = vsel %vm2313_vm3, %v6074_v16, 0.0  ;;  %v6217_v16 = vld [vmem:[%s13158_s6 + $0x110] sm:$0xff]  ;;  %v6222_v62 = vld [vmem:[%s13158_s6 + $0x138] sm:$0xff] }
 0x7ea   : > { %v5932_v26 = vsel %vm2313_vm3, %v5911_v53, %v12921_v58  ;;  %v5912_v58 = vsel %vm419_vm0, %v12653_v28, %v12929_v23  ;;  %v6012_v28 = vld [vmem:[%s13157_s5 + $0x1b0] sm:$0xff]  ;;  %v6013_v23 = vld [vmem:[%s13157_s5 + $0x1b8] sm:$0xff] }
 0x7eb   : > { %v6168_v61 = vadd.f32 %v6167_v18, %v6166_v49 }
 0x7ec   : > { %v5805_v51 = vpop.permute.xlu0 %5804 }
 0x7ed   : > { %v5866_v8 = vpop.permute.xlu1 %5865  ;;  %v5933_v34 = vsel %vm2313_vm3, %v5912_v58, %v5805_v51 }
 0x7ee   : > { %v5954_v33 = vsel %vm5936_vm8, %v5932_v26, %v5866_v8  ;;  %v6014_v8 = vld [vmem:[%s13157_s5 + $0x1c0] sm:$0xff] }
 0x7ef   : > { %v6072_v0 = vmul.f32 %v6009_v15, %v5954_v33  ;;  %v6073_v54 = vmul.f32 %v6010_v57, %v5954_v33  ;;  %v6077_v1 = vmul.f32 %v6014_v8, %v5912_v58 }
 0x7f0   : > { %v5868_v27 = vpop.permute.xlu0 %5867 }
 0x7f1   : > { %v5955_v39 = vsel %vm5936_vm8, %v5933_v34, %v5868_v27  ;;  %v6100_v7 = vadd.f32 %v6099_v50, %v6072_v0  ;;  %v6126_v22 = vadd.f32 %v6125_v35, %v6073_v54  ;;  %v6171_v26 = vsel %vm2313_vm3, %v6077_v1, 0.0  ;;  %v6220_v35 = vld [vmem:[%s13158_s6 + $0x128] sm:$0xff] }
 0x7f2   : > { %v6075_v36 = vmul.f32 %v6012_v28, %v5955_v39  ;;  %v6076_v55 = vmul.f32 %v6013_v23, %v5955_v39  ;;  %v6170_v27 = vadd.f32 %v6169_v63, %v6168_v61  ;;  %v6215_v39 = vld [vmem:[%s13158_s6 + $0x100] sm:$0xff] }
 0x7f3   : > { %v7115_v31 = vpack.c.bf16 %v6216_v19, %v6215_v39 }
 0x7f4   : > { %v6101_v13 = vadd.f32 %v6100_v7, %v6075_v36  ;;  %v6127_v6 = vadd.f32 %v6126_v22, %v6076_v55  ;;  %v6172_v58 = vadd.f32 %v6171_v26, %v6170_v27 }
 0x7f9   : > { %v5744_v40 = vpop.permute.xlu1 %5743 }
 0x7fa   : > { %v5913_v10 = vsel %vm419_vm0, %v12691_v4, %v5744_v40 }
 0x7fb   : > { %v6080_v56 = vmul.f32 %v6017_v42, %v5913_v10 }
 0x7fd   : > { %v5807_v38 = vpop.permute.xlu1 %5806  ;;  %v6173_v3 = vsel %vm2313_vm3, %v6080_v56, 0.0 }
 0x7fe   : > { %v5934_v51 = vsel %vm2313_vm3, %v5913_v10, %v5807_v38  ;;  %v6174_v47 = vadd.f32 %v6173_v3, %v6172_v58 }
 0x801   : > { %v5870_v20 = vpop.permute.xlu1 %5869 }
 0x802   : > { %v5746_v52 = vpop.permute.xlu0 %5745  ;;  %v5956_v4 = vsel %vm5936_vm8, %v5934_v51, %v5870_v20  ;;  %v6218_v51 = vld [vmem:[%s13158_s6 + $0x118] sm:$0xff]  ;;  %v6219_v20 = vld [vmem:[%s13158_s6 + $0x120] sm:$0xff] }
 0x803   : > { %v5914_v14 = vsel %vm419_vm0, %v12725_v43, %v5746_v52  ;;  %v6078_v11 = vmul.f32 %v6015_v37, %v5956_v4  ;;  %v6079_v40 = vmul.f32 %v6016_v12, %v5956_v4  ;;  %v7118_v52 = vpack.c.bf16 %v6218_v51, %v6217_v16  ;;  %v6221_v4 = vld [vmem:[%s13158_s6 + $0x130] sm:$0xff] }
 0x804   : > { %v6083_v21 = vmul.f32 %v6020_v24, %v5914_v14  ;;  %v14107_v37 = vmov 0.0   ;;  %v7121_v36 = vpack.c.bf16 %v6220_v35, %v6219_v20  ;;  %v7124_v18 = vpack.c.bf16 %v6222_v62, %v6221_v4 }
 0x805   : > { %v5872_v53 = vpop.permute.xlu1 %5871  ;;  %v6102_v60 = vadd.f32 %v6101_v13, %v6078_v11  ;;  %v6128_v41 = vadd.f32 %v6127_v6, %v6079_v40 }
 0x806   : > { %v5809_v29 = vpop.permute.xlu0 %5808  ;;  %v6175_v57 = vsel %vm2313_vm3, %v6083_v21, 0.0 }
 0x807   : > { %v5935_v43 = vsel %vm2313_vm3, %v5914_v14, %v5809_v29  ;;  %v6176_v34 = vadd.f32 %v6175_v57, %v6174_v47  ;;  %v6223_v14 = vld [vmem:[%s13159_s7] sm:$0x1] }
 0x808   : > { %v5957_v25 = vsel %vm5936_vm8, %v5935_v43, %v5872_v53 }
 0x809   : > { %v6081_v15 = vmul.f32 %v6018_v2, %v5957_v25  ;;  %v6082_v33 = vmul.f32 %v6019_v45, %v5957_v25  ;;  %v6177_v23 = vrot.slane %v6176_v34, 4 }
 0x80b   : > { %v6103_v30 = vadd.f32 %v6102_v60, %v6081_v15  ;;  %v6129_v48 = vadd.f32 %v6128_v41, %v6082_v33  ;;  %v6178_v50 = vadd.f32 %v6177_v23, %v6176_v34 }
 0x80d   : > { %v6104_v38 = vrot.slane %v6103_v30, 4  ;;  %v6130_v17 = vrot.slane %v6129_v48, 4  ;;  %v6179_v12 = vrot.slane %v6178_v50, 2 }
 0x80f   : > { %v6105_v32 = vadd.f32 %v6104_v38, %v6103_v30  ;;  %v6131_v9 = vadd.f32 %v6130_v17, %v6129_v48  ;;  %v6180_v55 = vadd.f32 %v6179_v12, %v6178_v50 }
 0x811   : > { %v6106_v5 = vrot.slane %v6105_v32, 2  ;;  %v6132_v46 = vrot.slane %v6131_v9, 2  ;;  %v6181_v1 = vrot.slane %v6180_v55, 1 }
 0x813   : > { %v6107_v0 = vadd.f32 %v6106_v5, %v6105_v32  ;;  %v6133_v28 = vadd.f32 %v6132_v46, %v6131_v9  ;;  %v6182_v7 = vadd.f32 %v6181_v1, %v6180_v55 }
 0x815   : > { %v6108_v59 = vrot.slane %v6107_v0, 1  ;;  %v6134_v8 = vrot.slane %v6133_v28, 1 }
 0x817   : > { %v6109_v54 = vadd.f32 %v6108_v59, %v6107_v0  ;;  %v6135_v10 = vadd.f32 %v6134_v8, %v6133_v28 }
 0x819   : > { %6291 = vmatprep.mubr.f32.mxu0 %v6135_v10 }
 0x81a   : > { %6292 = vmatmul.mubr.f32.vlgmr.msra.gmra.mrb[232].mxu0 %v6109_v54 }
 0x81b   : > { %7116 = vmatpush3.bf16.msra.mxu0 %v7115_v31  ;;  %6996 = vmatprep.mubr.msk.f32.mxu0 %vm7886_vm9, %v14107_v37 }
 0x81c   : > { %7117 = vmatprep.subr.bf16.mxu0 %v14102_v44 }
 0x81f   : > { %7119 = vmatpush3.bf16.msra.mxu0 %v7118_v52 }
 0x820   : > { %7120 = vmatprep.subr.bf16.mxu0 %v14102_v44 }
 0x823   : > { %7122 = vmatpush3.bf16.msra.mxu0 %v7121_v36 }
 0x824   : > { %7123 = vmatprep.subr.bf16.mxu0 %v14102_v44 }
 0x827   : > { %7125 = vmatpush3.bf16.msra.mxu0 %v7124_v18 }
 0x82a   : > { %6997 = vmatmul.mubr.msk.f32.vlgmr.msra.gmra.mrb[234].mxu0 %vm2313_vm3, %v6182_v7 }
 0x8ed   : > { %v6792_v42 = vpop.f32.mrb[232].mxu0 }
 0x8ee   : > { %v6793_v22 = vpop.f32.mrb[233].mxu0 }
 0x8ef   : > { %v6794_v24 = vadd.f32 %v6793_v22, %v6792_v42 }
 0x8f1   : > { %v6294_v11 = vadd.f32 %v6794_v24, %v6223_v14 }
 0x8fd   : > { %v6363_v40 = vpop.f32.mrb[234].mxu0 }
 0x8fe   : > { %v6364_v44 = vadd.f32 %v6363_v40, %v6294_v11  ;;  %v6998_v49 = vpop.f32.mrb[235].mxu0 }
 0x900   : > { %6368 = vst.msk [vmem:[%s297_s26] sm:$0x1] %vm6367_vm10, %v6364_v44 }
 0x901   : > { %7826 = shalt.err (!%p7823_p3)
}
 0x902   : > { %s7827_s13 = scalar_lea.hbm %s13110_s18, 16  ;;  %s7831_s25 = scalar_lea.hbm %s13160_s8, 32 }
 0x903   : > { %p7828_p4 = scmp.ne.s32.totalorder %s13110_s18, %s7827_s13  ;;  %p7832_p9 = scmp.lt.u32.totalorder %s13110_s18, %s13160_s8 }
 0x904   : > { %p7833_p10 = scmp.lt.u32.totalorder %s7831_s25, %s7827_s13  ;;  %p7835_p12 = scmp.lt.u32.totalorder %s7827_s13, %s13110_s18 }
 0x905   : > { %p7829_p7 = pnand %p7828_p4, %p7971_p5 }
 0x906   : > { %p7834_p11 = por %p7833_p10, %p7832_p9 }
 0x907   : > { %p7830_p8 = pneg %p7829_p7 }
 0x908   : > { %p7836_p13 = por %p7835_p12, %p7834_p11 }
 0x90a   : > { %p7837_p0 = pnand %p7836_p13, %p7830_p8 }
 0x90c   : > { %7840 = shalt.err (!%p7837_p0)
}
 0x90d   : > { %7267 = dma.vmem_to_hbm [thread:$0]  (%p7971_p5), %s13112_s17, 16, %s13110_s18, %s6370_s10  }
 0x90e PF: > { %p7273_p1 = scmp.ge.s32.totalorder %s7875_s30, 2  ;;  %s6394_s24 = sand.u32 1, %s7863_s27  }
 0x90f   : > { %s6395_s9 = scalar_lea.sflag [#allocation5], %s6394_s24 }
 0x910   : > { %p7270_p2 = pnand %p7273_p1, %p7975_p6 }
 0x912   : > { %7858 = dma.done.wait (!%p7270_p2), %s6395_s9, 16  }
 0x913   : > { %7860 = vsyncadd (!%p7270_p2), %s6395_s9, 4294967280  ;;  %p18_p3 = scmp.ge.s32.totalorder %s7958_s11, 4   ;;  %s14108_s27 = smov %s7867_s28 }
 0x914   : > { %s14109_s28 = smov %s7871_s29  ;;  %s14110_s29 = smov %s7969_s14 }
 0x915   : > { %s14111_s30 = smov %s7958_s11  ;;  %20 = sbr.rel (!%p18_p3) target bundleno = 3 (0x3), region = 87 }
 0x91c   :  { %6399 = vsyncpa [#allocation5], 1 }
 0x91d   :  { %6401 = vsyncpa [#allocation5 + $0x1], 1 }

</bundles_post_ra>
